<compile_context>
chip_gen: v7x
topology: tpu7x:2x2x1
jax: 0.10.0
libtpu: 0.0.40
codegen_flags: <defaults>
</compile_context>

<pallas_src>
import functools

import jax
import jax.numpy as jnp
from jax import lax
from jax.experimental import pallas as pl
from jax.experimental.pallas import tpu as pltpu


# ---------------------------------------------------------------------------
# Per-generation VMEM budget: ~half of physical VMEM, clamped to [32, 96] MiB.
# (v7x: 64 MiB physical -> 32 MiB limit; v5e/v6e: 128 MiB -> 64 MiB limit.)
# ---------------------------------------------------------------------------
_VMEM_LIMIT_CACHE = [None]


def _vmem_limit():
    if _VMEM_LIMIT_CACHE[0] is None:
        cap = None
        try:
            cap = getattr(pltpu.get_tpu_info(), "vmem_capacity_bytes", None)
        except Exception:
            cap = None
        if not cap:
            cap = 64 * 1024 * 1024                    # conservative (v7x-sized)
        _VMEM_LIMIT_CACHE[0] = int(min(max(cap // 2, 32 * 1024 * 1024),
                                       96 * 1024 * 1024))
    return _VMEM_LIMIT_CACHE[0]


def _round_up(v, m):
    return (v + m - 1) // m * m


def _pick_rows(rows, per_row_bytes, vmem_limit, frac=3):
    """Row tile for rows-x-channels kernels: as large as the VMEM budget allows
    (amortizes ~0.35us/step + DMA setup) while keeping >=2 grid steps."""
    budget = max(vmem_limit // frac, per_row_bytes * 8)
    cap = max(8, (budget // max(per_row_bytes, 1)) // 8 * 8)
    half = max(8, _round_up(-(-rows // 2), 8))
    tr = min(cap, half)
    rows_pad = _round_up(rows, tr)
    return tr, rows_pad


# ---------------------------------------------------------------------------
# conv3x3 (padding=1, stride=1, bias=False) with optional fused PReLU / residual.
# Halo row strips + single K=9*Cin matmul per strip.
# ---------------------------------------------------------------------------
def _make_conv3x3_kernel(apply_prelu, add_res):
    def kernel(*refs):
        x_ref, w_ref = refs[0], refs[1]
        pos = 2
        alpha_ref = res_ref = None
        if apply_prelu:
            alpha_ref = refs[pos]
            pos += 1
        if add_res:
            res_ref = refs[pos]
            pos += 1
        o_ref = refs[pos]

        xs = x_ref[0]                                  # (th+2, W+2, Cin)
        th = xs.shape[0] - 2
        wdim = xs.shape[1] - 2
        cin = xs.shape[2]
        cout = w_ref.shape[1]

        # 9 halo taps built in VMEM -> one K = 9*Cin MXU matmul
        # (no im2col round-trip through HBM, no per-tap grid steps / accumulator).
        taps = jnp.concatenate(
            [xs[dy:dy + th, dx:dx + wdim, :]
             for dy in range(3) for dx in range(3)], axis=-1)       # (th, W, 9*Cin)
        y = jnp.dot(taps.reshape(th * wdim, 9 * cin), w_ref[...],
                    preferred_element_type=jnp.float32)             # (th*W, Cout)
        if apply_prelu:
            a = alpha_ref[0]                                        # SMEM scalar
            y = jnp.where(y >= 0, y, y * a)
        y = y.reshape(th, wdim, cout)
        if add_res:
            y = y + res_ref[0]
        o_ref[0] = y.astype(o_ref.dtype)

    return kernel


def conv3x3(x, w, *, prelu_alpha=None, residual=None):
    """x: (N,H,W,Cin) f32, w: (3,3,Cin,Cout) HWIO.  out = conv(x) [prelu] [+res]."""
    N, H, W, Cin = x.shape
    Cout = w.shape[-1]
    vl = _vmem_limit()

    # Strip rows: budget for double-buffered strip IO + the in-kernel taps tensor.
    per_row = 4 * ((W + 2) * Cin * 2 + 9 * W * Cin + 4 * W * Cout)
    th = int(max(1, min(H, (vl // 2) // max(per_row, 1))))
    if N == 1 and th >= H and H > 1:
        th = (H + 1) // 2                       # keep >= 2 grid steps (megacore)
    S = -(-H // th)
    Hp = S * th

    # Overlapping row strips with a 2-row halo (one padded copy of the input,
    # vs the 9x im2col taps tensor of the previous version).
    # TODO(synk): a manual-DMA halo kernel reading the unpadded input straight
    # from HBM (memory_space=pl.ANY + double-buffered make_async_copy) would
    # remove this remaining wrapper copy entirely (~3x -> ~1x input traffic).
    xp = jnp.pad(x, ((0, 0), (1, 1), (1, 1), (0, 0)))
    if Hp > H:
        xp = jnp.pad(xp, ((0, 0), (0, Hp - H), (0, 0), (0, 0)))
    strips = jnp.stack([xp[:, s * th: s * th + th + 2] for s in range(S)], axis=1)
    strips = strips.reshape(N * S, th + 2, W + 2, Cin)

    w9 = w.reshape(9 * Cin, Cout)

    args = [strips, w9]
    in_specs = [
        pl.BlockSpec((1, th + 2, W + 2, Cin), lambda i: (i, 0, 0, 0)),
        pl.BlockSpec((9 * Cin, Cout), lambda i: (0, 0)),
    ]
    if prelu_alpha is not None:
        args.append(jnp.asarray(prelu_alpha, jnp.float32).reshape(1,))
        in_specs.append(pl.BlockSpec(memory_space=pltpu.MemorySpace.SMEM))
    if residual is not None:
        r = residual
        if Hp > H:
            r = jnp.pad(r, ((0, 0), (0, Hp - H), (0, 0), (0, 0)))
        args.append(r.reshape(N * S, th, W, Cout))
        in_specs.append(pl.BlockSpec((1, th, W, Cout), lambda i: (i, 0, 0, 0)))

    out = pl.pallas_call(
        _make_conv3x3_kernel(prelu_alpha is not None, residual is not None),
        out_shape=jax.ShapeDtypeStruct((N * S, th, W, Cout), x.dtype),
        grid_spec=pltpu.PrefetchScalarGridSpec(
            num_scalar_prefetch=0,
            grid=(N * S,),
            in_specs=in_specs,
            out_specs=pl.BlockSpec((1, th, W, Cout), lambda i: (i, 0, 0, 0)),
        ),
        compiler_params=pltpu.CompilerParams(
            dimension_semantics=("parallel",),
            vmem_limit_bytes=vl),
    )(*args)
    return out.reshape(N, Hp, W, Cout)[:, :H]


# ---------------------------------------------------------------------------
# conv1x1 (channel matmul), rows tiled.
# ---------------------------------------------------------------------------
def _matmul_kernel(x_ref, w_ref, o_ref):
    o_ref[...] = jnp.dot(x_ref[...], w_ref[...],
                         preferred_element_type=jnp.float32).astype(o_ref.dtype)


def conv1x1(x, w):
    """x: (N,H,W,Cin), w: (Cin,Cout)."""
    N, H, W, Cin = x.shape
    Cout = w.shape[-1]
    R = N * H * W
    vl = _vmem_limit()
    tr, Rp = _pick_rows(R, 4 * 2 * (Cin + Cout), vl)
    xr = x.reshape(R, Cin)
    if Rp != R:
        xr = jnp.pad(xr, ((0, Rp - R), (0, 0)))
    out = pl.pallas_call(
        _matmul_kernel,
        out_shape=jax.ShapeDtypeStruct((Rp, Cout), x.dtype),
        grid_spec=pltpu.PrefetchScalarGridSpec(
            num_scalar_prefetch=0,
            grid=(Rp // tr,),
            in_specs=[pl.BlockSpec((tr, Cin), lambda i: (i, 0)),
                      pl.BlockSpec((Cin, Cout), lambda i: (0, 0))],
            out_specs=pl.BlockSpec((tr, Cout), lambda i: (i, 0)),
        ),
        compiler_params=pltpu.CompilerParams(
            dimension_semantics=("parallel",),
            vmem_limit_bytes=vl),
    )(xr, w)
    return out[:R].reshape(N, H, W, Cout)


# ---------------------------------------------------------------------------
# Fused level-1 merge:  out = x + enc @ We + dec @ Wd
# ---------------------------------------------------------------------------
def _merge_kernel(x_ref, e_ref, d_ref, we_ref, wd_ref, o_ref):
    y = x_ref[...]
    y = y + jnp.dot(e_ref[...], we_ref[...], preferred_element_type=jnp.float32)
    y = y + jnp.dot(d_ref[...], wd_ref[...], preferred_element_type=jnp.float32)
    o_ref[...] = y.astype(o_ref.dtype)


def add_enc_dec(x, e, d, we, wd):
    N, H, W, C = x.shape
    Ce = e.shape[-1]
    R = N * H * W
    vl = _vmem_limit()
    tr, Rp = _pick_rows(R, 4 * 2 * (2 * C + 2 * Ce), vl)
    xr, er, dr = x.reshape(R, C), e.reshape(R, Ce), d.reshape(R, Ce)
    if Rp != R:
        pad = ((0, Rp - R), (0, 0))
        xr, er, dr = jnp.pad(xr, pad), jnp.pad(er, pad), jnp.pad(dr, pad)
    out = pl.pallas_call(
        _merge_kernel,
        out_shape=jax.ShapeDtypeStruct((Rp, C), x.dtype),
        grid_spec=pltpu.PrefetchScalarGridSpec(
            num_scalar_prefetch=0,
            grid=(Rp // tr,),
            in_specs=[pl.BlockSpec((tr, C), lambda i: (i, 0)),
                      pl.BlockSpec((tr, Ce), lambda i: (i, 0)),
                      pl.BlockSpec((tr, Ce), lambda i: (i, 0)),
                      pl.BlockSpec((Ce, C), lambda i: (0, 0)),
                      pl.BlockSpec((Ce, C), lambda i: (0, 0))],
            out_specs=pl.BlockSpec((tr, C), lambda i: (i, 0)),
        ),
        compiler_params=pltpu.CompilerParams(
            dimension_semantics=("parallel",),
            vmem_limit_bytes=vl),
    )(xr, er, dr, we, wd)
    return out[:R].reshape(N, H, W, C)


# ---------------------------------------------------------------------------
# Fused level-2/3 merge:  out = x + e + d   (1x1 convs already folded upstream)
# ---------------------------------------------------------------------------
def _add3_kernel(x_ref, e_ref, d_ref, o_ref):
    o_ref[...] = (x_ref[...] + e_ref[...] + d_ref[...]).astype(o_ref.dtype)


def add3(x, e, d):
    N, H, W, C = x.shape
    R = N * H * W
    vl = _vmem_limit()
    tr, Rp = _pick_rows(R, 4 * 2 * 4 * C, vl)
    xr, er, dr = x.reshape(R, C), e.reshape(R, C), d.reshape(R, C)
    if Rp != R:
        pad = ((0, Rp - R), (0, 0))
        xr, er, dr = jnp.pad(xr, pad), jnp.pad(er, pad), jnp.pad(dr, pad)
    out = pl.pallas_call(
        _add3_kernel,
        out_shape=jax.ShapeDtypeStruct((Rp, C), x.dtype),
        grid_spec=pltpu.PrefetchScalarGridSpec(
            num_scalar_prefetch=0,
            grid=(Rp // tr,),
            in_specs=[pl.BlockSpec((tr, C), lambda i: (i, 0)),
                      pl.BlockSpec((tr, C), lambda i: (i, 0)),
                      pl.BlockSpec((tr, C), lambda i: (i, 0))],
            out_specs=pl.BlockSpec((tr, C), lambda i: (i, 0)),
        ),
        compiler_params=pltpu.CompilerParams(
            dimension_semantics=("parallel",),
            vmem_limit_bytes=vl),
    )(xr, er, dr)
    return out[:R].reshape(N, H, W, C)


# ---------------------------------------------------------------------------
# CALayer fused with the CAB residual add.
#  * fused single-pass kernel when the per-image block fits the (double-buffered)
#    VMEM budget;
#  * otherwise a two-pass HW-tiled pipeline: pool+MLP (reduction grid axis,
#    f32 scratch accumulator) then scale+residual.
# ---------------------------------------------------------------------------
def _ca_fused_kernel(x_ref, w1_ref, w2_ref, res_ref, o_ref):
    x = x_ref[...]                                   # (nb, HW, C)
    inv_hw = 1.0 / x.shape[1]
    pooled = jnp.sum(x, axis=1) * inv_hw             # (nb, C)
    h = jnp.maximum(jnp.dot(pooled, w1_ref[...],
                            preferred_element_type=jnp.float32), 0.0)     # (nb, Cr)
    s = jax.nn.sigmoid(jnp.dot(h, w2_ref[...],
                               preferred_element_type=jnp.float32))       # (nb, C)
    o_ref[...] = (x * s[:, None, :] + res_ref[...]).astype(o_ref.dtype)


def _make_ca_pool_kernel(inv_hw):
    def kernel(x_ref, w1_ref, w2_ref, s_ref, acc_ref):
        t = pl.program_id(1)

        @pl.when(t == 0)
        def _init():
            acc_ref[...] = jnp.zeros_like(acc_ref)

        acc_ref[...] += jnp.sum(x_ref[0], axis=0, keepdims=True)      # (1, C)

        @pl.when(t == pl.num_programs(1) - 1)
        def _finish():
            pooled = acc_ref[...] * inv_hw
            h = jnp.maximum(jnp.dot(pooled, w1_ref[...],
                                    preferred_element_type=jnp.float32), 0.0)
            s = jax.nn.sigmoid(jnp.dot(h, w2_ref[...],
                                       preferred_element_type=jnp.float32))
            s_ref[0] = s.astype(s_ref.dtype)

    return kernel


def _ca_scale_kernel(x_ref, s_ref, res_ref, o_ref):
    o_ref[...] = (x_ref[...] * s_ref[...] + res_ref[...]).astype(o_ref.dtype)


def ca_layer(x, w1, w2, residual, *, force_tiled=False, hw_tile=None):
    """out = x * sigmoid(W2 @ relu(W1 @ avgpool(x))) + residual   (NHWC)."""
    N, H, W, C = x.shape
    HW = H * W
    vl = _vmem_limit()

    xr = x.reshape(N, HW, C)
    rr = residual.reshape(N, HW, C)

    per_img = 6 * HW * C * 4              # x + residual + out, double-buffered
    nb_fit = (vl // 2) // max(per_img, 1)
    if nb_fit >= 1 and not force_tiled:
        # ---- fused single-pass path ----
        nb = int(min(nb_fit, N))
        if N >= 2:
            nb = min(nb, max(1, (N + 1) // 2))   # keep >= 2 grid steps
        Np = _round_up(N, nb)
        if Np != N:
            xr = jnp.pad(xr, ((0, Np - N), (0, 0), (0, 0)))
            rr = jnp.pad(rr, ((0, Np - N), (0, 0), (0, 0)))
        out = pl.pallas_call(
            _ca_fused_kernel,
            out_shape=jax.ShapeDtypeStruct((Np, HW, C), x.dtype),
            grid_spec=pltpu.PrefetchScalarGridSpec(
                num_scalar_prefetch=0,
                grid=(Np // nb,),
                in_specs=[pl.BlockSpec((nb, HW, C), lambda n: (n, 0, 0)),
                          pl.BlockSpec(w1.shape, lambda n: (0, 0)),
                          pl.BlockSpec(w2.shape, lambda n: (0, 0)),
                          pl.BlockSpec((nb, HW, C), lambda n: (n, 0, 0))],
                out_specs=pl.BlockSpec((nb, HW, C), lambda n: (n, 0, 0)),
            ),
            compiler_params=pltpu.CompilerParams(
                dimension_semantics=("parallel",),
                vmem_limit_bytes=vl),
        )(xr, w1, w2, rr)
        return out[:N].reshape(N, H, W, C)

    # ---- two-pass HW-tiled path (large images / v7x 64 MiB VMEM) ----
    per_row = 8 * C * 4
    thw = hw_tile or max(8, min(_round_up(HW, 8), ((vl // 3) // per_row) // 8 * 8))
    HWp = _round_up(HW, thw)
    if HWp != HW:
        xr = jnp.pad(xr, ((0, 0), (0, HWp - HW), (0, 0)))
        rr = jnp.pad(rr, ((0, 0), (0, HWp - HW), (0, 0)))
    T = HWp // thw

    scale = pl.pallas_call(
        _make_ca_pool_kernel(1.0 / HW),
        out_shape=jax.ShapeDtypeStruct((N, 1, C), jnp.float32),
        grid_spec=pltpu.PrefetchScalarGridSpec(
            num_scalar_prefetch=0,
            grid=(N, T),
            in_specs=[pl.BlockSpec((1, thw, C), lambda n, t: (n, t, 0)),
                      pl.BlockSpec(w1.shape, lambda n, t: (0, 0)),
                      pl.BlockSpec(w2.shape, lambda n, t: (0, 0))],
            out_specs=pl.BlockSpec((1, 1, C), lambda n, t: (n, 0, 0)),
            scratch_shapes=[pltpu.VMEM((1, C), jnp.float32)],
        ),
        compiler_params=pltpu.CompilerParams(
            dimension_semantics=("parallel", "arbitrary"),
            vmem_limit_bytes=vl),
    )(xr, w1, w2)

    out = pl.pallas_call(
        _ca_scale_kernel,
        out_shape=jax.ShapeDtypeStruct((N, HWp, C), x.dtype),
        grid_spec=pltpu.PrefetchScalarGridSpec(
            num_scalar_prefetch=0,
            grid=(N, T),
            in_specs=[pl.BlockSpec((1, thw, C), lambda n, t: (n, t, 0)),
                      pl.BlockSpec((1, 1, C), lambda n, t: (n, 0, 0)),
                      pl.BlockSpec((1, thw, C), lambda n, t: (n, t, 0))],
            out_specs=pl.BlockSpec((1, thw, C), lambda n, t: (n, t, 0)),
        ),
        compiler_params=pltpu.CompilerParams(
            dimension_semantics=("parallel", "parallel"),
            vmem_limit_bytes=vl),
    )(xr, scale, rr)
    return out[:, :HW].reshape(N, H, W, C)


# ---------------------------------------------------------------------------
# Bilinear 2x upsample (exact nn.Upsample(scale_factor=2, 'bilinear',
# align_corners=False): 0.75/0.25 taps with edge clamping).
# TODO(synk): kept in plain JAX (cheap, memory-bound); a dedicated kernel adds little.
# ---------------------------------------------------------------------------
def bilinear_up2(x):
    def up_axis(a, axis):
        n = a.shape[axis]
        prev = jnp.concatenate([lax.slice_in_dim(a, 0, 1, axis=axis),
                                lax.slice_in_dim(a, 0, n - 1, axis=axis)], axis=axis)
        nxt = jnp.concatenate([lax.slice_in_dim(a, 1, n, axis=axis),
                               lax.slice_in_dim(a, n - 1, n, axis=axis)], axis=axis)
        even = 0.75 * a + 0.25 * prev
        odd = 0.75 * a + 0.25 * nxt
        out = jnp.stack([even, odd], axis=axis + 1)
        shp = list(a.shape)
        shp[axis] = 2 * n
        return out.reshape(shp)
    return up_axis(up_axis(x, 1), 2)


# ---------------------------------------------------------------------------
# ORSNet parameters and forward (Pallas pipeline)
# ---------------------------------------------------------------------------
def _winit(key, shape, fan_in):
    return jax.random.normal(key, shape, dtype=jnp.float32) / jnp.sqrt(float(fan_in))


def init_orsnet_params(key, n_feat, scale_orsnetfeats, scale_unetfeats,
                       reduction, num_cab):
    C = n_feat + scale_orsnetfeats
    Cr = max(1, C // reduction)
    keys = iter(jax.random.split(key, 64))

    def w3(cin, cout):
        return _winit(next(keys), (3, 3, cin, cout), 9 * cin)

    def w1(cin, cout):
        return _winit(next(keys), (cin, cout), cin)

    def orb_p():
        cabs = [dict(w1=w3(C, C), w2=w3(C, C),
                     ca_w1=w1(C, Cr), ca_w2=w1(Cr, C)) for _ in range(num_cab)]
        return dict(cabs=cabs, tail=w3(C, C))

    su = scale_unetfeats
    return dict(
        prelu_alpha=jnp.full((1,), 0.25, jnp.float32),     # shared nn.PReLU() slope
        orb1=orb_p(), orb2=orb_p(), orb3=orb_p(),
        up_enc1=w1(n_feat + su, n_feat), up_dec1=w1(n_feat + su, n_feat),
        up_enc2a=w1(n_feat + 2 * su, n_feat + su), up_enc2b=w1(n_feat + su, n_feat),
        up_dec2a=w1(n_feat + 2 * su, n_feat + su), up_dec2b=w1(n_feat + su, n_feat),
        conv_enc1=w1(n_feat, C), conv_enc2=w1(n_feat, C), conv_enc3=w1(n_feat, C),
        conv_dec1=w1(n_feat, C), conv_dec2=w1(n_feat, C), conv_dec3=w1(n_feat, C),
    )


def _compose(*ws):
    m = ws[0]
    for w in ws[1:]:
        m = jnp.dot(m, w, precision=lax.Precision.HIGHEST)
    return m


def orsnet_forward(params, x, encoder_outs, decoder_outs):
    """Pallas pipeline. Inputs/outputs are NCHW, like the PyTorch module."""
    nhwc = lambda a: jnp.transpose(a, (0, 2, 3, 1))
    nchw = lambda a: jnp.transpose(a, (0, 3, 1, 2))
    x = nhwc(x)
    enc = [nhwc(a) for a in encoder_outs]
    dec = [nhwc(a) for a in decoder_outs]
    alpha = params['prelu_alpha']

    def cab(h, p):
        # TODO(synk): fuse conv(w1)+PReLU+conv(w2) into one halo-strip kernel so the
        # intermediate activation never round-trips HBM (CA still needs a global pool).
        r = conv3x3(h, p['w1'], prelu_alpha=alpha)
        r = conv3x3(r, p['w2'])
        return ca_layer(r, p['ca_w1'], p['ca_w2'], residual=h)     # CA(r)*r + h

    def orb(h, p):
        r = h
        for pc in p['cabs']:
            r = cab(r, pc)
        return conv3x3(r, p['tail'], residual=h)                   # conv + h

    # Level 1 (full resolution): fused x + enc@We + dec@Wd merge.
    x = orb(x, params['orb1'])
    x = add_enc_dec(x, enc[0], dec[0], params['conv_enc1'], params['conv_dec1'])

    # Level 2: 1x1 convs commute with the bilinear upsample -> project at the low
    # resolution with pre-composed weights (4x fewer matmul rows), then upsample.
    x = orb(x, params['orb2'])
    e = bilinear_up2(conv1x1(enc[1], _compose(params['up_enc1'], params['conv_enc2'])))
    d = bilinear_up2(conv1x1(dec[1], _compose(params['up_dec1'], params['conv_dec2'])))
    x = add3(x, e, d)

    # Level 3: double-up path composed down to one low-res 1x1 conv (16x fewer rows).
    x = orb(x, params['orb3'])
    e = bilinear_up2(bilinear_up2(conv1x1(
        enc[2], _compose(params['up_enc2a'], params['up_enc2b'], params['conv_enc3']))))
    d = bilinear_up2(bilinear_up2(conv1x1(
        dec[2], _compose(params['up_dec2a'], params['up_dec2b'], params['conv_dec3']))))
    x = add3(x, e, d)
    return nchw(x)


# ---------------------------------------------------------------------------
# Pure-JAX reference (mirrors the PyTorch forward exactly, no weight composition)
# ---------------------------------------------------------------------------
def orsnet_reference(params, x, encoder_outs, decoder_outs):
    nhwc = lambda a: jnp.transpose(a, (0, 2, 3, 1))
    nchw = lambda a: jnp.transpose(a, (0, 3, 1, 2))
    hp = lax.Precision.HIGHEST

    def conv3(h, w):
        return lax.conv_general_dilated(h, w, (1, 1), 'SAME',
                                        dimension_numbers=('NHWC', 'HWIO', 'NHWC'),
                                        precision=hp)

    def conv1(h, w):
        return jnp.einsum('nhwc,cd->nhwd', h, w, precision=hp)

    def prelu(h, a):
        return jnp.where(h >= 0, h, h * a)

    def ca(h, w1, w2):
        y = jnp.mean(h, axis=(1, 2))
        y = jnp.maximum(jnp.einsum('nc,cr->nr', y, w1, precision=hp), 0.0)
        y = jax.nn.sigmoid(jnp.einsum('nr,rc->nc', y, w2, precision=hp))
        return h * y[:, None, None, :]

    x = nhwc(x)
    enc = [nhwc(a) for a in encoder_outs]
    dec = [nhwc(a) for a in decoder_outs]
    alpha = params['prelu_alpha']

    def cab(h, p):
        r = conv3(h, p['w1'])
        r = prelu(r, alpha)
        r = conv3(r, p['w2'])
        return ca(r, p['ca_w1'], p['ca_w2']) + h

    def orb(h, p):
        r = h
        for pc in p['cabs']:
            r = cab(r, pc)
        return conv3(r, p['tail']) + h

    def up(h, w):
        return conv1(bilinear_up2(h), w)

    x = orb(x, params['orb1'])
    x = x + conv1(enc[0], params['conv_enc1']) + conv1(dec[0], params['conv_dec1'])
    x = orb(x, params['orb2'])
    x = x + conv1(up(enc[1], params['up_enc1']), params['conv_enc2']) \
          + conv1(up(dec[1], params['up_dec1']), params['conv_dec2'])
    x = orb(x, params['orb3'])
    x = x + conv1(up(up(enc[2], params['up_enc2a']), params['up_enc2b']), params['conv_enc3']) \
          + conv1(up(up(dec[2], params['up_dec2a']), params['up_dec2b']), params['conv_dec3'])
    return nchw(x)


if __name__ == "__main__":
    # Production channel widths (C = 128 -> lane-dense outputs), small spatial dims.
    n_feat, scale_orsnetfeats, scale_unetfeats = 96, 32, 48
    kernel_size, reduction, num_cab = 3, 4, 2
    assert kernel_size == 3
    N, H, W = 2, 16, 16
    C = n_feat + scale_orsnetfeats

    key = jax.random.PRNGKey(0)
    kp, kx, ke0, ke1, ke2, kd0, kd1, kd2, kct, kcr = jax.random.split(key, 10)
    params = init_orsnet_params(kp, n_feat, scale_orsnetfeats, scale_unetfeats,
                                reduction, num_cab)

    x = jax.random.normal(kx, (N, C, H, W), jnp.float32)
    encoder_outs = [
        jax.random.normal(ke0, (N, n_feat, H, W), jnp.float32),
        jax.random.normal(ke1, (N, n_feat + scale_unetfeats, H // 2, W // 2), jnp.float32),
        jax.random.normal(ke2, (N, n_feat + 2 * scale_unetfeats, H // 4, W // 4), jnp.float32),
    ]
    decoder_outs = [
        jax.random.normal(kd0, (N, n_feat, H, W), jnp.float32),
        jax.random.normal(kd1, (N, n_feat + scale_unetfeats, H // 2, W // 2), jnp.float32),
        jax.random.normal(kd2, (N, n_feat + 2 * scale_unetfeats, H // 4, W // 4), jnp.float32),
    ]

    fwd = jax.jit(orsnet_forward)
    ref_fn = jax.jit(orsnet_reference)

    out = jax.block_until_ready(fwd(params, x, encoder_outs, decoder_outs))
    ref = jax.block_until_ready(ref_fn(params, x, encoder_outs, decoder_outs))

    assert out.shape == (N, C, H, W)
    assert bool(jnp.all(jnp.isfinite(out)))
    max_err = float(jnp.max(jnp.abs(out - ref)))
    assert jnp.allclose(out, ref, atol=2e-2, rtol=2e-2), max_err

    # Exercise the HW-tiled CA path (used for large images / tight v7x VMEM budgets).
    ca_w1 = params['orb1']['cabs'][0]['ca_w1']
    ca_w2 = params['orb1']['cabs'][0]['ca_w2']
    xt = jax.random.normal(kct, (N, H, W, C), jnp.float32)
    rt = jax.random.normal(kcr, (N, H, W, C), jnp.float32)
    ca_fused = jax.jit(ca_layer)(xt, ca_w1, ca_w2, rt)
    ca_tiled = jax.jit(functools.partial(ca_layer, force_tiled=True, hw_tile=64))(
        xt, ca_w1, ca_w2, rt)
    jax.block_until_ready((ca_fused, ca_tiled))
    assert jnp.allclose(ca_fused, ca_tiled, atol=1e-4, rtol=1e-4)

    print("KERNEL_OK")
</pallas_src>

<mosaic_0001>
module attributes {stable_mosaic.version = 11 : i64} {
  func.func @kernel(%arg0: i32, %arg1: memref<1x18x18x128xf32, #tpu.memory_space<vmem>>, %arg2: memref<1152x128xf32, #tpu.memory_space<vmem>>, %arg3: memref<1x16x16x128xf32, #tpu.memory_space<vmem>>) attributes {dimension_semantics = [#tpu.dimension_semantics<parallel>], iteration_bounds = array<i64: 2>, scalar_prefetch = 0 : i64, scratch_operands = 0 : i64, tpu.core_type = #tpu.core_type<tc>, window_params = [{transform_indices = @transform_0, window_bounds = array<i64: 1, 18, 18, 128>}, {pipeline_mode = #tpu.pipeline_mode<synchronous>, transform_indices = @transform_1, window_bounds = array<i64: 1152, 128>}, {transform_indices = @transform_2, window_bounds = array<i64: 1, 16, 16, 128>}]} {
    %c0 = arith.constant 0 : index
    %c0_0 = arith.constant 0 : index
    %c0_1 = arith.constant 0 : index
    %c0_2 = arith.constant 0 : index
    %0 = vector.load %arg1[%c0, %c0_0, %c0_1, %c0_2] : memref<1x18x18x128xf32, #tpu.memory_space<vmem>>, vector<1x18x18x128xf32>
    %1 = vector.shape_cast %0 : vector<1x18x18x128xf32> to vector<18x18x128xf32>
    %2 = vector.extract_strided_slice %1 {offsets = [0, 0, 0], sizes = [16, 16, 128], strides = [1, 1, 1]} : vector<18x18x128xf32> to vector<16x16x128xf32>
    %3 = vector.extract_strided_slice %1 {offsets = [0, 1, 0], sizes = [16, 16, 128], strides = [1, 1, 1]} : vector<18x18x128xf32> to vector<16x16x128xf32>
    %4 = vector.extract_strided_slice %1 {offsets = [0, 2, 0], sizes = [16, 16, 128], strides = [1, 1, 1]} : vector<18x18x128xf32> to vector<16x16x128xf32>
    %5 = vector.extract_strided_slice %1 {offsets = [1, 0, 0], sizes = [16, 16, 128], strides = [1, 1, 1]} : vector<18x18x128xf32> to vector<16x16x128xf32>
    %6 = vector.extract_strided_slice %1 {offsets = [1, 1, 0], sizes = [16, 16, 128], strides = [1, 1, 1]} : vector<18x18x128xf32> to vector<16x16x128xf32>
    %7 = vector.extract_strided_slice %1 {offsets = [1, 2, 0], sizes = [16, 16, 128], strides = [1, 1, 1]} : vector<18x18x128xf32> to vector<16x16x128xf32>
    %8 = vector.extract_strided_slice %1 {offsets = [2, 0, 0], sizes = [16, 16, 128], strides = [1, 1, 1]} : vector<18x18x128xf32> to vector<16x16x128xf32>
    %9 = vector.extract_strided_slice %1 {offsets = [2, 1, 0], sizes = [16, 16, 128], strides = [1, 1, 1]} : vector<18x18x128xf32> to vector<16x16x128xf32>
    %10 = vector.extract_strided_slice %1 {offsets = [2, 2, 0], sizes = [16, 16, 128], strides = [1, 1, 1]} : vector<18x18x128xf32> to vector<16x16x128xf32>
    %11 = tpu.concatenate %2, %3, %4, %5, %6, %7, %8, %9, %10 in 2 : vector<16x16x128xf32>, vector<16x16x128xf32>, vector<16x16x128xf32>, vector<16x16x128xf32>, vector<16x16x128xf32>, vector<16x16x128xf32>, vector<16x16x128xf32>, vector<16x16x128xf32>, vector<16x16x128xf32> -> vector<16x16x1152xf32>
    %12 = vector.shape_cast %11 : vector<16x16x1152xf32> to vector<256x1152xf32>
    %c0_3 = arith.constant 0 : index
    %c0_4 = arith.constant 0 : index
    %13 = vector.load %arg2[%c0_3, %c0_4] : memref<1152x128xf32, #tpu.memory_space<vmem>>, vector<1152x128xf32>
    %cst = arith.constant dense<0.000000e+00> : vector<256x128xf32>
    %14 = tpu.matmul %12, %13, %cst {dimension_numbers = #tpu.dot_dimension_numbers<[1], [0], [0], [1], [0, 0, 1, 1], [], []>} : vector<256x1152xf32>, vector<1152x128xf32>, vector<256x128xf32> -> vector<256x128xf32>
    %15 = vector.shape_cast %14 : vector<256x128xf32> to vector<16x16x128xf32>
    %c0_5 = arith.constant 0 : index
    %c0_6 = arith.constant 0 : index
    %c0_7 = arith.constant 0 : index
    %c0_8 = arith.constant 0 : index
    %16 = vector.load %arg3[%c0_5, %c0_6, %c0_7, %c0_8] : memref<1x16x16x128xf32, #tpu.memory_space<vmem>>, vector<1x16x16x128xf32>
    %17 = vector.shape_cast %16 : vector<1x16x16x128xf32> to vector<16x16x128xf32>
    %18 = vector.shape_cast %15 : vector<16x16x128xf32> to vector<1x16x16x128xf32>
    tpu.vector_store %arg3[%c0_5, %c0_6, %c0_7, %c0_8], %18 {strides = array<i32>} : memref<1x16x16x128xf32, #tpu.memory_space<vmem>>, vector<1x16x16x128xf32>,
    return
  }
  func.func @transform_0(%arg0: i32) -> (i32, i32, i32, i32) {
    %c0_i32 = arith.constant 0 : i32
    %c0_i32_0 = arith.constant 0 : i32
    %c0_i32_1 = arith.constant 0 : i32
    %c0_i32_2 = arith.constant 0 : i32
    return %arg0, %c0_i32, %c0_i32_0, %c0_i32_1 : i32, i32, i32, i32
  }
  func.func @transform_1(%arg0: i32) -> (i32, i32) {
    %c0_i32 = arith.constant 0 : i32
    %c0_i32_0 = arith.constant 0 : i32
    %c0_i32_1 = arith.constant 0 : i32
    return %c0_i32, %c0_i32_0 : i32, i32
  }
  func.func @transform_2(%arg0: i32) -> (i32, i32, i32, i32) {
    %c0_i32 = arith.constant 0 : i32
    %c0_i32_0 = arith.constant 0 : i32
    %c0_i32_1 = arith.constant 0 : i32
    %c0_i32_2 = arith.constant 0 : i32
    return %arg0, %c0_i32, %c0_i32_0, %c0_i32_1 : i32, i32, i32, i32
  }
}

module attributes {stable_mosaic.version = 11 : i64} {
  func.func @kernel(%arg0: i32, %arg1: memref<1x18x18x128xf32, #tpu.memory_space<vmem>>, %arg2: memref<1152x128xf32, #tpu.memory_space<vmem>>, %arg3: memref<1xf32, #tpu.memory_space<smem>>, %arg4: memref<1x16x16x128xf32, #tpu.memory_space<vmem>>) attributes {dimension_semantics = [#tpu.dimension_semantics<parallel>], iteration_bounds = array<i64: 2>, scalar_prefetch = 0 : i64, scratch_operands = 0 : i64, tpu.core_type = #tpu.core_type<tc>, window_params = [{transform_indices = @transform_0, window_bounds = array<i64: 1, 18, 18, 128>}, {pipeline_mode = #tpu.pipeline_mode<synchronous>, transform_indices = @transform_1, window_bounds = array<i64: 1152, 128>}, {transform_indices = @transform_2, window_bounds = array<i64: 1>}, {transform_indices = @transform_3, window_bounds = array<i64: 1, 16, 16, 128>}]} {
    %c0 = arith.constant 0 : index
    %c0_0 = arith.constant 0 : index
    %c0_1 = arith.constant 0 : index
    %c0_2 = arith.constant 0 : index
    %0 = vector.load %arg1[%c0, %c0_0, %c0_1, %c0_2] : memref<1x18x18x128xf32, #tpu.memory_space<vmem>>, vector<1x18x18x128xf32>
    %1 = vector.shape_cast %0 : vector<1x18x18x128xf32> to vector<18x18x128xf32>
    %2 = vector.extract_strided_slice %1 {offsets = [0, 0, 0], sizes = [16, 16, 128], strides = [1, 1, 1]} : vector<18x18x128xf32> to vector<16x16x128xf32>
    %3 = vector.extract_strided_slice %1 {offsets = [0, 1, 0], sizes = [16, 16, 128], strides = [1, 1, 1]} : vector<18x18x128xf32> to vector<16x16x128xf32>
    %4 = vector.extract_strided_slice %1 {offsets = [0, 2, 0], sizes = [16, 16, 128], strides = [1, 1, 1]} : vector<18x18x128xf32> to vector<16x16x128xf32>
    %5 = vector.extract_strided_slice %1 {offsets = [1, 0, 0], sizes = [16, 16, 128], strides = [1, 1, 1]} : vector<18x18x128xf32> to vector<16x16x128xf32>
    %6 = vector.extract_strided_slice %1 {offsets = [1, 1, 0], sizes = [16, 16, 128], strides = [1, 1, 1]} : vector<18x18x128xf32> to vector<16x16x128xf32>
    %7 = vector.extract_strided_slice %1 {offsets = [1, 2, 0], sizes = [16, 16, 128], strides = [1, 1, 1]} : vector<18x18x128xf32> to vector<16x16x128xf32>
    %8 = vector.extract_strided_slice %1 {offsets = [2, 0, 0], sizes = [16, 16, 128], strides = [1, 1, 1]} : vector<18x18x128xf32> to vector<16x16x128xf32>
    %9 = vector.extract_strided_slice %1 {offsets = [2, 1, 0], sizes = [16, 16, 128], strides = [1, 1, 1]} : vector<18x18x128xf32> to vector<16x16x128xf32>
    %10 = vector.extract_strided_slice %1 {offsets = [2, 2, 0], sizes = [16, 16, 128], strides = [1, 1, 1]} : vector<18x18x128xf32> to vector<16x16x128xf32>
    %11 = tpu.concatenate %2, %3, %4, %5, %6, %7, %8, %9, %10 in 2 : vector<16x16x128xf32>, vector<16x16x128xf32>, vector<16x16x128xf32>, vector<16x16x128xf32>, vector<16x16x128xf32>, vector<16x16x128xf32>, vector<16x16x128xf32>, vector<16x16x128xf32>, vector<16x16x128xf32> -> vector<16x16x1152xf32>
    %12 = vector.shape_cast %11 : vector<16x16x1152xf32> to vector<256x1152xf32>
    %c0_3 = arith.constant 0 : index
    %c0_4 = arith.constant 0 : index
    %13 = vector.load %arg2[%c0_3, %c0_4] : memref<1152x128xf32, #tpu.memory_space<vmem>>, vector<1152x128xf32>
    %cst = arith.constant dense<0.000000e+00> : vector<256x128xf32>
    %14 = tpu.matmul %12, %13, %cst {dimension_numbers = #tpu.dot_dimension_numbers<[1], [0], [0], [1], [0, 0, 1, 1], [], []>} : vector<256x1152xf32>, vector<1152x128xf32>, vector<256x128xf32> -> vector<256x128xf32>
    %c0_5 = arith.constant 0 : index
    %15 = memref.load %arg3[%c0_5] : memref<1xf32, #tpu.memory_space<smem>>
    %cst_6 = arith.constant 0.000000e+00 : f32
    %16 = vector.broadcast %cst_6 : f32 to vector<256x128xf32>
    %17 = arith.cmpf oge, %14, %16 : vector<256x128xf32>
    %18 = vector.broadcast %15 : f32 to vector<256x128xf32>
    %19 = arith.mulf %14, %18 : vector<256x128xf32>
    %20 = arith.select %17, %14, %19 : vector<256x128xi1>, vector<256x128xf32>
    %21 = vector.shape_cast %20 : vector<256x128xf32> to vector<16x16x128xf32>
    %c0_7 = arith.constant 0 : index
    %c0_8 = arith.constant 0 : index
    %c0_9 = arith.constant 0 : index
    %c0_10 = arith.constant 0 : index
    %22 = vector.load %arg4[%c0_7, %c0_8, %c0_9, %c0_10] : memref<1x16x16x128xf32, #tpu.memory_space<vmem>>, vector<1x16x16x128xf32>
    %23 = vector.shape_cast %22 : vector<1x16x16x128xf32> to vector<16x16x128xf32>
    %24 = vector.shape_cast %21 : vector<16x16x128xf32> to vector<1x16x16x128xf32>
    tpu.vector_store %arg4[%c0_7, %c0_8, %c0_9, %c0_10], %24 {strides = array<i32>} : memref<1x16x16x128xf32, #tpu.memory_space<vmem>>, vector<1x16x16x128xf32>,
    return
  }
  func.func @transform_0(%arg0: i32) -> (i32, i32, i32, i32) {
    %c0_i32 = arith.constant 0 : i32
    %c0_i32_0 = arith.constant 0 : i32
    %c0_i32_1 = arith.constant 0 : i32
    %c0_i32_2 = arith.constant 0 : i32
    return %arg0, %c0_i32, %c0_i32_0, %c0_i32_1 : i32, i32, i32, i32
  }
  func.func @transform_1(%arg0: i32) -> (i32, i32) {
    %c0_i32 = arith.constant 0 : i32
    %c0_i32_0 = arith.constant 0 : i32
    %c0_i32_1 = arith.constant 0 : i32
    return %c0_i32, %c0_i32_0 : i32, i32
  }
  func.func @transform_2(%arg0: i32) -> i32 {
    %c0_i32 = arith.constant 0 : i32
    %c0_i32_0 = arith.constant 0 : i32
    return %c0_i32 : i32
  }
  func.func @transform_3(%arg0: i32) -> (i32, i32, i32, i32) {
    %c0_i32 = arith.constant 0 : i32
    %c0_i32_0 = arith.constant 0 : i32
    %c0_i32_1 = arith.constant 0 : i32
    %c0_i32_2 = arith.constant 0 : i32
    return %arg0, %c0_i32, %c0_i32_0, %c0_i32_1 : i32, i32, i32, i32
  }
}

module attributes {stable_mosaic.version = 11 : i64} {
  func.func @_ca_fused_kernel(%arg0: i32, %arg1: memref<1x256x128xf32, #tpu.memory_space<vmem>>, %arg2: memref<128x32xf32, #tpu.memory_space<vmem>>, %arg3: memref<32x128xf32, #tpu.memory_space<vmem>>, %arg4: memref<1x256x128xf32, #tpu.memory_space<vmem>>, %arg5: memref<1x256x128xf32, #tpu.memory_space<vmem>>) attributes {dimension_semantics = [#tpu.dimension_semantics<parallel>], iteration_bounds = array<i64: 2>, scalar_prefetch = 0 : i64, scratch_operands = 0 : i64, tpu.core_type = #tpu.core_type<tc>, window_params = [{transform_indices = @transform_0, window_bounds = array<i64: 1, 256, 128>}, {pipeline_mode = #tpu.pipeline_mode<synchronous>, transform_indices = @transform_1, window_bounds = array<i64: 128, 32>}, {pipeline_mode = #tpu.pipeline_mode<synchronous>, transform_indices = @transform_2, window_bounds = array<i64: 32, 128>}, {transform_indices = @transform_3, window_bounds = array<i64: 1, 256, 128>}, {transform_indices = @transform_4, window_bounds = array<i64: 1, 256, 128>}]} {
    %c0 = arith.constant 0 : index
    %c0_0 = arith.constant 0 : index
    %c0_1 = arith.constant 0 : index
    %0 = vector.load %arg1[%c0, %c0_0, %c0_1] : memref<1x256x128xf32, #tpu.memory_space<vmem>>, vector<1x256x128xf32>
    %cst = arith.constant dense<0.000000e+00> : vector<1x128xf32>
    %1 = vector.multi_reduction <add>, %0, %cst [1] : vector<1x256x128xf32> to vector<1x128xf32>
    %cst_2 = arith.constant 3.906250e-03 : f32
    %2 = vector.broadcast %cst_2 : f32 to vector<1x128xf32>
    %3 = arith.mulf %1, %2 : vector<1x128xf32>
    %c0_3 = arith.constant 0 : index
    %c0_4 = arith.constant 0 : index
    %4 = vector.load %arg2[%c0_3, %c0_4] : memref<128x32xf32, #tpu.memory_space<vmem>>, vector<128x32xf32>
    %cst_5 = arith.constant dense<0.000000e+00> : vector<1x32xf32>
    %5 = tpu.matmul %3, %4, %cst_5 {dimension_numbers = #tpu.dot_dimension_numbers<[1], [0], [0], [1], [0, 0, 1, 1], [], []>} : vector<1x128xf32>, vector<128x32xf32>, vector<1x32xf32> -> vector<1x32xf32>
    %cst_6 = arith.constant 0.000000e+00 : f32
    %6 = vector.broadcast %cst_6 : f32 to vector<1x32xf32>
    %7 = arith.maximumf %5, %6 : vector<1x32xf32>
    %c0_7 = arith.constant 0 : index
    %c0_8 = arith.constant 0 : index
    %8 = vector.load %arg3[%c0_7, %c0_8] : memref<32x128xf32, #tpu.memory_space<vmem>>, vector<32x128xf32>
    %cst_9 = arith.constant dense<0.000000e+00> : vector<1x128xf32>
    %9 = tpu.matmul %7, %8, %cst_9 {dimension_numbers = #tpu.dot_dimension_numbers<[1], [0], [0], [1], [0, 0, 1, 1], [], []>} : vector<1x32xf32>, vector<32x128xf32>, vector<1x128xf32> -> vector<1x128xf32>
    %10 = arith.negf %9 : vector<1x128xf32>
    %11 = math.exp %10 : vector<1x128xf32>
    %cst_10 = arith.constant 1.000000e+00 : f32
    %12 = vector.broadcast %cst_10 : f32 to vector<1x128xf32>
    %13 = arith.addf %12, %11 : vector<1x128xf32>
    %14 = arith.divf %12, %13 : vector<1x128xf32>
    %15 = vector.shape_cast %14 : vector<1x128xf32> to vector<1x1x128xf32>
    %16 = vector.broadcast %15 : vector<1x1x128xf32> to vector<1x256x128xf32>
    %17 = arith.mulf %0, %16 : vector<1x256x128xf32>
    %c0_11 = arith.constant 0 : index
    %c0_12 = arith.constant 0 : index
    %c0_13 = arith.constant 0 : index
    %18 = vector.load %arg4[%c0_11, %c0_12, %c0_13] : memref<1x256x128xf32, #tpu.memory_space<vmem>>, vector<1x256x128xf32>
    %19 = arith.addf %17, %18 : vector<1x256x128xf32>
    %c0_14 = arith.constant 0 : index
    %c0_15 = arith.constant 0 : index
    %c0_16 = arith.constant 0 : index
    %20 = vector.load %arg5[%c0_14, %c0_15, %c0_16] : memref<1x256x128xf32, #tpu.memory_space<vmem>>, vector<1x256x128xf32>
    tpu.vector_store %arg5[%c0_14, %c0_15, %c0_16], %19 {strides = array<i32>} : memref<1x256x128xf32, #tpu.memory_space<vmem>>, vector<1x256x128xf32>,
    return
  }
  func.func @transform_0(%arg0: i32) -> (i32, i32, i32) {
    %c0_i32 = arith.constant 0 : i32
    %c0_i32_0 = arith.constant 0 : i32
    %c0_i32_1 = arith.constant 0 : i32
    return %arg0, %c0_i32, %c0_i32_0 : i32, i32, i32
  }
  func.func @transform_1(%arg0: i32) -> (i32, i32) {
    %c0_i32 = arith.constant 0 : i32
    %c0_i32_0 = arith.constant 0 : i32
    %c0_i32_1 = arith.constant 0 : i32
    return %c0_i32, %c0_i32_0 : i32, i32
  }
  func.func @transform_2(%arg0: i32) -> (i32, i32) {
    %c0_i32 = arith.constant 0 : i32
    %c0_i32_0 = arith.constant 0 : i32
    %c0_i32_1 = arith.constant 0 : i32
    return %c0_i32, %c0_i32_0 : i32, i32
  }
  func.func @transform_3(%arg0: i32) -> (i32, i32, i32) {
    %c0_i32 = arith.constant 0 : i32
    %c0_i32_0 = arith.constant 0 : i32
    %c0_i32_1 = arith.constant 0 : i32
    return %arg0, %c0_i32, %c0_i32_0 : i32, i32, i32
  }
  func.func @transform_4(%arg0: i32) -> (i32, i32, i32) {
    %c0_i32 = arith.constant 0 : i32
    %c0_i32_0 = arith.constant 0 : i32
    %c0_i32_1 = arith.constant 0 : i32
    return %arg0, %c0_i32, %c0_i32_0 : i32, i32, i32
  }
}

module attributes {stable_mosaic.version = 11 : i64} {
  func.func @kernel(%arg0: i32, %arg1: memref<1x18x18x128xf32, #tpu.memory_space<vmem>>, %arg2: memref<1152x128xf32, #tpu.memory_space<vmem>>, %arg3: memref<1x16x16x128xf32, #tpu.memory_space<vmem>>, %arg4: memref<1x16x16x128xf32, #tpu.memory_space<vmem>>) attributes {dimension_semantics = [#tpu.dimension_semantics<parallel>], iteration_bounds = array<i64: 2>, scalar_prefetch = 0 : i64, scratch_operands = 0 : i64, tpu.core_type = #tpu.core_type<tc>, window_params = [{transform_indices = @transform_0, window_bounds = array<i64: 1, 18, 18, 128>}, {pipeline_mode = #tpu.pipeline_mode<synchronous>, transform_indices = @transform_1, window_bounds = array<i64: 1152, 128>}, {transform_indices = @transform_2, window_bounds = array<i64: 1, 16, 16, 128>}, {transform_indices = @transform_3, window_bounds = array<i64: 1, 16, 16, 128>}]} {
    %c0 = arith.constant 0 : index
    %c0_0 = arith.constant 0 : index
    %c0_1 = arith.constant 0 : index
    %c0_2 = arith.constant 0 : index
    %0 = vector.load %arg1[%c0, %c0_0, %c0_1, %c0_2] : memref<1x18x18x128xf32, #tpu.memory_space<vmem>>, vector<1x18x18x128xf32>
    %1 = vector.shape_cast %0 : vector<1x18x18x128xf32> to vector<18x18x128xf32>
    %2 = vector.extract_strided_slice %1 {offsets = [0, 0, 0], sizes = [16, 16, 128], strides = [1, 1, 1]} : vector<18x18x128xf32> to vector<16x16x128xf32>
    %3 = vector.extract_strided_slice %1 {offsets = [0, 1, 0], sizes = [16, 16, 128], strides = [1, 1, 1]} : vector<18x18x128xf32> to vector<16x16x128xf32>
    %4 = vector.extract_strided_slice %1 {offsets = [0, 2, 0], sizes = [16, 16, 128], strides = [1, 1, 1]} : vector<18x18x128xf32> to vector<16x16x128xf32>
    %5 = vector.extract_strided_slice %1 {offsets = [1, 0, 0], sizes = [16, 16, 128], strides = [1, 1, 1]} : vector<18x18x128xf32> to vector<16x16x128xf32>
    %6 = vector.extract_strided_slice %1 {offsets = [1, 1, 0], sizes = [16, 16, 128], strides = [1, 1, 1]} : vector<18x18x128xf32> to vector<16x16x128xf32>
    %7 = vector.extract_strided_slice %1 {offsets = [1, 2, 0], sizes = [16, 16, 128], strides = [1, 1, 1]} : vector<18x18x128xf32> to vector<16x16x128xf32>
    %8 = vector.extract_strided_slice %1 {offsets = [2, 0, 0], sizes = [16, 16, 128], strides = [1, 1, 1]} : vector<18x18x128xf32> to vector<16x16x128xf32>
    %9 = vector.extract_strided_slice %1 {offsets = [2, 1, 0], sizes = [16, 16, 128], strides = [1, 1, 1]} : vector<18x18x128xf32> to vector<16x16x128xf32>
    %10 = vector.extract_strided_slice %1 {offsets = [2, 2, 0], sizes = [16, 16, 128], strides = [1, 1, 1]} : vector<18x18x128xf32> to vector<16x16x128xf32>
    %11 = tpu.concatenate %2, %3, %4, %5, %6, %7, %8, %9, %10 in 2 : vector<16x16x128xf32>, vector<16x16x128xf32>, vector<16x16x128xf32>, vector<16x16x128xf32>, vector<16x16x128xf32>, vector<16x16x128xf32>, vector<16x16x128xf32>, vector<16x16x128xf32>, vector<16x16x128xf32> -> vector<16x16x1152xf32>
    %12 = vector.shape_cast %11 : vector<16x16x1152xf32> to vector<256x1152xf32>
    %c0_3 = arith.constant 0 : index
    %c0_4 = arith.constant 0 : index
    %13 = vector.load %arg2[%c0_3, %c0_4] : memref<1152x128xf32, #tpu.memory_space<vmem>>, vector<1152x128xf32>
    %cst = arith.constant dense<0.000000e+00> : vector<256x128xf32>
    %14 = tpu.matmul %12, %13, %cst {dimension_numbers = #tpu.dot_dimension_numbers<[1], [0], [0], [1], [0, 0, 1, 1], [], []>} : vector<256x1152xf32>, vector<1152x128xf32>, vector<256x128xf32> -> vector<256x128xf32>
    %15 = vector.shape_cast %14 : vector<256x128xf32> to vector<16x16x128xf32>
    %c0_5 = arith.constant 0 : index
    %c0_6 = arith.constant 0 : index
    %c0_7 = arith.constant 0 : index
    %c0_8 = arith.constant 0 : index
    %16 = vector.load %arg3[%c0_5, %c0_6, %c0_7, %c0_8] : memref<1x16x16x128xf32, #tpu.memory_space<vmem>>, vector<1x16x16x128xf32>
    %17 = vector.shape_cast %16 : vector<1x16x16x128xf32> to vector<16x16x128xf32>
    %18 = arith.addf %15, %17 : vector<16x16x128xf32>
    %c0_9 = arith.constant 0 : index
    %c0_10 = arith.constant 0 : index
    %c0_11 = arith.constant 0 : index
    %c0_12 = arith.constant 0 : index
    %19 = vector.load %arg4[%c0_9, %c0_10, %c0_11, %c0_12] : memref<1x16x16x128xf32, #tpu.memory_space<vmem>>, vector<1x16x16x128xf32>
    %20 = vector.shape_cast %19 : vector<1x16x16x128xf32> to vector<16x16x128xf32>
    %21 = vector.shape_cast %18 : vector<16x16x128xf32> to vector<1x16x16x128xf32>
    tpu.vector_store %arg4[%c0_9, %c0_10, %c0_11, %c0_12], %21 {strides = array<i32>} : memref<1x16x16x128xf32, #tpu.memory_space<vmem>>, vector<1x16x16x128xf32>,
    return
  }
  func.func @transform_0(%arg0: i32) -> (i32, i32, i32, i32) {
    %c0_i32 = arith.constant 0 : i32
    %c0_i32_0 = arith.constant 0 : i32
    %c0_i32_1 = arith.constant 0 : i32
    %c0_i32_2 = arith.constant 0 : i32
    return %arg0, %c0_i32, %c0_i32_0, %c0_i32_1 : i32, i32, i32, i32
  }
  func.func @transform_1(%arg0: i32) -> (i32, i32) {
    %c0_i32 = arith.constant 0 : i32
    %c0_i32_0 = arith.constant 0 : i32
    %c0_i32_1 = arith.constant 0 : i32
    return %c0_i32, %c0_i32_0 : i32, i32
  }
  func.func @transform_2(%arg0: i32) -> (i32, i32, i32, i32) {
    %c0_i32 = arith.constant 0 : i32
    %c0_i32_0 = arith.constant 0 : i32
    %c0_i32_1 = arith.constant 0 : i32
    %c0_i32_2 = arith.constant 0 : i32
    return %arg0, %c0_i32, %c0_i32_0, %c0_i32_1 : i32, i32, i32, i32
  }
  func.func @transform_3(%arg0: i32) -> (i32, i32, i32, i32) {
    %c0_i32 = arith.constant 0 : i32
    %c0_i32_0 = arith.constant 0 : i32
    %c0_i32_1 = arith.constant 0 : i32
    %c0_i32_2 = arith.constant 0 : i32
    return %arg0, %c0_i32, %c0_i32_0, %c0_i32_1 : i32, i32, i32, i32
  }
}

module attributes {stable_mosaic.version = 11 : i64} {
  func.func @_merge_kernel(%arg0: i32, %arg1: memref<256x128xf32, #tpu.memory_space<vmem>>, %arg2: memref<256x96xf32, #tpu.memory_space<vmem>>, %arg3: memref<256x96xf32, #tpu.memory_space<vmem>>, %arg4: memref<96x128xf32, #tpu.memory_space<vmem>>, %arg5: memref<96x128xf32, #tpu.memory_space<vmem>>, %arg6: memref<256x128xf32, #tpu.memory_space<vmem>>) attributes {dimension_semantics = [#tpu.dimension_semantics<parallel>], iteration_bounds = array<i64: 2>, scalar_prefetch = 0 : i64, scratch_operands = 0 : i64, tpu.core_type = #tpu.core_type<tc>, window_params = [{transform_indices = @transform_0, window_bounds = array<i64: 256, 128>}, {transform_indices = @transform_1, window_bounds = array<i64: 256, 96>}, {transform_indices = @transform_2, window_bounds = array<i64: 256, 96>}, {pipeline_mode = #tpu.pipeline_mode<synchronous>, transform_indices = @transform_3, window_bounds = array<i64: 96, 128>}, {pipeline_mode = #tpu.pipeline_mode<synchronous>, transform_indices = @transform_4, window_bounds = array<i64: 96, 128>}, {transform_indices = @transform_5, window_bounds = array<i64: 256, 128>}]} {
    %c0 = arith.constant 0 : index
    %c0_0 = arith.constant 0 : index
    %0 = vector.load %arg1[%c0, %c0_0] : memref<256x128xf32, #tpu.memory_space<vmem>>, vector<256x128xf32>
    %c0_1 = arith.constant 0 : index
    %c0_2 = arith.constant 0 : index
    %1 = vector.load %arg2[%c0_1, %c0_2] : memref<256x96xf32, #tpu.memory_space<vmem>>, vector<256x96xf32>
    %c0_3 = arith.constant 0 : index
    %c0_4 = arith.constant 0 : index
    %2 = vector.load %arg4[%c0_3, %c0_4] : memref<96x128xf32, #tpu.memory_space<vmem>>, vector<96x128xf32>
    %cst = arith.constant dense<0.000000e+00> : vector<256x128xf32>
    %3 = tpu.matmul %1, %2, %cst {dimension_numbers = #tpu.dot_dimension_numbers<[1], [0], [0], [1], [0, 0, 1, 1], [], []>} : vector<256x96xf32>, vector<96x128xf32>, vector<256x128xf32> -> vector<256x128xf32>
    %4 = arith.addf %0, %3 : vector<256x128xf32>
    %c0_5 = arith.constant 0 : index
    %c0_6 = arith.constant 0 : index
    %5 = vector.load %arg3[%c0_5, %c0_6] : memref<256x96xf32, #tpu.memory_space<vmem>>, vector<256x96xf32>
    %c0_7 = arith.constant 0 : index
    %c0_8 = arith.constant 0 : index
    %6 = vector.load %arg5[%c0_7, %c0_8] : memref<96x128xf32, #tpu.memory_space<vmem>>, vector<96x128xf32>
    %cst_9 = arith.constant dense<0.000000e+00> : vector<256x128xf32>
    %7 = tpu.matmul %5, %6, %cst_9 {dimension_numbers = #tpu.dot_dimension_numbers<[1], [0], [0], [1], [0, 0, 1, 1], [], []>} : vector<256x96xf32>, vector<96x128xf32>, vector<256x128xf32> -> vector<256x128xf32>
    %8 = arith.addf %4, %7 : vector<256x128xf32>
    %c0_10 = arith.constant 0 : index
    %c0_11 = arith.constant 0 : index
    %9 = vector.load %arg6[%c0_10, %c0_11] : memref<256x128xf32, #tpu.memory_space<vmem>>, vector<256x128xf32>
    tpu.vector_store %arg6[%c0_10, %c0_11], %8 {strides = array<i32>} : memref<256x128xf32, #tpu.memory_space<vmem>>, vector<256x128xf32>,
    return
  }
  func.func @transform_0(%arg0: i32) -> (i32, i32) {
    %c0_i32 = arith.constant 0 : i32
    %c0_i32_0 = arith.constant 0 : i32
    return %arg0, %c0_i32 : i32, i32
  }
  func.func @transform_1(%arg0: i32) -> (i32, i32) {
    %c0_i32 = arith.constant 0 : i32
    %c0_i32_0 = arith.constant 0 : i32
    return %arg0, %c0_i32 : i32, i32
  }
  func.func @transform_2(%arg0: i32) -> (i32, i32) {
    %c0_i32 = arith.constant 0 : i32
    %c0_i32_0 = arith.constant 0 : i32
    return %arg0, %c0_i32 : i32, i32
  }
  func.func @transform_3(%arg0: i32) -> (i32, i32) {
    %c0_i32 = arith.constant 0 : i32
    %c0_i32_0 = arith.constant 0 : i32
    %c0_i32_1 = arith.constant 0 : i32
    return %c0_i32, %c0_i32_0 : i32, i32
  }
  func.func @transform_4(%arg0: i32) -> (i32, i32) {
    %c0_i32 = arith.constant 0 : i32
    %c0_i32_0 = arith.constant 0 : i32
    %c0_i32_1 = arith.constant 0 : i32
    return %c0_i32, %c0_i32_0 : i32, i32
  }
  func.func @transform_5(%arg0: i32) -> (i32, i32) {
    %c0_i32 = arith.constant 0 : i32
    %c0_i32_0 = arith.constant 0 : i32
    return %arg0, %c0_i32 : i32, i32
  }
}

module attributes {stable_mosaic.version = 11 : i64} {
  func.func @_matmul_kernel(%arg0: i32, %arg1: memref<64x144xf32, #tpu.memory_space<vmem>>, %arg2: memref<144x128xf32, #tpu.memory_space<vmem>>, %arg3: memref<64x128xf32, #tpu.memory_space<vmem>>) attributes {dimension_semantics = [#tpu.dimension_semantics<parallel>], iteration_bounds = array<i64: 2>, scalar_prefetch = 0 : i64, scratch_operands = 0 : i64, tpu.core_type = #tpu.core_type<tc>, window_params = [{transform_indices = @transform_0, window_bounds = array<i64: 64, 144>}, {pipeline_mode = #tpu.pipeline_mode<synchronous>, transform_indices = @transform_1, window_bounds = array<i64: 144, 128>}, {transform_indices = @transform_2, window_bounds = array<i64: 64, 128>}]} {
    %c0 = arith.constant 0 : index
    %c0_0 = arith.constant 0 : index
    %0 = vector.load %arg1[%c0, %c0_0] : memref<64x144xf32, #tpu.memory_space<vmem>>, vector<64x144xf32>
    %c0_1 = arith.constant 0 : index
    %c0_2 = arith.constant 0 : index
    %1 = vector.load %arg2[%c0_1, %c0_2] : memref<144x128xf32, #tpu.memory_space<vmem>>, vector<144x128xf32>
    %cst = arith.constant dense<0.000000e+00> : vector<64x128xf32>
    %2 = tpu.matmul %0, %1, %cst {dimension_numbers = #tpu.dot_dimension_numbers<[1], [0], [0], [1], [0, 0, 1, 1], [], []>} : vector<64x144xf32>, vector<144x128xf32>, vector<64x128xf32> -> vector<64x128xf32>
    %c0_3 = arith.constant 0 : index
    %c0_4 = arith.constant 0 : index
    %3 = vector.load %arg3[%c0_3, %c0_4] : memref<64x128xf32, #tpu.memory_space<vmem>>, vector<64x128xf32>
    tpu.vector_store %arg3[%c0_3, %c0_4], %2 {strides = array<i32>} : memref<64x128xf32, #tpu.memory_space<vmem>>, vector<64x128xf32>,
    return
  }
  func.func @transform_0(%arg0: i32) -> (i32, i32) {
    %c0_i32 = arith.constant 0 : i32
    %c0_i32_0 = arith.constant 0 : i32
    return %arg0, %c0_i32 : i32, i32
  }
  func.func @transform_1(%arg0: i32) -> (i32, i32) {
    %c0_i32 = arith.constant 0 : i32
    %c0_i32_0 = arith.constant 0 : i32
    %c0_i32_1 = arith.constant 0 : i32
    return %c0_i32, %c0_i32_0 : i32, i32
  }
  func.func @transform_2(%arg0: i32) -> (i32, i32) {
    %c0_i32 = arith.constant 0 : i32
    %c0_i32_0 = arith.constant 0 : i32
    return %arg0, %c0_i32 : i32, i32
  }
}

module attributes {stable_mosaic.version = 11 : i64} {
  func.func @_add3_kernel(%arg0: i32, %arg1: memref<256x128xf32, #tpu.memory_space<vmem>>, %arg2: memref<256x128xf32, #tpu.memory_space<vmem>>, %arg3: memref<256x128xf32, #tpu.memory_space<vmem>>, %arg4: memref<256x128xf32, #tpu.memory_space<vmem>>) attributes {dimension_semantics = [#tpu.dimension_semantics<parallel>], iteration_bounds = array<i64: 2>, scalar_prefetch = 0 : i64, scratch_operands = 0 : i64, tpu.core_type = #tpu.core_type<tc>, window_params = [{transform_indices = @transform_0, window_bounds = array<i64: 256, 128>}, {transform_indices = @transform_1, window_bounds = array<i64: 256, 128>}, {transform_indices = @transform_2, window_bounds = array<i64: 256, 128>}, {transform_indices = @transform_3, window_bounds = array<i64: 256, 128>}]} {
    %c0 = arith.constant 0 : index
    %c0_0 = arith.constant 0 : index
    %0 = vector.load %arg1[%c0, %c0_0] : memref<256x128xf32, #tpu.memory_space<vmem>>, vector<256x128xf32>
    %c0_1 = arith.constant 0 : index
    %c0_2 = arith.constant 0 : index
    %1 = vector.load %arg2[%c0_1, %c0_2] : memref<256x128xf32, #tpu.memory_space<vmem>>, vector<256x128xf32>
    %2 = arith.addf %0, %1 : vector<256x128xf32>
    %c0_3 = arith.constant 0 : index
    %c0_4 = arith.constant 0 : index
    %3 = vector.load %arg3[%c0_3, %c0_4] : memref<256x128xf32, #tpu.memory_space<vmem>>, vector<256x128xf32>
    %4 = arith.addf %2, %3 : vector<256x128xf32>
    %c0_5 = arith.constant 0 : index
    %c0_6 = arith.constant 0 : index
    %5 = vector.load %arg4[%c0_5, %c0_6] : memref<256x128xf32, #tpu.memory_space<vmem>>, vector<256x128xf32>
    tpu.vector_store %arg4[%c0_5, %c0_6], %4 {strides = array<i32>} : memref<256x128xf32, #tpu.memory_space<vmem>>, vector<256x128xf32>,
    return
  }
  func.func @transform_0(%arg0: i32) -> (i32, i32) {
    %c0_i32 = arith.constant 0 : i32
    %c0_i32_0 = arith.constant 0 : i32
    return %arg0, %c0_i32 : i32, i32
  }
  func.func @transform_1(%arg0: i32) -> (i32, i32) {
    %c0_i32 = arith.constant 0 : i32
    %c0_i32_0 = arith.constant 0 : i32
    return %arg0, %c0_i32 : i32, i32
  }
  func.func @transform_2(%arg0: i32) -> (i32, i32) {
    %c0_i32 = arith.constant 0 : i32
    %c0_i32_0 = arith.constant 0 : i32
    return %arg0, %c0_i32 : i32, i32
  }
  func.func @transform_3(%arg0: i32) -> (i32, i32) {
    %c0_i32 = arith.constant 0 : i32
    %c0_i32_0 = arith.constant 0 : i32
    return %arg0, %c0_i32 : i32, i32
  }
}

module attributes {stable_mosaic.version = 11 : i64} {
  func.func @_matmul_kernel(%arg0: i32, %arg1: memref<16x192xf32, #tpu.memory_space<vmem>>, %arg2: memref<192x128xf32, #tpu.memory_space<vmem>>, %arg3: memref<16x128xf32, #tpu.memory_space<vmem>>) attributes {dimension_semantics = [#tpu.dimension_semantics<parallel>], iteration_bounds = array<i64: 2>, scalar_prefetch = 0 : i64, scratch_operands = 0 : i64, tpu.core_type = #tpu.core_type<tc>, window_params = [{transform_indices = @transform_0, window_bounds = array<i64: 16, 192>}, {pipeline_mode = #tpu.pipeline_mode<synchronous>, transform_indices = @transform_1, window_bounds = array<i64: 192, 128>}, {transform_indices = @transform_2, window_bounds = array<i64: 16, 128>}]} {
    %c0 = arith.constant 0 : index
    %c0_0 = arith.constant 0 : index
    %0 = vector.load %arg1[%c0, %c0_0] : memref<16x192xf32, #tpu.memory_space<vmem>>, vector<16x192xf32>
    %c0_1 = arith.constant 0 : index
    %c0_2 = arith.constant 0 : index
    %1 = vector.load %arg2[%c0_1, %c0_2] : memref<192x128xf32, #tpu.memory_space<vmem>>, vector<192x128xf32>
    %cst = arith.constant dense<0.000000e+00> : vector<16x128xf32>
    %2 = tpu.matmul %0, %1, %cst {dimension_numbers = #tpu.dot_dimension_numbers<[1], [0], [0], [1], [0, 0, 1, 1], [], []>} : vector<16x192xf32>, vector<192x128xf32>, vector<16x128xf32> -> vector<16x128xf32>
    %c0_3 = arith.constant 0 : index
    %c0_4 = arith.constant 0 : index
    %3 = vector.load %arg3[%c0_3, %c0_4] : memref<16x128xf32, #tpu.memory_space<vmem>>, vector<16x128xf32>
    tpu.vector_store %arg3[%c0_3, %c0_4], %2 {strides = array<i32>} : memref<16x128xf32, #tpu.memory_space<vmem>>, vector<16x128xf32>,
    return
  }
  func.func @transform_0(%arg0: i32) -> (i32, i32) {
    %c0_i32 = arith.constant 0 : i32
    %c0_i32_0 = arith.constant 0 : i32
    return %arg0, %c0_i32 : i32, i32
  }
  func.func @transform_1(%arg0: i32) -> (i32, i32) {
    %c0_i32 = arith.constant 0 : i32
    %c0_i32_0 = arith.constant 0 : i32
    %c0_i32_1 = arith.constant 0 : i32
    return %c0_i32, %c0_i32_0 : i32, i32
  }
  func.func @transform_2(%arg0: i32) -> (i32, i32) {
    %c0_i32 = arith.constant 0 : i32
    %c0_i32_0 = arith.constant 0 : i32
    return %arg0, %c0_i32 : i32, i32
  }
}

module attributes {stable_mosaic.version = 11 : i64} {
  func.func @_add3_kernel(%arg0: i32, %arg1: memref<256x128xf32, #tpu.memory_space<vmem>>, %arg2: memref<256x128xf32, #tpu.memory_space<vmem>>, %arg3: memref<256x128xf32, #tpu.memory_space<vmem>>, %arg4: memref<256x128xf32, #tpu.memory_space<vmem>>) attributes {dimension_semantics = [#tpu.dimension_semantics<parallel>], iteration_bounds = array<i64: 2>, scalar_prefetch = 0 : i64, scratch_operands = 0 : i64, tpu.core_type = #tpu.core_type<tc>, window_params = [{transform_indices = @transform_0, window_bounds = array<i64: 256, 128>}, {transform_indices = @transform_1, window_bounds = array<i64: 256, 128>}, {transform_indices = @transform_2, window_bounds = array<i64: 256, 128>}, {transform_indices = @transform_3, window_bounds = array<i64: 256, 128>}]} {
    %c0 = arith.constant 0 : index
    %c0_0 = arith.constant 0 : index
    %0 = vector.load %arg1[%c0, %c0_0] : memref<256x128xf32, #tpu.memory_space<vmem>>, vector<256x128xf32>
    %c0_1 = arith.constant 0 : index
    %c0_2 = arith.constant 0 : index
    %1 = vector.load %arg2[%c0_1, %c0_2] : memref<256x128xf32, #tpu.memory_space<vmem>>, vector<256x128xf32>
    %2 = arith.addf %0, %1 : vector<256x128xf32>
    %c0_3 = arith.constant 0 : index
    %c0_4 = arith.constant 0 : index
    %3 = vector.load %arg3[%c0_3, %c0_4] : memref<256x128xf32, #tpu.memory_space<vmem>>, vector<256x128xf32>
    %4 = arith.addf %2, %3 : vector<256x128xf32>
    %c0_5 = arith.constant 0 : index
    %c0_6 = arith.constant 0 : index
    %5 = vector.load %arg4[%c0_5, %c0_6] : memref<256x128xf32, #tpu.memory_space<vmem>>, vector<256x128xf32>
    tpu.vector_store %arg4[%c0_5, %c0_6], %4 {strides = array<i32>} : memref<256x128xf32, #tpu.memory_space<vmem>>, vector<256x128xf32>,
    return
  }
  func.func @transform_0(%arg0: i32) -> (i32, i32) {
    %c0_i32 = arith.constant 0 : i32
    %c0_i32_0 = arith.constant 0 : i32
    return %arg0, %c0_i32 : i32, i32
  }
  func.func @transform_1(%arg0: i32) -> (i32, i32) {
    %c0_i32 = arith.constant 0 : i32
    %c0_i32_0 = arith.constant 0 : i32
    return %arg0, %c0_i32 : i32, i32
  }
  func.func @transform_2(%arg0: i32) -> (i32, i32) {
    %c0_i32 = arith.constant 0 : i32
    %c0_i32_0 = arith.constant 0 : i32
    return %arg0, %c0_i32 : i32, i32
  }
  func.func @transform_3(%arg0: i32) -> (i32, i32) {
    %c0_i32 = arith.constant 0 : i32
    %c0_i32_0 = arith.constant 0 : i32
    return %arg0, %c0_i32 : i32, i32
  }
}

</mosaic_0001>

<bundles_post_ra>
// kernel: orsnet_forward.30
= control target key start
LH: loop header
LB: loop body
LE: loop exit
PB: predicated region body
PF: predicated region fallthrough
CT: control target
= control target key end

     0   :  { %s825_s15 = smov 0   ;;  %s1198_s0 = inlined_call_operand.vmem [shape: f32[2,256,128], index: 0, kind: input, shape index: {}]   ;;  %s1199_s1 = inlined_call_operand.vmem [shape: f32[128,32], index: 1, kind: input, shape index: {}]   ;;  %s1200_s2 = inlined_call_operand.vmem [shape: f32[32,128], index: 2, kind: input, shape index: {}]   ;;  %s1201_s3 = inlined_call_operand.vmem [shape: f32[2,256,128], index: 3, kind: input, shape index: {}]   ;;  %s1202_s4 = inlined_call_operand.vmem [shape: f32[2,256,128], index: 4, kind: output, shape index: {}]  }
   0x1 LB: > { %s658_s16 = sadd.s32 4294967295, %s795_s15   ;;  %p662_p0 = scmp.ge.s32.totalorder %s795_s15, 1  ;;  %s795_s15 = sphi %s825_s15, %s14_s15  }
   0x2   : > { %p172_p1 = scmp.lt.s32.totalorder %s795_s15, 3 }
   0x4   : > { %p173_p2 = pnand %p662_p0, %p172_p1 }
   0x6   : > { %176 = sbr.rel (%p173_p2) target bundleno = 577 (0x241), region = 36 }
   0xd   : > { %v288_v0 = vld [vmem:[%s1199_s1] sm:$0xff]  ;;  %v289_v1 = vld [vmem:[%s1199_s1 + $0x8] sm:$0xff]  ;;  %v290_v2 = vld [vmem:[%s1199_s1 + $0x10] sm:$0xff]  ;;  %v797_v3 = vmov 0.0|0.0   ;;  %vm798_vm0 = vmmov 0   ;;  %v799_v6 = vmov 0.0  }
   0xe   : > { %744 = vmatprep.subr.bf16.mxu0 %v797_v3  ;;  %v745_v4 = vpack.c.bf16 %v289_v1, %v288_v0  ;;  %v291_v5 = vld [vmem:[%s1199_s1 + $0x18] sm:$0xff]  ;;  %730 = vmatprep.mubr.msk.f32.mxu0 %vm798_vm0, %v799_v6  ;;  %p203_p3 = scmp.lt.s32.totalorder %s658_s16, 1  ;;  %v292_v8 = vld [vmem:[%s1199_s1 + $0x20] sm:$0xff]  ;;  %v293_v9 = vld [vmem:[%s1199_s1 + $0x28] sm:$0xff]  ;;  %vm379_vm1 = vcmask 261120  }
   0xf   : > { %768 = vmatprep.subr.bf16.mxu1 %v797_v3  ;;  %741 = vmatprep.mubr.msk.f32.mxu1 %vm798_vm0, %v799_v6  ;;  %v748_v7 = vpack.c.bf16 %v291_v5, %v290_v2  ;;  %v375_v10 = vld [vmem:[%s1200_s2] sm:$0xff]  ;;  %v376_v11 = vld [vmem:[%s1200_s2 + $0x8] sm:$0xff]  ;;  %v751_v13 = vpack.c.bf16 %v293_v9, %v292_v8  ;;  %v294_v17 = vld [vmem:[%s1199_s1 + $0x30] sm:$0xff] }
  0x10   : > { %746 = vmatpush3.bf16.msra.mxu0 %v745_v4  ;;  %s1206_s16 = smov (!%p203_p3, %s658_s16), 1  ;;  %v769_v12 = vpack.c.bf16 %v376_v11, %v375_v10  ;;  %v295_v18 = vld [vmem:[%s1199_s1 + $0x38] sm:$0xff]  ;;  %v296_v24 = vld [vmem:[%s1199_s1 + $0x40] sm:$0xff]  ;;  %v297_v25 = vld [vmem:[%s1199_s1 + $0x48] sm:$0xff] }
  0x11   : > { %747 = vmatprep.subr.bf16.mxu0 %v797_v3  ;;  %s854_s29 = sshll.u32 %s1206_s16, 8  ;;  %v754_v22 = vpack.c.bf16 %v295_v18, %v294_v17  ;;  %v757_v29 = vpack.c.bf16 %v297_v25, %v296_v24  ;;  %v298_v31 = vld [vmem:[%s1199_s1 + $0x50] sm:$0xff]  ;;  %v299_v32 = vld [vmem:[%s1199_s1 + $0x58] sm:$0xff]  ;;  %v300_v38 = vld [vmem:[%s1199_s1 + $0x60] sm:$0xff] }
  0x12   : > { %s866_s10 = scalar_lea.vmem %s1198_s0, %s854_s29  ;;  %770 = vmatpush3.bf16.msra.mxu1 %v769_v12  ;;  %v760_v36 = vpack.c.bf16 %v299_v32, %v298_v31  ;;  %v301_v39 = vld [vmem:[%s1199_s1 + $0x68] sm:$0xff]  ;;  %v302_v45 = vld [vmem:[%s1199_s1 + $0x70] sm:$0xff]  ;;  %v303_v46 = vld [vmem:[%s1199_s1 + $0x78] sm:$0xff]  ;;  %s1043_s13 = scalar_lea.vmem %s1201_s3, %s854_s29 }
  0x13   : > { %v869_v14 = vld [vmem:[%s866_s10] sm:$0xff]  ;;  %v872_v15 = vld [vmem:[%s866_s10 + $0x8] sm:$0xff]  ;;  %v875_v16 = vld [vmem:[%s866_s10 + $0x10] sm:$0xff]  ;;  %771 = vmatprep.subr.bf16.mxu1 %v797_v3  ;;  %v763_v43 = vpack.c.bf16 %v301_v39, %v300_v38  ;;  %v766_v50 = vpack.c.bf16 %v303_v46, %v302_v45  ;;  %s1115_s17 = scalar_lea.vmem %s1202_s4, %s854_s29 }
  0x14   : > { %749 = vmatpush3.bf16.msra.mxu0 %v748_v7  ;;  %v250_v19 = vadd.f32 %v872_v15, %v869_v14  ;;  %v887_v20 = vld [vmem:[%s866_s10 + $0x18] sm:$0xff]  ;;  %v892_v23 = vld [vmem:[%s866_s10 + $0x20] sm:$0xff]  ;;  %v903_v27 = vld [vmem:[%s866_s10 + $0x28] sm:$0xff] }
  0x15   : > { %750 = vmatprep.subr.bf16.mxu0 %v797_v3  ;;  %v907_v30 = vld [vmem:[%s866_s10 + $0x30] sm:$0xff]  ;;  %v918_v34 = vld [vmem:[%s866_s10 + $0x38] sm:$0xff]  ;;  %v922_v37 = vld [vmem:[%s866_s10 + $0x40] sm:$0xff] }
  0x16   : > { %v251_v21 = vadd.f32 %v250_v19, %v875_v16  ;;  %v933_v41 = vld [vmem:[%s866_s10 + $0x48] sm:$0xff]  ;;  %v937_v44 = vld [vmem:[%s866_s10 + $0x50] sm:$0xff]  ;;  %v948_v48 = vld [vmem:[%s866_s10 + $0x58] sm:$0xff] }
  0x17   : > { %v952_v51 = vld [vmem:[%s866_s10 + $0x60] sm:$0xff]  ;;  %v957_v53 = vld [vmem:[%s866_s10 + $0x68] sm:$0xff]  ;;  %v961_v55 = vld [vmem:[%s866_s10 + $0x70] sm:$0xff] }
  0x18   : > { %752 = vmatpush3.bf16.msra.mxu0 %v751_v13  ;;  %v252_v26 = vadd.f32 %v251_v21, %v887_v20  ;;  %v965_v57 = vld [vmem:[%s866_s10 + $0x78] sm:$0xff]  ;;  %v969_v59 = vld [vmem:[%s866_s10 + $0x80] sm:$0xff]  ;;  %v973_v61 = vld [vmem:[%s866_s10 + $0x88] sm:$0xff] }
  0x19   : > { %753 = vmatprep.subr.bf16.mxu0 %v797_v3  ;;  %v977_v63 = vld [vmem:[%s866_s10 + $0x90] sm:$0xff]  ;;  %v981_v1 = vld [vmem:[%s866_s10 + $0x98] sm:$0xff]  ;;  %v989_v5 = vld [vmem:[%s866_s10 + $0xa8] sm:$0xff] }
  0x1a   : > { %v253_v28 = vadd.f32 %v252_v26, %v892_v23  ;;  %v993_v7 = vld [vmem:[%s866_s10 + $0xb0] sm:$0xff]  ;;  %v997_v9 = vld [vmem:[%s866_s10 + $0xb8] sm:$0xff]  ;;  %v1001_v11 = vld [vmem:[%s866_s10 + $0xc0] sm:$0xff] }
  0x1b   : > { %v1005_v13 = vld [vmem:[%s866_s10 + $0xc8] sm:$0xff]  ;;  %v1009_v18 = vld [vmem:[%s866_s10 + $0xd0] sm:$0xff]  ;;  %v1013_v21 = vld [vmem:[%s866_s10 + $0xd8] sm:$0xff] }
  0x1c   : > { %755 = vmatpush3.bf16.msra.mxu0 %v754_v22  ;;  %v254_v33 = vadd.f32 %v253_v28, %v903_v27  ;;  %v1017_v24 = vld [vmem:[%s866_s10 + $0xe0] sm:$0xff]  ;;  %v1021_v26 = vld [vmem:[%s866_s10 + $0xe8] sm:$0xff]  ;;  %v1029_v32 = vld [vmem:[%s866_s10 + $0xf8] sm:$0xff] }
  0x1d   : > { %756 = vmatprep.subr.bf16.mxu0 %v797_v3  ;;  %v377_v46 = vld [vmem:[%s1200_s2 + $0x10] sm:$0xff] }
  0x1e   : > { %v255_v35 = vadd.f32 %v254_v33, %v907_v30 }
  0x20   : > { %758 = vmatpush3.bf16.msra.mxu0 %v757_v29  ;;  %v256_v40 = vadd.f32 %v255_v35, %v918_v34  ;;  %v1025_v29 = vld [vmem:[%s866_s10 + $0xf0] sm:$0xff] }
  0x21   : > { %759 = vmatprep.subr.bf16.mxu0 %v797_v3 }
  0x22   : > { %v257_v42 = vadd.f32 %v256_v40, %v922_v37 }
  0x24   : > { %761 = vmatpush3.bf16.msra.mxu0 %v760_v36  ;;  %v258_v47 = vadd.f32 %v257_v42, %v933_v41 }
  0x25   : > { %762 = vmatprep.subr.bf16.mxu0 %v797_v3 }
  0x26   : > { %v259_v49 = vadd.f32 %v258_v47, %v937_v44  ;;  %v378_v47 = vld [vmem:[%s1200_s2 + $0x18] sm:$0xff] }
  0x28   : > { %764 = vmatpush3.bf16.msra.mxu0 %v763_v43  ;;  %v260_v52 = vadd.f32 %v259_v49, %v948_v48  ;;  %v772_v49 = vpack.c.bf16 %v378_v47, %v377_v46  ;;  %v507_v46 = vld [vmem:[%s1043_s13 + $0x60] sm:$0xff]  ;;  %v508_v47 = vld [vmem:[%s1043_s13 + $0x68] sm:$0xff] }
  0x29   : > { %765 = vmatprep.subr.bf16.mxu0 %v797_v3  ;;  %v985_v3 = vld [vmem:[%s866_s10 + $0xa0] sm:$0xff] }
  0x2a   : > { %v261_v54 = vadd.f32 %v260_v52, %v952_v51  ;;  %773 = vmatpush3.bf16.msra.mxu1 %v772_v49 }
  0x2c   : > { %767 = vmatpush3.bf16.msra.mxu0 %v766_v50  ;;  %v262_v56 = vadd.f32 %v261_v54, %v957_v53 }
  0x2e   : > { %v263_v58 = vadd.f32 %v262_v56, %v961_v55 }
  0x30   : > { %v264_v60 = vadd.f32 %v263_v58, %v965_v57 }
  0x32   : > { %v265_v62 = vadd.f32 %v264_v60, %v969_v59 }
  0x34   : > { %v266_v0 = vadd.f32 %v265_v62, %v973_v61 }
  0x36   : > { %v267_v2 = vadd.f32 %v266_v0, %v977_v63 }
  0x38   : > { %v268_v4 = vadd.f32 %v267_v2, %v981_v1  ;;  %v459_v2 = vlaneseq }
  0x3a   : > { %v269_v6 = vadd.f32 %v268_v4, %v985_v3  ;;  %v460_v4 = vshrl.u32 %v459_v2, 7  ;;  %v516_v2 = vld [vmem:[%s1043_s13 + $0xa8] sm:$0xff] }
  0x3c   : > { %v270_v8 = vadd.f32 %v269_v6, %v989_v5  ;;  %v461_v6 = vsub.s32 0, %v460_v4 }
  0x3e   : > { %v271_v10 = vadd.f32 %v270_v8, %v993_v7 }
  0x40   : > { %v272_v12 = vadd.f32 %v271_v10, %v997_v9 }
  0x42   : > { %v273_v17 = vadd.f32 %v272_v12, %v1001_v11 }
  0x44   : > { %v274_v19 = vadd.f32 %v273_v17, %v1005_v13 }
  0x46   : > { %v275_v22 = vadd.f32 %v274_v19, %v1009_v18 }
  0x48   : > { %v276_v25 = vadd.f32 %v275_v22, %v1013_v21 }
  0x4a   : > { %v277_v28 = vadd.f32 %v276_v25, %v1017_v24 }
  0x4c   : > { %v278_v31 = vadd.f32 %v277_v28, %v1021_v26 }
  0x4e   : > { %v279_v33 = vadd.f32 %v278_v31, %v1025_v29 }
  0x50   : > { %v280_v35 = vadd.f32 %v279_v33, %v1029_v32 }
  0x52   : > { %v281_v36 = vrot.slane %v280_v35, 4 }
  0x54   : > { %v282_v38 = vadd.f32 %v281_v36, %v280_v35  ;;  %v495_v35 = vld [vmem:[%s1043_s13] sm:$0xff]  ;;  %v498_v36 = vld [vmem:[%s1043_s13 + $0x18] sm:$0xff] }
  0x56   : > { %v283_v39 = vrot.slane %v282_v38, 2 }
  0x58   : > { %v284_v40 = vadd.f32 %v283_v39, %v282_v38  ;;  %v502_v39 = vld [vmem:[%s1043_s13 + $0x38] sm:$0xff] }
  0x5a   : > { %v285_v42 = vrot.slane %v284_v40, 1 }
  0x5c   : > { %v286_v43 = vadd.f32 %v285_v42, %v284_v40 }
  0x5e   : > { %v287_v45 = vmul.f32 0.00390625, %v286_v43  ;;  %v505_v43 = vld [vmem:[%s1043_s13 + $0x50] sm:$0xff] }
  0x60   : > { %731 = vmatmul.mubr.f32.vlgmr.msra.gmra.mrb[0].mxu0 %v287_v45 }
 0x133   : > { %v370_v50 = vpop.f32.mrb[0].mxu0 }
 0x134   : > { %v374_v52 = vmax.f32 %v370_v50, 0.0  ;;  %v732_v54 = vpop.f32.mrb[1].mxu0  ;;  %v511_v50 = vld [vmem:[%s1043_s13 + $0x80] sm:$0xff] }
 0x135   : > { %v512_v54 = vld [vmem:[%s1043_s13 + $0x88] sm:$0xff] }
 0x136   : > { %742 = vmatmul.mubr.msk.f32.vlgmr.msra.gmra.mrb[0].mxu1 %vm379_vm1, %v374_v52 }
 0x209   : > { %v449_v56 = vpop.f32.mrb[0].mxu1 }
 0x20a   : > { %v670_v58 = vmul.f32 -1.442695, %v449_v56  ;;  %v743_v60 = vpop.f32.mrb[1].mxu1  ;;  %v513_v56 = vld [vmem:[%s1043_s13 + $0x90] sm:$0xff] }
 0x20c   : > { %785 = vpow2.f32 %v670_v58  ;;  %v514_v58 = vld [vmem:[%s1043_s13 + $0x98] sm:$0xff] }
 0x216   : > { %v786_v62 = vpop.eup %785 }
 0x217   : > { %v456_v0 = vadd.f32 1.0, %v786_v62 }
 0x219   : > { %787 = vrcp.f32 %v456_v0 }
 0x223   : > { %v788_v8 = vpop.eup %787 }
 0x224   : > { %v462_v10 = vrot.slane %v788_v8, %v461_v6 }
 0x226   : > { %v463_v12 = vmul.f32 %v462_v10, %v869_v14  ;;  %v464_v17 = vmul.f32 %v462_v10, %v872_v15  ;;  %v465_v19 = vmul.f32 %v462_v10, %v875_v16  ;;  %v466_v22 = vmul.f32 %v462_v10, %v887_v20 }
 0x227   : > { %v467_v25 = vmul.f32 %v462_v10, %v892_v23  ;;  %v468_v28 = vmul.f32 %v462_v10, %v903_v27  ;;  %v469_v31 = vmul.f32 %v462_v10, %v907_v30  ;;  %v470_v33 = vmul.f32 %v462_v10, %v918_v34  ;;  %v496_v23 = vld [vmem:[%s1043_s13 + $0x8] sm:$0xff]  ;;  %v497_v27 = vld [vmem:[%s1043_s13 + $0x10] sm:$0xff] }
 0x228   : > { %v471_v14 = vmul.f32 %v462_v10, %v922_v37  ;;  %v472_v15 = vmul.f32 %v462_v10, %v933_v41  ;;  %v473_v16 = vmul.f32 %v462_v10, %v937_v44  ;;  %v474_v20 = vmul.f32 %v462_v10, %v948_v48  ;;  %v499_v41 = vld [vmem:[%s1043_s13 + $0x20] sm:$0xff]  ;;  %v500_v44 = vld [vmem:[%s1043_s13 + $0x28] sm:$0xff]  ;;  %v501_v48 = vld [vmem:[%s1043_s13 + $0x30] sm:$0xff] }
 0x229   : > { %v475_v30 = vmul.f32 %v462_v10, %v952_v51  ;;  %v476_v34 = vmul.f32 %v462_v10, %v957_v53  ;;  %v477_v38 = vmul.f32 %v462_v10, %v961_v55  ;;  %v478_v37 = vmul.f32 %v462_v10, %v965_v57  ;;  %v503_v55 = vld [vmem:[%s1043_s13 + $0x40] sm:$0xff]  ;;  %v504_v57 = vld [vmem:[%s1043_s13 + $0x48] sm:$0xff] }
 0x22a   : > { %v1070_v40 = vmul.f32 %v462_v10, %v969_v59  ;;  %v1073_v42 = vmul.f32 %v462_v10, %v973_v61  ;;  %v1076_v51 = vmul.f32 %v462_v10, %v977_v63  ;;  %v1079_v53 = vmul.f32 %v462_v10, %v981_v1  ;;  %v506_v1 = vld [vmem:[%s1043_s13 + $0x58] sm:$0xff] }
 0x22b   : > { %v1085_v45 = vmul.f32 %v462_v10, %v985_v3  ;;  %v1088_v59 = vmul.f32 %v462_v10, %v989_v5  ;;  %v1091_v61 = vmul.f32 %v462_v10, %v993_v7  ;;  %v1094_v63 = vmul.f32 %v462_v10, %v997_v9  ;;  %v509_v9 = vld [vmem:[%s1043_s13 + $0x70] sm:$0xff] }
 0x22c   : > { %v1100_v49 = vmul.f32 %v462_v10, %v1001_v11  ;;  %v1103_v3 = vmul.f32 %v462_v10, %v1005_v13  ;;  %v1106_v5 = vmul.f32 %v462_v10, %v1009_v18  ;;  %v1109_v7 = vmul.f32 %v462_v10, %v1013_v21  ;;  %v510_v11 = vld [vmem:[%s1043_s13 + $0x78] sm:$0xff] }
 0x22d   : > { %v1121_v13 = vmul.f32 %v462_v10, %v1017_v24  ;;  %v1124_v18 = vmul.f32 %v462_v10, %v1021_v26  ;;  %v1127_v21 = vmul.f32 %v462_v10, %v1025_v29  ;;  %v1130_v52 = vmul.f32 %v462_v10, %v1029_v32  ;;  %v515_v26 = vld [vmem:[%s1043_s13 + $0xa0] sm:$0xff]  ;;  %v517_v29 = vld [vmem:[%s1043_s13 + $0xb0] sm:$0xff]  ;;  %v518_v10 = vld [vmem:[%s1043_s13 + $0xb8] sm:$0xff] }
 0x22e   : > { %v527_v60 = vadd.f32 %v495_v35, %v463_v12  ;;  %v528_v62 = vadd.f32 %v496_v23, %v464_v17  ;;  %v529_v0 = vadd.f32 %v497_v27, %v465_v19  ;;  %v530_v24 = vadd.f32 %v498_v36, %v466_v22  ;;  %v520_v12 = vld [vmem:[%s1043_s13 + $0xc8] sm:$0xff]  ;;  %v525_v23 = vld [vmem:[%s1043_s13 + $0xf0] sm:$0xff]  ;;  %v526_v27 = vld [vmem:[%s1043_s13 + $0xf8] sm:$0xff] }
 0x22f   : > { %1203 = vst [vmem:[#allocation2_spill] sm:$0xff] %v1130_v52  ;;  %v531_v4 = vadd.f32 %v499_v41, %v467_v25  ;;  %v532_v32 = vadd.f32 %v500_v44, %v468_v28  ;;  %v533_v6 = vadd.f32 %v501_v48, %v469_v31  ;;  %v534_v8 = vadd.f32 %v502_v39, %v470_v33  ;;  %v519_v52 = vld [vmem:[%s1043_s13 + $0xc0] sm:$0xff]  ;;  %v521_v25 = vld [vmem:[%s1043_s13 + $0xd0] sm:$0xff]  ;;  %v522_v28 = vld [vmem:[%s1043_s13 + $0xd8] sm:$0xff] }
 0x230   : > { %v535_v17 = vadd.f32 %v503_v55, %v471_v14  ;;  %v536_v19 = vadd.f32 %v504_v57, %v472_v15  ;;  %v537_v22 = vadd.f32 %v505_v43, %v473_v16  ;;  %v538_v35 = vadd.f32 %v506_v1, %v474_v20  ;;  %559 = vst [vmem:[%s1115_s17] sm:$0xff] %v527_v60  ;;  %v523_v31 = vld [vmem:[%s1043_s13 + $0xe0] sm:$0xff]  ;;  %v524_v20 = vld [vmem:[%s1043_s13 + $0xe8] sm:$0xff] }
 0x231   : > { %560 = vst [vmem:[%s1115_s17 + $0x8] sm:$0xff] %v528_v62  ;;  %561 = vst [vmem:[%s1115_s17 + $0x10] sm:$0xff] %v529_v0  ;;  %v539_v33 = vadd.f32 %v507_v46, %v475_v30  ;;  %v540_v14 = vadd.f32 %v508_v47, %v476_v34  ;;  %v541_v15 = vadd.f32 %v509_v9, %v477_v38 }
 0x232   : > { %562 = vst [vmem:[%s1115_s17 + $0x18] sm:$0xff] %v530_v24  ;;  %v542_v16 = vadd.f32 %v510_v11, %v478_v37  ;;  %563 = vst [vmem:[%s1115_s17 + $0x20] sm:$0xff] %v531_v4  ;;  %v543_v36 = vadd.f32 %v511_v50, %v1070_v40  ;;  %v544_v30 = vadd.f32 %v512_v54, %v1073_v42 }
 0x233   : > { %564 = vst [vmem:[%s1115_s17 + $0x28] sm:$0xff] %v532_v32  ;;  %565 = vst [vmem:[%s1115_s17 + $0x30] sm:$0xff] %v533_v6  ;;  %v545_v34 = vadd.f32 %v513_v56, %v1076_v51  ;;  %v546_v38 = vadd.f32 %v514_v58, %v1079_v53  ;;  %v547_v37 = vadd.f32 %v515_v26, %v1085_v45 }
 0x234   : > { %566 = vst [vmem:[%s1115_s17 + $0x38] sm:$0xff] %v534_v8  ;;  %567 = vst [vmem:[%s1115_s17 + $0x40] sm:$0xff] %v535_v17  ;;  %v548_v41 = vadd.f32 %v516_v2, %v1088_v59  ;;  %v549_v44 = vadd.f32 %v517_v29, %v1091_v61  ;;  %v550_v48 = vadd.f32 %v518_v10, %v1094_v63 }
 0x235   : > { %568 = vst [vmem:[%s1115_s17 + $0x48] sm:$0xff] %v536_v19  ;;  %569 = vst [vmem:[%s1115_s17 + $0x50] sm:$0xff] %v537_v22  ;;  %v551_v39 = vadd.f32 %v519_v52, %v1100_v49  ;;  %v552_v40 = vadd.f32 %v520_v12, %v1103_v3  ;;  %v553_v42 = vadd.f32 %v521_v25, %v1106_v5 }
 0x236   : > { %570 = vst [vmem:[%s1115_s17 + $0x58] sm:$0xff] %v538_v35  ;;  %571 = vst [vmem:[%s1115_s17 + $0x60] sm:$0xff] %v539_v33  ;;  %v554_v51 = vadd.f32 %v522_v28, %v1109_v7  ;;  %v555_v53 = vadd.f32 %v523_v31, %v1121_v13  ;;  %v556_v55 = vadd.f32 %v524_v20, %v1124_v18  ;;  %v1204_v43 = vld [vmem:[#allocation2_spill] sm:$0xff] }
 0x237   : > { %572 = vst [vmem:[%s1115_s17 + $0x68] sm:$0xff] %v540_v14  ;;  %573 = vst [vmem:[%s1115_s17 + $0x70] sm:$0xff] %v541_v15  ;;  %v557_v57 = vadd.f32 %v525_v23, %v1127_v21  ;;  %v558_v45 = vadd.f32 %v526_v27, %v1204_v43 }
 0x238   : > { %574 = vst [vmem:[%s1115_s17 + $0x78] sm:$0xff] %v542_v16  ;;  %575 = vst [vmem:[%s1115_s17 + $0x80] sm:$0xff] %v543_v36 }
 0x239   : > { %576 = vst [vmem:[%s1115_s17 + $0x88] sm:$0xff] %v544_v30  ;;  %577 = vst [vmem:[%s1115_s17 + $0x90] sm:$0xff] %v545_v34 }
 0x23a   : > { %578 = vst [vmem:[%s1115_s17 + $0x98] sm:$0xff] %v546_v38  ;;  %579 = vst [vmem:[%s1115_s17 + $0xa0] sm:$0xff] %v547_v37 }
 0x23b   : > { %580 = vst [vmem:[%s1115_s17 + $0xa8] sm:$0xff] %v548_v41  ;;  %581 = vst [vmem:[%s1115_s17 + $0xb0] sm:$0xff] %v549_v44 }
 0x23c   : > { %582 = vst [vmem:[%s1115_s17 + $0xb8] sm:$0xff] %v550_v48  ;;  %583 = vst [vmem:[%s1115_s17 + $0xc0] sm:$0xff] %v551_v39 }
 0x23d   : > { %584 = vst [vmem:[%s1115_s17 + $0xc8] sm:$0xff] %v552_v40  ;;  %585 = vst [vmem:[%s1115_s17 + $0xd0] sm:$0xff] %v553_v42 }
 0x23e   : > { %586 = vst [vmem:[%s1115_s17 + $0xd8] sm:$0xff] %v554_v51  ;;  %587 = vst [vmem:[%s1115_s17 + $0xe0] sm:$0xff] %v555_v53 }
 0x23f   : > { %588 = vst [vmem:[%s1115_s17 + $0xe8] sm:$0xff] %v556_v55  ;;  %589 = vst [vmem:[%s1115_s17 + $0xf0] sm:$0xff] %v557_v57 }
 0x240   : > { %590 = vst [vmem:[%s1115_s17 + $0xf8] sm:$0xff] %v558_v45 }
 0x241 PF: > { %s14_s15 = sadd.s32 1, %s795_s15  }
 0x242   : > { %p11_p4 = scmp.ge.s32.totalorder %s14_s15, 4  }
 0x244   :  { %13 = sbr.rel (!%p11_p4) target bundleno = 1 (0x1), region = 69 }

// kernel: orsnet_forward.29
= control target key start
LH: loop header
LB: loop body
LE: loop exit
PB: predicated region body
PF: predicated region fallthrough
CT: control target
= control target key end

     0   :  { %s2435_s9 = smov 0   ;;  %s3959_s0 = inlined_call_operand.vmem [shape: f32[2,18,18,128], index: 0, kind: input, shape index: {}]   ;;  %s3960_s1 = inlined_call_operand.vmem [shape: f32[1152,128], index: 1, kind: input, shape index: {}]   ;;  %s3961_s2 = inlined_call_operand.vmem [shape: f32[2,16,16,128], index: 2, kind: output, shape index: {}]  }
   0x1 LB: > { %s1862_s10 = sadd.s32 4294967295, %s2417_s9   ;;  %p1866_p0 = scmp.ge.s32.totalorder %s2417_s9, 1  ;;  %s2417_s9 = sphi %s2435_s9, %s12_s9  }
   0x2   : > { %p112_p1 = scmp.lt.s32.totalorder %s2417_s9, 3 }
   0x4   : > { %p113_p2 = pnand %p1866_p0, %p112_p1 }
   0x6   : > { %116 = sbr.rel (%p113_p2) target bundleno = 581 (0x245), region = 28 }
   0xd   : > { %v506_v0 = vld [vmem:[%s3960_s1] sm:$0xff]  ;;  %v507_v1 = vld [vmem:[%s3960_s1 + $0x8] sm:$0xff]  ;;  %v3962_v3 = vmov 0.0|0.0   ;;  %v508_v6 = vld [vmem:[%s3960_s1 + $0x10] sm:$0xff]  ;;  %p134_p3 = scmp.lt.s32.totalorder %s1862_s10, 1  ;;  %vm246_vm0 = vcmask 1046528  }
   0xe   : > { %v538_v2 = vld [vmem:[%s3960_s1 + $0x100] sm:$0xff]  ;;  %2001 = vmatprep.subr.bf16.mxu1 %v3962_v3  ;;  %2049 = vmatprep.subr.bf16.mxu0 %v3962_v3  ;;  %v2002_v4 = vpack.c.bf16 %v507_v1, %v506_v0  ;;  %v539_v5 = vld [vmem:[%s3960_s1 + $0x108] sm:$0xff]  ;;  %v509_v7 = vld [vmem:[%s3960_s1 + $0x18] sm:$0xff]  ;;  %vm359_vm1 = vcmask 1045504  }
   0xf   : > { %v2050_v8 = vpack.c.bf16 %v539_v5, %v538_v2  ;;  %v540_v9 = vld [vmem:[%s3960_s1 + $0x110] sm:$0xff]  ;;  %v541_v10 = vld [vmem:[%s3960_s1 + $0x118] sm:$0xff]  ;;  %v2005_v11 = vpack.c.bf16 %v509_v7, %v508_v6  ;;  %v510_v13 = vld [vmem:[%s3960_s1 + $0x20] sm:$0xff]  ;;  %s4120_s10 = smov (!%p134_p3, %s1862_s10), 1 }
  0x10   : > { %2003 = vmatpush1.bf16.msra.mxu1 %v2002_v4  ;;  %v2053_v12 = vpack.c.bf16 %v541_v10, %v540_v9  ;;  %v511_v14 = vld [vmem:[%s3960_s1 + $0x28] sm:$0xff]  ;;  %v542_v15 = vld [vmem:[%s3960_s1 + $0x120] sm:$0xff]  ;;  %v512_v19 = vld [vmem:[%s3960_s1 + $0x30] sm:$0xff]  ;;  %s2393_s25 = smul.u32 432, %s4120_s10 }
  0x11   : > { %2051 = vmatpush1.bf16.msra.mxu0 %v2050_v8  ;;  %2004 = vmatprep.subr.bf16.mxu1 %v3962_v3  ;;  %v543_v16 = vld [vmem:[%s3960_s1 + $0x128] sm:$0xff]  ;;  %v2008_v17 = vpack.c.bf16 %v511_v14, %v510_v13  ;;  %v513_v20 = vld [vmem:[%s3960_s1 + $0x38] sm:$0xff]  ;;  %v544_v21 = vld [vmem:[%s3960_s1 + $0x130] sm:$0xff] }
  0x12   : > { %2052 = vmatprep.subr.bf16.mxu0 %v3962_v3  ;;  %v2056_v18 = vpack.c.bf16 %v543_v16, %v542_v15  ;;  %v545_v22 = vld [vmem:[%s3960_s1 + $0x138] sm:$0xff]  ;;  %v2011_v23 = vpack.c.bf16 %v513_v20, %v512_v19  ;;  %v514_v25 = vld [vmem:[%s3960_s1 + $0x40] sm:$0xff]  ;;  %v515_v26 = vld [vmem:[%s3960_s1 + $0x48] sm:$0xff]  ;;  %s2535_s8 = scalar_lea.vmem %s3959_s0, %s2393_s25 }
  0x13   : > { %v2059_v24 = vpack.c.bf16 %v545_v22, %v544_v21  ;;  %v546_v27 = vld [vmem:[%s3960_s1 + $0x140] sm:$0xff]  ;;  %v547_v28 = vld [vmem:[%s3960_s1 + $0x148] sm:$0xff]  ;;  %v2014_v29 = vpack.c.bf16 %v515_v26, %v514_v25  ;;  %v516_v31 = vld [vmem:[%s3960_s1 + $0x50] sm:$0xff] }
  0x14   : > { %2006 = vmatpush1.bf16.msra.mxu1 %v2005_v11  ;;  %v2062_v30 = vpack.c.bf16 %v547_v28, %v546_v27  ;;  %v517_v32 = vld [vmem:[%s3960_s1 + $0x58] sm:$0xff]  ;;  %v548_v33 = vld [vmem:[%s3960_s1 + $0x150] sm:$0xff]  ;;  %v518_v37 = vld [vmem:[%s3960_s1 + $0x60] sm:$0xff] }
  0x15   : > { %2054 = vmatpush1.bf16.msra.mxu0 %v2053_v12  ;;  %2007 = vmatprep.subr.bf16.mxu1 %v3962_v3  ;;  %v549_v34 = vld [vmem:[%s3960_s1 + $0x158] sm:$0xff]  ;;  %v2017_v35 = vpack.c.bf16 %v517_v32, %v516_v31  ;;  %v519_v38 = vld [vmem:[%s3960_s1 + $0x68] sm:$0xff]  ;;  %v550_v39 = vld [vmem:[%s3960_s1 + $0x160] sm:$0xff] }
  0x16   : > { %2055 = vmatprep.subr.bf16.mxu0 %v3962_v3  ;;  %v2065_v36 = vpack.c.bf16 %v549_v34, %v548_v33  ;;  %v551_v40 = vld [vmem:[%s3960_s1 + $0x168] sm:$0xff]  ;;  %v2552_v41 = vld [vmem:[%s2535_s8] sm:$0xff]  ;;  %v2560_v45 = vld [vmem:[%s2535_s8 + $0x18] sm:$0xff]  ;;  %v2020_v46 = vpack.c.bf16 %v519_v38, %v518_v37 }
  0x17   : > { %v2555_v42 = vld [vmem:[%s2535_s8 + $0x8] sm:$0xff]  ;;  %v247_v43 = vrot.slane %v2552_v41, 1  ;;  %939 = vmatprep.mubr.f32.mxu0 %v2560_v45  ;;  %v2068_v47 = vpack.c.bf16 %v551_v40, %v550_v39  ;;  %v520_v48 = vld [vmem:[%s3960_s1 + $0x70] sm:$0xff]  ;;  %v521_v49 = vld [vmem:[%s3960_s1 + $0x78] sm:$0xff] }
  0x18   : > { %2009 = vmatpush1.bf16.msra.mxu1 %v2008_v17  ;;  %v248_v44 = vrot.slane %v2555_v42, 1  ;;  %v552_v51 = vld [vmem:[%s3960_s1 + $0x170] sm:$0xff]  ;;  %v553_v52 = vld [vmem:[%s3960_s1 + $0x178] sm:$0xff]  ;;  %v2023_v53 = vpack.c.bf16 %v521_v49, %v520_v48  ;;  %v522_v55 = vld [vmem:[%s3960_s1 + $0x80] sm:$0xff] }
  0x19   : > { %2057 = vmatpush1.bf16.msra.mxu0 %v2056_v18  ;;  %2010 = vmatprep.subr.bf16.mxu1 %v3962_v3  ;;  %v2071_v54 = vpack.c.bf16 %v553_v52, %v552_v51  ;;  %v523_v56 = vld [vmem:[%s3960_s1 + $0x88] sm:$0xff]  ;;  %v554_v57 = vld [vmem:[%s3960_s1 + $0x180] sm:$0xff]  ;;  %v524_v61 = vld [vmem:[%s3960_s1 + $0x90] sm:$0xff] }
  0x1a   : > { %2058 = vmatprep.subr.bf16.mxu0 %v3962_v3  ;;  %v249_v50 = vsel %vm246_vm0, %v247_v43, %v248_v44  ;;  %v555_v58 = vld [vmem:[%s3960_s1 + $0x188] sm:$0xff]  ;;  %v2026_v59 = vpack.c.bf16 %v523_v56, %v522_v55  ;;  %v525_v62 = vld [vmem:[%s3960_s1 + $0x98] sm:$0xff]  ;;  %v556_v63 = vld [vmem:[%s3960_s1 + $0x190] sm:$0xff] }
  0x1b   : > { %714 = vmatprep.mubr.f32.mxu1 %v249_v50  ;;  %v2074_v60 = vpack.c.bf16 %v555_v58, %v554_v57  ;;  %v557_v0 = vld [vmem:[%s3960_s1 + $0x198] sm:$0xff]  ;;  %v2029_v1 = vpack.c.bf16 %v525_v62, %v524_v61  ;;  %v526_v4 = vld [vmem:[%s3960_s1 + $0xa0] sm:$0xff]  ;;  %v527_v5 = vld [vmem:[%s3960_s1 + $0xa8] sm:$0xff]  ;;  %v252_v57 = vrot.slane %v2560_v45, 1 }
  0x1c   : > { %2012 = vmatpush1.bf16.msra.mxu1 %v2011_v23  ;;  %v2077_v2 = vpack.c.bf16 %v557_v0, %v556_v63  ;;  %v558_v6 = vld [vmem:[%s3960_s1 + $0x1a0] sm:$0xff]  ;;  %v559_v7 = vld [vmem:[%s3960_s1 + $0x1a8] sm:$0xff]  ;;  %v2032_v8 = vpack.c.bf16 %v527_v5, %v526_v4  ;;  %v528_v10 = vld [vmem:[%s3960_s1 + $0xb0] sm:$0xff]  ;;  %v365_v0 = vrot.slane %v2560_v45, 2 }
  0x1d   : > { %2060 = vmatpush1.bf16.msra.mxu0 %v2059_v24  ;;  %2013 = vmatprep.subr.bf16.mxu1 %v3962_v3  ;;  %v2080_v9 = vpack.c.bf16 %v559_v7, %v558_v6  ;;  %v529_v11 = vld [vmem:[%s3960_s1 + $0xb8] sm:$0xff]  ;;  %v560_v12 = vld [vmem:[%s3960_s1 + $0x1b0] sm:$0xff]  ;;  %v530_v16 = vld [vmem:[%s3960_s1 + $0xc0] sm:$0xff] }
  0x1e   : > { %2061 = vmatprep.subr.bf16.mxu0 %v3962_v3  ;;  %v561_v13 = vld [vmem:[%s3960_s1 + $0x1b8] sm:$0xff]  ;;  %v2035_v14 = vpack.c.bf16 %v529_v11, %v528_v10  ;;  %v531_v17 = vld [vmem:[%s3960_s1 + $0xc8] sm:$0xff]  ;;  %v562_v18 = vld [vmem:[%s3960_s1 + $0x1c0] sm:$0xff] }
  0x1f   : > { %v2083_v15 = vpack.c.bf16 %v561_v13, %v560_v12  ;;  %v563_v19 = vld [vmem:[%s3960_s1 + $0x1c8] sm:$0xff]  ;;  %v2038_v20 = vpack.c.bf16 %v531_v17, %v530_v16  ;;  %v532_v22 = vld [vmem:[%s3960_s1 + $0xd0] sm:$0xff]  ;;  %v533_v23 = vld [vmem:[%s3960_s1 + $0xd8] sm:$0xff] }
  0x20   : > { %2015 = vmatpush1.bf16.msra.mxu1 %v2014_v29  ;;  %v2086_v21 = vpack.c.bf16 %v563_v19, %v562_v18  ;;  %v564_v24 = vld [vmem:[%s3960_s1 + $0x1d0] sm:$0xff]  ;;  %v565_v25 = vld [vmem:[%s3960_s1 + $0x1d8] sm:$0xff]  ;;  %v2041_v26 = vpack.c.bf16 %v533_v23, %v532_v22  ;;  %v534_v28 = vld [vmem:[%s3960_s1 + $0xe0] sm:$0xff] }
  0x21   : > { %2063 = vmatpush1.bf16.msra.mxu0 %v2062_v30  ;;  %2016 = vmatprep.subr.bf16.mxu1 %v3962_v3  ;;  %v2089_v27 = vpack.c.bf16 %v565_v25, %v564_v24  ;;  %v535_v29 = vld [vmem:[%s3960_s1 + $0xe8] sm:$0xff]  ;;  %v566_v30 = vld [vmem:[%s3960_s1 + $0x1e0] sm:$0xff]  ;;  %v536_v34 = vld [vmem:[%s3960_s1 + $0xf0] sm:$0xff] }
  0x22   : > { %2064 = vmatprep.subr.bf16.mxu0 %v3962_v3  ;;  %v567_v31 = vld [vmem:[%s3960_s1 + $0x1e8] sm:$0xff]  ;;  %v2044_v32 = vpack.c.bf16 %v535_v29, %v534_v28  ;;  %v569_v37 = vld [vmem:[%s3960_s1 + $0x1f8] sm:$0xff]  ;;  %v146_v38 = vld [vmem:[%s2535_s8 + $0x10] sm:$0x3] }
  0x23   : > { %v2092_v33 = vpack.c.bf16 %v567_v31, %v566_v30  ;;  %v570_v40 = vld [vmem:[%s3960_s1 + $0x200] sm:$0xff]  ;;  %v571_v48 = vld [vmem:[%s3960_s1 + $0x208] sm:$0xff]  ;;  %v250_v51 = vrot.slane %v146_v38, 1  ;;  %v363_v56 = vrot.slane %v146_v38, 2  ;;  %v573_v61 = vld [vmem:[%s3960_s1 + $0x218] sm:$0xff] }
  0x24   : > { %2018 = vmatpush1.bf16.msra.mxu1 %v2017_v35  ;;  %v537_v35 = vld [vmem:[%s3960_s1 + $0xf8] sm:$0xff]  ;;  %v602_v49 = vld [vmem:[%s3960_s1 + $0x300] sm:$0xff]  ;;  %v603_v50 = vld [vmem:[%s3960_s1 + $0x308] sm:$0xff] }
  0x25   : > { %2066 = vmatpush1.bf16.msra.mxu0 %v2065_v36  ;;  %2019 = vmatprep.subr.bf16.mxu1 %v3962_v3  ;;  %v568_v36 = vld [vmem:[%s3960_s1 + $0x1f0] sm:$0xff]  ;;  %v2047_v39 = vpack.c.bf16 %v537_v35, %v536_v34  ;;  %v2710_v52 = vld [vmem:[%s2535_s8 + $0x20] sm:$0xff]  ;;  %v149_v62 = vld [vmem:[%s2535_s8 + $0x28] sm:$0x3] }
  0x26   : > { %2067 = vmatprep.subr.bf16.mxu0 %v3962_v3  ;;  %v2095_v43 = vpack.c.bf16 %v569_v37, %v568_v36  ;;  %v253_v58 = vrot.slane %v2710_v52, 1  ;;  %v604_v63 = vld [vmem:[%s3960_s1 + $0x310] sm:$0xff]  ;;  %v255_v6 = vrot.slane %v149_v62, 1  ;;  %v575_v10 = vld [vmem:[%s3960_s1 + $0x228] sm:$0xff]  ;;  %v606_v11 = vld [vmem:[%s3960_s1 + $0x320] sm:$0xff] }
  0x27   : > { %v2744_v4 = vld [vmem:[%s2535_s8 + $0x30] sm:$0xff]  ;;  %v607_v12 = vld [vmem:[%s3960_s1 + $0x328] sm:$0xff]  ;;  %v152_v19 = vld [vmem:[%s2535_s8 + $0x40] sm:$0x3] }
  0x28   : > { %2021 = vmatpush1.bf16.msra.mxu1 %v2020_v46  ;;  %v360_v46 = vrot.slane %v2552_v41, 2  ;;  %v2779_v18 = vpack.c.bf16 %v607_v12, %v606_v11  ;;  %v608_v22 = vld [vmem:[%s3960_s1 + $0x330] sm:$0xff]  ;;  %v609_v23 = vld [vmem:[%s3960_s1 + $0x338] sm:$0xff]  ;;  %v370_v24 = vrot.slane %v2744_v4, 2  ;;  %v260_v28 = vrot.slane %v152_v19, 1  ;;  %v610_v34 = vld [vmem:[%s3960_s1 + $0x340] sm:$0xff] }
  0x29   : > { %2069 = vmatpush1.bf16.msra.mxu0 %v2068_v47  ;;  %2022 = vmatprep.subr.bf16.mxu1 %v3962_v3  ;;  %v361_v47 = vrot.slane %v2555_v42, 2  ;;  %v2812_v30 = vld [vmem:[%s2535_s8 + $0x50] sm:$0xff]  ;;  %v2815_v31 = vpack.c.bf16 %v609_v23, %v608_v22  ;;  %v611_v35 = vld [vmem:[%s3960_s1 + $0x348] sm:$0xff]  ;;  %v373_v37 = vrot.slane %v152_v19, 2  ;;  %v585_v12 = vld [vmem:[%s3960_s1 + $0x278] sm:$0xff] }
  0x2a   : > { %2070 = vmatprep.subr.bf16.mxu0 %v3962_v3  ;;  %v584_v11 = vld [vmem:[%s3960_s1 + $0x270] sm:$0xff] }
  0x2b   : > { %v362_v55 = vsel %vm359_vm1, %v360_v46, %v361_v47  ;;  %v155_v46 = vld [vmem:[%s2535_s8 + $0x58] sm:$0x3]  ;;  %v2119_v23 = vpack.c.bf16 %v585_v12, %v584_v11 }
  0x2c   : > { %2024 = vmatpush1.bf16.msra.mxu1 %v2023_v53  ;;  %v2098_v53 = vpack.c.bf16 %v571_v48, %v570_v40  ;;  %v263_v40 = vrot.slane %v2812_v30, 1  ;;  %v580_v48 = vld [vmem:[%s3960_s1 + $0x250] sm:$0xff] }
  0x2d   : > { %2072 = vmatpush1.bf16.msra.mxu0 %v2071_v54  ;;  %2025 = vmatprep.subr.bf16.mxu1 %v3962_v3  ;;  %v2712_v54 = vpack.c.bf16 %v603_v50, %v602_v49  ;;  %v581_v49 = vld [vmem:[%s3960_s1 + $0x258] sm:$0xff]  ;;  %v612_v50 = vld [vmem:[%s3960_s1 + $0x350] sm:$0xff] }
  0x2e   : > { %2073 = vmatprep.subr.bf16.mxu0 %v3962_v3 }
  0x30   : > { %2027 = vmatpush1.bf16.msra.mxu1 %v2026_v59  ;;  %v251_v59 = vsel %vm246_vm0, %v248_v44, %v250_v51  ;;  %v605_v44 = vld [vmem:[%s3960_s1 + $0x318] sm:$0xff] }
  0x31   : > { %2075 = vmatpush1.bf16.msra.mxu0 %v2074_v60  ;;  %2028 = vmatprep.subr.bf16.mxu1 %v3962_v3  ;;  %v572_v60 = vld [vmem:[%s3960_s1 + $0x210] sm:$0xff]  ;;  %v2748_v7 = vpack.c.bf16 %v605_v44, %v604_v63  ;;  %v613_v51 = vld [vmem:[%s3960_s1 + $0x358] sm:$0xff]  ;;  %v583_v63 = vld [vmem:[%s3960_s1 + $0x268] sm:$0xff] }
  0x32   : > { %2076 = vmatprep.subr.bf16.mxu0 %v3962_v3  ;;  %v2101_v5 = vpack.c.bf16 %v573_v61, %v572_v60  ;;  %v2876_v60 = vld [vmem:[%s2535_s8 + $0x68] sm:$0xff]  ;;  %v2880_v61 = vpack.c.bf16 %v613_v51, %v612_v50  ;;  %v614_v44 = vld [vmem:[%s3960_s1 + $0x360] sm:$0xff]  ;;  %v621_v50 = vld [vmem:[%s3960_s1 + $0x398] sm:$0xff] }
  0x34   : > { %2030 = vmatpush1.bf16.msra.mxu1 %v2029_v1  ;;  %v366_v1 = vrot.slane %v2710_v52, 2 }
  0x35   : > { %2078 = vmatpush1.bf16.msra.mxu0 %v2077_v2  ;;  %2031 = vmatprep.subr.bf16.mxu1 %v3962_v3  ;;  %v2741_v2 = vsel %vm246_vm0, %v252_v57, %v253_v58  ;;  %v2873_v57 = vld [vmem:[%s2535_s8 + $0x60] sm:$0xff] }
  0x36   : > { %2079 = vmatprep.subr.bf16.mxu0 %v3962_v3  ;;  %v2769_v13 = vsel %vm359_vm1, %v365_v0, %v366_v1  ;;  %v615_v0 = vld [vmem:[%s3960_s1 + $0x368] sm:$0xff] }
  0x38   : > { %2033 = vmatpush1.bf16.msra.mxu1 %v2032_v8  ;;  %v2751_v8 = vld [vmem:[%s2535_s8 + $0x38] sm:$0xff] }
  0x39   : > { %2081 = vmatpush1.bf16.msra.mxu0 %v2080_v9  ;;  %2034 = vmatprep.subr.bf16.mxu1 %v3962_v3  ;;  %v574_v9 = vld [vmem:[%s3960_s1 + $0x220] sm:$0xff]  ;;  %v258_v16 = vrot.slane %v2751_v8, 1  ;;  %v371_v25 = vrot.slane %v2751_v8, 2 }
  0x3a   : > { %2082 = vmatprep.subr.bf16.mxu0 %v3962_v3  ;;  %v2104_v17 = vpack.c.bf16 %v575_v10, %v574_v9  ;;  %v158_v9 = vld [vmem:[%s2535_s8 + $0x70] sm:$0x3]  ;;  %v2910_v10 = vpack.c.bf16 %v615_v0, %v614_v44  ;;  %v590_v0 = vld [vmem:[%s3960_s1 + $0x2a0] sm:$0xff] }
  0x3b   : > { %v2834_v36 = vsel %vm359_vm1, %v370_v24, %v371_v25  ;;  %v2838_v38 = vsel %vm246_vm0, %v258_v16, %v260_v28  ;;  %v270_v22 = vrot.slane %v158_v9, 1  ;;  %v2941_v24 = vld [vmem:[%s2535_s8 + $0x80] sm:$0xff]  ;;  %v587_v28 = vld [vmem:[%s3960_s1 + $0x288] sm:$0xff] }
  0x3c   : > { %2036 = vmatpush1.bf16.msra.mxu1 %v2035_v14  ;;  %v368_v14 = vrot.slane %v149_v62, 2  ;;  %v582_v62 = vld [vmem:[%s3960_s1 + $0x260] sm:$0xff] }
  0x3d   : > { %2084 = vmatpush1.bf16.msra.mxu0 %v2083_v15  ;;  %2037 = vmatprep.subr.bf16.mxu1 %v3962_v3  ;;  %v257_v15 = vrot.slane %v2744_v4, 1 }
  0x3e   : > { %2085 = vmatprep.subr.bf16.mxu0 %v3962_v3 }
  0x40   : > { %2039 = vmatpush1.bf16.msra.mxu1 %v2038_v20  ;;  %v576_v20 = vld [vmem:[%s3960_s1 + $0x230] sm:$0xff] }
  0x41   : > { %2087 = vmatpush1.bf16.msra.mxu0 %v2086_v21  ;;  %2040 = vmatprep.subr.bf16.mxu1 %v3962_v3  ;;  %v577_v21 = vld [vmem:[%s3960_s1 + $0x238] sm:$0xff] }
  0x42   : > { %2088 = vmatprep.subr.bf16.mxu0 %v3962_v3  ;;  %v2107_v29 = vpack.c.bf16 %v577_v21, %v576_v20  ;;  %v2937_v20 = vld [vmem:[%s2535_s8 + $0x78] sm:$0xff]  ;;  %v381_v21 = vrot.slane %v2876_v60, 2 }
  0x43   : > { %v385_v51 = vrot.slane %v2937_v20, 2 }
  0x44   : > { %2042 = vmatpush1.bf16.msra.mxu1 %v2041_v26  ;;  %v2805_v26 = vsel %vm246_vm0, %v257_v15, %v258_v16  ;;  %v617_v15 = vld [vmem:[%s3960_s1 + $0x378] sm:$0xff] }
  0x45   : > { %2090 = vmatpush1.bf16.msra.mxu0 %v2089_v27  ;;  %2043 = vmatprep.subr.bf16.mxu1 %v3962_v3  ;;  %v2808_v27 = vld [vmem:[%s2535_s8 + $0x48] sm:$0xff] }
  0x46   : > { %2091 = vmatprep.subr.bf16.mxu0 %v3962_v3 }
  0x48   : > { %2045 = vmatpush1.bf16.msra.mxu1 %v2044_v32  ;;  %v578_v32 = vld [vmem:[%s3960_s1 + $0x240] sm:$0xff] }
  0x49   : > { %2093 = vmatpush1.bf16.msra.mxu0 %v2092_v33  ;;  %2046 = vmatprep.subr.bf16.mxu1 %v3962_v3  ;;  %v579_v33 = vld [vmem:[%s3960_s1 + $0x248] sm:$0xff] }
  0x4a   : > { %2094 = vmatprep.subr.bf16.mxu0 %v3962_v3 }
  0x4c   : > { %2048 = vmatpush1.bf16.msra.mxu1 %v2047_v39  ;;  %v262_v39 = vrot.slane %v2808_v27, 1 }
  0x4d   : > { %2096 = vmatpush1.bf16.msra.mxu0 %v2095_v43  ;;  %2225 = vmatprep.subr.bf16.mxu1 %v3962_v3  ;;  %v2110_v43 = vpack.c.bf16 %v579_v33, %v578_v32  ;;  %v619_v32 = vld [vmem:[%s3960_s1 + $0x388] sm:$0xff]  ;;  %v383_v33 = vrot.slane %v158_v9, 2 }
  0x4e   : > { %2097 = vmatprep.subr.bf16.mxu0 %v3962_v3 }
  0x4f   : > { %715 = vmatmul.mubr.f32.vlgmr.msra.gmra.mrb[0].mxu1 %v2552_v41  ;;  %v364_v41 = vsel %vm359_vm1, %v361_v47, %v363_v56  ;;  %v2845_v47 = vpack.c.bf16 %v611_v35, %v610_v34  ;;  %v2870_v56 = vsel %vm246_vm0, %v262_v39, %v263_v40  ;;  %v272_v34 = vrot.slane %v2937_v20, 1 }
  0x50   : > { %940 = vmatmul.mubr.f32.vlgmr.msra.gmra.mrb[0].mxu0 %v362_v55  ;;  %2241 = vmatpush1.bf16.msra.mxu1 %v2712_v54  ;;  %v2867_v55 = vsel %vm359_vm1, %v371_v25, %v373_v37  ;;  %v273_v37 = vrot.slane %v2941_v24, 1 }
  0x51   : > { %2099 = vmatpush1.bf16.msra.mxu0 %v2098_v53  ;;  %719 = vmatprep.mubr.f32.mxu1 %v251_v59  ;;  %v376_v53 = vrot.slane %v2812_v30, 2  ;;  %v2113_v59 = vpack.c.bf16 %v581_v49, %v580_v48  ;;  %v589_v48 = vld [vmem:[%s3960_s1 + $0x298] sm:$0xff]  ;;  %v620_v49 = vld [vmem:[%s3960_s1 + $0x390] sm:$0xff] }
  0x52   : > { %944 = vmatprep.mubr.f32.mxu0 %v2710_v52  ;;  %2100 = vmatprep.subr.bf16.mxu0 %v3962_v3  ;;  %v3010_v44 = vpack.c.bf16 %v621_v50, %v620_v49  ;;  %v626_v49 = vld [vmem:[%s3960_s1 + $0x3c0] sm:$0xff]  ;;  %v627_v50 = vld [vmem:[%s3960_s1 + $0x3c8] sm:$0xff] }
  0x53   : > { %720 = vmatmul.mubr.f32.gmra.mrb[2].mxu1 %v2555_v42  ;;  %2226 = vmatprep.subr.bf16.mxu1 %v3962_v3  ;;  %v2773_v42 = vsel %vm246_vm0, %v253_v58, %v255_v6  ;;  %v265_v58 = vrot.slane %v155_v46, 1  ;;  %v268_v6 = vrot.slane %v2876_v60, 1 }
  0x54   : > { %945 = vmatmul.mubr.f32.gmra.mrb[2].mxu0 %v364_v41  ;;  %724 = vmatprep.mubr.f32.mxu1 %v2741_v2  ;;  %v378_v41 = vrot.slane %v155_v46, 2  ;;  %v588_v46 = vld [vmem:[%s3960_s1 + $0x290] sm:$0xff]  ;;  %4035 = vst [vmem:[#allocation3_spill] sm:$0xff] %v3010_v44 }
  0x55   : > { %949 = vmatprep.mubr.f32.mxu0 %v2744_v4  ;;  %2102 = vmatpush1.bf16.msra.mxu0 %v2101_v5  ;;  %v267_v5 = vrot.slane %v2873_v57, 1  ;;  %v2969_v35 = vsel %vm246_vm0, %v268_v6, %v270_v22  ;;  %v593_v22 = vld [vmem:[%s3960_s1 + $0x2b8] sm:$0xff] }
  0x56   : > { %2242 = vmatpush1.bf16.msra.mxu1 %v2748_v7  ;;  %2103 = vmatprep.subr.bf16.mxu0 %v3962_v3  ;;  %v2929_v16 = vsel %vm359_vm1, %v376_v53, %v378_v41  ;;  %v591_v41 = vld [vmem:[%s3960_s1 + $0x2a8] sm:$0xff] }
  0x57   : > { %725 = vmatmul.mubr.f32.gmra.mrb[4].mxu1 %v2560_v45  ;;  %2227 = vmatprep.subr.bf16.mxu1 %v3962_v3  ;;  %v2802_v45 = vsel %vm359_vm1, %v366_v1, %v368_v14  ;;  %v616_v14 = vld [vmem:[%s3960_s1 + $0x370] sm:$0xff]  ;;  %v2934_v19 = vsel %vm246_vm0, %v267_v5, %v268_v6  ;;  %v622_v5 = vld [vmem:[%s3960_s1 + $0x3a0] sm:$0xff]  ;;  %v623_v6 = vld [vmem:[%s3960_s1 + $0x3a8] sm:$0xff] }
  0x58   : > { %950 = vmatmul.mubr.f32.gmra.mrb[4].mxu0 %v2769_v13  ;;  %729 = vmatprep.mubr.f32.mxu1 %v2773_v42  ;;  %v2945_v25 = vpack.c.bf16 %v617_v15, %v616_v14  ;;  %v2128_v14 = vpack.c.bf16 %v591_v41, %v590_v0  ;;  %v164_v15 = vld [vmem:[%s2535_s8 + $0xa0] sm:$0x3]  ;;  %v167_v41 = vld [vmem:[%s2535_s8 + $0xb8] sm:$0x3] }
  0x59   : > { %954 = vmatprep.mubr.f32.mxu0 %v2751_v8  ;;  %2105 = vmatpush1.bf16.msra.mxu0 %v2104_v17  ;;  %v380_v17 = vrot.slane %v2873_v57, 2 }
  0x5a   : > { %2243 = vmatpush1.bf16.msra.mxu1 %v2779_v18  ;;  %2106 = vmatprep.subr.bf16.mxu0 %v3962_v3 }
  0x5b   : > { %730 = vmatmul.mubr.f32.gmra.mrb[6].mxu1 %v2710_v52  ;;  %2228 = vmatprep.subr.bf16.mxu1 %v3962_v3  ;;  %v375_v52 = vrot.slane %v2808_v27, 2 }
  0x5c   : > { %955 = vmatmul.mubr.f32.gmra.mrb[6].mxu0 %v2802_v45  ;;  %734 = vmatprep.mubr.f32.mxu1 %v2805_v26 }
  0x5d   : > { %959 = vmatprep.mubr.f32.mxu0 %v2808_v27  ;;  %2108 = vmatpush1.bf16.msra.mxu0 %v2107_v29  ;;  %v2899_v1 = vsel %vm359_vm1, %v375_v52, %v376_v53  ;;  %v618_v29 = vld [vmem:[%s3960_s1 + $0x380] sm:$0xff]  ;;  %v386_v52 = vrot.slane %v2941_v24, 2  ;;  %v2997_v53 = vsel %vm359_vm1, %v381_v21, %v383_v33  ;;  %v3068_v33 = vld [vmem:[%s2535_s8 + $0xa8] sm:$0xff] }
  0x5e   : > { %2244 = vmatpush1.bf16.msra.mxu1 %v2815_v31  ;;  %2109 = vmatprep.subr.bf16.mxu0 %v3962_v3 }
  0x5f   : > { %735 = vmatmul.mubr.f32.gmra.mrb[8].mxu1 %v2744_v4  ;;  %2229 = vmatprep.subr.bf16.mxu1 %v3962_v3  ;;  %v2903_v4 = vsel %vm246_vm0, %v263_v40, %v265_v58  ;;  %v161_v40 = vld [vmem:[%s2535_s8 + $0x88] sm:$0x3]  ;;  %v3003_v58 = vld [vmem:[%s2535_s8 + $0x90] sm:$0xff] }
  0x60   : > { %960 = vmatmul.mubr.f32.gmra.mrb[8].mxu0 %v2834_v36  ;;  %739 = vmatprep.mubr.f32.mxu1 %v2838_v38  ;;  %v388_v9 = vrot.slane %v161_v40, 2  ;;  %v277_v11 = vrot.slane %v3003_v58, 1 }
  0x61   : > { %964 = vmatprep.mubr.f32.mxu0 %v2812_v30  ;;  %2111 = vmatpush1.bf16.msra.mxu0 %v2110_v43  ;;  %v2975_v43 = vpack.c.bf16 %v619_v32, %v618_v29 }
  0x62   : > { %2245 = vmatpush1.bf16.msra.mxu1 %v2845_v47  ;;  %2112 = vmatprep.subr.bf16.mxu0 %v3962_v3 }
  0x63   : > { %740 = vmatmul.mubr.f32.gmra.mrb[10].mxu1 %v2751_v8  ;;  %2230 = vmatprep.subr.bf16.mxu1 %v3962_v3  ;;  %v2116_v8 = vpack.c.bf16 %v583_v63, %v582_v62  ;;  %4034 = vst [vmem:[#allocation2_spill] sm:$0xff] %v2975_v43  ;;  %v2125_v62 = vpack.c.bf16 %v589_v48, %v588_v46  ;;  %v3006_v63 = vld [vmem:[%s2535_s8 + $0x98] sm:$0xff]  ;;  %v594_v46 = vld [vmem:[%s3960_s1 + $0x2c0] sm:$0xff]  ;;  %v595_v48 = vld [vmem:[%s3960_s1 + $0x2c8] sm:$0xff] }
  0x64   : > { %965 = vmatmul.mubr.f32.gmra.mrb[10].mxu0 %v2867_v55  ;;  %744 = vmatprep.mubr.f32.mxu1 %v2870_v56  ;;  %v278_v12 = vrot.slane %v3006_v63, 1  ;;  %v391_v29 = vrot.slane %v3006_v63, 2  ;;  %v2134_v0 = vpack.c.bf16 %v595_v48, %v594_v46  ;;  %v599_v46 = vld [vmem:[%s3960_s1 + $0x2e8] sm:$0xff]  ;;  %v630_v48 = vld [vmem:[%s3960_s1 + $0x3e0] sm:$0xff] }
  0x65   : > { %969 = vmatprep.mubr.f32.mxu0 %v2873_v57  ;;  %2114 = vmatpush1.bf16.msra.mxu0 %v2113_v59  ;;  %v275_v59 = vrot.slane %v161_v40, 1 }
  0x66   : > { %2246 = vmatpush1.bf16.msra.mxu1 %v2880_v61  ;;  %2115 = vmatprep.subr.bf16.mxu0 %v3962_v3  ;;  %v3065_v32 = vsel %vm246_vm0, %v277_v11, %v278_v12  ;;  %v628_v11 = vld [vmem:[%s3960_s1 + $0x3d0] sm:$0xff] }
  0x67   : > { %745 = vmatmul.mubr.f32.gmra.mrb[12].mxu1 %v2808_v27  ;;  %2231 = vmatprep.subr.bf16.mxu1 %v3962_v3  ;;  %v586_v27 = vld [vmem:[%s3960_s1 + $0x280] sm:$0xff] }
  0x68   : > { %970 = vmatmul.mubr.f32.gmra.mrb[12].mxu0 %v2899_v1  ;;  %749 = vmatprep.mubr.f32.mxu1 %v2903_v4  ;;  %v2122_v39 = vpack.c.bf16 %v587_v28, %v586_v27  ;;  %v625_v27 = vld [vmem:[%s3960_s1 + $0x3b8] sm:$0xff]  ;;  %v390_v28 = vrot.slane %v3003_v58, 2 }
  0x69   : > { %974 = vmatprep.mubr.f32.mxu0 %v2876_v60  ;;  %2117 = vmatpush1.bf16.msra.mxu0 %v2116_v8  ;;  %v3029_v8 = vsel %vm359_vm1, %v385_v51, %v386_v52 }
  0x6a   : > { %2247 = vmatpush1.bf16.msra.mxu1 %v2910_v10  ;;  %2118 = vmatprep.subr.bf16.mxu0 %v3962_v3  ;;  %v3094_v51 = vsel %vm359_vm1, %v390_v28, %v391_v29 }
  0x6b   : > { %750 = vmatmul.mubr.f32.gmra.mrb[14].mxu1 %v2812_v30  ;;  %2232 = vmatprep.subr.bf16.mxu1 %v3962_v3  ;;  %v2966_v30 = vsel %vm359_vm1, %v380_v17, %v381_v21  ;;  %v3040_v17 = vpack.c.bf16 %v623_v6, %v622_v5  ;;  %v592_v21 = vld [vmem:[%s3960_s1 + $0x2b0] sm:$0xff]  ;;  %4040 = vst [vmem:[#allocation8_spill] sm:$0xff] %v3094_v51 }
  0x6c   : > { %975 = vmatmul.mubr.f32.gmra.mrb[14].mxu0 %v2929_v16  ;;  %754 = vmatprep.mubr.f32.mxu1 %v2934_v19  ;;  %v3105_v5 = vpack.c.bf16 %v627_v50, %v626_v49  ;;  %v596_v6 = vld [vmem:[%s3960_s1 + $0x2d0] sm:$0xff]  ;;  %v631_v49 = vld [vmem:[%s3960_s1 + $0x3e8] sm:$0xff] }
  0x6d   : > { %979 = vmatprep.mubr.f32.mxu0 %v2937_v20  ;;  %2120 = vmatpush1.bf16.msra.mxu0 %v2119_v23  ;;  %4037 = vst [vmem:[#allocation5_spill] sm:$0xff] %v3040_v17  ;;  %v624_v23 = vld [vmem:[%s3960_s1 + $0x3b0] sm:$0xff] }
  0x6e   : > { %2248 = vmatpush1.bf16.msra.mxu1 %v2945_v25  ;;  %2121 = vmatprep.subr.bf16.mxu0 %v3962_v3  ;;  %v3075_v40 = vpack.c.bf16 %v625_v27, %v624_v23  ;;  %4041 = vst [vmem:[#allocation9_spill] sm:$0xff] %v3105_v5  ;;  %v3133_v23 = vld [vmem:[%s2535_s8 + $0xc0] sm:$0xff]  ;;  %v285_v27 = vrot.slane %v167_v41, 1 }
  0x6f   : > { %755 = vmatmul.mubr.f32.gmra.mrb[16].mxu1 %v2873_v57  ;;  %2233 = vmatprep.subr.bf16.mxu1 %v3962_v3  ;;  %v3000_v57 = vsel %vm246_vm0, %v272_v34, %v273_v37  ;;  %v280_v34 = vrot.slane %v164_v15, 1 }
  0x70   : > { %980 = vmatmul.mubr.f32.gmra.mrb[16].mxu0 %v2966_v30  ;;  %759 = vmatprep.mubr.f32.mxu1 %v2969_v35  ;;  %4039 = vst [vmem:[#allocation7_spill] sm:$0xff] %v3075_v40 }
  0x71   : > { %984 = vmatprep.mubr.f32.mxu0 %v2941_v24  ;;  %2123 = vmatpush1.bf16.msra.mxu0 %v2122_v39  ;;  %v3071_v39 = vld [vmem:[%s2535_s8 + $0xb0] sm:$0xff] }
  0x72   : > { %2249 = vmatpush1.bf16.msra.mxu1 %v2975_v43  ;;  %2124 = vmatprep.subr.bf16.mxu0 %v3962_v3  ;;  %v3310_v43 = vld [vmem:[%s2535_s8 + $0x128] sm:$0xff] }
  0x73   : > { %760 = vmatmul.mubr.f32.gmra.mrb[18].mxu1 %v2876_v60  ;;  %2234 = vmatprep.subr.bf16.mxu1 %v3962_v3  ;;  %v3033_v60 = vsel %vm246_vm0, %v273_v37, %v275_v59  ;;  %v2131_v37 = vpack.c.bf16 %v593_v22, %v592_v21  ;;  %v282_v59 = vrot.slane %v3068_v33, 1  ;;  %4061 = vst [vmem:[#allocation28_spill] sm:$0xff] %v3310_v43 }
  0x74   : > { %985 = vmatmul.mubr.f32.gmra.mrb[18].mxu0 %v2997_v53  ;;  %764 = vmatprep.mubr.f32.mxu1 %v3000_v57  ;;  %4036 = vst [vmem:[#allocation4_spill] sm:$0xff] %v3033_v60 }
  0x75   : > { %989 = vmatprep.mubr.f32.mxu0 %v3003_v58  ;;  %2126 = vmatpush1.bf16.msra.mxu0 %v2125_v62  ;;  %v283_v62 = vrot.slane %v3071_v39, 1 }
  0x76   : > { %2250 = vmatpush1.bf16.msra.mxu1 %v3010_v44  ;;  %2127 = vmatprep.subr.bf16.mxu0 %v3962_v3 }
  0x77   : > { %765 = vmatmul.mubr.f32.gmra.mrb[20].mxu1 %v2937_v20  ;;  %2235 = vmatprep.subr.bf16.mxu1 %v3962_v3  ;;  %v3062_v20 = vsel %vm359_vm1, %v386_v52, %v388_v9  ;;  %v393_v52 = vrot.slane %v164_v15, 2  ;;  %v597_v9 = vld [vmem:[%s3960_s1 + $0x2d8] sm:$0xff]  ;;  %v396_v15 = vrot.slane %v3071_v39, 2  ;;  %v3130_v22 = vsel %vm246_vm0, %v282_v59, %v283_v62 }
  0x78   : > { %990 = vmatmul.mubr.f32.gmra.mrb[20].mxu0 %v3029_v8  ;;  %769 = vmatprep.mubr.f32.mxu1 %v3033_v60  ;;  %4038 = vst [vmem:[#allocation6_spill] sm:$0xff] %v3062_v20  ;;  %v2137_v28 = vpack.c.bf16 %v597_v9, %v596_v6  ;;  %v3163_v59 = vsel %vm246_vm0, %v283_v62, %v285_v27  ;;  %v601_v62 = vld [vmem:[%s3960_s1 + $0x2f8] sm:$0xff]  ;;  %v3307_v60 = vld [vmem:[%s2535_s8 + $0x120] sm:$0xff] }
  0x79   : > { %994 = vmatprep.mubr.f32.mxu0 %v3006_v63  ;;  %2129 = vmatpush1.bf16.msra.mxu0 %v2128_v14  ;;  %v395_v14 = vrot.slane %v3068_v33, 2  ;;  %v3127_v21 = vsel %vm359_vm1, %v391_v29, %v393_v52  ;;  %v598_v29 = vld [vmem:[%s3960_s1 + $0x2e0] sm:$0xff]  ;;  %v398_v52 = vrot.slane %v167_v41, 2  ;;  %v600_v41 = vld [vmem:[%s3960_s1 + $0x2f0] sm:$0xff]  ;;  %v633_v27 = vld [vmem:[%s3960_s1 + $0x3f8] sm:$0xff]  ;;  %4060 = vst [vmem:[#allocation27_spill] sm:$0xff] %v3307_v60 }
  0x7a   : > { %2251 = vmatpush1.bf16.msra.mxu1 %v3040_v17  ;;  %2130 = vmatprep.subr.bf16.mxu0 %v3962_v3  ;;  %4042 = vst [vmem:[#allocation10_spill] sm:$0xff] %v3127_v21  ;;  %v2140_v9 = vpack.c.bf16 %v599_v46, %v598_v29  ;;  %v400_v29 = vrot.slane %v3133_v23, 2  ;;  %v634_v46 = vld [vmem:[%s3960_s1 + $0x400] sm:$0xff]  ;;  %v3276_v17 = vld [vmem:[%s2535_s8 + $0x108] sm:$0xff] }
  0x7b   : > { %770 = vmatmul.mubr.f32.gmra.mrb[22].mxu1 %v2941_v24  ;;  %2236 = vmatprep.subr.bf16.mxu1 %v3962_v3  ;;  %v3098_v24 = vsel %vm246_vm0, %v278_v12, %v280_v34  ;;  %v629_v12 = vld [vmem:[%s3960_s1 + $0x3d8] sm:$0xff]  ;;  %v3136_v34 = vld [vmem:[%s2535_s8 + $0xc8] sm:$0xff]  ;;  %v3159_v50 = vsel %vm359_vm1, %v395_v14, %v396_v15  ;;  %v632_v14 = vld [vmem:[%s3960_s1 + $0x3f0] sm:$0xff]  ;;  %4054 = vst [vmem:[#allocation21_spill] sm:$0xff] %v3276_v17 }
  0x7c   : > { %995 = vmatmul.mubr.f32.gmra.mrb[22].mxu0 %v3062_v20  ;;  %774 = vmatprep.mubr.f32.mxu1 %v3065_v32  ;;  %4044 = vst [vmem:[#allocation12_spill] sm:$0xff] %v3159_v50  ;;  %v288_v6 = vrot.slane %v3136_v34, 1  ;;  %v308_v20 = vrot.slane %v3310_v43, 1 }
  0x7d   : > { %999 = vmatprep.mubr.f32.mxu0 %v3068_v33  ;;  %2132 = vmatpush1.bf16.msra.mxu0 %v2131_v37  ;;  %v3140_v37 = vpack.c.bf16 %v629_v12, %v628_v11  ;;  %v170_v11 = vld [vmem:[%s2535_s8 + $0xd0] sm:$0x3]  ;;  %v3170_v12 = vpack.c.bf16 %v631_v49, %v630_v48  ;;  %v635_v48 = vld [vmem:[%s3960_s1 + $0x408] sm:$0xff] }
  0x7e   : > { %2252 = vmatpush1.bf16.msra.mxu1 %v3075_v40  ;;  %2133 = vmatprep.subr.bf16.mxu0 %v3962_v3  ;;  %v4047_v40 = vmov 0.0|0.0  }
  0x7f   : > { %775 = vmatmul.mubr.f32.gmra.mrb[24].mxu1 %v3003_v58  ;;  %2237 = vmatprep.subr.bf16.mxu1 %v3962_v3  ;;  %4043 = vst [vmem:[#allocation11_spill] sm:$0xff] %v3140_v37  ;;  %4045 = vst [vmem:[#allocation13_spill] sm:$0xff] %v3170_v12 }
  0x80   : > { %1000 = vmatmul.mubr.f32.gmra.mrb[24].mxu0 %v3094_v51  ;;  %779 = vmatprep.mubr.f32.mxu1 %v3098_v24  ;;  %v179_v51 = vld [vmem:[%s2535_s8 + $0x118] sm:$0x3] }
  0x81   : > { %1004 = vmatprep.mubr.f32.mxu0 %v3071_v39  ;;  %2135 = vmatpush1.bf16.msra.mxu0 %v2134_v0  ;;  %v287_v0 = vrot.slane %v3133_v23, 1 }
  0x82   : > { %2253 = vmatpush1.bf16.msra.mxu1 %v3105_v5  ;;  %2136 = vmatprep.subr.bf16.mxu0 %v3962_v3  ;;  %v3207_v5 = vld [vmem:[%s2535_s8 + $0xe0] sm:$0xff] }
  0x83   : > { %780 = vmatmul.mubr.f32.gmra.mrb[26].mxu1 %v3006_v63  ;;  %2238 = vmatprep.subr.bf16.mxu1 %v3962_v3  ;;  %v3200_v49 = vsel %vm246_vm0, %v287_v0, %v288_v6  ;;  %v3215_v0 = vpack.c.bf16 %v635_v48, %v634_v46  ;;  %v173_v46 = vld [vmem:[%s2535_s8 + $0xe8] sm:$0x3] }
  0x84   : > { %1005 = vmatmul.mubr.f32.gmra.mrb[26].mxu0 %v3127_v21  ;;  %784 = vmatprep.mubr.f32.mxu1 %v3130_v22  ;;  %v295_v48 = vrot.slane %v173_v46, 1  ;;  %v3279_v21 = vld [vmem:[%s2535_s8 + $0x110] sm:$0xff] }
  0x85   : > { %1009 = vmatprep.mubr.f32.mxu0 %v3133_v23  ;;  %2138 = vmatpush1.bf16.msra.mxu0 %v2137_v28  ;;  %v3189_v28 = vsel %vm359_vm1, %v396_v15, %v398_v52  ;;  %v2143_v15 = vpack.c.bf16 %v601_v62, %v600_v41  ;;  %v3204_v52 = vld [vmem:[%s2535_s8 + $0xd8] sm:$0xff]  ;;  %4055 = vst [vmem:[#allocation22_spill] sm:$0xff] %v3279_v21  ;;  %v303_v44 = vrot.slane %v3279_v21, 1 }
  0x86   : > { %2254 = vmatpush1.bf16.msra.mxu1 %v3140_v37  ;;  %2139 = vmatprep.subr.bf16.mxu0 %v3962_v3  ;;  %4046 = vst [vmem:[#allocation14_spill] sm:$0xff] %v3189_v28  ;;  %v290_v37 = vrot.slane %v170_v11, 1 }
  0x87   : > { %785 = vmatmul.mubr.f32.gmra.mrb[28].mxu1 %v3068_v33  ;;  %2239 = vmatprep.subr.bf16.mxu1 %v3962_v3  ;;  %v401_v3 = vrot.slane %v3136_v34, 2 }
  0x88   : > { %1010 = vmatmul.mubr.f32.gmra.mrb[28].mxu0 %v3159_v50  ;;  %789 = vmatprep.mubr.f32.mxu1 %v3163_v59  ;;  %v3211_v50 = vpack.c.bf16 %v633_v27, %v632_v14  ;;  %v3224_v62 = vsel %vm246_vm0, %v288_v6, %v290_v37  ;;  %v292_v14 = vrot.slane %v3204_v52, 1  ;;  %v293_v27 = vrot.slane %v3207_v5, 1 }
  0x89   : > { %1014 = vmatprep.mubr.f32.mxu0 %v3136_v34  ;;  %2141 = vmatpush1.bf16.msra.mxu0 %v2140_v9  ;;  %v403_v9 = vrot.slane %v170_v11, 2  ;;  %v3221_v41 = vsel %vm359_vm1, %v400_v29, %v401_v3  ;;  %v405_v37 = vrot.slane %v3204_v52, 2  ;;  %v406_v6 = vrot.slane %v3207_v5, 2 }
  0x8a   : > { %2255 = vmatpush1.bf16.msra.mxu1 %v3170_v12  ;;  %2142 = vmatprep.subr.bf16.mxu0 %v4047_v40  ;;  %4048 = vst [vmem:[#allocation15_spill] sm:$0xff] %v3211_v50  ;;  %4049 = vst [vmem:[#allocation16_spill] sm:$0xff] %v3221_v41  ;;  %v3242_v29 = vsel %vm246_vm0, %v292_v14, %v293_v27 }
  0x8b   : > { %790 = vmatmul.mubr.f32.gmra.mrb[30].mxu1 %v3071_v39  ;;  %2240 = vmatprep.subr.bf16.mxu1 %v4047_v40  ;;  %v3239_v11 = vsel %vm359_vm1, %v401_v3, %v403_v9  ;;  %v3254_v12 = vsel %vm359_vm1, %v405_v37, %v406_v6  ;;  %v3258_v3 = vsel %vm246_vm0, %v293_v27, %v295_v48  ;;  %v408_v9 = vrot.slane %v173_v46, 2 }
  0x8c   : > { %1015 = vmatmul.mubr.f32.gmra.mrb[30].mxu0 %v3189_v28  ;;  %794 = vmatprep.mubr.f32.mxu1 %v3200_v49  ;;  %4050 = vst [vmem:[#allocation17_spill] sm:$0xff] %v3239_v11  ;;  %4052 = vst [vmem:[#allocation19_spill] sm:$0xff] %v3254_v12  ;;  %v176_v28 = vld [vmem:[%s2535_s8 + $0x100] sm:$0x3] }
  0x8d   : > { %1019 = vmatprep.mubr.f32.mxu0 %v3204_v52  ;;  %2144 = vmatpush1.bf16.msra.mxu0 %v2143_v15  ;;  %v3245_v15 = vld [vmem:[%s2535_s8 + $0xf0] sm:$0xff]  ;;  %v3270_v27 = vsel %vm359_vm1, %v406_v6, %v408_v9  ;;  %v300_v48 = vrot.slane %v176_v28, 1  ;;  %v413_v9 = vrot.slane %v176_v28, 2 }
  0x8e   : > { %2256 = vmatpush1.bf16.msra.mxu1 %v3211_v50  ;;  %2145 = vmatprep.subr.bf16.mxu0 %v4047_v40  ;;  %v3248_v50 = vld [vmem:[%s2535_s8 + $0xf8] sm:$0xff]  ;;  %v297_v14 = vrot.slane %v3245_v15, 1  ;;  %v410_v37 = vrot.slane %v3245_v15, 2  ;;  %4053 = vst [vmem:[#allocation20_spill] sm:$0xff] %v3270_v27 }
  0x8f   : > { %795 = vmatmul.mubr.f32.gmra.mrb[32].mxu1 %v3133_v23  ;;  %2194 = vmatprep.subr.bf16.mxu1 %v3215_v0  ;;  %4051 = vst [vmem:[#allocation18_spill] sm:$0xff] %v3248_v50 }
  0x90   : > { %1020 = vmatmul.mubr.f32.gmra.mrb[32].mxu0 %v3221_v41  ;;  %799 = vmatprep.mubr.f32.mxu1 %v3224_v62  ;;  %v298_v41 = vrot.slane %v3248_v50, 1 }
  0x91   : > { %1024 = vmatprep.mubr.f32.mxu0 %v3207_v5 }
  0x92   : > { %v3273_v46 = vsel %vm246_vm0, %v297_v14, %v298_v41  ;;  %v3289_v6 = vsel %vm246_vm0, %v298_v41, %v300_v48  ;;  %v302_v14 = vrot.slane %v3276_v17, 1  ;;  %v305_v48 = vrot.slane %v179_v51, 1 }
  0x93   : > { %800 = vmatmul.mubr.f32.gmra.mrb[34].mxu1 %v3136_v34  ;;  %4057 = vst [vmem:[#allocation24_spill] sm:$0xff] %v3289_v6 }
  0x94   : > { %1025 = vmatmul.mubr.f32.gmra.mrb[34].mxu0 %v3239_v11  ;;  %804 = vmatprep.mubr.f32.mxu1 %v3242_v29  ;;  %v411_v11 = vrot.slane %v3248_v50, 2  ;;  %v3304_v41 = vsel %vm246_vm0, %v302_v14, %v303_v44  ;;  %v307_v14 = vrot.slane %v3307_v60, 1 }
  0x95   : > { %1029 = vmatprep.mubr.f32.mxu0 %v3245_v15  ;;  %4059 = vst [vmem:[#allocation26_spill] sm:$0xff] %v3304_v41 }
  0x96   : > { %v3301_v28 = vsel %vm359_vm1, %v411_v11, %v413_v9  ;;  %v418_v9 = vrot.slane %v179_v51, 2  ;;  %v3334_v51 = vsel %vm246_vm0, %v307_v14, %v308_v20 }
  0x97   : > { %805 = vmatmul.mubr.f32.gmra.mrb[36].mxu1 %v3204_v52  ;;  %4058 = vst [vmem:[#allocation25_spill] sm:$0xff] %v3301_v28  ;;  %4065 = vst [vmem:[#allocation32_spill] sm:$0xff] %v3334_v51 }
  0x98   : > { %1030 = vmatmul.mubr.f32.gmra.mrb[36].mxu0 %v3254_v12  ;;  %809 = vmatprep.mubr.f32.mxu1 %v3258_v3  ;;  %v3285_v12 = vsel %vm359_vm1, %v410_v37, %v411_v11  ;;  %v415_v37 = vrot.slane %v3276_v17, 2  ;;  %v3320_v11 = vsel %vm246_vm0, %v303_v44, %v305_v48  ;;  %v421_v48 = vrot.slane %v3310_v43, 2 }
  0x99   : > { %1034 = vmatprep.mubr.f32.mxu0 %v3248_v50  ;;  %4056 = vst [vmem:[#allocation23_spill] sm:$0xff] %v3285_v12  ;;  %4063 = vst [vmem:[#allocation30_spill] sm:$0xff] %v3320_v11 }
  0x9b   : > { %810 = vmatmul.mubr.f32.gmra.mrb[38].mxu1 %v3207_v5 }
  0x9c   : > { %1035 = vmatmul.mubr.f32.gmra.mrb[38].mxu0 %v3270_v27  ;;  %814 = vmatprep.mubr.f32.mxu1 %v3273_v46  ;;  %v416_v27 = vrot.slane %v3279_v21, 2 }
  0x9d   : > { %1039 = vmatprep.mubr.f32.mxu0 %v3276_v17 }
  0x9e   : > { %v3331_v44 = vsel %vm359_vm1, %v416_v27, %v418_v9 }
  0x9f   : > { %815 = vmatmul.mubr.f32.gmra.mrb[40].mxu1 %v3245_v15  ;;  %4064 = vst [vmem:[#allocation31_spill] sm:$0xff] %v3331_v44 }
  0xa0   : > { %1040 = vmatmul.mubr.f32.gmra.mrb[40].mxu0 %v3285_v12  ;;  %819 = vmatprep.mubr.f32.mxu1 %v3289_v6  ;;  %v3316_v12 = vsel %vm359_vm1, %v415_v37, %v416_v27  ;;  %v420_v37 = vrot.slane %v3307_v60, 2  ;;  %v191_v6 = vld [vmem:[%s2535_s8 + $0x178] sm:$0x3] }
  0xa1   : > { %1044 = vmatprep.mubr.f32.mxu0 %v3279_v21  ;;  %4062 = vst [vmem:[#allocation29_spill] sm:$0xff] %v3316_v12 }
  0xa2   : > { %v3348_v27 = vsel %vm359_vm1, %v420_v37, %v421_v48 }
  0xa3   : > { %820 = vmatmul.mubr.f32.gmra.mrb[42].mxu1 %v3248_v50  ;;  %v182_v50 = vld [vmem:[%s2535_s8 + $0x130] sm:$0x3]  ;;  %4067 = vst [vmem:[#allocation34_spill] sm:$0xff] %v3348_v27 }
  0xa4   : > { %1045 = vmatmul.mubr.f32.gmra.mrb[42].mxu0 %v3301_v28  ;;  %824 = vmatprep.mubr.f32.mxu1 %v3304_v41  ;;  %v310_v28 = vrot.slane %v182_v50, 1  ;;  %v3338_v41 = vld [vmem:[%s2535_s8 + $0x138] sm:$0xff] }
  0xa5   : > { %1049 = vmatprep.mubr.f32.mxu0 %v3307_v60  ;;  %4066 = vst [vmem:[#allocation33_spill] sm:$0xff] %v3338_v41  ;;  %v312_v14 = vrot.slane %v3338_v41, 1 }
  0xa6   : > { %v3351_v9 = vsel %vm246_vm0, %v308_v20, %v310_v28 }
  0xa7   : > { %825 = vmatmul.mubr.f32.gmra.mrb[44].mxu1 %v3276_v17  ;;  %v3341_v17 = vld [vmem:[%s2535_s8 + $0x140] sm:$0xff]  ;;  %4068 = vst [vmem:[#allocation35_spill] sm:$0xff] %v3351_v9 }
  0xa8   : > { %1050 = vmatmul.mubr.f32.gmra.mrb[44].mxu0 %v3316_v12  ;;  %829 = vmatprep.mubr.f32.mxu1 %v3320_v11  ;;  %v423_v12 = vrot.slane %v182_v50, 2  ;;  %v313_v11 = vrot.slane %v3341_v17, 1  ;;  %v425_v50 = vrot.slane %v3338_v41, 2 }
  0xa9   : > { %1054 = vmatprep.mubr.f32.mxu0 %v3310_v43 }
  0xaa   : > { %v3363_v20 = vsel %vm359_vm1, %v421_v48, %v423_v12  ;;  %v3366_v28 = vsel %vm246_vm0, %v312_v14, %v313_v11 }
  0xab   : > { %830 = vmatmul.mubr.f32.gmra.mrb[46].mxu1 %v3279_v21  ;;  %v185_v21 = vld [vmem:[%s2535_s8 + $0x148] sm:$0x3]  ;;  %4069 = vst [vmem:[#allocation36_spill] sm:$0xff] %v3363_v20  ;;  %4070 = vst [vmem:[#allocation37_spill] sm:$0xff] %v3366_v28 }
  0xac   : > { %1055 = vmatmul.mubr.f32.gmra.mrb[46].mxu0 %v3331_v44  ;;  %834 = vmatprep.mubr.f32.mxu1 %v3334_v51  ;;  %v426_v44 = vrot.slane %v3341_v17, 2  ;;  %v315_v37 = vrot.slane %v185_v21, 1  ;;  %v3369_v51 = vld [vmem:[%s2535_s8 + $0x150] sm:$0xff]  ;;  %v428_v48 = vrot.slane %v185_v21, 2 }
  0xad   : > { %1059 = vmatprep.mubr.f32.mxu0 %v3338_v41  ;;  %v317_v14 = vrot.slane %v3369_v51, 1 }
  0xae   : > { %v3382_v12 = vsel %vm246_vm0, %v313_v11, %v315_v37  ;;  %v3394_v21 = vsel %vm359_vm1, %v426_v44, %v428_v48 }
  0xaf   : > { %835 = vmatmul.mubr.f32.gmra.mrb[48].mxu1 %v3307_v60  ;;  %v3372_v60 = vld [vmem:[%s2535_s8 + $0x158] sm:$0xff]  ;;  %4072 = vst [vmem:[#allocation39_spill] sm:$0xff] %v3382_v12  ;;  %4073 = vst [vmem:[#allocation40_spill] sm:$0xff] %v3394_v21 }
  0xb0   : > { %1060 = vmatmul.mubr.f32.gmra.mrb[48].mxu0 %v3348_v27  ;;  %839 = vmatprep.mubr.f32.mxu1 %v3351_v9  ;;  %v3378_v27 = vsel %vm359_vm1, %v425_v50, %v426_v44  ;;  %v318_v9 = vrot.slane %v3372_v60, 1  ;;  %v430_v50 = vrot.slane %v3369_v51, 2 }
  0xb1   : > { %1064 = vmatprep.mubr.f32.mxu0 %v3341_v17  ;;  %4071 = vst [vmem:[#allocation38_spill] sm:$0xff] %v3378_v27 }
  0xb2   : > { %v3397_v11 = vsel %vm246_vm0, %v317_v14, %v318_v9 }
  0xb3   : > { %840 = vmatmul.mubr.f32.gmra.mrb[50].mxu1 %v3310_v43  ;;  %v188_v43 = vld [vmem:[%s2535_s8 + $0x160] sm:$0x3]  ;;  %4074 = vst [vmem:[#allocation41_spill] sm:$0xff] %v3397_v11 }
  0xb4   : > { %1065 = vmatmul.mubr.f32.gmra.mrb[50].mxu0 %v3363_v20  ;;  %844 = vmatprep.mubr.f32.mxu1 %v3366_v28  ;;  %v431_v20 = vrot.slane %v3372_v60, 2  ;;  %v320_v37 = vrot.slane %v188_v43, 1  ;;  %v3400_v28 = vld [vmem:[%s2535_s8 + $0x168] sm:$0xff]  ;;  %v433_v48 = vrot.slane %v188_v43, 2 }
  0xb5   : > { %1069 = vmatprep.mubr.f32.mxu0 %v3369_v51  ;;  %v322_v14 = vrot.slane %v3400_v28, 1 }
  0xb6   : > { %v3413_v44 = vsel %vm246_vm0, %v318_v9, %v320_v37  ;;  %v3424_v9 = vsel %vm359_vm1, %v431_v20, %v433_v48  ;;  %v438_v48 = vrot.slane %v191_v6, 2 }
  0xb7   : > { %845 = vmatmul.mubr.f32.gmra.mrb[52].mxu1 %v3338_v41  ;;  %v3403_v41 = vld [vmem:[%s2535_s8 + $0x170] sm:$0xff]  ;;  %4076 = vst [vmem:[#allocation43_spill] sm:$0xff] %v3424_v9 }
  0xb8   : > { %1070 = vmatmul.mubr.f32.gmra.mrb[52].mxu0 %v3378_v27  ;;  %849 = vmatprep.mubr.f32.mxu1 %v3382_v12  ;;  %v3409_v27 = vsel %vm359_vm1, %v430_v50, %v431_v20  ;;  %v323_v12 = vrot.slane %v3403_v41, 1  ;;  %v435_v50 = vrot.slane %v3400_v28, 2  ;;  %v436_v37 = vrot.slane %v3403_v41, 2 }
  0xb9   : > { %1074 = vmatprep.mubr.f32.mxu0 %v3372_v60  ;;  %4075 = vst [vmem:[#allocation42_spill] sm:$0xff] %v3409_v27 }
  0xba   : > { %v3427_v43 = vsel %vm246_vm0, %v322_v14, %v323_v12  ;;  %v3444_v14 = vld [vmem:[%s2535_s8 + $0x188] sm:$0xff] }
  0xbb   : > { %850 = vmatmul.mubr.f32.gmra.mrb[54].mxu1 %v3341_v17 }
  0xbc   : > { %1075 = vmatmul.mubr.f32.gmra.mrb[54].mxu0 %v3394_v21  ;;  %854 = vmatprep.mubr.f32.mxu1 %v3397_v11  ;;  %v325_v21 = vrot.slane %v191_v6, 1  ;;  %v3431_v11 = vld [vmem:[%s2535_s8 + $0x180] sm:$0xff]  ;;  %v636_v6 = vld [vmem:[%s3960_s1 + $0x410] sm:$0xff] }
  0xbd   : > { %1079 = vmatprep.mubr.f32.mxu0 %v3400_v28 }
  0xbe   : > { %v3441_v20 = vsel %vm246_vm0, %v323_v12, %v325_v21  ;;  %v637_v12 = vld [vmem:[%s3960_s1 + $0x418] sm:$0xff] }
  0xbf   : > { %855 = vmatmul.mubr.f32.gmra.mrb[56].mxu1 %v3369_v51  ;;  %v2197_v21 = vpack.c.bf16 %v637_v12, %v636_v6  ;;  %v4083_v6 = vld [vmem:[#allocation8_spill] sm:$0xff]  ;;  %v4084_v12 = vld [vmem:[#allocation3_spill] sm:$0xff] }
  0xc0   : > { %1080 = vmatmul.mubr.f32.gmra.mrb[56].mxu0 %v3409_v27  ;;  %859 = vmatprep.mubr.f32.mxu1 %v3413_v44  ;;  %v3438_v27 = vsel %vm359_vm1, %v435_v50, %v436_v37  ;;  %v638_v50 = vld [vmem:[%s3960_s1 + $0x420] sm:$0xff] }
  0xc1   : > { %1084 = vmatprep.mubr.f32.mxu0 %v3403_v41 }
  0xc3   : > { %860 = vmatmul.mubr.f32.gmra.mrb[58].mxu1 %v3372_v60 }
  0xc4   : > { %1085 = vmatmul.mubr.f32.gmra.mrb[58].mxu0 %v3424_v9  ;;  %864 = vmatprep.mubr.f32.mxu1 %v3427_v43  ;;  %v3451_v9 = vsel %vm359_vm1, %v436_v37, %v438_v48  ;;  %v639_v37 = vld [vmem:[%s3960_s1 + $0x428] sm:$0xff]  ;;  %v649_v48 = vld [vmem:[%s3960_s1 + $0x478] sm:$0xff] }
  0xc5   : > { %1089 = vmatprep.mubr.f32.mxu0 %v3431_v11 }
  0xc7   : > { %865 = vmatmul.mubr.f32.gmra.mrb[60].mxu1 %v3400_v28 }
  0xc8   : > { %1090 = vmatmul.mubr.f32.gmra.mrb[60].mxu0 %v3438_v27  ;;  %869 = vmatprep.mubr.f32.mxu1 %v3441_v20 }
  0xc9   : > { %1094 = vmatprep.mubr.f32.mxu0 %v3444_v14 }
  0xcb   : > { %870 = vmatmul.mubr.f32.gmra.mrb[62].mxu1 %v3403_v41 }
  0xcc   : > { %1095 = vmatmul.mubr.f32.gmra.mrb[62].mxu0 %v3451_v9  ;;  %1429 = vmatprep.mubr.f32.mxu1 %v3065_v32 }
  0xcd   : > { %1164 = vmatprep.mubr.f32.mxu0 %v2769_v13  ;;  %v640_v13 = vld [vmem:[%s3960_s1 + $0x430] sm:$0xff] }
  0xcf   : > { %1430 = vmatmul.mubr.f32.vlgmr.msra.gmra.mrb[64].mxu1 %v3003_v58  ;;  %v643_v58 = vld [vmem:[%s3960_s1 + $0x448] sm:$0xff] }
  0xd0   : > { %1165 = vmatmul.mubr.f32.vlgmr.msra.gmra.mrb[0].mxu0 %v2741_v2  ;;  %2196 = vmatpush3.bf16.msra.mxu1 %v3215_v0  ;;  %v2201_v2 = vpack.c.bf16 %v639_v37, %v638_v50  ;;  %v647_v0 = vld [vmem:[%s3960_s1 + $0x468] sm:$0xff]  ;;  %v4087_v50 = vld [vmem:[#allocation10_spill] sm:$0xff]  ;;  %v4088_v37 = vld [vmem:[#allocation5_spill] sm:$0xff] }
  0xd1   : > { %2147 = vmatpush1.bf16.msra.mxu0 %v2712_v54  ;;  %1169 = vmatprep.mubr.f32.mxu0 %v2802_v45  ;;  %v641_v54 = vld [vmem:[%s3960_s1 + $0x438] sm:$0xff]  ;;  %v642_v45 = vld [vmem:[%s3960_s1 + $0x440] sm:$0xff] }
  0xd2   : > { %1434 = vmatprep.mubr.f32.mxu1 %v3098_v24  ;;  %2148 = vmatprep.subr.bf16.mxu0 %v4047_v40 }
  0xd3   : > { %1435 = vmatmul.mubr.f32.gmra.mrb[66].mxu1 %v3006_v63  ;;  %2198 = vmatprep.subr.bf16.mxu1 %v2197_v21  ;;  %v644_v63 = vld [vmem:[%s3960_s1 + $0x450] sm:$0xff] }
  0xd4   : > { %1170 = vmatmul.mubr.f32.gmra.mrb[2].mxu0 %v2773_v42  ;;  %1439 = vmatprep.mubr.f32.mxu1 %v3130_v22  ;;  %v2205_v42 = vpack.c.bf16 %v641_v54, %v640_v13  ;;  %v4090_v13 = vld [vmem:[#allocation32_spill] sm:$0xff] }
  0xd5   : > { %1174 = vmatprep.mubr.f32.mxu0 %v2834_v36  ;;  %2150 = vmatpush1.bf16.msra.mxu0 %v2748_v7  ;;  %v2209_v7 = vpack.c.bf16 %v643_v58, %v642_v45  ;;  %v4091_v54 = vld [vmem:[#allocation12_spill] sm:$0xff]  ;;  %v4094_v45 = vld [vmem:[#allocation35_spill] sm:$0xff]  ;;  %v4095_v58 = vld [vmem:[#allocation14_spill] sm:$0xff] }
  0xd6   : > { %2200 = vmatpush3.bf16.msra.mxu1 %v2197_v21  ;;  %2151 = vmatprep.subr.bf16.mxu0 %v4047_v40  ;;  %v4086_v21 = vld [vmem:[#allocation30_spill] sm:$0xff] }
  0xd7   : > { %1440 = vmatmul.mubr.f32.gmra.mrb[68].mxu1 %v3068_v33  ;;  %2202 = vmatprep.subr.bf16.mxu1 %v2201_v2  ;;  %v645_v33 = vld [vmem:[%s3960_s1 + $0x458] sm:$0xff] }
  0xd8   : > { %1175 = vmatmul.mubr.f32.gmra.mrb[4].mxu0 %v2805_v26  ;;  %1444 = vmatprep.mubr.f32.mxu1 %v3163_v59 }
  0xd9   : > { %1179 = vmatprep.mubr.f32.mxu0 %v2867_v55  ;;  %2153 = vmatpush1.bf16.msra.mxu0 %v2779_v18  ;;  %v2213_v18 = vpack.c.bf16 %v645_v33, %v644_v63  ;;  %v4098_v63 = vld [vmem:[#allocation37_spill] sm:$0xff]  ;;  %v4099_v33 = vld [vmem:[#allocation16_spill] sm:$0xff] }
  0xda   : > { %2154 = vmatprep.subr.bf16.mxu0 %v4047_v40  ;;  %2204 = vmatpush3.bf16.msra.mxu1 %v2201_v2  ;;  %v4089_v2 = vld [vmem:[#allocation22_spill] sm:$0xff] }
  0xdb   : > { %1445 = vmatmul.mubr.f32.gmra.mrb[70].mxu1 %v3071_v39  ;;  %2206 = vmatprep.subr.bf16.mxu1 %v2205_v42  ;;  %v646_v39 = vld [vmem:[%s3960_s1 + $0x460] sm:$0xff] }
  0xdc   : > { %1180 = vmatmul.mubr.f32.gmra.mrb[6].mxu0 %v2838_v38  ;;  %1449 = vmatprep.mubr.f32.mxu1 %v3200_v49 }
  0xdd   : > { %1184 = vmatprep.mubr.f32.mxu0 %v2899_v1  ;;  %2156 = vmatpush1.bf16.msra.mxu0 %v2815_v31  ;;  %v2217_v31 = vpack.c.bf16 %v647_v0, %v646_v39  ;;  %v4102_v39 = vld [vmem:[#allocation39_spill] sm:$0xff]  ;;  %v4103_v0 = vld [vmem:[#allocation17_spill] sm:$0xff] }
  0xde   : > { %2157 = vmatprep.subr.bf16.mxu0 %v4047_v40  ;;  %2208 = vmatpush3.bf16.msra.mxu1 %v2205_v42  ;;  %v4092_v42 = vld [vmem:[#allocation7_spill] sm:$0xff] }
  0xdf   : > { %1450 = vmatmul.mubr.f32.gmra.mrb[72].mxu1 %v3133_v23  ;;  %2210 = vmatprep.subr.bf16.mxu1 %v2209_v7  ;;  %v648_v23 = vld [vmem:[%s3960_s1 + $0x470] sm:$0xff] }
  0xe0   : > { %1185 = vmatmul.mubr.f32.gmra.mrb[8].mxu0 %v2870_v56  ;;  %1454 = vmatprep.mubr.f32.mxu1 %v3224_v62 }
  0xe1   : > { %1189 = vmatprep.mubr.f32.mxu0 %v2929_v16  ;;  %2159 = vmatpush1.bf16.msra.mxu0 %v2845_v47  ;;  %v2221_v47 = vpack.c.bf16 %v649_v48, %v648_v23  ;;  %v4106_v23 = vld [vmem:[#allocation19_spill] sm:$0xff] }
  0xe2   : > { %2160 = vmatprep.subr.bf16.mxu0 %v4047_v40  ;;  %2212 = vmatpush3.bf16.msra.mxu1 %v2209_v7  ;;  %v4096_v7 = vld [vmem:[#allocation9_spill] sm:$0xff]  ;;  %v4107_v48 = vld [vmem:[#allocation15_spill] sm:$0xff] }
  0xe3   : > { %1455 = vmatmul.mubr.f32.gmra.mrb[74].mxu1 %v3136_v34  ;;  %2214 = vmatprep.subr.bf16.mxu1 %v2213_v18  ;;  %v4080_v34 = vld [vmem:[#allocation18_spill] sm:$0xff] }
  0xe4   : > { %1190 = vmatmul.mubr.f32.gmra.mrb[10].mxu0 %v2903_v4  ;;  %1459 = vmatprep.mubr.f32.mxu1 %v3242_v29 }
  0xe5   : > { %1194 = vmatprep.mubr.f32.mxu0 %v2966_v30  ;;  %2162 = vmatpush1.bf16.msra.mxu0 %v2880_v61  ;;  %v4077_v61 = vld [vmem:[#allocation24_spill] sm:$0xff] }
  0xe6   : > { %2163 = vmatprep.subr.bf16.mxu0 %v4047_v40  ;;  %2216 = vmatpush3.bf16.msra.mxu1 %v2213_v18  ;;  %v4100_v18 = vld [vmem:[#allocation11_spill] sm:$0xff] }
  0xe7   : > { %1460 = vmatmul.mubr.f32.gmra.mrb[76].mxu1 %v3204_v52  ;;  %2218 = vmatprep.subr.bf16.mxu1 %v2217_v31  ;;  %v4081_v52 = vld [vmem:[#allocation4_spill] sm:$0xff] }
  0xe8   : > { %1195 = vmatmul.mubr.f32.gmra.mrb[12].mxu0 %v2934_v19  ;;  %1464 = vmatprep.mubr.f32.mxu1 %v3258_v3 }
  0xe9   : > { %1199 = vmatprep.mubr.f32.mxu0 %v2997_v53  ;;  %2165 = vmatpush1.bf16.msra.mxu0 %v2910_v10  ;;  %v4078_v10 = vld [vmem:[#allocation6_spill] sm:$0xff] }
  0xea   : > { %2166 = vmatprep.subr.bf16.mxu0 %v4047_v40  ;;  %2220 = vmatpush3.bf16.msra.mxu1 %v2217_v31  ;;  %v4104_v31 = vld [vmem:[#allocation13_spill] sm:$0xff] }
  0xeb   : > { %1465 = vmatmul.mubr.f32.gmra.mrb[78].mxu1 %v3207_v5  ;;  %2222 = vmatprep.subr.bf16.mxu1 %v2221_v47  ;;  %v4079_v5 = vld [vmem:[#allocation2_spill] sm:$0xff] }
  0xec   : > { %1200 = vmatmul.mubr.f32.gmra.mrb[14].mxu0 %v2969_v35  ;;  %1469 = vmatprep.mubr.f32.mxu1 %v3273_v46 }
  0xed   : > { %1204 = vmatprep.mubr.f32.mxu0 %v3029_v8  ;;  %2168 = vmatpush1.bf16.msra.mxu0 %v2945_v25  ;;  %v4082_v25 = vld [vmem:[#allocation26_spill] sm:$0xff] }
  0xee   : > { %2169 = vmatprep.subr.bf16.mxu0 %v4047_v40  ;;  %2224 = vmatpush3.bf16.msra.mxu1 %v2221_v47  ;;  %v3617_v47 = vld [vmem:[%s2535_s8 + $0x198] sm:$0xff] }
  0xef   : > { %1470 = vmatmul.mubr.f32.gmra.mrb[80].mxu1 %v3245_v15  ;;  %v4085_v15 = vld [vmem:[#allocation21_spill] sm:$0xff] }
  0xf0   : > { %1205 = vmatmul.mubr.f32.gmra.mrb[16].mxu0 %v3000_v57  ;;  %1474 = vmatprep.mubr.f32.mxu1 %v4077_v61 }
  0xf1   : > { %1209 = vmatprep.mubr.f32.mxu0 %v4078_v10  ;;  %2171 = vmatpush1.bf16.msra.mxu0 %v4079_v5  ;;  %v3620_v5 = vld [vmem:[%s2535_s8 + $0x1a0] sm:$0xff] }
  0xf2   : > { %2172 = vmatprep.subr.bf16.mxu0 %v4047_v40 }
  0xf3   : > { %1475 = vmatmul.mubr.f32.gmra.mrb[82].mxu1 %v4080_v34  ;;  %v492_v34 = vrot.slane %v3617_v47, 1 }
  0xf4   : > { %1210 = vmatmul.mubr.f32.gmra.mrb[18].mxu0 %v4081_v52  ;;  %1479 = vmatprep.mubr.f32.mxu1 %v4082_v25 }
  0xf5   : > { %1214 = vmatprep.mubr.f32.mxu0 %v4083_v6  ;;  %2174 = vmatpush1.bf16.msra.mxu0 %v4084_v12  ;;  %v493_v12 = vrot.slane %v3620_v5, 1 }
  0xf6   : > { %2175 = vmatprep.subr.bf16.mxu0 %v4047_v40 }
  0xf7   : > { %1480 = vmatmul.mubr.f32.gmra.mrb[84].mxu1 %v4085_v15  ;;  %v3632_v15 = vld [vmem:[%s2535_s8 + $0x1a8] sm:$0x3] }
  0xf8   : > { %1215 = vmatmul.mubr.f32.gmra.mrb[20].mxu0 %v3065_v32  ;;  %1484 = vmatprep.mubr.f32.mxu1 %v4086_v21  ;;  %v4093_v32 = vld [vmem:[#allocation27_spill] sm:$0xff] }
  0xf9   : > { %1219 = vmatprep.mubr.f32.mxu0 %v4087_v50  ;;  %2177 = vmatpush1.bf16.msra.mxu0 %v4088_v37  ;;  %v495_v37 = vrot.slane %v3632_v15, 1 }
  0xfa   : > { %2178 = vmatprep.subr.bf16.mxu0 %v4047_v40 }
  0xfb   : > { %1485 = vmatmul.mubr.f32.gmra.mrb[86].mxu1 %v4089_v2 }
  0xfc   : > { %1220 = vmatmul.mubr.f32.gmra.mrb[22].mxu0 %v3098_v24  ;;  %1489 = vmatprep.mubr.f32.mxu1 %v4090_v13  ;;  %v4097_v24 = vld [vmem:[#allocation28_spill] sm:$0xff] }
  0xfd   : > { %1224 = vmatprep.mubr.f32.mxu0 %v4091_v54  ;;  %2180 = vmatpush1.bf16.msra.mxu0 %v4092_v42 }
  0xfe   : > { %2181 = vmatprep.subr.bf16.mxu0 %v4047_v40 }
  0xff   : > { %1490 = vmatmul.mubr.f32.gmra.mrb[88].mxu1 %v4093_v32  ;;  %v4113_v32 = vld [vmem:[#allocation34_spill] sm:$0xff] }
 0x100   : > { %1225 = vmatmul.mubr.f32.gmra.mrb[24].mxu0 %v3130_v22  ;;  %1494 = vmatprep.mubr.f32.mxu1 %v4094_v45  ;;  %v4101_v22 = vld [vmem:[#allocation33_spill] sm:$0xff] }
 0x101   : > { %1229 = vmatprep.mubr.f32.mxu0 %v4095_v58  ;;  %2183 = vmatpush1.bf16.msra.mxu0 %v4096_v7 }
 0x102   : > { %2184 = vmatprep.subr.bf16.mxu0 %v4047_v40 }
 0x103   : > { %1495 = vmatmul.mubr.f32.gmra.mrb[90].mxu1 %v4097_v24 }
 0x104   : > { %1230 = vmatmul.mubr.f32.gmra.mrb[26].mxu0 %v3163_v59  ;;  %1499 = vmatprep.mubr.f32.mxu1 %v4098_v63  ;;  %v4105_v59 = vld [vmem:[#allocation41_spill] sm:$0xff] }
 0x105   : > { %1234 = vmatprep.mubr.f32.mxu0 %v4099_v33  ;;  %2186 = vmatpush1.bf16.msra.mxu0 %v4100_v18  ;;  %v4114_v18 = vld [vmem:[#allocation36_spill] sm:$0xff] }
 0x106   : > { %2187 = vmatprep.subr.bf16.mxu0 %v4047_v40 }
 0x107   : > { %1500 = vmatmul.mubr.f32.gmra.mrb[92].mxu1 %v4101_v22 }
 0x108   : > { %1235 = vmatmul.mubr.f32.gmra.mrb[28].mxu0 %v3200_v49  ;;  %1504 = vmatprep.mubr.f32.mxu1 %v4102_v39  ;;  %v4108_v49 = vld [vmem:[#allocation20_spill] sm:$0xff] }
 0x109   : > { %1239 = vmatprep.mubr.f32.mxu0 %v4103_v0  ;;  %2189 = vmatpush1.bf16.msra.mxu0 %v4104_v31  ;;  %v4115_v31 = vld [vmem:[#allocation38_spill] sm:$0xff] }
 0x10a   : > { %2190 = vmatprep.subr.bf16.mxu0 %v4047_v40  ;;  %v475_v40 = vrot.slane %v3431_v11, 1 }
 0x10b   : > { %1505 = vmatmul.mubr.f32.gmra.mrb[94].mxu1 %v3341_v17  ;;  %v4109_v17 = vld [vmem:[#allocation23_spill] sm:$0xff] }
 0x10c   : > { %1240 = vmatmul.mubr.f32.gmra.mrb[30].mxu0 %v3224_v62  ;;  %1509 = vmatprep.mubr.f32.mxu1 %v4105_v59  ;;  %v476_v62 = vrot.slane %v3444_v14, 1 }
 0x10d   : > { %1244 = vmatprep.mubr.f32.mxu0 %v4106_v23  ;;  %2192 = vmatpush1.bf16.msra.mxu0 %v4107_v48 }
 0x10f   : > { %1510 = vmatmul.mubr.f32.gmra.mrb[96].mxu1 %v3369_v51  ;;  %v3606_v51 = vld [vmem:[%s2535_s8 + $0x190] sm:$0x3] }
 0x110   : > { %1245 = vmatmul.mubr.f32.gmra.mrb[32].mxu0 %v3242_v29  ;;  %1514 = vmatprep.mubr.f32.mxu1 %v3413_v44  ;;  %v3613_v29 = vsel %vm246_vm0, %v475_v40, %v476_v62 }
 0x111   : > { %1249 = vmatprep.mubr.f32.mxu0 %v4108_v49 }
 0x113   : > { %1515 = vmatmul.mubr.f32.gmra.mrb[98].mxu1 %v3372_v60  ;;  %v4110_v60 = vld [vmem:[#allocation25_spill] sm:$0xff] }
 0x114   : > { %1250 = vmatmul.mubr.f32.gmra.mrb[34].mxu0 %v3258_v3  ;;  %1519 = vmatprep.mubr.f32.mxu1 %v3427_v43  ;;  %v478_v3 = vrot.slane %v3606_v51, 1 }
 0x115   : > { %1254 = vmatprep.mubr.f32.mxu0 %v4109_v17 }
 0x117   : > { %1520 = vmatmul.mubr.f32.gmra.mrb[100].mxu1 %v3400_v28  ;;  %v3627_v28 = vsel %vm246_vm0, %v476_v62, %v478_v3 }
 0x118   : > { %1255 = vmatmul.mubr.f32.gmra.mrb[36].mxu0 %v3273_v46  ;;  %1524 = vmatprep.mubr.f32.mxu1 %v3441_v20  ;;  %v4111_v46 = vld [vmem:[#allocation29_spill] sm:$0xff] }
 0x119   : > { %1259 = vmatprep.mubr.f32.mxu0 %v4110_v60 }
 0x11b   : > { %1525 = vmatmul.mubr.f32.gmra.mrb[102].mxu1 %v3403_v41  ;;  %v4112_v41 = vld [vmem:[#allocation31_spill] sm:$0xff] }
 0x11c   : > { %1260 = vmatmul.mubr.f32.gmra.mrb[38].mxu0 %v4077_v61  ;;  %1529 = vmatprep.mubr.f32.mxu1 %v3613_v29  ;;  %v494_v61 = vsel %vm246_vm0, %v492_v34, %v493_v12  ;;  %v500_v34 = vrot.slane %v3620_v5, 2 }
 0x11d   : > { %1264 = vmatprep.mubr.f32.mxu0 %v4111_v46 }
 0x11f   : > { %1530 = vmatmul.mubr.f32.gmra.mrb[104].mxu1 %v3431_v11 }
 0x120   : > { %1265 = vmatmul.mubr.f32.gmra.mrb[40].mxu0 %v4082_v25  ;;  %1534 = vmatprep.mubr.f32.mxu1 %v3627_v28  ;;  %v496_v25 = vsel %vm246_vm0, %v493_v12, %v495_v37 }
 0x121   : > { %1269 = vmatprep.mubr.f32.mxu0 %v4112_v41 }
 0x122   : > { %v3640_v2 = vpop.f32.mrb[0].mxu1 }
 0x123   : > { %1535 = vmatmul.mubr.f32.gmra.mrb[106].mxu1 %v3444_v14  ;;  %v718_v42 = vpop.f32.mrb[1].mxu1 }
 0x124   : > { %1270 = vmatmul.mubr.f32.gmra.mrb[42].mxu0 %v4086_v21  ;;  %1539 = vmatprep.mubr.f32.mxu1 %v494_v61  ;;  %v502_v61 = vrot.slane %v3632_v15, 2  ;;  %v2410_v15 = vld [vmem:[%s2535_s8 + $0x80] sm:$0xff] }
 0x125   : > { %1274 = vmatprep.mubr.f32.mxu0 %v4113_v32 }
 0x126   : > { %v3646_v7 = vpop.f32.mrb[2].mxu1 }
 0x127   : > { %1540 = vmatmul.mubr.f32.gmra.mrb[108].mxu1 %v3617_v47  ;;  %v723_v24 = vpop.f32.mrb[3].mxu1 }
 0x128   : > { %1275 = vmatmul.mubr.f32.gmra.mrb[44].mxu0 %v4090_v13  ;;  %1544 = vmatprep.mubr.f32.mxu1 %v496_v25  ;;  %v4116_v13 = vld [vmem:[#allocation40_spill] sm:$0xff] }
 0x129   : > { %1279 = vmatprep.mubr.f32.mxu0 %v4114_v18 }
 0x12a   : > { %v3651_v22 = vpop.f32.mrb[4].mxu1 }
 0x12b   : > { %1545 = vmatmul.mubr.f32.gmra.mrb[110].mxu1 %v3620_v5  ;;  %v728_v21 = vpop.f32.mrb[5].mxu1  ;;  %v2409_v5 = vld [vmem:[%s2535_s8 + $0x78] sm:$0xff] }
 0x12c   : > { %1280 = vmatmul.mubr.f32.gmra.mrb[46].mxu0 %v4094_v45  ;;  %1953 = vmatprep.mubr.f32.mxu1 %v2834_v36  ;;  %v4117_v36 = vld [vmem:[#allocation42_spill] sm:$0xff] }
 0x12d   : > { %1284 = vmatprep.mubr.f32.mxu0 %v4115_v31 }
 0x12e   : > { %v3657_v48 = vpop.f32.mrb[6].mxu1 }
 0x12f   : > { %1954 = vmatmul.mubr.f32.vlgmr.msra.gmra.mrb[112].mxu1 %v2867_v55  ;;  %v733_v40 = vpop.f32.mrb[7].mxu1 }
 0x130   : > { %1285 = vmatmul.mubr.f32.gmra.mrb[48].mxu0 %v4098_v63  ;;  %1956 = vmatprep.mubr.f32.mxu1 %v2899_v1  ;;  %v4118_v1 = vld [vmem:[#allocation43_spill] sm:$0xff] }
 0x131   : > { %1289 = vmatprep.mubr.f32.mxu0 %v4116_v13 }
 0x132   : > { %v3663_v62 = vpop.f32.mrb[8].mxu1 }
 0x133   : > { %1957 = vmatmul.mubr.f32.gmra.mrb[114].mxu1 %v2929_v16  ;;  %v738_v45 = vpop.f32.mrb[9].mxu1 }
 0x134   : > { %1290 = vmatmul.mubr.f32.gmra.mrb[50].mxu0 %v4102_v39  ;;  %1959 = vmatprep.mubr.f32.mxu1 %v2966_v30  ;;  %v483_v39 = vrot.slane %v3444_v14, 2 }
 0x135   : > { %1294 = vmatprep.mubr.f32.mxu0 %v4117_v36 }
 0x136   : > { %v3669_v3 = vpop.f32.mrb[10].mxu1 }
 0x137   : > { %1960 = vmatmul.mubr.f32.gmra.mrb[116].mxu1 %v2997_v53  ;;  %v743_v55 = vpop.f32.mrb[11].mxu1  ;;  %v482_v53 = vrot.slane %v3431_v11, 2 }
 0x138   : > { %1295 = vmatmul.mubr.f32.gmra.mrb[52].mxu0 %v4105_v59  ;;  %1962 = vmatprep.mubr.f32.mxu1 %v3029_v8 }
 0x139   : > { %1299 = vmatprep.mubr.f32.mxu0 %v4118_v1 }
 0x13a   : > { %v3675_v63 = vpop.f32.mrb[12].mxu1 }
 0x13b   : > { %1963 = vmatmul.mubr.f32.gmra.mrb[118].mxu1 %v4078_v10  ;;  %v748_v16 = vpop.f32.mrb[13].mxu1  ;;  %v484_v10 = vsel %vm359_vm1, %v482_v53, %v483_v39 }
 0x13c   : > { %1300 = vmatmul.mubr.f32.gmra.mrb[54].mxu0 %v3413_v44  ;;  %1965 = vmatprep.mubr.f32.mxu1 %v4083_v6  ;;  %v485_v6 = vrot.slane %v3606_v51, 2  ;;  %v2405_v51 = vld [vmem:[%s2535_s8 + $0x48] sm:$0xff] }
 0x13d   : > { %1304 = vmatprep.mubr.f32.mxu0 %v3438_v27 }
 0x13e   : > { %v3681_v30 = vpop.f32.mrb[14].mxu1 }
 0x13f   : > { %1966 = vmatmul.mubr.f32.gmra.mrb[120].mxu1 %v4087_v50  ;;  %v753_v8 = vpop.f32.mrb[15].mxu1 }
 0x140   : > { %1305 = vmatmul.mubr.f32.gmra.mrb[56].mxu0 %v3427_v43  ;;  %1968 = vmatprep.mubr.f32.mxu1 %v4091_v54  ;;  %v486_v43 = vsel %vm359_vm1, %v483_v39, %v485_v6 }
 0x141   : > { %1309 = vmatprep.mubr.f32.mxu0 %v3451_v9 }
 0x142   : > { %v3689_v44 = vpop.f32.mrb[16].mxu1 }
 0x143   : > { %1969 = vmatmul.mubr.f32.gmra.mrb[122].mxu1 %v4095_v58  ;;  %v758_v11 = vpop.f32.mrb[17].mxu1 }
 0x144   : > { %1310 = vmatmul.mubr.f32.gmra.mrb[58].mxu0 %v3441_v20  ;;  %1971 = vmatprep.mubr.f32.mxu1 %v4099_v33 }
 0x145   : > { %1314 = vmatprep.mubr.f32.mxu0 %v484_v10 }
 0x146   : > { %v3696_v14 = vpop.f32.mrb[18].mxu1 }
 0x147   : > { %1972 = vmatmul.mubr.f32.gmra.mrb[124].mxu1 %v4103_v0  ;;  %v763_v50 = vpop.f32.mrb[19].mxu1  ;;  %v2403_v0 = vld [vmem:[%s2535_s8 + $0x30] sm:$0xff] }
 0x148   : > { %1315 = vmatmul.mubr.f32.gmra.mrb[60].mxu0 %v3613_v29  ;;  %1974 = vmatprep.mubr.f32.mxu1 %v4106_v23  ;;  %v2406_v29 = vld [vmem:[%s2535_s8 + $0x50] sm:$0xff] }
 0x149   : > { %1319 = vmatprep.mubr.f32.mxu0 %v486_v43 }
 0x14a   : > { %v3702_v54 = vpop.f32.mrb[20].mxu1 }
 0x14b   : > { %1975 = vmatmul.mubr.f32.gmra.mrb[126].mxu1 %v4108_v49  ;;  %v768_v20 = vpop.f32.mrb[21].mxu1  ;;  %v2404_v49 = vld [vmem:[%s2535_s8 + $0x38] sm:$0xff] }
 0x14c   : > { %1320 = vmatmul.mubr.f32.gmra.mrb[62].mxu0 %v3627_v28  ;;  %1977 = vmatprep.mubr.f32.mxu1 %v4109_v17  ;;  %v2407_v28 = vld [vmem:[%s2535_s8 + $0x60] sm:$0xff] }
 0x14d   : > { %1389 = vmatprep.mubr.f32.mxu0 %v2805_v26 }
 0x14e   : > { %v3708_v58 = vpop.f32.mrb[22].mxu1 }
 0x14f   : > { %1978 = vmatmul.mubr.f32.gmra.mrb[128].mxu1 %v4110_v60  ;;  %v773_v33 = vpop.f32.mrb[23].mxu1 }
 0x150   : > { %1390 = vmatmul.mubr.f32.vlgmr.msra.gmra.mrb[0].mxu0 %v2403_v0  ;;  %1980 = vmatprep.mubr.f32.mxu1 %v4111_v46 }
 0x151   : > { %1394 = vmatprep.mubr.f32.mxu0 %v2838_v38 }
 0x152   : > { %v3714_v59 = vpop.f32.mrb[24].mxu1 }
 0x153   : > { %1981 = vmatmul.mubr.f32.gmra.mrb[130].mxu1 %v4112_v41  ;;  %v778_v23 = vpop.f32.mrb[25].mxu1  ;;  %v2408_v41 = vld [vmem:[%s2535_s8 + $0x68] sm:$0xff]  ;;  %s1872_s8 = sshll.u32 %s4120_s10, 8 }
 0x154   : > { %1395 = vmatmul.mubr.f32.gmra.mrb[2].mxu0 %v2404_v49  ;;  %1983 = vmatprep.mubr.f32.mxu1 %v4113_v32  ;;  %s3865_s28 = scalar_lea.vmem %s3961_s2, %s1872_s8 }
 0x155   : > { %1399 = vmatprep.mubr.f32.mxu0 %v2870_v56 }
 0x156   : > { %v3720_v26 = vpop.f32.mrb[26].mxu1 }
 0x157   : > { %1984 = vmatmul.mubr.f32.gmra.mrb[132].mxu1 %v4114_v18  ;;  %v783_v17 = vpop.f32.mrb[27].mxu1 }
 0x158   : > { %1400 = vmatmul.mubr.f32.gmra.mrb[4].mxu0 %v2405_v51  ;;  %1986 = vmatprep.mubr.f32.mxu1 %v4115_v31 }
 0x159   : > { %1404 = vmatprep.mubr.f32.mxu0 %v2903_v4  ;;  %v499_v4 = vrot.slane %v3617_v47, 2 }
 0x15a   : > { %v3726_v38 = vpop.f32.mrb[28].mxu1 }
 0x15b   : > { %1987 = vmatmul.mubr.f32.gmra.mrb[134].mxu1 %v4116_v13  ;;  %v788_v60 = vpop.f32.mrb[29].mxu1 }
 0x15c   : > { %1405 = vmatmul.mubr.f32.gmra.mrb[6].mxu0 %v2406_v29  ;;  %1989 = vmatprep.mubr.f32.mxu1 %v4117_v36 }
 0x15d   : > { %1409 = vmatprep.mubr.f32.mxu0 %v2934_v19 }
 0x15e   : > { %v3732_v56 = vpop.f32.mrb[30].mxu1 }
 0x15f   : > { %1990 = vmatmul.mubr.f32.gmra.mrb[136].mxu1 %v4118_v1  ;;  %v793_v46 = vpop.f32.mrb[31].mxu1 }
 0x160   : > { %1410 = vmatmul.mubr.f32.gmra.mrb[8].mxu0 %v2407_v28  ;;  %1992 = vmatprep.mubr.f32.mxu1 %v3438_v27  ;;  %v501_v27 = vsel %vm359_vm1, %v499_v4, %v500_v34 }
 0x161   : > { %1414 = vmatprep.mubr.f32.mxu0 %v2969_v35 }
 0x162   : > { %v3740_v12 = vpop.f32.mrb[32].mxu1 }
 0x163   : > { %1993 = vmatmul.mubr.f32.gmra.mrb[138].mxu1 %v3451_v9  ;;  %v798_v19 = vpop.f32.mrb[33].mxu1  ;;  %v503_v9 = vsel %vm359_vm1, %v500_v34, %v502_v61 }
 0x164   : > { %1415 = vmatmul.mubr.f32.gmra.mrb[10].mxu0 %v2408_v41  ;;  %1995 = vmatprep.mubr.f32.mxu1 %v484_v10 }
 0x165   : > { %1419 = vmatprep.mubr.f32.mxu0 %v3000_v57 }
 0x166   : > { %v3747_v35 = vpop.f32.mrb[34].mxu1 }
 0x167   : > { %1996 = vmatmul.mubr.f32.gmra.mrb[140].mxu1 %v486_v43  ;;  %v803_v47 = vpop.f32.mrb[35].mxu1 }
 0x168   : > { %1420 = vmatmul.mubr.f32.gmra.mrb[12].mxu0 %v2409_v5  ;;  %1998 = vmatprep.mubr.f32.mxu1 %v501_v27 }
 0x169   : > { %1424 = vmatprep.mubr.f32.mxu0 %v4081_v52 }
 0x16a   : > { %v3752_v37 = vpop.f32.mrb[36].mxu1 }
 0x16b   : > { %1999 = vmatmul.mubr.f32.gmra.mrb[142].mxu1 %v503_v9  ;;  %v808_v42 = vpop.f32.mrb[37].mxu1 }
 0x16c   : > { %1425 = vmatmul.mubr.f32.gmra.mrb[14].mxu0 %v2410_v15 }
 0x16e   : > { %v3755_v57 = vpop.f32.mrb[38].mxu1 }
 0x16f   : > { %v813_v32 = vpop.f32.mrb[39].mxu1 }
 0x172   : > { %v3757_v25 = vpop.f32.mrb[40].mxu1 }
 0x173   : > { %v818_v24 = vpop.f32.mrb[41].mxu1 }
 0x176   : > { %v3759_v18 = vpop.f32.mrb[42].mxu1 }
 0x177   : > { %v823_v21 = vpop.f32.mrb[43].mxu1 }
 0x17a   : > { %v3761_v31 = vpop.f32.mrb[44].mxu1 }
 0x17b   : > { %v828_v40 = vpop.f32.mrb[45].mxu1 }
 0x17e   : > { %v3763_v13 = vpop.f32.mrb[46].mxu1 }
 0x17f   : > { %v833_v52 = vpop.f32.mrb[47].mxu1 }
 0x182   : > { %v3765_v45 = vpop.f32.mrb[48].mxu1 }
 0x183   : > { %v838_v36 = vpop.f32.mrb[49].mxu1 }
 0x186   : > { %v3767_v55 = vpop.f32.mrb[50].mxu1 }
 0x187   : > { %v843_v1 = vpop.f32.mrb[51].mxu1 }
 0x18a   : > { %v3769_v16 = vpop.f32.mrb[52].mxu1 }
 0x18b   : > { %v848_v53 = vpop.f32.mrb[53].mxu1 }
 0x18e   : > { %v3771_v39 = vpop.f32.mrb[54].mxu1 }
 0x18f   : > { %v853_v8 = vpop.f32.mrb[55].mxu1 }
 0x192   : > { %v3773_v10 = vpop.f32.mrb[56].mxu1 }
 0x193   : > { %v858_v6 = vpop.f32.mrb[57].mxu1 }
 0x196   : > { %v3775_v11 = vpop.f32.mrb[58].mxu1 }
 0x197   : > { %v863_v43 = vpop.f32.mrb[59].mxu1 }
 0x19a   : > { %v3777_v50 = vpop.f32.mrb[60].mxu1 }
 0x19b   : > { %v868_v20 = vpop.f32.mrb[61].mxu1 }
 0x19e   : > { %v3779_v33 = vpop.f32.mrb[62].mxu1 }
 0x19f   : > { %v873_v0 = vpop.f32.mrb[63].mxu1 }
 0x1a2   : > { %v1431_v23 = vpop.f32.mrb[64].mxu1 }
 0x1a3   : > { %v1433_v49 = vpop.f32.mrb[65].mxu1 }
 0x1a6   : > { %v1436_v17 = vpop.f32.mrb[66].mxu1 }
 0x1a7   : > { %v1438_v51 = vpop.f32.mrb[67].mxu1 }
 0x1aa   : > { %v1441_v60 = vpop.f32.mrb[68].mxu1 }
 0x1ab   : > { %v1443_v29 = vpop.f32.mrb[69].mxu1 }
 0x1ae   : > { %v1446_v46 = vpop.f32.mrb[70].mxu1 }
 0x1af   : > { %v1448_v28 = vpop.f32.mrb[71].mxu1 }
 0x1b2   : > { %v1451_v4 = vpop.f32.mrb[72].mxu1 }
 0x1b3   : > { %v1453_v34 = vpop.f32.mrb[73].mxu1 }
 0x1b6   : > { %v1456_v19 = vpop.f32.mrb[74].mxu1 }
 0x1b7   : > { %v1458_v41 = vpop.f32.mrb[75].mxu1 }
 0x1ba   : > { %v1461_v61 = vpop.f32.mrb[76].mxu1 }
 0x1bb   : > { %v1463_v27 = vpop.f32.mrb[77].mxu1 }
 0x1be   : > { %v1466_v47 = vpop.f32.mrb[78].mxu1 }
 0x1bf   : > { %v1468_v5 = vpop.f32.mrb[79].mxu1 }
 0x1c2   : > { %v1471_v9 = vpop.f32.mrb[80].mxu1 }
 0x1c3   : > { %v1206_v42 = vpop.f32.mrb[16].mxu0  ;;  %v1473_v15 = vpop.f32.mrb[81].mxu1 }
 0x1c4   : > { %v2265_v32 = vadd.f32 %v1206_v42, %v3689_v44  ;;  %v1208_v24 = vpop.f32.mrb[17].mxu0 }
 0x1c6   : > { %v1476_v21 = vpop.f32.mrb[82].mxu1  ;;  %v3782_v40 = vadd.f32 %v2265_v32, %v1431_v23 }
 0x1c7   : > { %v1211_v52 = vpop.f32.mrb[18].mxu0  ;;  %v1478_v36 = vpop.f32.mrb[83].mxu1 }
 0x1c8   : > { %v2267_v1 = vadd.f32 %v1211_v52, %v3696_v14  ;;  %v1213_v53 = vpop.f32.mrb[19].mxu0 }
 0x1ca   : > { %v1481_v8 = vpop.f32.mrb[84].mxu1  ;;  %v3785_v6 = vadd.f32 %v2267_v1, %v1436_v17 }
 0x1cb   : > { %v1216_v43 = vpop.f32.mrb[20].mxu0  ;;  %v1483_v20 = vpop.f32.mrb[85].mxu1 }
 0x1cc   : > { %v2269_v0 = vadd.f32 %v1216_v43, %v3702_v54  ;;  %v1218_v49 = vpop.f32.mrb[21].mxu0 }
 0x1ce   : > { %v1486_v51 = vpop.f32.mrb[86].mxu1  ;;  %v3788_v29 = vadd.f32 %v2269_v0, %v1441_v60 }
 0x1cf   : > { %v1221_v44 = vpop.f32.mrb[22].mxu0  ;;  %v1488_v28 = vpop.f32.mrb[87].mxu1 }
 0x1d0   : > { %v2271_v23 = vadd.f32 %v1221_v44, %v3708_v58  ;;  %v1223_v34 = vpop.f32.mrb[23].mxu0 }
 0x1d2   : > { %v1491_v41 = vpop.f32.mrb[88].mxu1  ;;  %v3791_v27 = vadd.f32 %v2271_v23, %v1446_v46 }
 0x1d3   : > { %v1226_v14 = vpop.f32.mrb[24].mxu0  ;;  %v1493_v5 = vpop.f32.mrb[89].mxu1 }
 0x1d4   : > { %v2273_v17 = vadd.f32 %v1226_v14, %v3714_v59  ;;  %v1228_v42 = vpop.f32.mrb[25].mxu0 }
 0x1d6   : > { %v1496_v15 = vpop.f32.mrb[90].mxu1  ;;  %v3794_v32 = vadd.f32 %v2273_v17, %v1451_v4 }
 0x1d7   : > { %v1231_v54 = vpop.f32.mrb[26].mxu0  ;;  %v1498_v24 = vpop.f32.mrb[91].mxu1 }
 0x1d8   : > { %v2275_v60 = vadd.f32 %v1231_v54, %v3720_v26  ;;  %v1233_v52 = vpop.f32.mrb[27].mxu0 }
 0x1da   : > { %v1501_v36 = vpop.f32.mrb[92].mxu1  ;;  %v3797_v1 = vadd.f32 %v2275_v60, %v1456_v19 }
 0x1db   : > { %v1236_v58 = vpop.f32.mrb[28].mxu0  ;;  %v1503_v53 = vpop.f32.mrb[93].mxu1 }
 0x1dc   : > { %v2277_v46 = vadd.f32 %v1236_v58, %v3726_v38  ;;  %v1238_v43 = vpop.f32.mrb[29].mxu0 }
 0x1de   : > { %v1506_v20 = vpop.f32.mrb[94].mxu1  ;;  %v3800_v0 = vadd.f32 %v2277_v46, %v1461_v61 }
 0x1df   : > { %v1241_v59 = vpop.f32.mrb[30].mxu0  ;;  %v1508_v49 = vpop.f32.mrb[95].mxu1 }
 0x1e0   : > { %v2279_v4 = vadd.f32 %v1241_v59, %v3732_v56  ;;  %v1243_v44 = vpop.f32.mrb[31].mxu0 }
 0x1e2   : > { %v1511_v28 = vpop.f32.mrb[96].mxu1  ;;  %v3803_v23 = vadd.f32 %v2279_v4, %v1466_v47 }
 0x1e3   : > { %v1246_v26 = vpop.f32.mrb[32].mxu0  ;;  %v1513_v34 = vpop.f32.mrb[97].mxu1 }
 0x1e4   : > { %v2281_v19 = vadd.f32 %v1246_v26, %v3740_v12  ;;  %v1248_v14 = vpop.f32.mrb[33].mxu0 }
 0x1e6   : > { %v1516_v5 = vpop.f32.mrb[98].mxu1  ;;  %v3806_v17 = vadd.f32 %v2281_v19, %v1471_v9 }
 0x1e7   : > { %v1251_v38 = vpop.f32.mrb[34].mxu0  ;;  %v1518_v42 = vpop.f32.mrb[99].mxu1 }
 0x1e8   : > { %v2283_v61 = vadd.f32 %v1251_v38, %v3747_v35  ;;  %v1253_v54 = vpop.f32.mrb[35].mxu0 }
 0x1ea   : > { %v1521_v24 = vpop.f32.mrb[100].mxu1  ;;  %v3809_v60 = vadd.f32 %v2283_v61, %v1476_v21 }
 0x1eb   : > { %v1256_v56 = vpop.f32.mrb[36].mxu0  ;;  %v1523_v52 = vpop.f32.mrb[101].mxu1 }
 0x1ec   : > { %v2285_v47 = vadd.f32 %v1256_v56, %v3752_v37  ;;  %v1258_v58 = vpop.f32.mrb[37].mxu0 }
 0x1ee   : > { %v1526_v53 = vpop.f32.mrb[102].mxu1  ;;  %v3812_v46 = vadd.f32 %v2285_v47, %v1481_v8 }
 0x1ef   : > { %v1261_v12 = vpop.f32.mrb[38].mxu0  ;;  %v1528_v43 = vpop.f32.mrb[103].mxu1 }
 0x1f0   : > { %v2287_v9 = vadd.f32 %v1261_v12, %v3755_v57  ;;  %v1263_v59 = vpop.f32.mrb[39].mxu0 }
 0x1f2   : > { %v1531_v49 = vpop.f32.mrb[104].mxu1  ;;  %v3815_v4 = vadd.f32 %v2287_v9, %v1486_v51 }
 0x1f3   : > { %v1266_v35 = vpop.f32.mrb[40].mxu0  ;;  %v1533_v44 = vpop.f32.mrb[105].mxu1 }
 0x1f4   : > { %v2289_v21 = vadd.f32 %v1266_v35, %v3757_v25  ;;  %v1268_v26 = vpop.f32.mrb[41].mxu0 }
 0x1f6   : > { %v3818_v34 = vpop.f32.mrb[106].mxu1  ;;  %v3820_v37 = vadd.f32 %v2289_v21, %v1491_v41 }
 0x1f7   : > { %v1271_v19 = vpop.f32.mrb[42].mxu0  ;;  %v1538_v8 = vpop.f32.mrb[107].mxu1 }
 0x1f8   : > { %v2291_v14 = vadd.f32 %v1271_v19, %v3759_v18  ;;  %v1273_v38 = vpop.f32.mrb[43].mxu0 }
 0x1fa   : > { %v3823_v42 = vpop.f32.mrb[108].mxu1  ;;  %v3825_v57 = vadd.f32 %v2291_v14, %v1496_v15 }
 0x1fb   : > { %v1276_v51 = vpop.f32.mrb[44].mxu0  ;;  %v1543_v61 = vpop.f32.mrb[109].mxu1 }
 0x1fc   : > { %v2293_v54 = vadd.f32 %v1276_v51, %v3761_v31  ;;  %v1278_v56 = vpop.f32.mrb[45].mxu0 }
 0x1fe   : > { %v3828_v25 = vpop.f32.mrb[110].mxu1  ;;  %v3830_v52 = vadd.f32 %v2293_v54, %v1501_v36 }
 0x1ff   : > { %v1281_v41 = vpop.f32.mrb[46].mxu0  ;;  %v1548_v47 = vpop.f32.mrb[111].mxu1 }
 0x200   : > { %v2295_v58 = vadd.f32 %v1281_v41, %v3763_v13  ;;  %v1283_v12 = vpop.f32.mrb[47].mxu0 }
 0x202   : > { %v3833_v18 = vpop.f32.mrb[112].mxu1  ;;  %v3835_v43 = vadd.f32 %v2295_v58, %v1506_v20 }
 0x203   : > { %v1286_v15 = vpop.f32.mrb[48].mxu0  ;;  %v3837_v9 = vpop.f32.mrb[113].mxu1 }
 0x204   : > { %v2297_v59 = vadd.f32 %v1286_v15, %v3765_v45  ;;  %v1288_v31 = vpop.f32.mrb[49].mxu0 }
 0x206   : > { %v3840_v35 = vpop.f32.mrb[114].mxu1  ;;  %v3842_v36 = vadd.f32 %v2297_v59, %v1511_v28 }
 0x207   : > { %v1291_v44 = vpop.f32.mrb[50].mxu0  ;;  %v3844_v21 = vpop.f32.mrb[115].mxu1 }
 0x208   : > { %v2299_v13 = vadd.f32 %v1291_v44, %v3767_v55  ;;  %v1293_v26 = vpop.f32.mrb[51].mxu0 }
 0x20a   : > { %v3847_v19 = vpop.f32.mrb[116].mxu1  ;;  %v3849_v20 = vadd.f32 %v2299_v13, %v1516_v5 }
 0x20b   : > { %v1296_v8 = vpop.f32.mrb[52].mxu0  ;;  %v3851_v14 = vpop.f32.mrb[117].mxu1 }
 0x20c   : > { %v2301_v45 = vadd.f32 %v1296_v8, %v3769_v16  ;;  %v1298_v38 = vpop.f32.mrb[53].mxu0 }
 0x20e   : > { %v3854_v51 = vpop.f32.mrb[118].mxu1  ;;  %v3856_v28 = vadd.f32 %v2301_v45, %v1521_v24 }
 0x20f   : > { %v1301_v61 = vpop.f32.mrb[54].mxu0  ;;  %v3858_v54 = vpop.f32.mrb[119].mxu1 }
 0x210   : > { %v2303_v55 = vadd.f32 %v1301_v61, %v3771_v39  ;;  %v1303_v56 = vpop.f32.mrb[55].mxu0 }
 0x212   : > { %v1967_v16 = vpop.f32.mrb[120].mxu1  ;;  %v3867_v5 = vadd.f32 %v2303_v55, %v1526_v53 }
 0x213   : > { %v1306_v41 = vpop.f32.mrb[56].mxu0  ;;  %v1662_v24 = vadd.f32 %v3785_v6, %v1967_v16  ;;  %v1656_v47 = vpop.f32.mrb[121].mxu1 }
 0x214   : > { %v2305_v58 = vadd.f32 %v1306_v41, %v3773_v10  ;;  %v1308_v39 = vpop.f32.mrb[57].mxu0  ;;  %v1657_v12 = vadd.f32 %v3782_v40, %v1656_v47 }
 0x215   : > { %1784 = vst [vmem:[%s3865_s28 + $0x48] sm:$0xff] %v1662_v24 }
 0x216   : > { %1783 = vst [vmem:[%s3865_s28 + $0x40] sm:$0xff] %v1657_v12  ;;  %v1970_v15 = vpop.f32.mrb[122].mxu1  ;;  %v3874_v59 = vadd.f32 %v2305_v58, %v1531_v49 }
 0x217   : > { %v1311_v31 = vpop.f32.mrb[58].mxu0  ;;  %v1672_v53 = vadd.f32 %v3791_v27, %v1970_v15  ;;  %v1666_v44 = vpop.f32.mrb[123].mxu1 }
 0x218   : > { %v2307_v6 = vadd.f32 %v1311_v31, %v3775_v11  ;;  %v1313_v13 = vpop.f32.mrb[59].mxu0  ;;  %v1667_v26 = vadd.f32 %v3788_v29, %v1666_v44 }
 0x219   : > { %1786 = vst [vmem:[%s3865_s28 + $0x58] sm:$0xff] %v1672_v53 }
 0x21a   : > { %1785 = vst [vmem:[%s3865_s28 + $0x50] sm:$0xff] %v1667_v26  ;;  %v1973_v10 = vpop.f32.mrb[124].mxu1  ;;  %v3882_v40 = vadd.f32 %v2307_v6, %v3818_v34 }
 0x21b   : > { %v1316_v8 = vpop.f32.mrb[60].mxu0  ;;  %v1682_v49 = vadd.f32 %v3797_v1, %v1973_v10  ;;  %v1676_v45 = vpop.f32.mrb[125].mxu1 }
 0x21c   : > { %v2309_v27 = vadd.f32 %v1316_v8, %v3777_v50  ;;  %v1318_v38 = vpop.f32.mrb[61].mxu0  ;;  %v1677_v11 = vadd.f32 %v3794_v32, %v1676_v45 }
 0x21d   : > { %1788 = vst [vmem:[%s3865_s28 + $0x68] sm:$0xff] %v1682_v49 }
 0x21e   : > { %1787 = vst [vmem:[%s3865_s28 + $0x60] sm:$0xff] %v1677_v11  ;;  %v1976_v29 = vpop.f32.mrb[126].mxu1  ;;  %v3890_v61 = vadd.f32 %v2309_v27, %v3823_v42 }
 0x21f   : > { %v1321_v55 = vpop.f32.mrb[62].mxu0  ;;  %v1692_v34 = vadd.f32 %v3803_v23, %v1976_v29  ;;  %v1686_v56 = vpop.f32.mrb[127].mxu1 }
 0x220   : > { %v2311_v1 = vadd.f32 %v1321_v55, %v3779_v33  ;;  %v1323_v16 = vpop.f32.mrb[63].mxu0  ;;  %v1687_v50 = vadd.f32 %v3800_v0, %v1686_v56 }
 0x221   : > { %1790 = vst [vmem:[%s3865_s28 + $0x78] sm:$0xff] %v1692_v34 }
 0x222   : > { %1789 = vst [vmem:[%s3865_s28 + $0x70] sm:$0xff] %v1687_v50  ;;  %v1979_v32 = vpop.f32.mrb[128].mxu1  ;;  %v3898_v41 = vadd.f32 %v2311_v1, %v3828_v25 }
 0x223   : > { %v1391_v42 = vpop.f32.mrb[0].mxu0  ;;  %v1702_v24 = vadd.f32 %v3809_v60, %v1979_v32  ;;  %v1696_v47 = vpop.f32.mrb[129].mxu1 }
 0x224   : > { %v2257_v23 = vadd.f32 %v1391_v42, %v3640_v2  ;;  %v1393_v58 = vpop.f32.mrb[1].mxu0  ;;  %v1697_v33 = vadd.f32 %v3806_v17, %v1696_v47 }
 0x225   : > { %1792 = vst [vmem:[%s3865_s28 + $0x88] sm:$0xff] %v1702_v24 }
 0x226   : > { %v1617_v0 = vadd.f32 %v2257_v23, %v3837_v9  ;;  %1791 = vst [vmem:[%s3865_s28 + $0x80] sm:$0xff] %v1697_v33  ;;  %v1982_v39 = vpop.f32.mrb[130].mxu1 }
 0x227   : > { %v1396_v12 = vpop.f32.mrb[2].mxu0  ;;  %v1712_v25 = vadd.f32 %v3815_v4, %v1982_v39  ;;  %v1706_v15 = vpop.f32.mrb[131].mxu1 }
 0x228   : > { %1775 = vst [vmem:[%s3865_s28] sm:$0xff] %v1617_v0  ;;  %v2258_v60 = vadd.f32 %v1396_v12, %v3646_v7  ;;  %v1398_v2 = vpop.f32.mrb[3].mxu0  ;;  %v1707_v31 = vadd.f32 %v3812_v46, %v1706_v15 }
 0x229   : > { %1794 = vst [vmem:[%s3865_s28 + $0x98] sm:$0xff] %v1712_v25 }
 0x22a   : > { %v1622_v17 = vadd.f32 %v2258_v60, %v3833_v18  ;;  %1793 = vst [vmem:[%s3865_s28 + $0x90] sm:$0xff] %v1707_v31  ;;  %v1985_v9 = vpop.f32.mrb[132].mxu1 }
 0x22b   : > { %v1401_v53 = vpop.f32.mrb[4].mxu0  ;;  %v1722_v44 = vadd.f32 %v3825_v57, %v1985_v9  ;;  %v1716_v6 = vpop.f32.mrb[133].mxu1 }
 0x22c   : > { %1776 = vst [vmem:[%s3865_s28 + $0x8] sm:$0xff] %v1622_v17  ;;  %v2259_v4 = vadd.f32 %v1401_v53, %v3651_v22  ;;  %v1403_v7 = vpop.f32.mrb[5].mxu0  ;;  %v1717_v13 = vadd.f32 %v3820_v37, %v1716_v6 }
 0x22d   : > { %1796 = vst [vmem:[%s3865_s28 + $0xa8] sm:$0xff] %v1722_v44 }
 0x22e   : > { %v1627_v46 = vadd.f32 %v2259_v4, %v3844_v21  ;;  %1795 = vst [vmem:[%s3865_s28 + $0xa0] sm:$0xff] %v1717_v13  ;;  %v1988_v18 = vpop.f32.mrb[134].mxu1 }
 0x22f   : > { %v1406_v26 = vpop.f32.mrb[6].mxu0  ;;  %v1732_v10 = vadd.f32 %v3835_v43, %v1988_v18  ;;  %v1726_v8 = vpop.f32.mrb[135].mxu1 }
 0x230   : > { %1777 = vst [vmem:[%s3865_s28 + $0x10] sm:$0xff] %v1627_v46  ;;  %v2260_v57 = vadd.f32 %v1406_v26, %v3657_v48  ;;  %v1408_v22 = vpop.f32.mrb[7].mxu0  ;;  %v1727_v49 = vadd.f32 %v3830_v52, %v1726_v8 }
 0x231   : > { %1798 = vst [vmem:[%s3865_s28 + $0xb8] sm:$0xff] %v1732_v10 }
 0x232   : > { %v1632_v37 = vadd.f32 %v2260_v57, %v3840_v35  ;;  %1797 = vst [vmem:[%s3865_s28 + $0xb0] sm:$0xff] %v1727_v49  ;;  %v1991_v21 = vpop.f32.mrb[136].mxu1 }
 0x233   : > { %v1411_v45 = vpop.f32.mrb[8].mxu0  ;;  %v1742_v27 = vadd.f32 %v3849_v20, %v1991_v21  ;;  %v1736_v38 = vpop.f32.mrb[137].mxu1 }
 0x234   : > { %1778 = vst [vmem:[%s3865_s28 + $0x18] sm:$0xff] %v1632_v37  ;;  %v2261_v43 = vadd.f32 %v1411_v45, %v3663_v62  ;;  %v1413_v48 = vpop.f32.mrb[9].mxu0  ;;  %v1737_v11 = vadd.f32 %v3842_v36, %v1736_v38 }
 0x235   : > { %1800 = vst [vmem:[%s3865_s28 + $0xc8] sm:$0xff] %v1742_v27 }
 0x236   : > { %v1637_v52 = vadd.f32 %v2261_v43, %v3851_v14  ;;  %1799 = vst [vmem:[%s3865_s28 + $0xc0] sm:$0xff] %v1737_v11  ;;  %v1994_v35 = vpop.f32.mrb[138].mxu1 }
 0x237   : > { %v1416_v29 = vpop.f32.mrb[10].mxu0  ;;  %v1752_v55 = vadd.f32 %v3867_v5, %v1994_v35  ;;  %v1746_v34 = vpop.f32.mrb[139].mxu1 }
 0x238   : > { %1779 = vst [vmem:[%s3865_s28 + $0x20] sm:$0xff] %v1637_v52  ;;  %v2262_v20 = vadd.f32 %v1416_v29, %v3669_v3  ;;  %v1418_v62 = vpop.f32.mrb[11].mxu0  ;;  %v1747_v56 = vadd.f32 %v3856_v28, %v1746_v34 }
 0x239   : > { %1802 = vst [vmem:[%s3865_s28 + $0xd8] sm:$0xff] %v1752_v55 }
 0x23a   : > { %v1642_v36 = vadd.f32 %v2262_v20, %v3847_v19  ;;  %1801 = vst [vmem:[%s3865_s28 + $0xd0] sm:$0xff] %v1747_v56  ;;  %v1997_v14 = vpop.f32.mrb[140].mxu1 }
 0x23b   : > { %v1421_v1 = vpop.f32.mrb[12].mxu0  ;;  %v1762_v16 = vadd.f32 %v3882_v40, %v1997_v14  ;;  %v1756_v50 = vpop.f32.mrb[141].mxu1 }
 0x23c   : > { %1780 = vst [vmem:[%s3865_s28 + $0x28] sm:$0xff] %v1642_v36  ;;  %v2263_v5 = vadd.f32 %v1421_v1, %v3675_v63  ;;  %v1423_v3 = vpop.f32.mrb[13].mxu0  ;;  %v1757_v32 = vadd.f32 %v3874_v59, %v1756_v50 }
 0x23d   : > { %1804 = vst [vmem:[%s3865_s28 + $0xe8] sm:$0xff] %v1762_v16 }
 0x23e   : > { %v1647_v28 = vadd.f32 %v2263_v5, %v3858_v54  ;;  %1803 = vst [vmem:[%s3865_s28 + $0xe0] sm:$0xff] %v1757_v32  ;;  %v2000_v19 = vpop.f32.mrb[142].mxu1 }
 0x23f   : > { %v1426_v42 = vpop.f32.mrb[14].mxu0  ;;  %v1772_v24 = vadd.f32 %v3898_v41, %v2000_v19  ;;  %v1766_v47 = vpop.f32.mrb[143].mxu1 }
 0x240   : > { %1781 = vst [vmem:[%s3865_s28 + $0x30] sm:$0xff] %v1647_v28  ;;  %v2264_v40 = vadd.f32 %v1426_v42, %v3681_v30  ;;  %v1428_v23 = vpop.f32.mrb[15].mxu0  ;;  %v1767_v63 = vadd.f32 %v3890_v61, %v1766_v47 }
 0x241   : > { %1806 = vst [vmem:[%s3865_s28 + $0xf8] sm:$0xff] %v1772_v24 }
 0x242   : > { %v1652_v58 = vadd.f32 %v2264_v40, %v3854_v51  ;;  %1805 = vst [vmem:[%s3865_s28 + $0xf0] sm:$0xff] %v1767_v63 }
 0x244   : > { %1782 = vst [vmem:[%s3865_s28 + $0x38] sm:$0xff] %v1652_v58 }
 0x245 PF: > { %s12_s9 = sadd.s32 1, %s2417_s9  }
 0x246   : > { %p9_p4 = scmp.ge.s32.totalorder %s12_s9, 4  }
 0x248   :  { %11 = sbr.rel (!%p9_p4) target bundleno = 1 (0x1), region = 58 }

// kernel: orsnet_forward.28
= control target key start
LH: loop header
LB: loop body
LE: loop exit
PB: predicated region body
PF: predicated region fallthrough
CT: control target
= control target key end

     0   :  { %s2569_s14 = smov 0   ;;  %s4130_s0 = inlined_call_operand.vmem [shape: f32[2,18,18,128], index: 0, kind: input, shape index: {}]   ;;  %s4131_s1 = inlined_call_operand.vmem [shape: f32[1152,128], index: 1, kind: input, shape index: {}]   ;;  %s4132_s2 = inlined_call_operand.<no memory space> [shape: f32[1], index: 2, kind: input, shape index: {}]   ;;  %s4133_s3 = inlined_call_operand.vmem [shape: f32[2,16,16,128], index: 3, kind: output, shape index: {}]  }
   0x1   :  { %8 = sst [smem:[#allocation2]] %s4132_s2 }
   0x2 LB: > { %s1988_s15 = sadd.s32 4294967295, %s2543_s14   ;;  %p1992_p0 = scmp.ge.s32.totalorder %s2543_s14, 1  ;;  %s2543_s14 = sphi %s2569_s14, %s14_s14  }
   0x3   : > { %p138_p1 = scmp.lt.s32.totalorder %s2543_s14, 3 }
   0x5   : > { %p139_p2 = pnand %p1992_p0, %p138_p1 }
   0x7   : > { %142 = sbr.rel (%p139_p2) target bundleno = 585 (0x249), region = 32 }
   0xe   : > { %v534_v0 = vld [vmem:[%s4131_s1] sm:$0xff]  ;;  %v535_v1 = vld [vmem:[%s4131_s1 + $0x8] sm:$0xff]  ;;  %v4134_v3 = vmov 0.0|0.0   ;;  %v536_v6 = vld [vmem:[%s4131_s1 + $0x10] sm:$0xff]  ;;  %p162_p3 = scmp.lt.s32.totalorder %s1988_s15, 1  ;;  %vm274_vm0 = vcmask 1046528  }
   0xf   : > { %v566_v2 = vld [vmem:[%s4131_s1 + $0x100] sm:$0xff]  ;;  %2127 = vmatprep.subr.bf16.mxu1 %v4134_v3  ;;  %2175 = vmatprep.subr.bf16.mxu0 %v4134_v3  ;;  %v2128_v4 = vpack.c.bf16 %v535_v1, %v534_v0  ;;  %v567_v5 = vld [vmem:[%s4131_s1 + $0x108] sm:$0xff]  ;;  %v537_v7 = vld [vmem:[%s4131_s1 + $0x18] sm:$0xff]  ;;  %vm387_vm1 = vcmask 1045504  }
  0x10   : > { %v2176_v8 = vpack.c.bf16 %v567_v5, %v566_v2  ;;  %v568_v9 = vld [vmem:[%s4131_s1 + $0x110] sm:$0xff]  ;;  %v569_v10 = vld [vmem:[%s4131_s1 + $0x118] sm:$0xff]  ;;  %v2131_v11 = vpack.c.bf16 %v537_v7, %v536_v6  ;;  %v538_v13 = vld [vmem:[%s4131_s1 + $0x20] sm:$0xff]  ;;  %s4292_s15 = smov (!%p162_p3, %s1988_s15), 1 }
  0x11   : > { %2129 = vmatpush1.bf16.msra.mxu1 %v2128_v4  ;;  %v2179_v12 = vpack.c.bf16 %v569_v10, %v568_v9  ;;  %v539_v14 = vld [vmem:[%s4131_s1 + $0x28] sm:$0xff]  ;;  %v570_v15 = vld [vmem:[%s4131_s1 + $0x120] sm:$0xff]  ;;  %v540_v19 = vld [vmem:[%s4131_s1 + $0x30] sm:$0xff]  ;;  %s2519_s29 = smul.u32 432, %s4292_s15  ;;  %s1998_s30 = sshll.u32 %s4292_s15, 8 }
  0x12   : > { %2177 = vmatpush1.bf16.msra.mxu0 %v2176_v8  ;;  %2130 = vmatprep.subr.bf16.mxu1 %v4134_v3  ;;  %v571_v16 = vld [vmem:[%s4131_s1 + $0x128] sm:$0xff]  ;;  %v2134_v17 = vpack.c.bf16 %v539_v14, %v538_v13  ;;  %v541_v20 = vld [vmem:[%s4131_s1 + $0x38] sm:$0xff]  ;;  %v572_v21 = vld [vmem:[%s4131_s1 + $0x130] sm:$0xff]  ;;  %s4008_s6 = scalar_lea.vmem %s4133_s3, %s1998_s30 }
  0x13   : > { %2178 = vmatprep.subr.bf16.mxu0 %v4134_v3  ;;  %v2182_v18 = vpack.c.bf16 %v571_v16, %v570_v15  ;;  %v573_v22 = vld [vmem:[%s4131_s1 + $0x138] sm:$0xff]  ;;  %v2137_v23 = vpack.c.bf16 %v541_v20, %v540_v19  ;;  %v542_v25 = vld [vmem:[%s4131_s1 + $0x40] sm:$0xff]  ;;  %v543_v26 = vld [vmem:[%s4131_s1 + $0x48] sm:$0xff]  ;;  %s2669_s13 = scalar_lea.vmem %s4130_s0, %s2519_s29 }
  0x14   : > { %v2185_v24 = vpack.c.bf16 %v573_v22, %v572_v21  ;;  %v574_v27 = vld [vmem:[%s4131_s1 + $0x140] sm:$0xff]  ;;  %v575_v28 = vld [vmem:[%s4131_s1 + $0x148] sm:$0xff]  ;;  %v2140_v29 = vpack.c.bf16 %v543_v26, %v542_v25  ;;  %v544_v31 = vld [vmem:[%s4131_s1 + $0x50] sm:$0xff] }
  0x15   : > { %2132 = vmatpush1.bf16.msra.mxu1 %v2131_v11  ;;  %v2188_v30 = vpack.c.bf16 %v575_v28, %v574_v27  ;;  %v545_v32 = vld [vmem:[%s4131_s1 + $0x58] sm:$0xff]  ;;  %v576_v33 = vld [vmem:[%s4131_s1 + $0x150] sm:$0xff]  ;;  %v546_v37 = vld [vmem:[%s4131_s1 + $0x60] sm:$0xff] }
  0x16   : > { %2180 = vmatpush1.bf16.msra.mxu0 %v2179_v12  ;;  %2133 = vmatprep.subr.bf16.mxu1 %v4134_v3  ;;  %v577_v34 = vld [vmem:[%s4131_s1 + $0x158] sm:$0xff]  ;;  %v2143_v35 = vpack.c.bf16 %v545_v32, %v544_v31  ;;  %v547_v38 = vld [vmem:[%s4131_s1 + $0x68] sm:$0xff]  ;;  %v578_v39 = vld [vmem:[%s4131_s1 + $0x160] sm:$0xff] }
  0x17   : > { %2181 = vmatprep.subr.bf16.mxu0 %v4134_v3  ;;  %v2191_v36 = vpack.c.bf16 %v577_v34, %v576_v33  ;;  %v579_v40 = vld [vmem:[%s4131_s1 + $0x168] sm:$0xff]  ;;  %v2686_v41 = vld [vmem:[%s2669_s13] sm:$0xff]  ;;  %v2694_v45 = vld [vmem:[%s2669_s13 + $0x18] sm:$0xff]  ;;  %v2146_v46 = vpack.c.bf16 %v547_v38, %v546_v37 }
  0x18   : > { %v2689_v42 = vld [vmem:[%s2669_s13 + $0x8] sm:$0xff]  ;;  %v275_v43 = vrot.slane %v2686_v41, 1  ;;  %967 = vmatprep.mubr.f32.mxu0 %v2694_v45  ;;  %v2194_v47 = vpack.c.bf16 %v579_v40, %v578_v39  ;;  %v548_v48 = vld [vmem:[%s4131_s1 + $0x70] sm:$0xff]  ;;  %v549_v49 = vld [vmem:[%s4131_s1 + $0x78] sm:$0xff] }
  0x19   : > { %2135 = vmatpush1.bf16.msra.mxu1 %v2134_v17  ;;  %v276_v44 = vrot.slane %v2689_v42, 1  ;;  %v580_v51 = vld [vmem:[%s4131_s1 + $0x170] sm:$0xff]  ;;  %v581_v52 = vld [vmem:[%s4131_s1 + $0x178] sm:$0xff]  ;;  %v2149_v53 = vpack.c.bf16 %v549_v49, %v548_v48  ;;  %v550_v55 = vld [vmem:[%s4131_s1 + $0x80] sm:$0xff] }
  0x1a   : > { %2183 = vmatpush1.bf16.msra.mxu0 %v2182_v18  ;;  %2136 = vmatprep.subr.bf16.mxu1 %v4134_v3  ;;  %v2197_v54 = vpack.c.bf16 %v581_v52, %v580_v51  ;;  %v551_v56 = vld [vmem:[%s4131_s1 + $0x88] sm:$0xff]  ;;  %v582_v57 = vld [vmem:[%s4131_s1 + $0x180] sm:$0xff]  ;;  %v552_v61 = vld [vmem:[%s4131_s1 + $0x90] sm:$0xff] }
  0x1b   : > { %2184 = vmatprep.subr.bf16.mxu0 %v4134_v3  ;;  %v277_v50 = vsel %vm274_vm0, %v275_v43, %v276_v44  ;;  %v583_v58 = vld [vmem:[%s4131_s1 + $0x188] sm:$0xff]  ;;  %v2152_v59 = vpack.c.bf16 %v551_v56, %v550_v55  ;;  %v553_v62 = vld [vmem:[%s4131_s1 + $0x98] sm:$0xff]  ;;  %v584_v63 = vld [vmem:[%s4131_s1 + $0x190] sm:$0xff] }
  0x1c   : > { %742 = vmatprep.mubr.f32.mxu1 %v277_v50  ;;  %v2200_v60 = vpack.c.bf16 %v583_v58, %v582_v57  ;;  %v585_v0 = vld [vmem:[%s4131_s1 + $0x198] sm:$0xff]  ;;  %v2155_v1 = vpack.c.bf16 %v553_v62, %v552_v61  ;;  %v554_v4 = vld [vmem:[%s4131_s1 + $0xa0] sm:$0xff]  ;;  %v555_v5 = vld [vmem:[%s4131_s1 + $0xa8] sm:$0xff]  ;;  %v280_v57 = vrot.slane %v2694_v45, 1 }
  0x1d   : > { %2138 = vmatpush1.bf16.msra.mxu1 %v2137_v23  ;;  %v2203_v2 = vpack.c.bf16 %v585_v0, %v584_v63  ;;  %v586_v6 = vld [vmem:[%s4131_s1 + $0x1a0] sm:$0xff]  ;;  %v587_v7 = vld [vmem:[%s4131_s1 + $0x1a8] sm:$0xff]  ;;  %v2158_v8 = vpack.c.bf16 %v555_v5, %v554_v4  ;;  %v556_v10 = vld [vmem:[%s4131_s1 + $0xb0] sm:$0xff]  ;;  %v393_v0 = vrot.slane %v2694_v45, 2 }
  0x1e   : > { %2186 = vmatpush1.bf16.msra.mxu0 %v2185_v24  ;;  %2139 = vmatprep.subr.bf16.mxu1 %v4134_v3  ;;  %v2206_v9 = vpack.c.bf16 %v587_v7, %v586_v6  ;;  %v557_v11 = vld [vmem:[%s4131_s1 + $0xb8] sm:$0xff]  ;;  %v588_v12 = vld [vmem:[%s4131_s1 + $0x1b0] sm:$0xff]  ;;  %v558_v16 = vld [vmem:[%s4131_s1 + $0xc0] sm:$0xff] }
  0x1f   : > { %2187 = vmatprep.subr.bf16.mxu0 %v4134_v3  ;;  %v589_v13 = vld [vmem:[%s4131_s1 + $0x1b8] sm:$0xff]  ;;  %v2161_v14 = vpack.c.bf16 %v557_v11, %v556_v10  ;;  %v559_v17 = vld [vmem:[%s4131_s1 + $0xc8] sm:$0xff]  ;;  %v590_v18 = vld [vmem:[%s4131_s1 + $0x1c0] sm:$0xff] }
  0x20   : > { %v2209_v15 = vpack.c.bf16 %v589_v13, %v588_v12  ;;  %v591_v19 = vld [vmem:[%s4131_s1 + $0x1c8] sm:$0xff]  ;;  %v2164_v20 = vpack.c.bf16 %v559_v17, %v558_v16  ;;  %v560_v22 = vld [vmem:[%s4131_s1 + $0xd0] sm:$0xff]  ;;  %v561_v23 = vld [vmem:[%s4131_s1 + $0xd8] sm:$0xff] }
  0x21   : > { %2141 = vmatpush1.bf16.msra.mxu1 %v2140_v29  ;;  %v2212_v21 = vpack.c.bf16 %v591_v19, %v590_v18  ;;  %v592_v24 = vld [vmem:[%s4131_s1 + $0x1d0] sm:$0xff]  ;;  %v593_v25 = vld [vmem:[%s4131_s1 + $0x1d8] sm:$0xff]  ;;  %v2167_v26 = vpack.c.bf16 %v561_v23, %v560_v22  ;;  %v562_v28 = vld [vmem:[%s4131_s1 + $0xe0] sm:$0xff] }
  0x22   : > { %2189 = vmatpush1.bf16.msra.mxu0 %v2188_v30  ;;  %2142 = vmatprep.subr.bf16.mxu1 %v4134_v3  ;;  %v2215_v27 = vpack.c.bf16 %v593_v25, %v592_v24  ;;  %v563_v29 = vld [vmem:[%s4131_s1 + $0xe8] sm:$0xff]  ;;  %v594_v30 = vld [vmem:[%s4131_s1 + $0x1e0] sm:$0xff]  ;;  %v564_v34 = vld [vmem:[%s4131_s1 + $0xf0] sm:$0xff] }
  0x23   : > { %2190 = vmatprep.subr.bf16.mxu0 %v4134_v3  ;;  %v595_v31 = vld [vmem:[%s4131_s1 + $0x1e8] sm:$0xff]  ;;  %v2170_v32 = vpack.c.bf16 %v563_v29, %v562_v28  ;;  %v597_v37 = vld [vmem:[%s4131_s1 + $0x1f8] sm:$0xff]  ;;  %v174_v38 = vld [vmem:[%s2669_s13 + $0x10] sm:$0x3] }
  0x24   : > { %v2218_v33 = vpack.c.bf16 %v595_v31, %v594_v30  ;;  %v598_v40 = vld [vmem:[%s4131_s1 + $0x200] sm:$0xff]  ;;  %v599_v48 = vld [vmem:[%s4131_s1 + $0x208] sm:$0xff]  ;;  %v278_v51 = vrot.slane %v174_v38, 1  ;;  %v391_v56 = vrot.slane %v174_v38, 2  ;;  %v601_v61 = vld [vmem:[%s4131_s1 + $0x218] sm:$0xff] }
  0x25   : > { %2144 = vmatpush1.bf16.msra.mxu1 %v2143_v35  ;;  %v565_v35 = vld [vmem:[%s4131_s1 + $0xf8] sm:$0xff]  ;;  %v630_v49 = vld [vmem:[%s4131_s1 + $0x300] sm:$0xff]  ;;  %v631_v50 = vld [vmem:[%s4131_s1 + $0x308] sm:$0xff] }
  0x26   : > { %2192 = vmatpush1.bf16.msra.mxu0 %v2191_v36  ;;  %2145 = vmatprep.subr.bf16.mxu1 %v4134_v3  ;;  %v596_v36 = vld [vmem:[%s4131_s1 + $0x1f0] sm:$0xff]  ;;  %v2173_v39 = vpack.c.bf16 %v565_v35, %v564_v34  ;;  %v2844_v52 = vld [vmem:[%s2669_s13 + $0x20] sm:$0xff]  ;;  %v177_v62 = vld [vmem:[%s2669_s13 + $0x28] sm:$0x3] }
  0x27   : > { %2193 = vmatprep.subr.bf16.mxu0 %v4134_v3  ;;  %v2221_v43 = vpack.c.bf16 %v597_v37, %v596_v36  ;;  %v281_v58 = vrot.slane %v2844_v52, 1  ;;  %v632_v63 = vld [vmem:[%s4131_s1 + $0x310] sm:$0xff]  ;;  %v283_v6 = vrot.slane %v177_v62, 1  ;;  %v603_v10 = vld [vmem:[%s4131_s1 + $0x228] sm:$0xff]  ;;  %v634_v11 = vld [vmem:[%s4131_s1 + $0x320] sm:$0xff] }
  0x28   : > { %v2878_v4 = vld [vmem:[%s2669_s13 + $0x30] sm:$0xff]  ;;  %v635_v12 = vld [vmem:[%s4131_s1 + $0x328] sm:$0xff]  ;;  %v180_v19 = vld [vmem:[%s2669_s13 + $0x40] sm:$0x3] }
  0x29   : > { %2147 = vmatpush1.bf16.msra.mxu1 %v2146_v46  ;;  %v388_v46 = vrot.slane %v2686_v41, 2  ;;  %v2913_v18 = vpack.c.bf16 %v635_v12, %v634_v11  ;;  %v636_v22 = vld [vmem:[%s4131_s1 + $0x330] sm:$0xff]  ;;  %v637_v23 = vld [vmem:[%s4131_s1 + $0x338] sm:$0xff]  ;;  %v398_v24 = vrot.slane %v2878_v4, 2  ;;  %v288_v28 = vrot.slane %v180_v19, 1  ;;  %v638_v34 = vld [vmem:[%s4131_s1 + $0x340] sm:$0xff] }
  0x2a   : > { %2195 = vmatpush1.bf16.msra.mxu0 %v2194_v47  ;;  %2148 = vmatprep.subr.bf16.mxu1 %v4134_v3  ;;  %v389_v47 = vrot.slane %v2689_v42, 2  ;;  %v2946_v30 = vld [vmem:[%s2669_s13 + $0x50] sm:$0xff]  ;;  %v2949_v31 = vpack.c.bf16 %v637_v23, %v636_v22  ;;  %v639_v35 = vld [vmem:[%s4131_s1 + $0x348] sm:$0xff]  ;;  %v401_v37 = vrot.slane %v180_v19, 2  ;;  %v613_v12 = vld [vmem:[%s4131_s1 + $0x278] sm:$0xff] }
  0x2b   : > { %2196 = vmatprep.subr.bf16.mxu0 %v4134_v3  ;;  %v612_v11 = vld [vmem:[%s4131_s1 + $0x270] sm:$0xff] }
  0x2c   : > { %v390_v55 = vsel %vm387_vm1, %v388_v46, %v389_v47  ;;  %v183_v46 = vld [vmem:[%s2669_s13 + $0x58] sm:$0x3]  ;;  %v2245_v23 = vpack.c.bf16 %v613_v12, %v612_v11 }
  0x2d   : > { %2150 = vmatpush1.bf16.msra.mxu1 %v2149_v53  ;;  %v2224_v53 = vpack.c.bf16 %v599_v48, %v598_v40  ;;  %v291_v40 = vrot.slane %v2946_v30, 1  ;;  %v608_v48 = vld [vmem:[%s4131_s1 + $0x250] sm:$0xff] }
  0x2e   : > { %2198 = vmatpush1.bf16.msra.mxu0 %v2197_v54  ;;  %2151 = vmatprep.subr.bf16.mxu1 %v4134_v3  ;;  %v2846_v54 = vpack.c.bf16 %v631_v50, %v630_v49  ;;  %v609_v49 = vld [vmem:[%s4131_s1 + $0x258] sm:$0xff]  ;;  %v640_v50 = vld [vmem:[%s4131_s1 + $0x350] sm:$0xff] }
  0x2f   : > { %2199 = vmatprep.subr.bf16.mxu0 %v4134_v3 }
  0x31   : > { %2153 = vmatpush1.bf16.msra.mxu1 %v2152_v59  ;;  %v279_v59 = vsel %vm274_vm0, %v276_v44, %v278_v51  ;;  %v633_v44 = vld [vmem:[%s4131_s1 + $0x318] sm:$0xff] }
  0x32   : > { %2201 = vmatpush1.bf16.msra.mxu0 %v2200_v60  ;;  %2154 = vmatprep.subr.bf16.mxu1 %v4134_v3  ;;  %v600_v60 = vld [vmem:[%s4131_s1 + $0x210] sm:$0xff]  ;;  %v2882_v7 = vpack.c.bf16 %v633_v44, %v632_v63  ;;  %v641_v51 = vld [vmem:[%s4131_s1 + $0x358] sm:$0xff]  ;;  %v611_v63 = vld [vmem:[%s4131_s1 + $0x268] sm:$0xff] }
  0x33   : > { %2202 = vmatprep.subr.bf16.mxu0 %v4134_v3  ;;  %v2227_v5 = vpack.c.bf16 %v601_v61, %v600_v60  ;;  %v3010_v60 = vld [vmem:[%s2669_s13 + $0x68] sm:$0xff]  ;;  %v3014_v61 = vpack.c.bf16 %v641_v51, %v640_v50  ;;  %v642_v44 = vld [vmem:[%s4131_s1 + $0x360] sm:$0xff]  ;;  %v649_v50 = vld [vmem:[%s4131_s1 + $0x398] sm:$0xff] }
  0x35   : > { %2156 = vmatpush1.bf16.msra.mxu1 %v2155_v1  ;;  %v394_v1 = vrot.slane %v2844_v52, 2 }
  0x36   : > { %2204 = vmatpush1.bf16.msra.mxu0 %v2203_v2  ;;  %2157 = vmatprep.subr.bf16.mxu1 %v4134_v3  ;;  %v2875_v2 = vsel %vm274_vm0, %v280_v57, %v281_v58  ;;  %v3007_v57 = vld [vmem:[%s2669_s13 + $0x60] sm:$0xff] }
  0x37   : > { %2205 = vmatprep.subr.bf16.mxu0 %v4134_v3  ;;  %v2903_v13 = vsel %vm387_vm1, %v393_v0, %v394_v1  ;;  %v643_v0 = vld [vmem:[%s4131_s1 + $0x368] sm:$0xff] }
  0x39   : > { %2159 = vmatpush1.bf16.msra.mxu1 %v2158_v8  ;;  %v2885_v8 = vld [vmem:[%s2669_s13 + $0x38] sm:$0xff] }
  0x3a   : > { %2207 = vmatpush1.bf16.msra.mxu0 %v2206_v9  ;;  %2160 = vmatprep.subr.bf16.mxu1 %v4134_v3  ;;  %v602_v9 = vld [vmem:[%s4131_s1 + $0x220] sm:$0xff]  ;;  %v286_v16 = vrot.slane %v2885_v8, 1  ;;  %v399_v25 = vrot.slane %v2885_v8, 2 }
  0x3b   : > { %2208 = vmatprep.subr.bf16.mxu0 %v4134_v3  ;;  %v2230_v17 = vpack.c.bf16 %v603_v10, %v602_v9  ;;  %v186_v9 = vld [vmem:[%s2669_s13 + $0x70] sm:$0x3]  ;;  %v3044_v10 = vpack.c.bf16 %v643_v0, %v642_v44  ;;  %v618_v0 = vld [vmem:[%s4131_s1 + $0x2a0] sm:$0xff] }
  0x3c   : > { %v2968_v36 = vsel %vm387_vm1, %v398_v24, %v399_v25  ;;  %v2972_v38 = vsel %vm274_vm0, %v286_v16, %v288_v28  ;;  %v298_v22 = vrot.slane %v186_v9, 1  ;;  %v3075_v24 = vld [vmem:[%s2669_s13 + $0x80] sm:$0xff]  ;;  %v615_v28 = vld [vmem:[%s4131_s1 + $0x288] sm:$0xff] }
  0x3d   : > { %2162 = vmatpush1.bf16.msra.mxu1 %v2161_v14  ;;  %v396_v14 = vrot.slane %v177_v62, 2  ;;  %v610_v62 = vld [vmem:[%s4131_s1 + $0x260] sm:$0xff] }
  0x3e   : > { %2210 = vmatpush1.bf16.msra.mxu0 %v2209_v15  ;;  %2163 = vmatprep.subr.bf16.mxu1 %v4134_v3  ;;  %v285_v15 = vrot.slane %v2878_v4, 1 }
  0x3f   : > { %2211 = vmatprep.subr.bf16.mxu0 %v4134_v3 }
  0x41   : > { %2165 = vmatpush1.bf16.msra.mxu1 %v2164_v20  ;;  %v604_v20 = vld [vmem:[%s4131_s1 + $0x230] sm:$0xff] }
  0x42   : > { %2213 = vmatpush1.bf16.msra.mxu0 %v2212_v21  ;;  %2166 = vmatprep.subr.bf16.mxu1 %v4134_v3  ;;  %v605_v21 = vld [vmem:[%s4131_s1 + $0x238] sm:$0xff] }
  0x43   : > { %2214 = vmatprep.subr.bf16.mxu0 %v4134_v3  ;;  %v2233_v29 = vpack.c.bf16 %v605_v21, %v604_v20  ;;  %v3071_v20 = vld [vmem:[%s2669_s13 + $0x78] sm:$0xff]  ;;  %v409_v21 = vrot.slane %v3010_v60, 2 }
  0x44   : > { %v413_v51 = vrot.slane %v3071_v20, 2 }
  0x45   : > { %2168 = vmatpush1.bf16.msra.mxu1 %v2167_v26  ;;  %v2939_v26 = vsel %vm274_vm0, %v285_v15, %v286_v16  ;;  %v645_v15 = vld [vmem:[%s4131_s1 + $0x378] sm:$0xff] }
  0x46   : > { %2216 = vmatpush1.bf16.msra.mxu0 %v2215_v27  ;;  %2169 = vmatprep.subr.bf16.mxu1 %v4134_v3  ;;  %v2942_v27 = vld [vmem:[%s2669_s13 + $0x48] sm:$0xff] }
  0x47   : > { %2217 = vmatprep.subr.bf16.mxu0 %v4134_v3 }
  0x49   : > { %2171 = vmatpush1.bf16.msra.mxu1 %v2170_v32  ;;  %v606_v32 = vld [vmem:[%s4131_s1 + $0x240] sm:$0xff] }
  0x4a   : > { %2219 = vmatpush1.bf16.msra.mxu0 %v2218_v33  ;;  %2172 = vmatprep.subr.bf16.mxu1 %v4134_v3  ;;  %v607_v33 = vld [vmem:[%s4131_s1 + $0x248] sm:$0xff] }
  0x4b   : > { %2220 = vmatprep.subr.bf16.mxu0 %v4134_v3 }
  0x4d   : > { %2174 = vmatpush1.bf16.msra.mxu1 %v2173_v39  ;;  %v290_v39 = vrot.slane %v2942_v27, 1 }
  0x4e   : > { %2222 = vmatpush1.bf16.msra.mxu0 %v2221_v43  ;;  %2351 = vmatprep.subr.bf16.mxu1 %v4134_v3  ;;  %v2236_v43 = vpack.c.bf16 %v607_v33, %v606_v32  ;;  %v647_v32 = vld [vmem:[%s4131_s1 + $0x388] sm:$0xff]  ;;  %v411_v33 = vrot.slane %v186_v9, 2 }
  0x4f   : > { %2223 = vmatprep.subr.bf16.mxu0 %v4134_v3 }
  0x50   : > { %743 = vmatmul.mubr.f32.vlgmr.msra.gmra.mrb[0].mxu1 %v2686_v41  ;;  %v392_v41 = vsel %vm387_vm1, %v389_v47, %v391_v56  ;;  %v2979_v47 = vpack.c.bf16 %v639_v35, %v638_v34  ;;  %v3004_v56 = vsel %vm274_vm0, %v290_v39, %v291_v40  ;;  %v300_v34 = vrot.slane %v3071_v20, 1 }
  0x51   : > { %968 = vmatmul.mubr.f32.vlgmr.msra.gmra.mrb[0].mxu0 %v390_v55  ;;  %2367 = vmatpush1.bf16.msra.mxu1 %v2846_v54  ;;  %v3001_v55 = vsel %vm387_vm1, %v399_v25, %v401_v37  ;;  %v301_v37 = vrot.slane %v3075_v24, 1 }
  0x52   : > { %2225 = vmatpush1.bf16.msra.mxu0 %v2224_v53  ;;  %747 = vmatprep.mubr.f32.mxu1 %v279_v59  ;;  %v404_v53 = vrot.slane %v2946_v30, 2  ;;  %v2239_v59 = vpack.c.bf16 %v609_v49, %v608_v48  ;;  %v617_v48 = vld [vmem:[%s4131_s1 + $0x298] sm:$0xff]  ;;  %v648_v49 = vld [vmem:[%s4131_s1 + $0x390] sm:$0xff] }
  0x53   : > { %972 = vmatprep.mubr.f32.mxu0 %v2844_v52  ;;  %2226 = vmatprep.subr.bf16.mxu0 %v4134_v3  ;;  %v3144_v44 = vpack.c.bf16 %v649_v50, %v648_v49  ;;  %v654_v49 = vld [vmem:[%s4131_s1 + $0x3c0] sm:$0xff]  ;;  %v655_v50 = vld [vmem:[%s4131_s1 + $0x3c8] sm:$0xff] }
  0x54   : > { %748 = vmatmul.mubr.f32.gmra.mrb[2].mxu1 %v2689_v42  ;;  %2352 = vmatprep.subr.bf16.mxu1 %v4134_v3  ;;  %v2907_v42 = vsel %vm274_vm0, %v281_v58, %v283_v6  ;;  %v293_v58 = vrot.slane %v183_v46, 1  ;;  %v296_v6 = vrot.slane %v3010_v60, 1 }
  0x55   : > { %973 = vmatmul.mubr.f32.gmra.mrb[2].mxu0 %v392_v41  ;;  %752 = vmatprep.mubr.f32.mxu1 %v2875_v2  ;;  %v406_v41 = vrot.slane %v183_v46, 2  ;;  %v616_v46 = vld [vmem:[%s4131_s1 + $0x290] sm:$0xff]  ;;  %4207 = vst [vmem:[#allocation4_spill] sm:$0xff] %v3144_v44 }
  0x56   : > { %977 = vmatprep.mubr.f32.mxu0 %v2878_v4  ;;  %2228 = vmatpush1.bf16.msra.mxu0 %v2227_v5  ;;  %v295_v5 = vrot.slane %v3007_v57, 1  ;;  %v3103_v35 = vsel %vm274_vm0, %v296_v6, %v298_v22  ;;  %v621_v22 = vld [vmem:[%s4131_s1 + $0x2b8] sm:$0xff] }
  0x57   : > { %2368 = vmatpush1.bf16.msra.mxu1 %v2882_v7  ;;  %2229 = vmatprep.subr.bf16.mxu0 %v4134_v3  ;;  %v3063_v16 = vsel %vm387_vm1, %v404_v53, %v406_v41  ;;  %v619_v41 = vld [vmem:[%s4131_s1 + $0x2a8] sm:$0xff] }
  0x58   : > { %753 = vmatmul.mubr.f32.gmra.mrb[4].mxu1 %v2694_v45  ;;  %2353 = vmatprep.subr.bf16.mxu1 %v4134_v3  ;;  %v2936_v45 = vsel %vm387_vm1, %v394_v1, %v396_v14  ;;  %v644_v14 = vld [vmem:[%s4131_s1 + $0x370] sm:$0xff]  ;;  %v3068_v19 = vsel %vm274_vm0, %v295_v5, %v296_v6  ;;  %v650_v5 = vld [vmem:[%s4131_s1 + $0x3a0] sm:$0xff]  ;;  %v651_v6 = vld [vmem:[%s4131_s1 + $0x3a8] sm:$0xff] }
  0x59   : > { %978 = vmatmul.mubr.f32.gmra.mrb[4].mxu0 %v2903_v13  ;;  %757 = vmatprep.mubr.f32.mxu1 %v2907_v42  ;;  %v3079_v25 = vpack.c.bf16 %v645_v15, %v644_v14  ;;  %v2254_v14 = vpack.c.bf16 %v619_v41, %v618_v0  ;;  %v192_v15 = vld [vmem:[%s2669_s13 + $0xa0] sm:$0x3]  ;;  %v195_v41 = vld [vmem:[%s2669_s13 + $0xb8] sm:$0x3] }
  0x5a   : > { %982 = vmatprep.mubr.f32.mxu0 %v2885_v8  ;;  %2231 = vmatpush1.bf16.msra.mxu0 %v2230_v17  ;;  %v408_v17 = vrot.slane %v3007_v57, 2 }
  0x5b   : > { %2369 = vmatpush1.bf16.msra.mxu1 %v2913_v18  ;;  %2232 = vmatprep.subr.bf16.mxu0 %v4134_v3 }
  0x5c   : > { %758 = vmatmul.mubr.f32.gmra.mrb[6].mxu1 %v2844_v52  ;;  %2354 = vmatprep.subr.bf16.mxu1 %v4134_v3  ;;  %v403_v52 = vrot.slane %v2942_v27, 2 }
  0x5d   : > { %983 = vmatmul.mubr.f32.gmra.mrb[6].mxu0 %v2936_v45  ;;  %762 = vmatprep.mubr.f32.mxu1 %v2939_v26 }
  0x5e   : > { %987 = vmatprep.mubr.f32.mxu0 %v2942_v27  ;;  %2234 = vmatpush1.bf16.msra.mxu0 %v2233_v29  ;;  %v3033_v1 = vsel %vm387_vm1, %v403_v52, %v404_v53  ;;  %v646_v29 = vld [vmem:[%s4131_s1 + $0x380] sm:$0xff]  ;;  %v414_v52 = vrot.slane %v3075_v24, 2  ;;  %v3131_v53 = vsel %vm387_vm1, %v409_v21, %v411_v33  ;;  %v3202_v33 = vld [vmem:[%s2669_s13 + $0xa8] sm:$0xff] }
  0x5f   : > { %2370 = vmatpush1.bf16.msra.mxu1 %v2949_v31  ;;  %2235 = vmatprep.subr.bf16.mxu0 %v4134_v3 }
  0x60   : > { %763 = vmatmul.mubr.f32.gmra.mrb[8].mxu1 %v2878_v4  ;;  %2355 = vmatprep.subr.bf16.mxu1 %v4134_v3  ;;  %v3037_v4 = vsel %vm274_vm0, %v291_v40, %v293_v58  ;;  %v189_v40 = vld [vmem:[%s2669_s13 + $0x88] sm:$0x3]  ;;  %v3137_v58 = vld [vmem:[%s2669_s13 + $0x90] sm:$0xff] }
  0x61   : > { %988 = vmatmul.mubr.f32.gmra.mrb[8].mxu0 %v2968_v36  ;;  %767 = vmatprep.mubr.f32.mxu1 %v2972_v38  ;;  %v416_v9 = vrot.slane %v189_v40, 2  ;;  %v305_v11 = vrot.slane %v3137_v58, 1 }
  0x62   : > { %992 = vmatprep.mubr.f32.mxu0 %v2946_v30  ;;  %2237 = vmatpush1.bf16.msra.mxu0 %v2236_v43  ;;  %v3109_v43 = vpack.c.bf16 %v647_v32, %v646_v29 }
  0x63   : > { %2371 = vmatpush1.bf16.msra.mxu1 %v2979_v47  ;;  %2238 = vmatprep.subr.bf16.mxu0 %v4134_v3 }
  0x64   : > { %768 = vmatmul.mubr.f32.gmra.mrb[10].mxu1 %v2885_v8  ;;  %2356 = vmatprep.subr.bf16.mxu1 %v4134_v3  ;;  %v2242_v8 = vpack.c.bf16 %v611_v63, %v610_v62  ;;  %4206 = vst [vmem:[#allocation3_spill] sm:$0xff] %v3109_v43  ;;  %v2251_v62 = vpack.c.bf16 %v617_v48, %v616_v46  ;;  %v3140_v63 = vld [vmem:[%s2669_s13 + $0x98] sm:$0xff]  ;;  %v622_v46 = vld [vmem:[%s4131_s1 + $0x2c0] sm:$0xff]  ;;  %v623_v48 = vld [vmem:[%s4131_s1 + $0x2c8] sm:$0xff] }
  0x65   : > { %993 = vmatmul.mubr.f32.gmra.mrb[10].mxu0 %v3001_v55  ;;  %772 = vmatprep.mubr.f32.mxu1 %v3004_v56  ;;  %v306_v12 = vrot.slane %v3140_v63, 1  ;;  %v419_v29 = vrot.slane %v3140_v63, 2  ;;  %v2260_v0 = vpack.c.bf16 %v623_v48, %v622_v46  ;;  %v627_v46 = vld [vmem:[%s4131_s1 + $0x2e8] sm:$0xff]  ;;  %v658_v48 = vld [vmem:[%s4131_s1 + $0x3e0] sm:$0xff] }
  0x66   : > { %997 = vmatprep.mubr.f32.mxu0 %v3007_v57  ;;  %2240 = vmatpush1.bf16.msra.mxu0 %v2239_v59  ;;  %v303_v59 = vrot.slane %v189_v40, 1 }
  0x67   : > { %2372 = vmatpush1.bf16.msra.mxu1 %v3014_v61  ;;  %2241 = vmatprep.subr.bf16.mxu0 %v4134_v3  ;;  %v3199_v32 = vsel %vm274_vm0, %v305_v11, %v306_v12  ;;  %v656_v11 = vld [vmem:[%s4131_s1 + $0x3d0] sm:$0xff] }
  0x68   : > { %773 = vmatmul.mubr.f32.gmra.mrb[12].mxu1 %v2942_v27  ;;  %2357 = vmatprep.subr.bf16.mxu1 %v4134_v3  ;;  %v614_v27 = vld [vmem:[%s4131_s1 + $0x280] sm:$0xff] }
  0x69   : > { %998 = vmatmul.mubr.f32.gmra.mrb[12].mxu0 %v3033_v1  ;;  %777 = vmatprep.mubr.f32.mxu1 %v3037_v4  ;;  %v2248_v39 = vpack.c.bf16 %v615_v28, %v614_v27  ;;  %v653_v27 = vld [vmem:[%s4131_s1 + $0x3b8] sm:$0xff]  ;;  %v418_v28 = vrot.slane %v3137_v58, 2 }
  0x6a   : > { %1002 = vmatprep.mubr.f32.mxu0 %v3010_v60  ;;  %2243 = vmatpush1.bf16.msra.mxu0 %v2242_v8  ;;  %v3163_v8 = vsel %vm387_vm1, %v413_v51, %v414_v52 }
  0x6b   : > { %2373 = vmatpush1.bf16.msra.mxu1 %v3044_v10  ;;  %2244 = vmatprep.subr.bf16.mxu0 %v4134_v3  ;;  %v3228_v51 = vsel %vm387_vm1, %v418_v28, %v419_v29 }
  0x6c   : > { %778 = vmatmul.mubr.f32.gmra.mrb[14].mxu1 %v2946_v30  ;;  %2358 = vmatprep.subr.bf16.mxu1 %v4134_v3  ;;  %v3100_v30 = vsel %vm387_vm1, %v408_v17, %v409_v21  ;;  %v3174_v17 = vpack.c.bf16 %v651_v6, %v650_v5  ;;  %v620_v21 = vld [vmem:[%s4131_s1 + $0x2b0] sm:$0xff]  ;;  %4212 = vst [vmem:[#allocation9_spill] sm:$0xff] %v3228_v51 }
  0x6d   : > { %1003 = vmatmul.mubr.f32.gmra.mrb[14].mxu0 %v3063_v16  ;;  %782 = vmatprep.mubr.f32.mxu1 %v3068_v19  ;;  %v3239_v5 = vpack.c.bf16 %v655_v50, %v654_v49  ;;  %v624_v6 = vld [vmem:[%s4131_s1 + $0x2d0] sm:$0xff]  ;;  %v659_v49 = vld [vmem:[%s4131_s1 + $0x3e8] sm:$0xff] }
  0x6e   : > { %1007 = vmatprep.mubr.f32.mxu0 %v3071_v20  ;;  %2246 = vmatpush1.bf16.msra.mxu0 %v2245_v23  ;;  %4209 = vst [vmem:[#allocation6_spill] sm:$0xff] %v3174_v17  ;;  %v652_v23 = vld [vmem:[%s4131_s1 + $0x3b0] sm:$0xff] }
  0x6f   : > { %2374 = vmatpush1.bf16.msra.mxu1 %v3079_v25  ;;  %2247 = vmatprep.subr.bf16.mxu0 %v4134_v3  ;;  %v3209_v40 = vpack.c.bf16 %v653_v27, %v652_v23  ;;  %4213 = vst [vmem:[#allocation10_spill] sm:$0xff] %v3239_v5  ;;  %v3267_v23 = vld [vmem:[%s2669_s13 + $0xc0] sm:$0xff]  ;;  %v313_v27 = vrot.slane %v195_v41, 1 }
  0x70   : > { %783 = vmatmul.mubr.f32.gmra.mrb[16].mxu1 %v3007_v57  ;;  %2359 = vmatprep.subr.bf16.mxu1 %v4134_v3  ;;  %v3134_v57 = vsel %vm274_vm0, %v300_v34, %v301_v37  ;;  %v308_v34 = vrot.slane %v192_v15, 1 }
  0x71   : > { %1008 = vmatmul.mubr.f32.gmra.mrb[16].mxu0 %v3100_v30  ;;  %787 = vmatprep.mubr.f32.mxu1 %v3103_v35  ;;  %4211 = vst [vmem:[#allocation8_spill] sm:$0xff] %v3209_v40 }
  0x72   : > { %1012 = vmatprep.mubr.f32.mxu0 %v3075_v24  ;;  %2249 = vmatpush1.bf16.msra.mxu0 %v2248_v39  ;;  %v3205_v39 = vld [vmem:[%s2669_s13 + $0xb0] sm:$0xff] }
  0x73   : > { %2375 = vmatpush1.bf16.msra.mxu1 %v3109_v43  ;;  %2250 = vmatprep.subr.bf16.mxu0 %v4134_v3  ;;  %v3444_v43 = vld [vmem:[%s2669_s13 + $0x128] sm:$0xff] }
  0x74   : > { %788 = vmatmul.mubr.f32.gmra.mrb[18].mxu1 %v3010_v60  ;;  %2360 = vmatprep.subr.bf16.mxu1 %v4134_v3  ;;  %v3167_v60 = vsel %vm274_vm0, %v301_v37, %v303_v59  ;;  %v2257_v37 = vpack.c.bf16 %v621_v22, %v620_v21  ;;  %v310_v59 = vrot.slane %v3202_v33, 1  ;;  %4233 = vst [vmem:[#allocation29_spill] sm:$0xff] %v3444_v43 }
  0x75   : > { %1013 = vmatmul.mubr.f32.gmra.mrb[18].mxu0 %v3131_v53  ;;  %792 = vmatprep.mubr.f32.mxu1 %v3134_v57  ;;  %4208 = vst [vmem:[#allocation5_spill] sm:$0xff] %v3167_v60 }
  0x76   : > { %1017 = vmatprep.mubr.f32.mxu0 %v3137_v58  ;;  %2252 = vmatpush1.bf16.msra.mxu0 %v2251_v62  ;;  %v311_v62 = vrot.slane %v3205_v39, 1 }
  0x77   : > { %2376 = vmatpush1.bf16.msra.mxu1 %v3144_v44  ;;  %2253 = vmatprep.subr.bf16.mxu0 %v4134_v3 }
  0x78   : > { %793 = vmatmul.mubr.f32.gmra.mrb[20].mxu1 %v3071_v20  ;;  %2361 = vmatprep.subr.bf16.mxu1 %v4134_v3  ;;  %v3196_v20 = vsel %vm387_vm1, %v414_v52, %v416_v9  ;;  %v421_v52 = vrot.slane %v192_v15, 2  ;;  %v625_v9 = vld [vmem:[%s4131_s1 + $0x2d8] sm:$0xff]  ;;  %v424_v15 = vrot.slane %v3205_v39, 2  ;;  %v3264_v22 = vsel %vm274_vm0, %v310_v59, %v311_v62 }
  0x79   : > { %1018 = vmatmul.mubr.f32.gmra.mrb[20].mxu0 %v3163_v8  ;;  %797 = vmatprep.mubr.f32.mxu1 %v3167_v60  ;;  %4210 = vst [vmem:[#allocation7_spill] sm:$0xff] %v3196_v20  ;;  %v2263_v28 = vpack.c.bf16 %v625_v9, %v624_v6  ;;  %v3297_v59 = vsel %vm274_vm0, %v311_v62, %v313_v27  ;;  %v629_v62 = vld [vmem:[%s4131_s1 + $0x2f8] sm:$0xff]  ;;  %v3441_v60 = vld [vmem:[%s2669_s13 + $0x120] sm:$0xff] }
  0x7a   : > { %1022 = vmatprep.mubr.f32.mxu0 %v3140_v63  ;;  %2255 = vmatpush1.bf16.msra.mxu0 %v2254_v14  ;;  %v423_v14 = vrot.slane %v3202_v33, 2  ;;  %v3261_v21 = vsel %vm387_vm1, %v419_v29, %v421_v52  ;;  %v626_v29 = vld [vmem:[%s4131_s1 + $0x2e0] sm:$0xff]  ;;  %v426_v52 = vrot.slane %v195_v41, 2  ;;  %v628_v41 = vld [vmem:[%s4131_s1 + $0x2f0] sm:$0xff]  ;;  %v661_v27 = vld [vmem:[%s4131_s1 + $0x3f8] sm:$0xff]  ;;  %4232 = vst [vmem:[#allocation28_spill] sm:$0xff] %v3441_v60 }
  0x7b   : > { %2377 = vmatpush1.bf16.msra.mxu1 %v3174_v17  ;;  %2256 = vmatprep.subr.bf16.mxu0 %v4134_v3  ;;  %4214 = vst [vmem:[#allocation11_spill] sm:$0xff] %v3261_v21  ;;  %v2266_v9 = vpack.c.bf16 %v627_v46, %v626_v29  ;;  %v428_v29 = vrot.slane %v3267_v23, 2  ;;  %v662_v46 = vld [vmem:[%s4131_s1 + $0x400] sm:$0xff]  ;;  %v3410_v17 = vld [vmem:[%s2669_s13 + $0x108] sm:$0xff] }
  0x7c   : > { %798 = vmatmul.mubr.f32.gmra.mrb[22].mxu1 %v3075_v24  ;;  %2362 = vmatprep.subr.bf16.mxu1 %v4134_v3  ;;  %v3232_v24 = vsel %vm274_vm0, %v306_v12, %v308_v34  ;;  %v657_v12 = vld [vmem:[%s4131_s1 + $0x3d8] sm:$0xff]  ;;  %v3270_v34 = vld [vmem:[%s2669_s13 + $0xc8] sm:$0xff]  ;;  %v3293_v50 = vsel %vm387_vm1, %v423_v14, %v424_v15  ;;  %v660_v14 = vld [vmem:[%s4131_s1 + $0x3f0] sm:$0xff]  ;;  %4226 = vst [vmem:[#allocation22_spill] sm:$0xff] %v3410_v17 }
  0x7d   : > { %1023 = vmatmul.mubr.f32.gmra.mrb[22].mxu0 %v3196_v20  ;;  %802 = vmatprep.mubr.f32.mxu1 %v3199_v32  ;;  %4216 = vst [vmem:[#allocation13_spill] sm:$0xff] %v3293_v50  ;;  %v316_v6 = vrot.slane %v3270_v34, 1  ;;  %v336_v20 = vrot.slane %v3444_v43, 1 }
  0x7e   : > { %1027 = vmatprep.mubr.f32.mxu0 %v3202_v33  ;;  %2258 = vmatpush1.bf16.msra.mxu0 %v2257_v37  ;;  %v3274_v37 = vpack.c.bf16 %v657_v12, %v656_v11  ;;  %v198_v11 = vld [vmem:[%s2669_s13 + $0xd0] sm:$0x3]  ;;  %v3304_v12 = vpack.c.bf16 %v659_v49, %v658_v48  ;;  %v663_v48 = vld [vmem:[%s4131_s1 + $0x408] sm:$0xff] }
  0x7f   : > { %2378 = vmatpush1.bf16.msra.mxu1 %v3209_v40  ;;  %2259 = vmatprep.subr.bf16.mxu0 %v4134_v3  ;;  %v4219_v40 = vmov 0.0|0.0  }
  0x80   : > { %803 = vmatmul.mubr.f32.gmra.mrb[24].mxu1 %v3137_v58  ;;  %2363 = vmatprep.subr.bf16.mxu1 %v4134_v3  ;;  %4215 = vst [vmem:[#allocation12_spill] sm:$0xff] %v3274_v37  ;;  %4217 = vst [vmem:[#allocation14_spill] sm:$0xff] %v3304_v12 }
  0x81   : > { %1028 = vmatmul.mubr.f32.gmra.mrb[24].mxu0 %v3228_v51  ;;  %807 = vmatprep.mubr.f32.mxu1 %v3232_v24  ;;  %v207_v51 = vld [vmem:[%s2669_s13 + $0x118] sm:$0x3] }
  0x82   : > { %1032 = vmatprep.mubr.f32.mxu0 %v3205_v39  ;;  %2261 = vmatpush1.bf16.msra.mxu0 %v2260_v0  ;;  %v315_v0 = vrot.slane %v3267_v23, 1 }
  0x83   : > { %2379 = vmatpush1.bf16.msra.mxu1 %v3239_v5  ;;  %2262 = vmatprep.subr.bf16.mxu0 %v4134_v3  ;;  %v3341_v5 = vld [vmem:[%s2669_s13 + $0xe0] sm:$0xff] }
  0x84   : > { %808 = vmatmul.mubr.f32.gmra.mrb[26].mxu1 %v3140_v63  ;;  %2364 = vmatprep.subr.bf16.mxu1 %v4134_v3  ;;  %v3334_v49 = vsel %vm274_vm0, %v315_v0, %v316_v6  ;;  %v3349_v0 = vpack.c.bf16 %v663_v48, %v662_v46  ;;  %v201_v46 = vld [vmem:[%s2669_s13 + $0xe8] sm:$0x3] }
  0x85   : > { %1033 = vmatmul.mubr.f32.gmra.mrb[26].mxu0 %v3261_v21  ;;  %812 = vmatprep.mubr.f32.mxu1 %v3264_v22  ;;  %v323_v48 = vrot.slane %v201_v46, 1  ;;  %v3413_v21 = vld [vmem:[%s2669_s13 + $0x110] sm:$0xff] }
  0x86   : > { %1037 = vmatprep.mubr.f32.mxu0 %v3267_v23  ;;  %2264 = vmatpush1.bf16.msra.mxu0 %v2263_v28  ;;  %v3323_v28 = vsel %vm387_vm1, %v424_v15, %v426_v52  ;;  %v2269_v15 = vpack.c.bf16 %v629_v62, %v628_v41  ;;  %v3338_v52 = vld [vmem:[%s2669_s13 + $0xd8] sm:$0xff]  ;;  %4227 = vst [vmem:[#allocation23_spill] sm:$0xff] %v3413_v21  ;;  %v331_v44 = vrot.slane %v3413_v21, 1 }
  0x87   : > { %2380 = vmatpush1.bf16.msra.mxu1 %v3274_v37  ;;  %2265 = vmatprep.subr.bf16.mxu0 %v4134_v3  ;;  %4218 = vst [vmem:[#allocation15_spill] sm:$0xff] %v3323_v28  ;;  %v318_v37 = vrot.slane %v198_v11, 1 }
  0x88   : > { %813 = vmatmul.mubr.f32.gmra.mrb[28].mxu1 %v3202_v33  ;;  %2365 = vmatprep.subr.bf16.mxu1 %v4134_v3  ;;  %v429_v3 = vrot.slane %v3270_v34, 2 }
  0x89   : > { %1038 = vmatmul.mubr.f32.gmra.mrb[28].mxu0 %v3293_v50  ;;  %817 = vmatprep.mubr.f32.mxu1 %v3297_v59  ;;  %v3345_v50 = vpack.c.bf16 %v661_v27, %v660_v14  ;;  %v3358_v62 = vsel %vm274_vm0, %v316_v6, %v318_v37  ;;  %v320_v14 = vrot.slane %v3338_v52, 1  ;;  %v321_v27 = vrot.slane %v3341_v5, 1 }
  0x8a   : > { %1042 = vmatprep.mubr.f32.mxu0 %v3270_v34  ;;  %2267 = vmatpush1.bf16.msra.mxu0 %v2266_v9  ;;  %v431_v9 = vrot.slane %v198_v11, 2  ;;  %v3355_v41 = vsel %vm387_vm1, %v428_v29, %v429_v3  ;;  %v433_v37 = vrot.slane %v3338_v52, 2  ;;  %v434_v6 = vrot.slane %v3341_v5, 2 }
  0x8b   : > { %2381 = vmatpush1.bf16.msra.mxu1 %v3304_v12  ;;  %2268 = vmatprep.subr.bf16.mxu0 %v4219_v40  ;;  %4220 = vst [vmem:[#allocation16_spill] sm:$0xff] %v3345_v50  ;;  %4221 = vst [vmem:[#allocation17_spill] sm:$0xff] %v3355_v41  ;;  %v3376_v29 = vsel %vm274_vm0, %v320_v14, %v321_v27 }
  0x8c   : > { %818 = vmatmul.mubr.f32.gmra.mrb[30].mxu1 %v3205_v39  ;;  %2366 = vmatprep.subr.bf16.mxu1 %v4219_v40  ;;  %v3373_v11 = vsel %vm387_vm1, %v429_v3, %v431_v9  ;;  %v3388_v12 = vsel %vm387_vm1, %v433_v37, %v434_v6  ;;  %v3392_v3 = vsel %vm274_vm0, %v321_v27, %v323_v48  ;;  %v436_v9 = vrot.slane %v201_v46, 2 }
  0x8d   : > { %1043 = vmatmul.mubr.f32.gmra.mrb[30].mxu0 %v3323_v28  ;;  %822 = vmatprep.mubr.f32.mxu1 %v3334_v49  ;;  %4222 = vst [vmem:[#allocation18_spill] sm:$0xff] %v3373_v11  ;;  %4224 = vst [vmem:[#allocation20_spill] sm:$0xff] %v3388_v12  ;;  %v204_v28 = vld [vmem:[%s2669_s13 + $0x100] sm:$0x3] }
  0x8e   : > { %1047 = vmatprep.mubr.f32.mxu0 %v3338_v52  ;;  %2270 = vmatpush1.bf16.msra.mxu0 %v2269_v15  ;;  %v3379_v15 = vld [vmem:[%s2669_s13 + $0xf0] sm:$0xff]  ;;  %v3404_v27 = vsel %vm387_vm1, %v434_v6, %v436_v9  ;;  %v328_v48 = vrot.slane %v204_v28, 1  ;;  %v441_v9 = vrot.slane %v204_v28, 2 }
  0x8f   : > { %2382 = vmatpush1.bf16.msra.mxu1 %v3345_v50  ;;  %2271 = vmatprep.subr.bf16.mxu0 %v4219_v40  ;;  %v3382_v50 = vld [vmem:[%s2669_s13 + $0xf8] sm:$0xff]  ;;  %v325_v14 = vrot.slane %v3379_v15, 1  ;;  %v438_v37 = vrot.slane %v3379_v15, 2  ;;  %4225 = vst [vmem:[#allocation21_spill] sm:$0xff] %v3404_v27 }
  0x90   : > { %823 = vmatmul.mubr.f32.gmra.mrb[32].mxu1 %v3267_v23  ;;  %2320 = vmatprep.subr.bf16.mxu1 %v3349_v0  ;;  %4223 = vst [vmem:[#allocation19_spill] sm:$0xff] %v3382_v50 }
  0x91   : > { %1048 = vmatmul.mubr.f32.gmra.mrb[32].mxu0 %v3355_v41  ;;  %827 = vmatprep.mubr.f32.mxu1 %v3358_v62  ;;  %v326_v41 = vrot.slane %v3382_v50, 1 }
  0x92   : > { %1052 = vmatprep.mubr.f32.mxu0 %v3341_v5 }
  0x93   : > { %v3407_v46 = vsel %vm274_vm0, %v325_v14, %v326_v41  ;;  %v3423_v6 = vsel %vm274_vm0, %v326_v41, %v328_v48  ;;  %v330_v14 = vrot.slane %v3410_v17, 1  ;;  %v333_v48 = vrot.slane %v207_v51, 1 }
  0x94   : > { %828 = vmatmul.mubr.f32.gmra.mrb[34].mxu1 %v3270_v34  ;;  %4229 = vst [vmem:[#allocation25_spill] sm:$0xff] %v3423_v6 }
  0x95   : > { %1053 = vmatmul.mubr.f32.gmra.mrb[34].mxu0 %v3373_v11  ;;  %832 = vmatprep.mubr.f32.mxu1 %v3376_v29  ;;  %v439_v11 = vrot.slane %v3382_v50, 2  ;;  %v3438_v41 = vsel %vm274_vm0, %v330_v14, %v331_v44  ;;  %v335_v14 = vrot.slane %v3441_v60, 1 }
  0x96   : > { %1057 = vmatprep.mubr.f32.mxu0 %v3379_v15  ;;  %4231 = vst [vmem:[#allocation27_spill] sm:$0xff] %v3438_v41 }
  0x97   : > { %v3435_v28 = vsel %vm387_vm1, %v439_v11, %v441_v9  ;;  %v446_v9 = vrot.slane %v207_v51, 2  ;;  %v3468_v51 = vsel %vm274_vm0, %v335_v14, %v336_v20 }
  0x98   : > { %833 = vmatmul.mubr.f32.gmra.mrb[36].mxu1 %v3338_v52  ;;  %4230 = vst [vmem:[#allocation26_spill] sm:$0xff] %v3435_v28  ;;  %4237 = vst [vmem:[#allocation33_spill] sm:$0xff] %v3468_v51 }
  0x99   : > { %1058 = vmatmul.mubr.f32.gmra.mrb[36].mxu0 %v3388_v12  ;;  %837 = vmatprep.mubr.f32.mxu1 %v3392_v3  ;;  %v3419_v12 = vsel %vm387_vm1, %v438_v37, %v439_v11  ;;  %v443_v37 = vrot.slane %v3410_v17, 2  ;;  %v3454_v11 = vsel %vm274_vm0, %v331_v44, %v333_v48  ;;  %v449_v48 = vrot.slane %v3444_v43, 2 }
  0x9a   : > { %1062 = vmatprep.mubr.f32.mxu0 %v3382_v50  ;;  %4228 = vst [vmem:[#allocation24_spill] sm:$0xff] %v3419_v12  ;;  %4235 = vst [vmem:[#allocation31_spill] sm:$0xff] %v3454_v11 }
  0x9c   : > { %838 = vmatmul.mubr.f32.gmra.mrb[38].mxu1 %v3341_v5 }
  0x9d   : > { %1063 = vmatmul.mubr.f32.gmra.mrb[38].mxu0 %v3404_v27  ;;  %842 = vmatprep.mubr.f32.mxu1 %v3407_v46  ;;  %v444_v27 = vrot.slane %v3413_v21, 2 }
  0x9e   : > { %1067 = vmatprep.mubr.f32.mxu0 %v3410_v17 }
  0x9f   : > { %v3465_v44 = vsel %vm387_vm1, %v444_v27, %v446_v9 }
  0xa0   : > { %843 = vmatmul.mubr.f32.gmra.mrb[40].mxu1 %v3379_v15  ;;  %4236 = vst [vmem:[#allocation32_spill] sm:$0xff] %v3465_v44 }
  0xa1   : > { %1068 = vmatmul.mubr.f32.gmra.mrb[40].mxu0 %v3419_v12  ;;  %847 = vmatprep.mubr.f32.mxu1 %v3423_v6  ;;  %v3450_v12 = vsel %vm387_vm1, %v443_v37, %v444_v27  ;;  %v448_v37 = vrot.slane %v3441_v60, 2  ;;  %v219_v6 = vld [vmem:[%s2669_s13 + $0x178] sm:$0x3] }
  0xa2   : > { %1072 = vmatprep.mubr.f32.mxu0 %v3413_v21  ;;  %4234 = vst [vmem:[#allocation30_spill] sm:$0xff] %v3450_v12 }
  0xa3   : > { %v3482_v27 = vsel %vm387_vm1, %v448_v37, %v449_v48 }
  0xa4   : > { %848 = vmatmul.mubr.f32.gmra.mrb[42].mxu1 %v3382_v50  ;;  %v210_v50 = vld [vmem:[%s2669_s13 + $0x130] sm:$0x3]  ;;  %4239 = vst [vmem:[#allocation35_spill] sm:$0xff] %v3482_v27 }
  0xa5   : > { %1073 = vmatmul.mubr.f32.gmra.mrb[42].mxu0 %v3435_v28  ;;  %852 = vmatprep.mubr.f32.mxu1 %v3438_v41  ;;  %v338_v28 = vrot.slane %v210_v50, 1  ;;  %v3472_v41 = vld [vmem:[%s2669_s13 + $0x138] sm:$0xff] }
  0xa6   : > { %1077 = vmatprep.mubr.f32.mxu0 %v3441_v60  ;;  %4238 = vst [vmem:[#allocation34_spill] sm:$0xff] %v3472_v41  ;;  %v340_v14 = vrot.slane %v3472_v41, 1 }
  0xa7   : > { %v3485_v9 = vsel %vm274_vm0, %v336_v20, %v338_v28 }
  0xa8   : > { %853 = vmatmul.mubr.f32.gmra.mrb[44].mxu1 %v3410_v17  ;;  %v3475_v17 = vld [vmem:[%s2669_s13 + $0x140] sm:$0xff]  ;;  %4240 = vst [vmem:[#allocation36_spill] sm:$0xff] %v3485_v9 }
  0xa9   : > { %1078 = vmatmul.mubr.f32.gmra.mrb[44].mxu0 %v3450_v12  ;;  %857 = vmatprep.mubr.f32.mxu1 %v3454_v11  ;;  %v451_v12 = vrot.slane %v210_v50, 2  ;;  %v341_v11 = vrot.slane %v3475_v17, 1  ;;  %v453_v50 = vrot.slane %v3472_v41, 2 }
  0xaa   : > { %1082 = vmatprep.mubr.f32.mxu0 %v3444_v43 }
  0xab   : > { %v3497_v20 = vsel %vm387_vm1, %v449_v48, %v451_v12  ;;  %v3500_v28 = vsel %vm274_vm0, %v340_v14, %v341_v11 }
  0xac   : > { %858 = vmatmul.mubr.f32.gmra.mrb[46].mxu1 %v3413_v21  ;;  %v213_v21 = vld [vmem:[%s2669_s13 + $0x148] sm:$0x3]  ;;  %4241 = vst [vmem:[#allocation37_spill] sm:$0xff] %v3497_v20  ;;  %4242 = vst [vmem:[#allocation38_spill] sm:$0xff] %v3500_v28 }
  0xad   : > { %1083 = vmatmul.mubr.f32.gmra.mrb[46].mxu0 %v3465_v44  ;;  %862 = vmatprep.mubr.f32.mxu1 %v3468_v51  ;;  %v454_v44 = vrot.slane %v3475_v17, 2  ;;  %v343_v37 = vrot.slane %v213_v21, 1  ;;  %v3503_v51 = vld [vmem:[%s2669_s13 + $0x150] sm:$0xff]  ;;  %v456_v48 = vrot.slane %v213_v21, 2 }
  0xae   : > { %1087 = vmatprep.mubr.f32.mxu0 %v3472_v41  ;;  %v345_v14 = vrot.slane %v3503_v51, 1 }
  0xaf   : > { %v3516_v12 = vsel %vm274_vm0, %v341_v11, %v343_v37  ;;  %v3528_v21 = vsel %vm387_vm1, %v454_v44, %v456_v48 }
  0xb0   : > { %863 = vmatmul.mubr.f32.gmra.mrb[48].mxu1 %v3441_v60  ;;  %v3506_v60 = vld [vmem:[%s2669_s13 + $0x158] sm:$0xff]  ;;  %4244 = vst [vmem:[#allocation40_spill] sm:$0xff] %v3516_v12  ;;  %4245 = vst [vmem:[#allocation41_spill] sm:$0xff] %v3528_v21 }
  0xb1   : > { %1088 = vmatmul.mubr.f32.gmra.mrb[48].mxu0 %v3482_v27  ;;  %867 = vmatprep.mubr.f32.mxu1 %v3485_v9  ;;  %v3512_v27 = vsel %vm387_vm1, %v453_v50, %v454_v44  ;;  %v346_v9 = vrot.slane %v3506_v60, 1  ;;  %v458_v50 = vrot.slane %v3503_v51, 2 }
  0xb2   : > { %1092 = vmatprep.mubr.f32.mxu0 %v3475_v17  ;;  %4243 = vst [vmem:[#allocation39_spill] sm:$0xff] %v3512_v27 }
  0xb3   : > { %v3531_v11 = vsel %vm274_vm0, %v345_v14, %v346_v9 }
  0xb4   : > { %868 = vmatmul.mubr.f32.gmra.mrb[50].mxu1 %v3444_v43  ;;  %v216_v43 = vld [vmem:[%s2669_s13 + $0x160] sm:$0x3]  ;;  %4246 = vst [vmem:[#allocation42_spill] sm:$0xff] %v3531_v11 }
  0xb5   : > { %1093 = vmatmul.mubr.f32.gmra.mrb[50].mxu0 %v3497_v20  ;;  %872 = vmatprep.mubr.f32.mxu1 %v3500_v28  ;;  %v459_v20 = vrot.slane %v3506_v60, 2  ;;  %v348_v37 = vrot.slane %v216_v43, 1  ;;  %v3534_v28 = vld [vmem:[%s2669_s13 + $0x168] sm:$0xff]  ;;  %v461_v48 = vrot.slane %v216_v43, 2 }
  0xb6   : > { %1097 = vmatprep.mubr.f32.mxu0 %v3503_v51  ;;  %v350_v14 = vrot.slane %v3534_v28, 1 }
  0xb7   : > { %v3547_v44 = vsel %vm274_vm0, %v346_v9, %v348_v37  ;;  %v3558_v9 = vsel %vm387_vm1, %v459_v20, %v461_v48  ;;  %v466_v48 = vrot.slane %v219_v6, 2 }
  0xb8   : > { %873 = vmatmul.mubr.f32.gmra.mrb[52].mxu1 %v3472_v41  ;;  %v3537_v41 = vld [vmem:[%s2669_s13 + $0x170] sm:$0xff]  ;;  %4248 = vst [vmem:[#allocation44_spill] sm:$0xff] %v3558_v9 }
  0xb9   : > { %1098 = vmatmul.mubr.f32.gmra.mrb[52].mxu0 %v3512_v27  ;;  %877 = vmatprep.mubr.f32.mxu1 %v3516_v12  ;;  %v3543_v27 = vsel %vm387_vm1, %v458_v50, %v459_v20  ;;  %v351_v12 = vrot.slane %v3537_v41, 1  ;;  %v463_v50 = vrot.slane %v3534_v28, 2  ;;  %v464_v37 = vrot.slane %v3537_v41, 2 }
  0xba   : > { %1102 = vmatprep.mubr.f32.mxu0 %v3506_v60  ;;  %4247 = vst [vmem:[#allocation43_spill] sm:$0xff] %v3543_v27 }
  0xbb   : > { %v3561_v43 = vsel %vm274_vm0, %v350_v14, %v351_v12  ;;  %v3578_v14 = vld [vmem:[%s2669_s13 + $0x188] sm:$0xff] }
  0xbc   : > { %878 = vmatmul.mubr.f32.gmra.mrb[54].mxu1 %v3475_v17 }
  0xbd   : > { %1103 = vmatmul.mubr.f32.gmra.mrb[54].mxu0 %v3528_v21  ;;  %882 = vmatprep.mubr.f32.mxu1 %v3531_v11  ;;  %v353_v21 = vrot.slane %v219_v6, 1  ;;  %v3565_v11 = vld [vmem:[%s2669_s13 + $0x180] sm:$0xff]  ;;  %v664_v6 = vld [vmem:[%s4131_s1 + $0x410] sm:$0xff] }
  0xbe   : > { %1107 = vmatprep.mubr.f32.mxu0 %v3534_v28 }
  0xbf   : > { %v3575_v20 = vsel %vm274_vm0, %v351_v12, %v353_v21  ;;  %v665_v12 = vld [vmem:[%s4131_s1 + $0x418] sm:$0xff] }
  0xc0   : > { %883 = vmatmul.mubr.f32.gmra.mrb[56].mxu1 %v3503_v51  ;;  %v2323_v21 = vpack.c.bf16 %v665_v12, %v664_v6  ;;  %v4255_v6 = vld [vmem:[#allocation9_spill] sm:$0xff]  ;;  %v4256_v12 = vld [vmem:[#allocation4_spill] sm:$0xff] }
  0xc1   : > { %1108 = vmatmul.mubr.f32.gmra.mrb[56].mxu0 %v3543_v27  ;;  %887 = vmatprep.mubr.f32.mxu1 %v3547_v44  ;;  %v3572_v27 = vsel %vm387_vm1, %v463_v50, %v464_v37  ;;  %v666_v50 = vld [vmem:[%s4131_s1 + $0x420] sm:$0xff] }
  0xc2   : > { %1112 = vmatprep.mubr.f32.mxu0 %v3537_v41 }
  0xc4   : > { %888 = vmatmul.mubr.f32.gmra.mrb[58].mxu1 %v3506_v60 }
  0xc5   : > { %1113 = vmatmul.mubr.f32.gmra.mrb[58].mxu0 %v3558_v9  ;;  %892 = vmatprep.mubr.f32.mxu1 %v3561_v43  ;;  %v3585_v9 = vsel %vm387_vm1, %v464_v37, %v466_v48  ;;  %v667_v37 = vld [vmem:[%s4131_s1 + $0x428] sm:$0xff]  ;;  %v677_v48 = vld [vmem:[%s4131_s1 + $0x478] sm:$0xff] }
  0xc6   : > { %1117 = vmatprep.mubr.f32.mxu0 %v3565_v11 }
  0xc8   : > { %893 = vmatmul.mubr.f32.gmra.mrb[60].mxu1 %v3534_v28 }
  0xc9   : > { %1118 = vmatmul.mubr.f32.gmra.mrb[60].mxu0 %v3572_v27  ;;  %897 = vmatprep.mubr.f32.mxu1 %v3575_v20 }
  0xca   : > { %1122 = vmatprep.mubr.f32.mxu0 %v3578_v14 }
  0xcc   : > { %898 = vmatmul.mubr.f32.gmra.mrb[62].mxu1 %v3537_v41 }
  0xcd   : > { %1123 = vmatmul.mubr.f32.gmra.mrb[62].mxu0 %v3585_v9  ;;  %1457 = vmatprep.mubr.f32.mxu1 %v3199_v32 }
  0xce   : > { %1192 = vmatprep.mubr.f32.mxu0 %v2903_v13  ;;  %v668_v13 = vld [vmem:[%s4131_s1 + $0x430] sm:$0xff] }
  0xd0   : > { %1458 = vmatmul.mubr.f32.vlgmr.msra.gmra.mrb[64].mxu1 %v3137_v58  ;;  %v671_v58 = vld [vmem:[%s4131_s1 + $0x448] sm:$0xff] }
  0xd1   : > { %1193 = vmatmul.mubr.f32.vlgmr.msra.gmra.mrb[0].mxu0 %v2875_v2  ;;  %2322 = vmatpush3.bf16.msra.mxu1 %v3349_v0  ;;  %v2327_v2 = vpack.c.bf16 %v667_v37, %v666_v50  ;;  %v675_v0 = vld [vmem:[%s4131_s1 + $0x468] sm:$0xff]  ;;  %v4259_v50 = vld [vmem:[#allocation11_spill] sm:$0xff]  ;;  %v4260_v37 = vld [vmem:[#allocation6_spill] sm:$0xff] }
  0xd2   : > { %2273 = vmatpush1.bf16.msra.mxu0 %v2846_v54  ;;  %1197 = vmatprep.mubr.f32.mxu0 %v2936_v45  ;;  %v669_v54 = vld [vmem:[%s4131_s1 + $0x438] sm:$0xff]  ;;  %v670_v45 = vld [vmem:[%s4131_s1 + $0x440] sm:$0xff] }
  0xd3   : > { %1462 = vmatprep.mubr.f32.mxu1 %v3232_v24  ;;  %2274 = vmatprep.subr.bf16.mxu0 %v4219_v40 }
  0xd4   : > { %1463 = vmatmul.mubr.f32.gmra.mrb[66].mxu1 %v3140_v63  ;;  %2324 = vmatprep.subr.bf16.mxu1 %v2323_v21  ;;  %v672_v63 = vld [vmem:[%s4131_s1 + $0x450] sm:$0xff] }
  0xd5   : > { %1198 = vmatmul.mubr.f32.gmra.mrb[2].mxu0 %v2907_v42  ;;  %1467 = vmatprep.mubr.f32.mxu1 %v3264_v22  ;;  %v2331_v42 = vpack.c.bf16 %v669_v54, %v668_v13  ;;  %v4262_v13 = vld [vmem:[#allocation33_spill] sm:$0xff] }
  0xd6   : > { %1202 = vmatprep.mubr.f32.mxu0 %v2968_v36  ;;  %2276 = vmatpush1.bf16.msra.mxu0 %v2882_v7  ;;  %v2335_v7 = vpack.c.bf16 %v671_v58, %v670_v45  ;;  %v4263_v54 = vld [vmem:[#allocation13_spill] sm:$0xff]  ;;  %v4266_v45 = vld [vmem:[#allocation36_spill] sm:$0xff]  ;;  %v4267_v58 = vld [vmem:[#allocation15_spill] sm:$0xff] }
  0xd7   : > { %2326 = vmatpush3.bf16.msra.mxu1 %v2323_v21  ;;  %2277 = vmatprep.subr.bf16.mxu0 %v4219_v40  ;;  %v4258_v21 = vld [vmem:[#allocation31_spill] sm:$0xff] }
  0xd8   : > { %1468 = vmatmul.mubr.f32.gmra.mrb[68].mxu1 %v3202_v33  ;;  %2328 = vmatprep.subr.bf16.mxu1 %v2327_v2  ;;  %v673_v33 = vld [vmem:[%s4131_s1 + $0x458] sm:$0xff] }
  0xd9   : > { %1203 = vmatmul.mubr.f32.gmra.mrb[4].mxu0 %v2939_v26  ;;  %1472 = vmatprep.mubr.f32.mxu1 %v3297_v59 }
  0xda   : > { %1207 = vmatprep.mubr.f32.mxu0 %v3001_v55  ;;  %2279 = vmatpush1.bf16.msra.mxu0 %v2913_v18  ;;  %v2339_v18 = vpack.c.bf16 %v673_v33, %v672_v63  ;;  %v4270_v63 = vld [vmem:[#allocation38_spill] sm:$0xff]  ;;  %v4271_v33 = vld [vmem:[#allocation17_spill] sm:$0xff] }
  0xdb   : > { %2280 = vmatprep.subr.bf16.mxu0 %v4219_v40  ;;  %2330 = vmatpush3.bf16.msra.mxu1 %v2327_v2  ;;  %v4261_v2 = vld [vmem:[#allocation23_spill] sm:$0xff] }
  0xdc   : > { %1473 = vmatmul.mubr.f32.gmra.mrb[70].mxu1 %v3205_v39  ;;  %2332 = vmatprep.subr.bf16.mxu1 %v2331_v42  ;;  %v674_v39 = vld [vmem:[%s4131_s1 + $0x460] sm:$0xff] }
  0xdd   : > { %1208 = vmatmul.mubr.f32.gmra.mrb[6].mxu0 %v2972_v38  ;;  %1477 = vmatprep.mubr.f32.mxu1 %v3334_v49 }
  0xde   : > { %1212 = vmatprep.mubr.f32.mxu0 %v3033_v1  ;;  %2282 = vmatpush1.bf16.msra.mxu0 %v2949_v31  ;;  %v2343_v31 = vpack.c.bf16 %v675_v0, %v674_v39  ;;  %v4274_v39 = vld [vmem:[#allocation40_spill] sm:$0xff]  ;;  %v4275_v0 = vld [vmem:[#allocation18_spill] sm:$0xff] }
  0xdf   : > { %2283 = vmatprep.subr.bf16.mxu0 %v4219_v40  ;;  %2334 = vmatpush3.bf16.msra.mxu1 %v2331_v42  ;;  %v4264_v42 = vld [vmem:[#allocation8_spill] sm:$0xff] }
  0xe0   : > { %1478 = vmatmul.mubr.f32.gmra.mrb[72].mxu1 %v3267_v23  ;;  %2336 = vmatprep.subr.bf16.mxu1 %v2335_v7  ;;  %v676_v23 = vld [vmem:[%s4131_s1 + $0x470] sm:$0xff] }
  0xe1   : > { %1213 = vmatmul.mubr.f32.gmra.mrb[8].mxu0 %v3004_v56  ;;  %1482 = vmatprep.mubr.f32.mxu1 %v3358_v62 }
  0xe2   : > { %1217 = vmatprep.mubr.f32.mxu0 %v3063_v16  ;;  %2285 = vmatpush1.bf16.msra.mxu0 %v2979_v47  ;;  %v2347_v47 = vpack.c.bf16 %v677_v48, %v676_v23  ;;  %v4278_v23 = vld [vmem:[#allocation20_spill] sm:$0xff] }
  0xe3   : > { %2286 = vmatprep.subr.bf16.mxu0 %v4219_v40  ;;  %2338 = vmatpush3.bf16.msra.mxu1 %v2335_v7  ;;  %v4268_v7 = vld [vmem:[#allocation10_spill] sm:$0xff]  ;;  %v4279_v48 = vld [vmem:[#allocation16_spill] sm:$0xff] }
  0xe4   : > { %1483 = vmatmul.mubr.f32.gmra.mrb[74].mxu1 %v3270_v34  ;;  %2340 = vmatprep.subr.bf16.mxu1 %v2339_v18  ;;  %v4252_v34 = vld [vmem:[#allocation19_spill] sm:$0xff] }
  0xe5   : > { %1218 = vmatmul.mubr.f32.gmra.mrb[10].mxu0 %v3037_v4  ;;  %1487 = vmatprep.mubr.f32.mxu1 %v3376_v29 }
  0xe6   : > { %1222 = vmatprep.mubr.f32.mxu0 %v3100_v30  ;;  %2288 = vmatpush1.bf16.msra.mxu0 %v3014_v61  ;;  %v4249_v61 = vld [vmem:[#allocation25_spill] sm:$0xff] }
  0xe7   : > { %2289 = vmatprep.subr.bf16.mxu0 %v4219_v40  ;;  %2342 = vmatpush3.bf16.msra.mxu1 %v2339_v18  ;;  %v4272_v18 = vld [vmem:[#allocation12_spill] sm:$0xff] }
  0xe8   : > { %1488 = vmatmul.mubr.f32.gmra.mrb[76].mxu1 %v3338_v52  ;;  %2344 = vmatprep.subr.bf16.mxu1 %v2343_v31  ;;  %v4253_v52 = vld [vmem:[#allocation5_spill] sm:$0xff] }
  0xe9   : > { %1223 = vmatmul.mubr.f32.gmra.mrb[12].mxu0 %v3068_v19  ;;  %1492 = vmatprep.mubr.f32.mxu1 %v3392_v3 }
  0xea   : > { %1227 = vmatprep.mubr.f32.mxu0 %v3131_v53  ;;  %2291 = vmatpush1.bf16.msra.mxu0 %v3044_v10  ;;  %v4250_v10 = vld [vmem:[#allocation7_spill] sm:$0xff] }
  0xeb   : > { %2292 = vmatprep.subr.bf16.mxu0 %v4219_v40  ;;  %2346 = vmatpush3.bf16.msra.mxu1 %v2343_v31  ;;  %v4276_v31 = vld [vmem:[#allocation14_spill] sm:$0xff] }
  0xec   : > { %1493 = vmatmul.mubr.f32.gmra.mrb[78].mxu1 %v3341_v5  ;;  %2348 = vmatprep.subr.bf16.mxu1 %v2347_v47  ;;  %v4251_v5 = vld [vmem:[#allocation3_spill] sm:$0xff] }
  0xed   : > { %1228 = vmatmul.mubr.f32.gmra.mrb[14].mxu0 %v3103_v35  ;;  %1497 = vmatprep.mubr.f32.mxu1 %v3407_v46 }
  0xee   : > { %1232 = vmatprep.mubr.f32.mxu0 %v3163_v8  ;;  %2294 = vmatpush1.bf16.msra.mxu0 %v3079_v25  ;;  %v4254_v25 = vld [vmem:[#allocation27_spill] sm:$0xff] }
  0xef   : > { %2295 = vmatprep.subr.bf16.mxu0 %v4219_v40  ;;  %2350 = vmatpush3.bf16.msra.mxu1 %v2347_v47  ;;  %v3751_v47 = vld [vmem:[%s2669_s13 + $0x198] sm:$0xff] }
  0xf0   : > { %1498 = vmatmul.mubr.f32.gmra.mrb[80].mxu1 %v3379_v15  ;;  %v4257_v15 = vld [vmem:[#allocation22_spill] sm:$0xff] }
  0xf1   : > { %1233 = vmatmul.mubr.f32.gmra.mrb[16].mxu0 %v3134_v57  ;;  %1502 = vmatprep.mubr.f32.mxu1 %v4249_v61 }
  0xf2   : > { %1237 = vmatprep.mubr.f32.mxu0 %v4250_v10  ;;  %2297 = vmatpush1.bf16.msra.mxu0 %v4251_v5  ;;  %v3754_v5 = vld [vmem:[%s2669_s13 + $0x1a0] sm:$0xff] }
  0xf3   : > { %2298 = vmatprep.subr.bf16.mxu0 %v4219_v40 }
  0xf4   : > { %1503 = vmatmul.mubr.f32.gmra.mrb[82].mxu1 %v4252_v34  ;;  %v520_v34 = vrot.slane %v3751_v47, 1 }
  0xf5   : > { %1238 = vmatmul.mubr.f32.gmra.mrb[18].mxu0 %v4253_v52  ;;  %1507 = vmatprep.mubr.f32.mxu1 %v4254_v25 }
  0xf6   : > { %1242 = vmatprep.mubr.f32.mxu0 %v4255_v6  ;;  %2300 = vmatpush1.bf16.msra.mxu0 %v4256_v12  ;;  %v521_v12 = vrot.slane %v3754_v5, 1 }
  0xf7   : > { %2301 = vmatprep.subr.bf16.mxu0 %v4219_v40 }
  0xf8   : > { %1508 = vmatmul.mubr.f32.gmra.mrb[84].mxu1 %v4257_v15  ;;  %v3766_v15 = vld [vmem:[%s2669_s13 + $0x1a8] sm:$0x3] }
  0xf9   : > { %1243 = vmatmul.mubr.f32.gmra.mrb[20].mxu0 %v3199_v32  ;;  %1512 = vmatprep.mubr.f32.mxu1 %v4258_v21  ;;  %v4265_v32 = vld [vmem:[#allocation28_spill] sm:$0xff] }
  0xfa   : > { %1247 = vmatprep.mubr.f32.mxu0 %v4259_v50  ;;  %2303 = vmatpush1.bf16.msra.mxu0 %v4260_v37  ;;  %v523_v37 = vrot.slane %v3766_v15, 1 }
  0xfb   : > { %2304 = vmatprep.subr.bf16.mxu0 %v4219_v40 }
  0xfc   : > { %1513 = vmatmul.mubr.f32.gmra.mrb[86].mxu1 %v4261_v2 }
  0xfd   : > { %1248 = vmatmul.mubr.f32.gmra.mrb[22].mxu0 %v3232_v24  ;;  %1517 = vmatprep.mubr.f32.mxu1 %v4262_v13  ;;  %v4269_v24 = vld [vmem:[#allocation29_spill] sm:$0xff] }
  0xfe   : > { %1252 = vmatprep.mubr.f32.mxu0 %v4263_v54  ;;  %2306 = vmatpush1.bf16.msra.mxu0 %v4264_v42 }
  0xff   : > { %2307 = vmatprep.subr.bf16.mxu0 %v4219_v40 }
 0x100   : > { %1518 = vmatmul.mubr.f32.gmra.mrb[88].mxu1 %v4265_v32  ;;  %v4285_v32 = vld [vmem:[#allocation35_spill] sm:$0xff] }
 0x101   : > { %1253 = vmatmul.mubr.f32.gmra.mrb[24].mxu0 %v3264_v22  ;;  %1522 = vmatprep.mubr.f32.mxu1 %v4266_v45  ;;  %v4273_v22 = vld [vmem:[#allocation34_spill] sm:$0xff] }
 0x102   : > { %1257 = vmatprep.mubr.f32.mxu0 %v4267_v58  ;;  %2309 = vmatpush1.bf16.msra.mxu0 %v4268_v7 }
 0x103   : > { %2310 = vmatprep.subr.bf16.mxu0 %v4219_v40 }
 0x104   : > { %1523 = vmatmul.mubr.f32.gmra.mrb[90].mxu1 %v4269_v24 }
 0x105   : > { %1258 = vmatmul.mubr.f32.gmra.mrb[26].mxu0 %v3297_v59  ;;  %1527 = vmatprep.mubr.f32.mxu1 %v4270_v63  ;;  %v4277_v59 = vld [vmem:[#allocation42_spill] sm:$0xff] }
 0x106   : > { %1262 = vmatprep.mubr.f32.mxu0 %v4271_v33  ;;  %2312 = vmatpush1.bf16.msra.mxu0 %v4272_v18  ;;  %v4286_v18 = vld [vmem:[#allocation37_spill] sm:$0xff] }
 0x107   : > { %2313 = vmatprep.subr.bf16.mxu0 %v4219_v40 }
 0x108   : > { %1528 = vmatmul.mubr.f32.gmra.mrb[92].mxu1 %v4273_v22 }
 0x109   : > { %1263 = vmatmul.mubr.f32.gmra.mrb[28].mxu0 %v3334_v49  ;;  %1532 = vmatprep.mubr.f32.mxu1 %v4274_v39  ;;  %v4280_v49 = vld [vmem:[#allocation21_spill] sm:$0xff] }
 0x10a   : > { %1267 = vmatprep.mubr.f32.mxu0 %v4275_v0  ;;  %2315 = vmatpush1.bf16.msra.mxu0 %v4276_v31  ;;  %v4287_v31 = vld [vmem:[#allocation39_spill] sm:$0xff] }
 0x10b   : > { %2316 = vmatprep.subr.bf16.mxu0 %v4219_v40  ;;  %v503_v40 = vrot.slane %v3565_v11, 1 }
 0x10c   : > { %1533 = vmatmul.mubr.f32.gmra.mrb[94].mxu1 %v3475_v17  ;;  %v4281_v17 = vld [vmem:[#allocation24_spill] sm:$0xff] }
 0x10d   : > { %1268 = vmatmul.mubr.f32.gmra.mrb[30].mxu0 %v3358_v62  ;;  %1537 = vmatprep.mubr.f32.mxu1 %v4277_v59  ;;  %v504_v62 = vrot.slane %v3578_v14, 1 }
 0x10e   : > { %1272 = vmatprep.mubr.f32.mxu0 %v4278_v23  ;;  %2318 = vmatpush1.bf16.msra.mxu0 %v4279_v48 }
 0x110   : > { %1538 = vmatmul.mubr.f32.gmra.mrb[96].mxu1 %v3503_v51  ;;  %v3740_v51 = vld [vmem:[%s2669_s13 + $0x190] sm:$0x3] }
 0x111   : > { %1273 = vmatmul.mubr.f32.gmra.mrb[32].mxu0 %v3376_v29  ;;  %1542 = vmatprep.mubr.f32.mxu1 %v3547_v44  ;;  %v3747_v29 = vsel %vm274_vm0, %v503_v40, %v504_v62 }
 0x112   : > { %1277 = vmatprep.mubr.f32.mxu0 %v4280_v49 }
 0x114   : > { %1543 = vmatmul.mubr.f32.gmra.mrb[98].mxu1 %v3506_v60  ;;  %v4282_v60 = vld [vmem:[#allocation26_spill] sm:$0xff] }
 0x115   : > { %1278 = vmatmul.mubr.f32.gmra.mrb[34].mxu0 %v3392_v3  ;;  %1547 = vmatprep.mubr.f32.mxu1 %v3561_v43  ;;  %v506_v3 = vrot.slane %v3740_v51, 1 }
 0x116   : > { %1282 = vmatprep.mubr.f32.mxu0 %v4281_v17 }
 0x118   : > { %1548 = vmatmul.mubr.f32.gmra.mrb[100].mxu1 %v3534_v28  ;;  %v3761_v28 = vsel %vm274_vm0, %v504_v62, %v506_v3 }
 0x119   : > { %1283 = vmatmul.mubr.f32.gmra.mrb[36].mxu0 %v3407_v46  ;;  %1552 = vmatprep.mubr.f32.mxu1 %v3575_v20  ;;  %v4283_v46 = vld [vmem:[#allocation30_spill] sm:$0xff] }
 0x11a   : > { %1287 = vmatprep.mubr.f32.mxu0 %v4282_v60 }
 0x11c   : > { %1553 = vmatmul.mubr.f32.gmra.mrb[102].mxu1 %v3537_v41  ;;  %v4284_v41 = vld [vmem:[#allocation32_spill] sm:$0xff] }
 0x11d   : > { %1288 = vmatmul.mubr.f32.gmra.mrb[38].mxu0 %v4249_v61  ;;  %1557 = vmatprep.mubr.f32.mxu1 %v3747_v29  ;;  %v522_v61 = vsel %vm274_vm0, %v520_v34, %v521_v12  ;;  %v528_v34 = vrot.slane %v3754_v5, 2 }
 0x11e   : > { %1292 = vmatprep.mubr.f32.mxu0 %v4283_v46 }
 0x120   : > { %1558 = vmatmul.mubr.f32.gmra.mrb[104].mxu1 %v3565_v11 }
 0x121   : > { %1293 = vmatmul.mubr.f32.gmra.mrb[40].mxu0 %v4254_v25  ;;  %1562 = vmatprep.mubr.f32.mxu1 %v3761_v28  ;;  %v524_v25 = vsel %vm274_vm0, %v521_v12, %v523_v37 }
 0x122   : > { %1297 = vmatprep.mubr.f32.mxu0 %v4284_v41 }
 0x123   : > { %v3774_v2 = vpop.f32.mrb[0].mxu1 }
 0x124   : > { %1563 = vmatmul.mubr.f32.gmra.mrb[106].mxu1 %v3578_v14  ;;  %v746_v42 = vpop.f32.mrb[1].mxu1 }
 0x125   : > { %1298 = vmatmul.mubr.f32.gmra.mrb[42].mxu0 %v4258_v21  ;;  %1567 = vmatprep.mubr.f32.mxu1 %v522_v61  ;;  %v530_v61 = vrot.slane %v3766_v15, 2  ;;  %v2536_v15 = vld [vmem:[%s2669_s13 + $0x80] sm:$0xff] }
 0x126   : > { %1302 = vmatprep.mubr.f32.mxu0 %v4285_v32 }
 0x127   : > { %v3780_v7 = vpop.f32.mrb[2].mxu1 }
 0x128   : > { %1568 = vmatmul.mubr.f32.gmra.mrb[108].mxu1 %v3751_v47  ;;  %v751_v24 = vpop.f32.mrb[3].mxu1 }
 0x129   : > { %1303 = vmatmul.mubr.f32.gmra.mrb[44].mxu0 %v4262_v13  ;;  %1572 = vmatprep.mubr.f32.mxu1 %v524_v25  ;;  %v4288_v13 = vld [vmem:[#allocation41_spill] sm:$0xff] }
 0x12a   : > { %1307 = vmatprep.mubr.f32.mxu0 %v4286_v18 }
 0x12b   : > { %v3785_v22 = vpop.f32.mrb[4].mxu1 }
 0x12c   : > { %1573 = vmatmul.mubr.f32.gmra.mrb[110].mxu1 %v3754_v5  ;;  %v756_v21 = vpop.f32.mrb[5].mxu1  ;;  %v2535_v5 = vld [vmem:[%s2669_s13 + $0x78] sm:$0xff] }
 0x12d   : > { %1308 = vmatmul.mubr.f32.gmra.mrb[46].mxu0 %v4266_v45  ;;  %2079 = vmatprep.mubr.f32.mxu1 %v2968_v36  ;;  %v4289_v36 = vld [vmem:[#allocation43_spill] sm:$0xff] }
 0x12e   : > { %1312 = vmatprep.mubr.f32.mxu0 %v4287_v31 }
 0x12f   : > { %v3791_v48 = vpop.f32.mrb[6].mxu1 }
 0x130   : > { %2080 = vmatmul.mubr.f32.vlgmr.msra.gmra.mrb[112].mxu1 %v3001_v55  ;;  %v761_v40 = vpop.f32.mrb[7].mxu1 }
 0x131   : > { %1313 = vmatmul.mubr.f32.gmra.mrb[48].mxu0 %v4270_v63  ;;  %2082 = vmatprep.mubr.f32.mxu1 %v3033_v1  ;;  %v4290_v1 = vld [vmem:[#allocation44_spill] sm:$0xff] }
 0x132   : > { %1317 = vmatprep.mubr.f32.mxu0 %v4288_v13 }
 0x133   : > { %v3797_v62 = vpop.f32.mrb[8].mxu1 }
 0x134   : > { %2083 = vmatmul.mubr.f32.gmra.mrb[114].mxu1 %v3063_v16  ;;  %v766_v45 = vpop.f32.mrb[9].mxu1 }
 0x135   : > { %1318 = vmatmul.mubr.f32.gmra.mrb[50].mxu0 %v4274_v39  ;;  %2085 = vmatprep.mubr.f32.mxu1 %v3100_v30  ;;  %v511_v39 = vrot.slane %v3578_v14, 2 }
 0x136   : > { %1322 = vmatprep.mubr.f32.mxu0 %v4289_v36 }
 0x137   : > { %v3803_v3 = vpop.f32.mrb[10].mxu1 }
 0x138   : > { %2086 = vmatmul.mubr.f32.gmra.mrb[116].mxu1 %v3131_v53  ;;  %v771_v55 = vpop.f32.mrb[11].mxu1  ;;  %v510_v53 = vrot.slane %v3565_v11, 2 }
 0x139   : > { %1323 = vmatmul.mubr.f32.gmra.mrb[52].mxu0 %v4277_v59  ;;  %2088 = vmatprep.mubr.f32.mxu1 %v3163_v8 }
 0x13a   : > { %1327 = vmatprep.mubr.f32.mxu0 %v4290_v1 }
 0x13b   : > { %v3809_v63 = vpop.f32.mrb[12].mxu1 }
 0x13c   : > { %2089 = vmatmul.mubr.f32.gmra.mrb[118].mxu1 %v4250_v10  ;;  %v776_v16 = vpop.f32.mrb[13].mxu1  ;;  %v512_v10 = vsel %vm387_vm1, %v510_v53, %v511_v39 }
 0x13d   : > { %1328 = vmatmul.mubr.f32.gmra.mrb[54].mxu0 %v3547_v44  ;;  %2091 = vmatprep.mubr.f32.mxu1 %v4255_v6  ;;  %v513_v6 = vrot.slane %v3740_v51, 2  ;;  %v2531_v51 = vld [vmem:[%s2669_s13 + $0x48] sm:$0xff] }
 0x13e   : > { %1332 = vmatprep.mubr.f32.mxu0 %v3572_v27 }
 0x13f   : > { %v3815_v30 = vpop.f32.mrb[14].mxu1 }
 0x140   : > { %2092 = vmatmul.mubr.f32.gmra.mrb[120].mxu1 %v4259_v50  ;;  %v781_v8 = vpop.f32.mrb[15].mxu1 }
 0x141   : > { %1333 = vmatmul.mubr.f32.gmra.mrb[56].mxu0 %v3561_v43  ;;  %2094 = vmatprep.mubr.f32.mxu1 %v4263_v54  ;;  %v514_v43 = vsel %vm387_vm1, %v511_v39, %v513_v6 }
 0x142   : > { %1337 = vmatprep.mubr.f32.mxu0 %v3585_v9 }
 0x143   : > { %v3823_v44 = vpop.f32.mrb[16].mxu1 }
 0x144   : > { %2095 = vmatmul.mubr.f32.gmra.mrb[122].mxu1 %v4267_v58  ;;  %v786_v11 = vpop.f32.mrb[17].mxu1 }
 0x145   : > { %1338 = vmatmul.mubr.f32.gmra.mrb[58].mxu0 %v3575_v20  ;;  %2097 = vmatprep.mubr.f32.mxu1 %v4271_v33 }
 0x146   : > { %1342 = vmatprep.mubr.f32.mxu0 %v512_v10 }
 0x147   : > { %v3830_v14 = vpop.f32.mrb[18].mxu1 }
 0x148   : > { %2098 = vmatmul.mubr.f32.gmra.mrb[124].mxu1 %v4275_v0  ;;  %v791_v50 = vpop.f32.mrb[19].mxu1  ;;  %v2529_v0 = vld [vmem:[%s2669_s13 + $0x30] sm:$0xff] }
 0x149   : > { %1343 = vmatmul.mubr.f32.gmra.mrb[60].mxu0 %v3747_v29  ;;  %2100 = vmatprep.mubr.f32.mxu1 %v4278_v23  ;;  %v2532_v29 = vld [vmem:[%s2669_s13 + $0x50] sm:$0xff] }
 0x14a   : > { %1347 = vmatprep.mubr.f32.mxu0 %v514_v43 }
 0x14b   : > { %v3836_v54 = vpop.f32.mrb[20].mxu1 }
 0x14c   : > { %2101 = vmatmul.mubr.f32.gmra.mrb[126].mxu1 %v4280_v49  ;;  %v796_v20 = vpop.f32.mrb[21].mxu1  ;;  %v2530_v49 = vld [vmem:[%s2669_s13 + $0x38] sm:$0xff] }
 0x14d   : > { %1348 = vmatmul.mubr.f32.gmra.mrb[62].mxu0 %v3761_v28  ;;  %2103 = vmatprep.mubr.f32.mxu1 %v4281_v17  ;;  %v2533_v28 = vld [vmem:[%s2669_s13 + $0x60] sm:$0xff] }
 0x14e   : > { %1417 = vmatprep.mubr.f32.mxu0 %v2939_v26 }
 0x14f   : > { %v3842_v58 = vpop.f32.mrb[22].mxu1 }
 0x150   : > { %2104 = vmatmul.mubr.f32.gmra.mrb[128].mxu1 %v4282_v60  ;;  %v801_v33 = vpop.f32.mrb[23].mxu1 }
 0x151   : > { %1418 = vmatmul.mubr.f32.vlgmr.msra.gmra.mrb[0].mxu0 %v2529_v0  ;;  %2106 = vmatprep.mubr.f32.mxu1 %v4283_v46 }
 0x152   : > { %1422 = vmatprep.mubr.f32.mxu0 %v2972_v38 }
 0x153   : > { %v3848_v59 = vpop.f32.mrb[24].mxu1 }
 0x154   : > { %2107 = vmatmul.mubr.f32.gmra.mrb[130].mxu1 %v4284_v41  ;;  %v806_v23 = vpop.f32.mrb[25].mxu1  ;;  %v2534_v41 = vld [vmem:[%s2669_s13 + $0x68] sm:$0xff]  ;;  %s1803_s13 = sld [smem:[#allocation2]] }
 0x155   : > { %1423 = vmatmul.mubr.f32.gmra.mrb[2].mxu0 %v2530_v49  ;;  %2109 = vmatprep.mubr.f32.mxu1 %v4285_v32 }
 0x156   : > { %1427 = vmatprep.mubr.f32.mxu0 %v3004_v56 }
 0x157   : > { %v3854_v26 = vpop.f32.mrb[26].mxu1 }
 0x158   : > { %2110 = vmatmul.mubr.f32.gmra.mrb[132].mxu1 %v4286_v18  ;;  %v811_v17 = vpop.f32.mrb[27].mxu1 }
 0x159   : > { %1428 = vmatmul.mubr.f32.gmra.mrb[4].mxu0 %v2531_v51  ;;  %2112 = vmatprep.mubr.f32.mxu1 %v4287_v31 }
 0x15a   : > { %1432 = vmatprep.mubr.f32.mxu0 %v3037_v4  ;;  %v527_v4 = vrot.slane %v3751_v47, 2 }
 0x15b   : > { %v3860_v38 = vpop.f32.mrb[28].mxu1 }
 0x15c   : > { %2113 = vmatmul.mubr.f32.gmra.mrb[134].mxu1 %v4288_v13  ;;  %v816_v60 = vpop.f32.mrb[29].mxu1 }
 0x15d   : > { %1433 = vmatmul.mubr.f32.gmra.mrb[6].mxu0 %v2532_v29  ;;  %2115 = vmatprep.mubr.f32.mxu1 %v4289_v36 }
 0x15e   : > { %1437 = vmatprep.mubr.f32.mxu0 %v3068_v19 }
 0x15f   : > { %v3866_v56 = vpop.f32.mrb[30].mxu1 }
 0x160   : > { %2116 = vmatmul.mubr.f32.gmra.mrb[136].mxu1 %v4290_v1  ;;  %v821_v46 = vpop.f32.mrb[31].mxu1 }
 0x161   : > { %1438 = vmatmul.mubr.f32.gmra.mrb[8].mxu0 %v2533_v28  ;;  %2118 = vmatprep.mubr.f32.mxu1 %v3572_v27  ;;  %v529_v27 = vsel %vm387_vm1, %v527_v4, %v528_v34 }
 0x162   : > { %1442 = vmatprep.mubr.f32.mxu0 %v3103_v35 }
 0x163   : > { %v3874_v12 = vpop.f32.mrb[32].mxu1 }
 0x164   : > { %2119 = vmatmul.mubr.f32.gmra.mrb[138].mxu1 %v3585_v9  ;;  %v826_v19 = vpop.f32.mrb[33].mxu1  ;;  %v531_v9 = vsel %vm387_vm1, %v528_v34, %v530_v61 }
 0x165   : > { %1443 = vmatmul.mubr.f32.gmra.mrb[10].mxu0 %v2534_v41  ;;  %2121 = vmatprep.mubr.f32.mxu1 %v512_v10 }
 0x166   : > { %1447 = vmatprep.mubr.f32.mxu0 %v3134_v57 }
 0x167   : > { %v3881_v35 = vpop.f32.mrb[34].mxu1 }
 0x168   : > { %2122 = vmatmul.mubr.f32.gmra.mrb[140].mxu1 %v514_v43  ;;  %v831_v47 = vpop.f32.mrb[35].mxu1 }
 0x169   : > { %1448 = vmatmul.mubr.f32.gmra.mrb[12].mxu0 %v2535_v5  ;;  %2124 = vmatprep.mubr.f32.mxu1 %v529_v27 }
 0x16a   : > { %1452 = vmatprep.mubr.f32.mxu0 %v4253_v52 }
 0x16b   : > { %v3886_v37 = vpop.f32.mrb[36].mxu1 }
 0x16c   : > { %2125 = vmatmul.mubr.f32.gmra.mrb[142].mxu1 %v531_v9  ;;  %v836_v42 = vpop.f32.mrb[37].mxu1 }
 0x16d   : > { %1453 = vmatmul.mubr.f32.gmra.mrb[14].mxu0 %v2536_v15 }
 0x16f   : > { %v3889_v57 = vpop.f32.mrb[38].mxu1 }
 0x170   : > { %v841_v32 = vpop.f32.mrb[39].mxu1 }
 0x173   : > { %v3891_v25 = vpop.f32.mrb[40].mxu1 }
 0x174   : > { %v846_v24 = vpop.f32.mrb[41].mxu1 }
 0x177   : > { %v3893_v18 = vpop.f32.mrb[42].mxu1 }
 0x178   : > { %v851_v21 = vpop.f32.mrb[43].mxu1 }
 0x17b   : > { %v3895_v31 = vpop.f32.mrb[44].mxu1 }
 0x17c   : > { %v856_v40 = vpop.f32.mrb[45].mxu1 }
 0x17f   : > { %v3897_v13 = vpop.f32.mrb[46].mxu1 }
 0x180   : > { %v861_v52 = vpop.f32.mrb[47].mxu1 }
 0x183   : > { %v3899_v45 = vpop.f32.mrb[48].mxu1 }
 0x184   : > { %v866_v36 = vpop.f32.mrb[49].mxu1 }
 0x187   : > { %v3901_v55 = vpop.f32.mrb[50].mxu1 }
 0x188   : > { %v871_v1 = vpop.f32.mrb[51].mxu1 }
 0x18b   : > { %v3903_v16 = vpop.f32.mrb[52].mxu1 }
 0x18c   : > { %v876_v53 = vpop.f32.mrb[53].mxu1 }
 0x18f   : > { %v3905_v39 = vpop.f32.mrb[54].mxu1 }
 0x190   : > { %v881_v8 = vpop.f32.mrb[55].mxu1 }
 0x193   : > { %v3907_v10 = vpop.f32.mrb[56].mxu1 }
 0x194   : > { %v886_v6 = vpop.f32.mrb[57].mxu1 }
 0x197   : > { %v3909_v11 = vpop.f32.mrb[58].mxu1 }
 0x198   : > { %v891_v43 = vpop.f32.mrb[59].mxu1 }
 0x19b   : > { %v3911_v50 = vpop.f32.mrb[60].mxu1 }
 0x19c   : > { %v896_v20 = vpop.f32.mrb[61].mxu1 }
 0x19f   : > { %v3913_v33 = vpop.f32.mrb[62].mxu1 }
 0x1a0   : > { %v901_v0 = vpop.f32.mrb[63].mxu1 }
 0x1a3   : > { %v1459_v23 = vpop.f32.mrb[64].mxu1 }
 0x1a4   : > { %v1461_v49 = vpop.f32.mrb[65].mxu1 }
 0x1a7   : > { %v1464_v17 = vpop.f32.mrb[66].mxu1 }
 0x1a8   : > { %v1466_v51 = vpop.f32.mrb[67].mxu1 }
 0x1ab   : > { %v1469_v60 = vpop.f32.mrb[68].mxu1 }
 0x1ac   : > { %v1471_v29 = vpop.f32.mrb[69].mxu1 }
 0x1af   : > { %v1474_v46 = vpop.f32.mrb[70].mxu1 }
 0x1b0   : > { %v1476_v28 = vpop.f32.mrb[71].mxu1 }
 0x1b3   : > { %v1479_v4 = vpop.f32.mrb[72].mxu1 }
 0x1b4   : > { %v1481_v34 = vpop.f32.mrb[73].mxu1 }
 0x1b7   : > { %v1484_v19 = vpop.f32.mrb[74].mxu1 }
 0x1b8   : > { %v1486_v41 = vpop.f32.mrb[75].mxu1 }
 0x1bb   : > { %v1489_v61 = vpop.f32.mrb[76].mxu1 }
 0x1bc   : > { %v1491_v27 = vpop.f32.mrb[77].mxu1 }
 0x1bf   : > { %v1494_v47 = vpop.f32.mrb[78].mxu1 }
 0x1c0   : > { %v1496_v5 = vpop.f32.mrb[79].mxu1 }
 0x1c3   : > { %v1499_v9 = vpop.f32.mrb[80].mxu1 }
 0x1c4   : > { %v1234_v42 = vpop.f32.mrb[16].mxu0  ;;  %v1501_v15 = vpop.f32.mrb[81].mxu1 }
 0x1c5   : > { %v2391_v32 = vadd.f32 %v1234_v42, %v3823_v44  ;;  %v1236_v24 = vpop.f32.mrb[17].mxu0 }
 0x1c7   : > { %v1504_v21 = vpop.f32.mrb[82].mxu1  ;;  %v3916_v40 = vadd.f32 %v2391_v32, %v1459_v23 }
 0x1c8   : > { %v1239_v52 = vpop.f32.mrb[18].mxu0  ;;  %v1506_v36 = vpop.f32.mrb[83].mxu1 }
 0x1c9   : > { %v2393_v1 = vadd.f32 %v1239_v52, %v3830_v14  ;;  %v1241_v53 = vpop.f32.mrb[19].mxu0 }
 0x1cb   : > { %v1509_v8 = vpop.f32.mrb[84].mxu1  ;;  %v3919_v6 = vadd.f32 %v2393_v1, %v1464_v17 }
 0x1cc   : > { %v1244_v43 = vpop.f32.mrb[20].mxu0  ;;  %v1511_v20 = vpop.f32.mrb[85].mxu1 }
 0x1cd   : > { %v2395_v0 = vadd.f32 %v1244_v43, %v3836_v54  ;;  %v1246_v49 = vpop.f32.mrb[21].mxu0 }
 0x1cf   : > { %v1514_v51 = vpop.f32.mrb[86].mxu1  ;;  %v3922_v29 = vadd.f32 %v2395_v0, %v1469_v60 }
 0x1d0   : > { %v1249_v44 = vpop.f32.mrb[22].mxu0  ;;  %v1516_v28 = vpop.f32.mrb[87].mxu1 }
 0x1d1   : > { %v2397_v23 = vadd.f32 %v1249_v44, %v3842_v58  ;;  %v1251_v34 = vpop.f32.mrb[23].mxu0 }
 0x1d3   : > { %v1519_v41 = vpop.f32.mrb[88].mxu1  ;;  %v3925_v27 = vadd.f32 %v2397_v23, %v1474_v46 }
 0x1d4   : > { %v1254_v14 = vpop.f32.mrb[24].mxu0  ;;  %v1521_v5 = vpop.f32.mrb[89].mxu1 }
 0x1d5   : > { %v2399_v17 = vadd.f32 %v1254_v14, %v3848_v59  ;;  %v1256_v42 = vpop.f32.mrb[25].mxu0 }
 0x1d7   : > { %v1524_v15 = vpop.f32.mrb[90].mxu1  ;;  %v3928_v32 = vadd.f32 %v2399_v17, %v1479_v4 }
 0x1d8   : > { %v1259_v54 = vpop.f32.mrb[26].mxu0  ;;  %v1526_v24 = vpop.f32.mrb[91].mxu1 }
 0x1d9   : > { %v2401_v60 = vadd.f32 %v1259_v54, %v3854_v26  ;;  %v1261_v52 = vpop.f32.mrb[27].mxu0 }
 0x1db   : > { %v1529_v36 = vpop.f32.mrb[92].mxu1  ;;  %v3931_v1 = vadd.f32 %v2401_v60, %v1484_v19 }
 0x1dc   : > { %v1264_v58 = vpop.f32.mrb[28].mxu0  ;;  %v1531_v53 = vpop.f32.mrb[93].mxu1 }
 0x1dd   : > { %v2403_v46 = vadd.f32 %v1264_v58, %v3860_v38  ;;  %v1266_v43 = vpop.f32.mrb[29].mxu0 }
 0x1df   : > { %v1534_v20 = vpop.f32.mrb[94].mxu1  ;;  %v3934_v0 = vadd.f32 %v2403_v46, %v1489_v61 }
 0x1e0   : > { %v1269_v59 = vpop.f32.mrb[30].mxu0  ;;  %v1536_v49 = vpop.f32.mrb[95].mxu1 }
 0x1e1   : > { %v2405_v4 = vadd.f32 %v1269_v59, %v3866_v56  ;;  %v1271_v44 = vpop.f32.mrb[31].mxu0 }
 0x1e3   : > { %v1539_v28 = vpop.f32.mrb[96].mxu1  ;;  %v3937_v23 = vadd.f32 %v2405_v4, %v1494_v47 }
 0x1e4   : > { %v1274_v26 = vpop.f32.mrb[32].mxu0  ;;  %v1541_v34 = vpop.f32.mrb[97].mxu1 }
 0x1e5   : > { %v2407_v19 = vadd.f32 %v1274_v26, %v3874_v12  ;;  %v1276_v14 = vpop.f32.mrb[33].mxu0 }
 0x1e7   : > { %v1544_v5 = vpop.f32.mrb[98].mxu1  ;;  %v3940_v17 = vadd.f32 %v2407_v19, %v1499_v9 }
 0x1e8   : > { %v1279_v38 = vpop.f32.mrb[34].mxu0  ;;  %v1546_v42 = vpop.f32.mrb[99].mxu1 }
 0x1e9   : > { %v2409_v61 = vadd.f32 %v1279_v38, %v3881_v35  ;;  %v1281_v54 = vpop.f32.mrb[35].mxu0 }
 0x1eb   : > { %v1549_v24 = vpop.f32.mrb[100].mxu1  ;;  %v3943_v60 = vadd.f32 %v2409_v61, %v1504_v21 }
 0x1ec   : > { %v1284_v56 = vpop.f32.mrb[36].mxu0  ;;  %v1551_v52 = vpop.f32.mrb[101].mxu1 }
 0x1ed   : > { %v2411_v47 = vadd.f32 %v1284_v56, %v3886_v37  ;;  %v1286_v58 = vpop.f32.mrb[37].mxu0 }
 0x1ef   : > { %v1554_v53 = vpop.f32.mrb[102].mxu1  ;;  %v3946_v46 = vadd.f32 %v2411_v47, %v1509_v8 }
 0x1f0   : > { %v1289_v12 = vpop.f32.mrb[38].mxu0  ;;  %v1556_v43 = vpop.f32.mrb[103].mxu1 }
 0x1f1   : > { %v2413_v9 = vadd.f32 %v1289_v12, %v3889_v57  ;;  %v1291_v59 = vpop.f32.mrb[39].mxu0 }
 0x1f3   : > { %v3949_v49 = vpop.f32.mrb[104].mxu1  ;;  %v3951_v35 = vadd.f32 %v2413_v9, %v1514_v51 }
 0x1f4   : > { %v1294_v4 = vpop.f32.mrb[40].mxu0  ;;  %v1561_v21 = vpop.f32.mrb[105].mxu1 }
 0x1f5   : > { %v2415_v44 = vadd.f32 %v1294_v4, %v3891_v25  ;;  %v1296_v26 = vpop.f32.mrb[41].mxu0 }
 0x1f7   : > { %v3954_v34 = vpop.f32.mrb[106].mxu1  ;;  %v3956_v37 = vadd.f32 %v2415_v44, %v1519_v41 }
 0x1f8   : > { %v1299_v8 = vpop.f32.mrb[42].mxu0  ;;  %v1566_v19 = vpop.f32.mrb[107].mxu1 }
 0x1f9   : > { %v2417_v14 = vadd.f32 %v1299_v8, %v3893_v18  ;;  %v1301_v38 = vpop.f32.mrb[43].mxu0 }
 0x1fb   : > { %v3959_v57 = vpop.f32.mrb[108].mxu1  ;;  %v3961_v42 = vadd.f32 %v2417_v14, %v1524_v15 }
 0x1fc   : > { %v1304_v51 = vpop.f32.mrb[44].mxu0  ;;  %v1571_v61 = vpop.f32.mrb[109].mxu1 }
 0x1fd   : > { %v2419_v54 = vadd.f32 %v1304_v51, %v3895_v31  ;;  %v1306_v56 = vpop.f32.mrb[45].mxu0 }
 0x1ff   : > { %v3964_v25 = vpop.f32.mrb[110].mxu1  ;;  %v3966_v52 = vadd.f32 %v2419_v54, %v1529_v36 }
 0x200   : > { %v1309_v41 = vpop.f32.mrb[46].mxu0  ;;  %v1576_v47 = vpop.f32.mrb[111].mxu1 }
 0x201   : > { %v2421_v58 = vadd.f32 %v1309_v41, %v3897_v13  ;;  %v1311_v12 = vpop.f32.mrb[47].mxu0 }
 0x203   : > { %v3969_v18 = vpop.f32.mrb[112].mxu1  ;;  %v3971_v43 = vadd.f32 %v2421_v58, %v1534_v20 }
 0x204   : > { %v1314_v15 = vpop.f32.mrb[48].mxu0  ;;  %v3973_v9 = vpop.f32.mrb[113].mxu1 }
 0x205   : > { %v2423_v59 = vadd.f32 %v1314_v15, %v3899_v45  ;;  %v1316_v31 = vpop.f32.mrb[49].mxu0 }
 0x207   : > { %v3976_v4 = vpop.f32.mrb[114].mxu1  ;;  %v3978_v21 = vadd.f32 %v2423_v59, %v1539_v28 }
 0x208   : > { %v1319_v36 = vpop.f32.mrb[50].mxu0  ;;  %v3980_v44 = vpop.f32.mrb[115].mxu1 }
 0x209   : > { %v2425_v13 = vadd.f32 %v1319_v36, %v3901_v55  ;;  %v1321_v26 = vpop.f32.mrb[51].mxu0 }
 0x20b   : > { %v3983_v8 = vpop.f32.mrb[116].mxu1  ;;  %v3985_v20 = vadd.f32 %v2425_v13, %v1544_v5  ;;  %v3998_v5 = vstv %s1803_s13 }
 0x20c   : > { %v1324_v19 = vpop.f32.mrb[52].mxu0  ;;  %v3987_v14 = vpop.f32.mrb[117].mxu1 }
 0x20d   : > { %v2427_v45 = vadd.f32 %v1324_v19, %v3903_v16  ;;  %v1326_v38 = vpop.f32.mrb[53].mxu0 }
 0x20f   : > { %v3990_v28 = vpop.f32.mrb[118].mxu1  ;;  %v3992_v51 = vadd.f32 %v2427_v45, %v1549_v24 }
 0x210   : > { %v1329_v61 = vpop.f32.mrb[54].mxu0  ;;  %v3994_v54 = vpop.f32.mrb[119].mxu1 }
 0x211   : > { %v2429_v55 = vadd.f32 %v1329_v61, %v3905_v39  ;;  %v1331_v56 = vpop.f32.mrb[55].mxu0 }
 0x213   : > { %v2093_v41 = vpop.f32.mrb[120].mxu1  ;;  %v4000_v47 = vadd.f32 %v2429_v55, %v1554_v53 }
 0x214   : > { %v1334_v58 = vpop.f32.mrb[56].mxu0  ;;  %v1690_v16 = vadd.f32 %v3919_v6, %v2093_v41  ;;  %v1684_v12 = vpop.f32.mrb[121].mxu1 }
 0x215   : > { %v2431_v15 = vadd.f32 %v1334_v58, %v3907_v10  ;;  %v1336_v24 = vpop.f32.mrb[57].mxu0  ;;  %v1685_v59 = vadd.f32 %v3916_v40, %v1684_v12 }
 0x216   : > { %vm1813_vm2 = vcmp.ge.f32.partialorder %v1690_v16, 0.0  ;;  %v1846_v39 = vmul.f32 %v3998_v5, %v1690_v16 }
 0x217   : > { %vm1812_vm3 = vcmp.ge.f32.partialorder %v1685_v59, 0.0  ;;  %v1845_v53 = vmul.f32 %v3998_v5, %v1685_v59  ;;  %v2096_v6 = vpop.f32.mrb[122].mxu1  ;;  %v4013_v31 = vadd.f32 %v2431_v15, %v3949_v49 }
 0x218   : > { %v1878_v10 = vsel %vm1813_vm2, %v1690_v16, %v1846_v39  ;;  %v1339_v36 = vpop.f32.mrb[58].mxu0  ;;  %v1700_v40 = vadd.f32 %v3925_v27, %v2096_v6  ;;  %v1694_v13 = vpop.f32.mrb[123].mxu1 }
 0x219   : > { %1910 = vst [vmem:[%s4008_s6 + $0x48] sm:$0xff] %v1878_v10  ;;  %v1877_v26 = vsel %vm1812_vm3, %v1685_v59, %v1845_v53  ;;  %v2433_v19 = vadd.f32 %v1339_v36, %v3909_v11  ;;  %v1341_v45 = vpop.f32.mrb[59].mxu0  ;;  %v1695_v38 = vadd.f32 %v3922_v29, %v1694_v13 }
 0x21a   : > { %1909 = vst [vmem:[%s4008_s6 + $0x40] sm:$0xff] %v1877_v26  ;;  %vm1815_vm4 = vcmp.ge.f32.partialorder %v1700_v40, 0.0  ;;  %v1848_v61 = vmul.f32 %v3998_v5, %v1700_v40 }
 0x21b   : > { %vm1814_vm5 = vcmp.ge.f32.partialorder %v1695_v38, 0.0  ;;  %v1847_v49 = vmul.f32 %v3998_v5, %v1695_v38  ;;  %v2099_v55 = vpop.f32.mrb[124].mxu1  ;;  %v4023_v27 = vadd.f32 %v2433_v19, %v3954_v34 }
 0x21c   : > { %v1880_v56 = vsel %vm1815_vm4, %v1700_v40, %v1848_v61  ;;  %v1344_v41 = vpop.f32.mrb[60].mxu0  ;;  %v1710_v58 = vadd.f32 %v3931_v1, %v2099_v55  ;;  %v1704_v11 = vpop.f32.mrb[125].mxu1 }
 0x21d   : > { %1912 = vst [vmem:[%s4008_s6 + $0x58] sm:$0xff] %v1880_v56  ;;  %v1879_v29 = vsel %vm1814_vm5, %v1695_v38, %v1847_v49  ;;  %v2435_v16 = vadd.f32 %v1344_v41, %v3911_v50  ;;  %v1346_v12 = vpop.f32.mrb[61].mxu0  ;;  %v1705_v15 = vadd.f32 %v3928_v32, %v1704_v11 }
 0x21e   : > { %1911 = vst [vmem:[%s4008_s6 + $0x50] sm:$0xff] %v1879_v29  ;;  %vm1817_vm6 = vcmp.ge.f32.partialorder %v1710_v58, 0.0  ;;  %v1850_v24 = vmul.f32 %v3998_v5, %v1710_v58 }
 0x21f   : > { %vm1816_vm7 = vcmp.ge.f32.partialorder %v1705_v15, 0.0  ;;  %v1849_v34 = vmul.f32 %v3998_v5, %v1705_v15  ;;  %v2102_v59 = vpop.f32.mrb[126].mxu1  ;;  %v4033_v1 = vadd.f32 %v2435_v16, %v3959_v57 }
 0x220   : > { %v1882_v39 = vsel %vm1817_vm6, %v1710_v58, %v1850_v24  ;;  %v1349_v53 = vpop.f32.mrb[62].mxu0  ;;  %v1720_v6 = vadd.f32 %v3937_v23, %v2102_v59  ;;  %v1714_v50 = vpop.f32.mrb[127].mxu1 }
 0x221   : > { %1914 = vst [vmem:[%s4008_s6 + $0x68] sm:$0xff] %v1882_v39  ;;  %v1881_v32 = vsel %vm1816_vm7, %v1705_v15, %v1849_v34  ;;  %v2437_v10 = vadd.f32 %v1349_v53, %v3913_v33  ;;  %v1351_v36 = vpop.f32.mrb[63].mxu0  ;;  %v1715_v40 = vadd.f32 %v3934_v0, %v1714_v50 }
 0x222   : > { %1913 = vst [vmem:[%s4008_s6 + $0x60] sm:$0xff] %v1881_v32  ;;  %vm1819_vm8 = vcmp.ge.f32.partialorder %v1720_v6, 0.0  ;;  %v1852_v13 = vmul.f32 %v3998_v5, %v1720_v6 }
 0x223   : > { %vm1818_vm9 = vcmp.ge.f32.partialorder %v1715_v40, 0.0  ;;  %v1851_v57 = vmul.f32 %v3998_v5, %v1715_v40  ;;  %v2105_v26 = vpop.f32.mrb[128].mxu1  ;;  %v4043_v23 = vadd.f32 %v2437_v10, %v3964_v25 }
 0x224   : > { %v1884_v19 = vsel %vm1819_vm8, %v1720_v6, %v1852_v13  ;;  %v1419_v45 = vpop.f32.mrb[0].mxu0  ;;  %v1730_v38 = vadd.f32 %v3943_v60, %v2105_v26  ;;  %v1724_v33 = vpop.f32.mrb[129].mxu1 }
 0x225   : > { %1916 = vst [vmem:[%s4008_s6 + $0x78] sm:$0xff] %v1884_v19  ;;  %v1883_v61 = vsel %vm1818_vm9, %v1715_v40, %v1851_v57  ;;  %v2383_v0 = vadd.f32 %v1419_v45, %v3774_v2  ;;  %v1421_v49 = vpop.f32.mrb[1].mxu0  ;;  %v1725_v55 = vadd.f32 %v3940_v17, %v1724_v33 }
 0x226   : > { %1915 = vst [vmem:[%s4008_s6 + $0x70] sm:$0xff] %v1883_v61  ;;  %vm1821_vm10 = vcmp.ge.f32.partialorder %v1730_v38, 0.0  ;;  %v1854_v56 = vmul.f32 %v3998_v5, %v1730_v38 }
 0x227   : > { %v1645_v25 = vadd.f32 %v2383_v0, %v3973_v9  ;;  %vm1820_vm11 = vcmp.ge.f32.partialorder %v1725_v55, 0.0  ;;  %v1853_v41 = vmul.f32 %v3998_v5, %v1725_v55  ;;  %v2108_v60 = vpop.f32.mrb[130].mxu1 }
 0x228   : > { %v1886_v58 = vsel %vm1821_vm10, %v1730_v38, %v1854_v56  ;;  %v1424_v11 = vpop.f32.mrb[2].mxu0  ;;  %v1740_v2 = vadd.f32 %v3951_v35, %v2108_v60  ;;  %v1734_v29 = vpop.f32.mrb[131].mxu1 }
 0x229   : > { %vm1804_vm12 = vcmp.ge.f32.partialorder %v1645_v25, 0.0  ;;  %v1837_v17 = vmul.f32 %v3998_v5, %v1645_v25  ;;  %1918 = vst [vmem:[%s4008_s6 + $0x88] sm:$0xff] %v1886_v58  ;;  %v1885_v16 = vsel %vm1820_vm11, %v1725_v55, %v1853_v41  ;;  %v2384_v12 = vadd.f32 %v1424_v11, %v3780_v7  ;;  %v1426_v15 = vpop.f32.mrb[3].mxu0 }
 0x22a   : > { %1917 = vst [vmem:[%s4008_s6 + $0x80] sm:$0xff] %v1885_v16  ;;  %vm1823_vm13 = vcmp.ge.f32.partialorder %v1740_v2, 0.0  ;;  %v1856_v9 = vmul.f32 %v3998_v5, %v1740_v2  ;;  %v1735_v24 = vadd.f32 %v3946_v46, %v1734_v29 }
 0x22b   : > { %v1869_v34 = vsel %vm1804_vm12, %v1645_v25, %v1837_v17  ;;  %v1650_v59 = vadd.f32 %v2384_v12, %v3969_v18  ;;  %v2111_v35 = vpop.f32.mrb[132].mxu1 }
 0x22c   : > { %1901 = vst [vmem:[%s4008_s6] sm:$0xff] %v1869_v34  ;;  %v1888_v39 = vsel %vm1823_vm13, %v1740_v2, %v1856_v9  ;;  %vm1822_vm14 = vcmp.ge.f32.partialorder %v1735_v24, 0.0  ;;  %v1855_v53 = vmul.f32 %v3998_v5, %v1735_v24  ;;  %v1429_v6 = vpop.f32.mrb[4].mxu0  ;;  %v1750_v7 = vadd.f32 %v3961_v42, %v2111_v35  ;;  %v1744_v50 = vpop.f32.mrb[133].mxu1 }
 0x22d   : > { %vm1805_vm15 = vcmp.ge.f32.partialorder %v1650_v59, 0.0  ;;  %v1838_v32 = vmul.f32 %v3998_v5, %v1650_v59  ;;  %1920 = vst [vmem:[%s4008_s6 + $0x98] sm:$0xff] %v1888_v39  ;;  %v2385_v46 = vadd.f32 %v1429_v6, %v3785_v22  ;;  %v1431_v10 = vpop.f32.mrb[5].mxu0  ;;  %v1745_v18 = vadd.f32 %v3956_v37, %v1744_v50 }
 0x22e   : > { %v1887_v36 = vsel %vm1822_vm14, %v1735_v24, %v1855_v53  ;;  %vm1825_vm0 = vcmp.ge.f32.partialorder %v1750_v7, 0.0  ;;  %v1858_v40 = vmul.f32 %v3998_v5, %v1750_v7 }
 0x22f   : > { %v1870_v13 = vsel %vm1805_vm15, %v1650_v59, %v1838_v32  ;;  %1919 = vst [vmem:[%s4008_s6 + $0x90] sm:$0xff] %v1887_v36  ;;  %v1655_v42 = vadd.f32 %v2385_v46, %v3980_v44  ;;  %vm1824_vm1 = vcmp.ge.f32.partialorder %v1745_v18, 0.0  ;;  %v1857_v57 = vmul.f32 %v3998_v5, %v1745_v18  ;;  %v2114_v26 = vpop.f32.mrb[134].mxu1 }
 0x230   : > { %1902 = vst [vmem:[%s4008_s6 + $0x8] sm:$0xff] %v1870_v13  ;;  %v1890_v19 = vsel %vm1825_vm0, %v1750_v7, %v1858_v40  ;;  %v1434_v22 = vpop.f32.mrb[6].mxu0  ;;  %v1760_v37 = vadd.f32 %v3971_v43, %v2114_v26  ;;  %v1754_v45 = vpop.f32.mrb[135].mxu1 }
 0x231   : > { %vm1806_vm2 = vcmp.ge.f32.partialorder %v1655_v42, 0.0  ;;  %v1839_v38 = vmul.f32 %v3998_v5, %v1655_v42  ;;  %1922 = vst [vmem:[%s4008_s6 + $0xa8] sm:$0xff] %v1890_v19  ;;  %v1889_v33 = vsel %vm1824_vm1, %v1745_v18, %v1857_v57  ;;  %v2386_v61 = vadd.f32 %v1434_v22, %v3791_v48  ;;  %v1436_v0 = vpop.f32.mrb[7].mxu0 }
 0x232   : > { %1921 = vst [vmem:[%s4008_s6 + $0xa0] sm:$0xff] %v1889_v33  ;;  %vm1827_vm3 = vcmp.ge.f32.partialorder %v1760_v37, 0.0  ;;  %v1860_v44 = vmul.f32 %v3998_v5, %v1760_v37  ;;  %v1755_v49 = vadd.f32 %v3966_v52, %v1754_v45 }
 0x233   : > { %v1871_v55 = vsel %vm1806_vm2, %v1655_v42, %v1839_v38  ;;  %v1660_v56 = vadd.f32 %v2386_v61, %v3976_v4  ;;  %v2117_v43 = vpop.f32.mrb[136].mxu1 }
 0x234   : > { %1903 = vst [vmem:[%s4008_s6 + $0x10] sm:$0xff] %v1871_v55  ;;  %v1892_v25 = vsel %vm1827_vm3, %v1760_v37, %v1860_v44  ;;  %vm1826_vm4 = vcmp.ge.f32.partialorder %v1755_v49, 0.0  ;;  %v1859_v41 = vmul.f32 %v3998_v5, %v1755_v49  ;;  %v1439_v60 = vpop.f32.mrb[8].mxu0  ;;  %v1770_v48 = vadd.f32 %v3985_v20, %v2117_v43  ;;  %v1764_v58 = vpop.f32.mrb[137].mxu1 }
 0x235   : > { %vm1807_vm5 = vcmp.ge.f32.partialorder %v1660_v56, 0.0  ;;  %v1840_v11 = vmul.f32 %v3998_v5, %v1660_v56  ;;  %1924 = vst [vmem:[%s4008_s6 + $0xb8] sm:$0xff] %v1892_v25  ;;  %v2387_v52 = vadd.f32 %v1439_v60, %v3797_v62  ;;  %v1441_v2 = vpop.f32.mrb[9].mxu0  ;;  %v1765_v4 = vadd.f32 %v3978_v21, %v1764_v58 }
 0x236   : > { %v1891_v29 = vsel %vm1826_vm4, %v1755_v49, %v1859_v41  ;;  %vm1829_vm6 = vcmp.ge.f32.partialorder %v1770_v48, 0.0  ;;  %v1862_v17 = vmul.f32 %v3998_v5, %v1770_v48 }
 0x237   : > { %v1872_v16 = vsel %vm1807_vm5, %v1660_v56, %v1840_v11  ;;  %1923 = vst [vmem:[%s4008_s6 + $0xb0] sm:$0xff] %v1891_v29  ;;  %v1665_v20 = vadd.f32 %v2387_v52, %v3987_v14  ;;  %vm1828_vm7 = vcmp.ge.f32.partialorder %v1765_v4, 0.0  ;;  %v1861_v12 = vmul.f32 %v3998_v5, %v1765_v4  ;;  %v2120_v15 = vpop.f32.mrb[138].mxu1 }
 0x238   : > { %1904 = vst [vmem:[%s4008_s6 + $0x18] sm:$0xff] %v1872_v16  ;;  %v1894_v9 = vsel %vm1829_vm6, %v1770_v48, %v1862_v17  ;;  %v1444_v62 = vpop.f32.mrb[10].mxu0  ;;  %v1780_v21 = vadd.f32 %v4000_v47, %v2120_v15  ;;  %v1774_v24 = vpop.f32.mrb[139].mxu1 }
 0x239   : > { %vm1808_vm8 = vcmp.ge.f32.partialorder %v1665_v20, 0.0  ;;  %v1841_v34 = vmul.f32 %v3998_v5, %v1665_v20  ;;  %1926 = vst [vmem:[%s4008_s6 + $0xc8] sm:$0xff] %v1894_v9  ;;  %v1893_v59 = vsel %vm1828_vm7, %v1765_v4, %v1861_v12  ;;  %v2388_v35 = vadd.f32 %v1444_v62, %v3803_v3  ;;  %v1446_v39 = vpop.f32.mrb[11].mxu0 }
 0x23a   : > { %1925 = vst [vmem:[%s4008_s6 + $0xc0] sm:$0xff] %v1893_v59  ;;  %vm1831_vm9 = vcmp.ge.f32.partialorder %v1780_v21, 0.0  ;;  %v1864_v14 = vmul.f32 %v3998_v5, %v1780_v21  ;;  %v1775_v53 = vadd.f32 %v3992_v51, %v1774_v24 }
 0x23b   : > { %v1873_v6 = vsel %vm1808_vm8, %v1665_v20, %v1841_v34  ;;  %v1670_v7 = vadd.f32 %v2388_v35, %v3983_v8  ;;  %v2123_v47 = vpop.f32.mrb[140].mxu1 }
 0x23c   : > { %1905 = vst [vmem:[%s4008_s6 + $0x20] sm:$0xff] %v1873_v6  ;;  %v1896_v50 = vsel %vm1831_vm9, %v1780_v21, %v1864_v14  ;;  %vm1830_vm10 = vcmp.ge.f32.partialorder %v1775_v53, 0.0  ;;  %v1863_v32 = vmul.f32 %v3998_v5, %v1775_v53  ;;  %v1449_v46 = vpop.f32.mrb[12].mxu0  ;;  %v1790_v3 = vadd.f32 %v4023_v27, %v2123_v47  ;;  %v1784_v10 = vpop.f32.mrb[141].mxu1 }
 0x23d   : > { %vm1809_vm11 = vcmp.ge.f32.partialorder %v1670_v7, 0.0  ;;  %v1842_v18 = vmul.f32 %v3998_v5, %v1670_v7  ;;  %1928 = vst [vmem:[%s4008_s6 + $0xd8] sm:$0xff] %v1896_v50  ;;  %v2389_v51 = vadd.f32 %v1449_v46, %v3809_v63  ;;  %v1451_v36 = vpop.f32.mrb[13].mxu0  ;;  %v1785_v8 = vadd.f32 %v4013_v31, %v1784_v10 }
 0x23e   : > { %v1895_v40 = vsel %vm1830_vm10, %v1775_v53, %v1863_v32  ;;  %vm1833_vm12 = vcmp.ge.f32.partialorder %v1790_v3, 0.0  ;;  %v1866_v13 = vmul.f32 %v3998_v5, %v1790_v3 }
 0x23f   : > { %v1874_v42 = vsel %vm1809_vm11, %v1670_v7, %v1842_v18  ;;  %1927 = vst [vmem:[%s4008_s6 + $0xd0] sm:$0xff] %v1895_v40  ;;  %v1675_v27 = vadd.f32 %v2389_v51, %v3994_v54  ;;  %vm1832_vm13 = vcmp.ge.f32.partialorder %v1785_v8, 0.0  ;;  %v1865_v57 = vmul.f32 %v3998_v5, %v1785_v8  ;;  %v2126_v26 = vpop.f32.mrb[142].mxu1 }
 0x240   : > { %1906 = vst [vmem:[%s4008_s6 + $0x28] sm:$0xff] %v1874_v42  ;;  %v1898_v19 = vsel %vm1833_vm12, %v1790_v3, %v1866_v13  ;;  %v1454_v63 = vpop.f32.mrb[14].mxu0  ;;  %v1800_v31 = vadd.f32 %v4043_v23, %v2126_v26  ;;  %v1794_v22 = vpop.f32.mrb[143].mxu1 }
 0x241   : > { %vm1810_vm14 = vcmp.ge.f32.partialorder %v1675_v27, 0.0  ;;  %v1843_v37 = vmul.f32 %v3998_v5, %v1675_v27  ;;  %1930 = vst [vmem:[%s4008_s6 + $0xe8] sm:$0xff] %v1898_v19  ;;  %v1897_v45 = vsel %vm1832_vm13, %v1785_v8, %v1865_v57  ;;  %v2390_v38 = vadd.f32 %v1454_v63, %v3815_v30  ;;  %v1456_v54 = vpop.f32.mrb[15].mxu0 }
 0x242   : > { %1929 = vst [vmem:[%s4008_s6 + $0xe0] sm:$0xff] %v1897_v45  ;;  %vm1835_vm15 = vcmp.ge.f32.partialorder %v1800_v31, 0.0  ;;  %v1868_v33 = vmul.f32 %v3998_v5, %v1800_v31  ;;  %v1795_v61 = vadd.f32 %v4033_v1, %v1794_v22 }
 0x243   : > { %v1875_v0 = vsel %vm1810_vm14, %v1675_v27, %v1843_v37  ;;  %v1680_v23 = vadd.f32 %v2390_v38, %v3990_v28 }
 0x244   : > { %1907 = vst [vmem:[%s4008_s6 + $0x30] sm:$0xff] %v1875_v0  ;;  %v1900_v44 = vsel %vm1835_vm15, %v1800_v31, %v1868_v33  ;;  %vm1834_vm0 = vcmp.ge.f32.partialorder %v1795_v61, 0.0  ;;  %v1867_v49 = vmul.f32 %v3998_v5, %v1795_v61 }
 0x245   : > { %vm1811_vm1 = vcmp.ge.f32.partialorder %v1680_v23, 0.0  ;;  %v1844_v30 = vmul.f32 %v3998_v5, %v1680_v23  ;;  %1932 = vst [vmem:[%s4008_s6 + $0xf8] sm:$0xff] %v1900_v44 }
 0x246   : > { %v1899_v55 = vsel %vm1834_vm0, %v1795_v61, %v1867_v49 }
 0x247   : > { %v1876_v56 = vsel %vm1811_vm1, %v1680_v23, %v1844_v30  ;;  %1931 = vst [vmem:[%s4008_s6 + $0xf0] sm:$0xff] %v1899_v55 }
 0x248   : > { %1908 = vst [vmem:[%s4008_s6 + $0x38] sm:$0xff] %v1876_v56 }
 0x249 PF: > { %s14_s14 = sadd.s32 1, %s2543_s14  }
 0x24a   : > { %p11_p4 = scmp.ge.s32.totalorder %s14_s14, 4  }
 0x24c   :  { %13 = sbr.rel (!%p11_p4) target bundleno = 2 (0x2), region = 62 }

// kernel: orsnet_forward.34
= control target key start
LH: loop header
LB: loop body
LE: loop exit
PB: predicated region body
PF: predicated region fallthrough
CT: control target
= control target key end

     0   :  { %s2566_s12 = smov 0   ;;  %s4130_s0 = inlined_call_operand.vmem [shape: f32[2,18,18,128], index: 0, kind: input, shape index: {}]   ;;  %s4131_s1 = inlined_call_operand.vmem [shape: f32[1152,128], index: 1, kind: input, shape index: {}]   ;;  %s4132_s2 = inlined_call_operand.vmem [shape: f32[2,16,16,128], index: 2, kind: input, shape index: {}]   ;;  %s4133_s3 = inlined_call_operand.vmem [shape: f32[2,16,16,128], index: 3, kind: output, shape index: {}]  }
   0x1 LB: > { %s1985_s13 = sadd.s32 4294967295, %s2543_s12   ;;  %p1989_p0 = scmp.ge.s32.totalorder %s2543_s12, 1  ;;  %s2543_s12 = sphi %s2566_s12, %s13_s12  }
   0x2   : > { %p147_p1 = scmp.lt.s32.totalorder %s2543_s12, 3 }
   0x4   : > { %p148_p2 = pnand %p1989_p0, %p147_p1 }
   0x6   : > { %151 = sbr.rel (%p148_p2) target bundleno = 583 (0x247), region = 32 }
   0xd   : > { %v553_v0 = vld [vmem:[%s4131_s1] sm:$0xff]  ;;  %v554_v1 = vld [vmem:[%s4131_s1 + $0x8] sm:$0xff]  ;;  %v4134_v3 = vmov 0.0|0.0   ;;  %v555_v6 = vld [vmem:[%s4131_s1 + $0x10] sm:$0xff]  ;;  %p176_p3 = scmp.lt.s32.totalorder %s1985_s13, 1  ;;  %vm293_vm0 = vcmask 1046528  }
   0xe   : > { %v585_v2 = vld [vmem:[%s4131_s1 + $0x100] sm:$0xff]  ;;  %2127 = vmatprep.subr.bf16.mxu1 %v4134_v3  ;;  %2175 = vmatprep.subr.bf16.mxu0 %v4134_v3  ;;  %v2128_v4 = vpack.c.bf16 %v554_v1, %v553_v0  ;;  %v586_v5 = vld [vmem:[%s4131_s1 + $0x108] sm:$0xff]  ;;  %v556_v7 = vld [vmem:[%s4131_s1 + $0x18] sm:$0xff]  ;;  %vm406_vm1 = vcmask 1045504  }
   0xf   : > { %v2176_v8 = vpack.c.bf16 %v586_v5, %v585_v2  ;;  %v587_v9 = vld [vmem:[%s4131_s1 + $0x110] sm:$0xff]  ;;  %v588_v10 = vld [vmem:[%s4131_s1 + $0x118] sm:$0xff]  ;;  %v2131_v11 = vpack.c.bf16 %v556_v7, %v555_v6  ;;  %v557_v13 = vld [vmem:[%s4131_s1 + $0x20] sm:$0xff]  ;;  %s4292_s13 = smov (!%p176_p3, %s1985_s13), 1 }
  0x10   : > { %2129 = vmatpush1.bf16.msra.mxu1 %v2128_v4  ;;  %v2179_v12 = vpack.c.bf16 %v588_v10, %v587_v9  ;;  %v558_v14 = vld [vmem:[%s4131_s1 + $0x28] sm:$0xff]  ;;  %v589_v15 = vld [vmem:[%s4131_s1 + $0x120] sm:$0xff]  ;;  %v559_v19 = vld [vmem:[%s4131_s1 + $0x30] sm:$0xff]  ;;  %s2519_s29 = smul.u32 432, %s4292_s13 }
  0x11   : > { %2177 = vmatpush1.bf16.msra.mxu0 %v2176_v8  ;;  %2130 = vmatprep.subr.bf16.mxu1 %v4134_v3  ;;  %v590_v16 = vld [vmem:[%s4131_s1 + $0x128] sm:$0xff]  ;;  %v2134_v17 = vpack.c.bf16 %v558_v14, %v557_v13  ;;  %v560_v20 = vld [vmem:[%s4131_s1 + $0x38] sm:$0xff]  ;;  %v591_v21 = vld [vmem:[%s4131_s1 + $0x130] sm:$0xff] }
  0x12   : > { %2178 = vmatprep.subr.bf16.mxu0 %v4134_v3  ;;  %v2182_v18 = vpack.c.bf16 %v590_v16, %v589_v15  ;;  %v592_v22 = vld [vmem:[%s4131_s1 + $0x138] sm:$0xff]  ;;  %v2137_v23 = vpack.c.bf16 %v560_v20, %v559_v19  ;;  %v561_v25 = vld [vmem:[%s4131_s1 + $0x40] sm:$0xff]  ;;  %v562_v26 = vld [vmem:[%s4131_s1 + $0x48] sm:$0xff]  ;;  %s2666_s15 = scalar_lea.vmem %s4130_s0, %s2519_s29 }
  0x13   : > { %v2185_v24 = vpack.c.bf16 %v592_v22, %v591_v21  ;;  %v593_v27 = vld [vmem:[%s4131_s1 + $0x140] sm:$0xff]  ;;  %v594_v28 = vld [vmem:[%s4131_s1 + $0x148] sm:$0xff]  ;;  %v2140_v29 = vpack.c.bf16 %v562_v26, %v561_v25  ;;  %v563_v31 = vld [vmem:[%s4131_s1 + $0x50] sm:$0xff] }
  0x14   : > { %2132 = vmatpush1.bf16.msra.mxu1 %v2131_v11  ;;  %v2188_v30 = vpack.c.bf16 %v594_v28, %v593_v27  ;;  %v564_v32 = vld [vmem:[%s4131_s1 + $0x58] sm:$0xff]  ;;  %v595_v33 = vld [vmem:[%s4131_s1 + $0x150] sm:$0xff]  ;;  %v565_v37 = vld [vmem:[%s4131_s1 + $0x60] sm:$0xff] }
  0x15   : > { %2180 = vmatpush1.bf16.msra.mxu0 %v2179_v12  ;;  %2133 = vmatprep.subr.bf16.mxu1 %v4134_v3  ;;  %v596_v34 = vld [vmem:[%s4131_s1 + $0x158] sm:$0xff]  ;;  %v2143_v35 = vpack.c.bf16 %v564_v32, %v563_v31  ;;  %v566_v38 = vld [vmem:[%s4131_s1 + $0x68] sm:$0xff]  ;;  %v597_v39 = vld [vmem:[%s4131_s1 + $0x160] sm:$0xff] }
  0x16   : > { %2181 = vmatprep.subr.bf16.mxu0 %v4134_v3  ;;  %v2191_v36 = vpack.c.bf16 %v596_v34, %v595_v33  ;;  %v598_v40 = vld [vmem:[%s4131_s1 + $0x168] sm:$0xff]  ;;  %v2683_v41 = vld [vmem:[%s2666_s15] sm:$0xff]  ;;  %v2691_v45 = vld [vmem:[%s2666_s15 + $0x18] sm:$0xff]  ;;  %v2146_v46 = vpack.c.bf16 %v566_v38, %v565_v37 }
  0x17   : > { %v2686_v42 = vld [vmem:[%s2666_s15 + $0x8] sm:$0xff]  ;;  %v294_v43 = vrot.slane %v2683_v41, 1  ;;  %986 = vmatprep.mubr.f32.mxu0 %v2691_v45  ;;  %v2194_v47 = vpack.c.bf16 %v598_v40, %v597_v39  ;;  %v567_v48 = vld [vmem:[%s4131_s1 + $0x70] sm:$0xff]  ;;  %v568_v49 = vld [vmem:[%s4131_s1 + $0x78] sm:$0xff] }
  0x18   : > { %2135 = vmatpush1.bf16.msra.mxu1 %v2134_v17  ;;  %v295_v44 = vrot.slane %v2686_v42, 1  ;;  %v599_v51 = vld [vmem:[%s4131_s1 + $0x170] sm:$0xff]  ;;  %v600_v52 = vld [vmem:[%s4131_s1 + $0x178] sm:$0xff]  ;;  %v2149_v53 = vpack.c.bf16 %v568_v49, %v567_v48  ;;  %v569_v55 = vld [vmem:[%s4131_s1 + $0x80] sm:$0xff] }
  0x19   : > { %2183 = vmatpush1.bf16.msra.mxu0 %v2182_v18  ;;  %2136 = vmatprep.subr.bf16.mxu1 %v4134_v3  ;;  %v2197_v54 = vpack.c.bf16 %v600_v52, %v599_v51  ;;  %v570_v56 = vld [vmem:[%s4131_s1 + $0x88] sm:$0xff]  ;;  %v601_v57 = vld [vmem:[%s4131_s1 + $0x180] sm:$0xff]  ;;  %v571_v61 = vld [vmem:[%s4131_s1 + $0x90] sm:$0xff] }
  0x1a   : > { %2184 = vmatprep.subr.bf16.mxu0 %v4134_v3  ;;  %v296_v50 = vsel %vm293_vm0, %v294_v43, %v295_v44  ;;  %v602_v58 = vld [vmem:[%s4131_s1 + $0x188] sm:$0xff]  ;;  %v2152_v59 = vpack.c.bf16 %v570_v56, %v569_v55  ;;  %v572_v62 = vld [vmem:[%s4131_s1 + $0x98] sm:$0xff]  ;;  %v603_v63 = vld [vmem:[%s4131_s1 + $0x190] sm:$0xff] }
  0x1b   : > { %761 = vmatprep.mubr.f32.mxu1 %v296_v50  ;;  %v2200_v60 = vpack.c.bf16 %v602_v58, %v601_v57  ;;  %v604_v0 = vld [vmem:[%s4131_s1 + $0x198] sm:$0xff]  ;;  %v2155_v1 = vpack.c.bf16 %v572_v62, %v571_v61  ;;  %v573_v4 = vld [vmem:[%s4131_s1 + $0xa0] sm:$0xff]  ;;  %v574_v5 = vld [vmem:[%s4131_s1 + $0xa8] sm:$0xff]  ;;  %v299_v57 = vrot.slane %v2691_v45, 1 }
  0x1c   : > { %2138 = vmatpush1.bf16.msra.mxu1 %v2137_v23  ;;  %v2203_v2 = vpack.c.bf16 %v604_v0, %v603_v63  ;;  %v605_v6 = vld [vmem:[%s4131_s1 + $0x1a0] sm:$0xff]  ;;  %v606_v7 = vld [vmem:[%s4131_s1 + $0x1a8] sm:$0xff]  ;;  %v2158_v8 = vpack.c.bf16 %v574_v5, %v573_v4  ;;  %v575_v10 = vld [vmem:[%s4131_s1 + $0xb0] sm:$0xff]  ;;  %v412_v0 = vrot.slane %v2691_v45, 2 }
  0x1d   : > { %2186 = vmatpush1.bf16.msra.mxu0 %v2185_v24  ;;  %2139 = vmatprep.subr.bf16.mxu1 %v4134_v3  ;;  %v2206_v9 = vpack.c.bf16 %v606_v7, %v605_v6  ;;  %v576_v11 = vld [vmem:[%s4131_s1 + $0xb8] sm:$0xff]  ;;  %v607_v12 = vld [vmem:[%s4131_s1 + $0x1b0] sm:$0xff]  ;;  %v577_v16 = vld [vmem:[%s4131_s1 + $0xc0] sm:$0xff] }
  0x1e   : > { %2187 = vmatprep.subr.bf16.mxu0 %v4134_v3  ;;  %v608_v13 = vld [vmem:[%s4131_s1 + $0x1b8] sm:$0xff]  ;;  %v2161_v14 = vpack.c.bf16 %v576_v11, %v575_v10  ;;  %v578_v17 = vld [vmem:[%s4131_s1 + $0xc8] sm:$0xff]  ;;  %v609_v18 = vld [vmem:[%s4131_s1 + $0x1c0] sm:$0xff] }
  0x1f   : > { %v2209_v15 = vpack.c.bf16 %v608_v13, %v607_v12  ;;  %v610_v19 = vld [vmem:[%s4131_s1 + $0x1c8] sm:$0xff]  ;;  %v2164_v20 = vpack.c.bf16 %v578_v17, %v577_v16  ;;  %v579_v22 = vld [vmem:[%s4131_s1 + $0xd0] sm:$0xff]  ;;  %v580_v23 = vld [vmem:[%s4131_s1 + $0xd8] sm:$0xff] }
  0x20   : > { %2141 = vmatpush1.bf16.msra.mxu1 %v2140_v29  ;;  %v2212_v21 = vpack.c.bf16 %v610_v19, %v609_v18  ;;  %v611_v24 = vld [vmem:[%s4131_s1 + $0x1d0] sm:$0xff]  ;;  %v612_v25 = vld [vmem:[%s4131_s1 + $0x1d8] sm:$0xff]  ;;  %v2167_v26 = vpack.c.bf16 %v580_v23, %v579_v22  ;;  %v581_v28 = vld [vmem:[%s4131_s1 + $0xe0] sm:$0xff] }
  0x21   : > { %2189 = vmatpush1.bf16.msra.mxu0 %v2188_v30  ;;  %2142 = vmatprep.subr.bf16.mxu1 %v4134_v3  ;;  %v2215_v27 = vpack.c.bf16 %v612_v25, %v611_v24  ;;  %v582_v29 = vld [vmem:[%s4131_s1 + $0xe8] sm:$0xff]  ;;  %v613_v30 = vld [vmem:[%s4131_s1 + $0x1e0] sm:$0xff]  ;;  %v583_v34 = vld [vmem:[%s4131_s1 + $0xf0] sm:$0xff] }
  0x22   : > { %2190 = vmatprep.subr.bf16.mxu0 %v4134_v3  ;;  %v614_v31 = vld [vmem:[%s4131_s1 + $0x1e8] sm:$0xff]  ;;  %v2170_v32 = vpack.c.bf16 %v582_v29, %v581_v28  ;;  %v616_v37 = vld [vmem:[%s4131_s1 + $0x1f8] sm:$0xff]  ;;  %v193_v38 = vld [vmem:[%s2666_s15 + $0x10] sm:$0x3] }
  0x23   : > { %v2218_v33 = vpack.c.bf16 %v614_v31, %v613_v30  ;;  %v617_v40 = vld [vmem:[%s4131_s1 + $0x200] sm:$0xff]  ;;  %v618_v48 = vld [vmem:[%s4131_s1 + $0x208] sm:$0xff]  ;;  %v297_v51 = vrot.slane %v193_v38, 1  ;;  %v410_v56 = vrot.slane %v193_v38, 2  ;;  %v620_v61 = vld [vmem:[%s4131_s1 + $0x218] sm:$0xff] }
  0x24   : > { %2144 = vmatpush1.bf16.msra.mxu1 %v2143_v35  ;;  %v584_v35 = vld [vmem:[%s4131_s1 + $0xf8] sm:$0xff]  ;;  %v649_v49 = vld [vmem:[%s4131_s1 + $0x300] sm:$0xff]  ;;  %v650_v50 = vld [vmem:[%s4131_s1 + $0x308] sm:$0xff] }
  0x25   : > { %2192 = vmatpush1.bf16.msra.mxu0 %v2191_v36  ;;  %2145 = vmatprep.subr.bf16.mxu1 %v4134_v3  ;;  %v615_v36 = vld [vmem:[%s4131_s1 + $0x1f0] sm:$0xff]  ;;  %v2173_v39 = vpack.c.bf16 %v584_v35, %v583_v34  ;;  %v2841_v52 = vld [vmem:[%s2666_s15 + $0x20] sm:$0xff]  ;;  %v196_v62 = vld [vmem:[%s2666_s15 + $0x28] sm:$0x3] }
  0x26   : > { %2193 = vmatprep.subr.bf16.mxu0 %v4134_v3  ;;  %v2221_v43 = vpack.c.bf16 %v616_v37, %v615_v36  ;;  %v300_v58 = vrot.slane %v2841_v52, 1  ;;  %v651_v63 = vld [vmem:[%s4131_s1 + $0x310] sm:$0xff]  ;;  %v302_v6 = vrot.slane %v196_v62, 1  ;;  %v622_v10 = vld [vmem:[%s4131_s1 + $0x228] sm:$0xff]  ;;  %v653_v11 = vld [vmem:[%s4131_s1 + $0x320] sm:$0xff] }
  0x27   : > { %v2875_v4 = vld [vmem:[%s2666_s15 + $0x30] sm:$0xff]  ;;  %v654_v12 = vld [vmem:[%s4131_s1 + $0x328] sm:$0xff]  ;;  %v199_v19 = vld [vmem:[%s2666_s15 + $0x40] sm:$0x3] }
  0x28   : > { %2147 = vmatpush1.bf16.msra.mxu1 %v2146_v46  ;;  %v407_v46 = vrot.slane %v2683_v41, 2  ;;  %v2910_v18 = vpack.c.bf16 %v654_v12, %v653_v11  ;;  %v655_v22 = vld [vmem:[%s4131_s1 + $0x330] sm:$0xff]  ;;  %v656_v23 = vld [vmem:[%s4131_s1 + $0x338] sm:$0xff]  ;;  %v417_v24 = vrot.slane %v2875_v4, 2  ;;  %v307_v28 = vrot.slane %v199_v19, 1  ;;  %v657_v34 = vld [vmem:[%s4131_s1 + $0x340] sm:$0xff] }
  0x29   : > { %2195 = vmatpush1.bf16.msra.mxu0 %v2194_v47  ;;  %2148 = vmatprep.subr.bf16.mxu1 %v4134_v3  ;;  %v408_v47 = vrot.slane %v2686_v42, 2  ;;  %v2943_v30 = vld [vmem:[%s2666_s15 + $0x50] sm:$0xff]  ;;  %v2946_v31 = vpack.c.bf16 %v656_v23, %v655_v22  ;;  %v658_v35 = vld [vmem:[%s4131_s1 + $0x348] sm:$0xff]  ;;  %v420_v37 = vrot.slane %v199_v19, 2  ;;  %v632_v12 = vld [vmem:[%s4131_s1 + $0x278] sm:$0xff] }
  0x2a   : > { %2196 = vmatprep.subr.bf16.mxu0 %v4134_v3  ;;  %v631_v11 = vld [vmem:[%s4131_s1 + $0x270] sm:$0xff] }
  0x2b   : > { %v409_v55 = vsel %vm406_vm1, %v407_v46, %v408_v47  ;;  %v202_v46 = vld [vmem:[%s2666_s15 + $0x58] sm:$0x3]  ;;  %v2245_v23 = vpack.c.bf16 %v632_v12, %v631_v11 }
  0x2c   : > { %2150 = vmatpush1.bf16.msra.mxu1 %v2149_v53  ;;  %v2224_v53 = vpack.c.bf16 %v618_v48, %v617_v40  ;;  %v310_v40 = vrot.slane %v2943_v30, 1  ;;  %v627_v48 = vld [vmem:[%s4131_s1 + $0x250] sm:$0xff] }
  0x2d   : > { %2198 = vmatpush1.bf16.msra.mxu0 %v2197_v54  ;;  %2151 = vmatprep.subr.bf16.mxu1 %v4134_v3  ;;  %v2843_v54 = vpack.c.bf16 %v650_v50, %v649_v49  ;;  %v628_v49 = vld [vmem:[%s4131_s1 + $0x258] sm:$0xff]  ;;  %v659_v50 = vld [vmem:[%s4131_s1 + $0x350] sm:$0xff] }
  0x2e   : > { %2199 = vmatprep.subr.bf16.mxu0 %v4134_v3 }
  0x30   : > { %2153 = vmatpush1.bf16.msra.mxu1 %v2152_v59  ;;  %v298_v59 = vsel %vm293_vm0, %v295_v44, %v297_v51  ;;  %v652_v44 = vld [vmem:[%s4131_s1 + $0x318] sm:$0xff] }
  0x31   : > { %2201 = vmatpush1.bf16.msra.mxu0 %v2200_v60  ;;  %2154 = vmatprep.subr.bf16.mxu1 %v4134_v3  ;;  %v619_v60 = vld [vmem:[%s4131_s1 + $0x210] sm:$0xff]  ;;  %v2879_v7 = vpack.c.bf16 %v652_v44, %v651_v63  ;;  %v660_v51 = vld [vmem:[%s4131_s1 + $0x358] sm:$0xff]  ;;  %v630_v63 = vld [vmem:[%s4131_s1 + $0x268] sm:$0xff] }
  0x32   : > { %2202 = vmatprep.subr.bf16.mxu0 %v4134_v3  ;;  %v2227_v5 = vpack.c.bf16 %v620_v61, %v619_v60  ;;  %v3007_v60 = vld [vmem:[%s2666_s15 + $0x68] sm:$0xff]  ;;  %v3011_v61 = vpack.c.bf16 %v660_v51, %v659_v50  ;;  %v661_v44 = vld [vmem:[%s4131_s1 + $0x360] sm:$0xff]  ;;  %v668_v50 = vld [vmem:[%s4131_s1 + $0x398] sm:$0xff] }
  0x34   : > { %2156 = vmatpush1.bf16.msra.mxu1 %v2155_v1  ;;  %v413_v1 = vrot.slane %v2841_v52, 2 }
  0x35   : > { %2204 = vmatpush1.bf16.msra.mxu0 %v2203_v2  ;;  %2157 = vmatprep.subr.bf16.mxu1 %v4134_v3  ;;  %v2872_v2 = vsel %vm293_vm0, %v299_v57, %v300_v58  ;;  %v3004_v57 = vld [vmem:[%s2666_s15 + $0x60] sm:$0xff] }
  0x36   : > { %2205 = vmatprep.subr.bf16.mxu0 %v4134_v3  ;;  %v2900_v13 = vsel %vm406_vm1, %v412_v0, %v413_v1  ;;  %v662_v0 = vld [vmem:[%s4131_s1 + $0x368] sm:$0xff] }
  0x38   : > { %2159 = vmatpush1.bf16.msra.mxu1 %v2158_v8  ;;  %v2882_v8 = vld [vmem:[%s2666_s15 + $0x38] sm:$0xff] }
  0x39   : > { %2207 = vmatpush1.bf16.msra.mxu0 %v2206_v9  ;;  %2160 = vmatprep.subr.bf16.mxu1 %v4134_v3  ;;  %v621_v9 = vld [vmem:[%s4131_s1 + $0x220] sm:$0xff]  ;;  %v305_v16 = vrot.slane %v2882_v8, 1  ;;  %v418_v25 = vrot.slane %v2882_v8, 2 }
  0x3a   : > { %2208 = vmatprep.subr.bf16.mxu0 %v4134_v3  ;;  %v2230_v17 = vpack.c.bf16 %v622_v10, %v621_v9  ;;  %v205_v9 = vld [vmem:[%s2666_s15 + $0x70] sm:$0x3]  ;;  %v3041_v10 = vpack.c.bf16 %v662_v0, %v661_v44  ;;  %v637_v0 = vld [vmem:[%s4131_s1 + $0x2a0] sm:$0xff] }
  0x3b   : > { %v2965_v36 = vsel %vm406_vm1, %v417_v24, %v418_v25  ;;  %v2969_v38 = vsel %vm293_vm0, %v305_v16, %v307_v28  ;;  %v317_v22 = vrot.slane %v205_v9, 1  ;;  %v3072_v24 = vld [vmem:[%s2666_s15 + $0x80] sm:$0xff]  ;;  %v634_v28 = vld [vmem:[%s4131_s1 + $0x288] sm:$0xff] }
  0x3c   : > { %2162 = vmatpush1.bf16.msra.mxu1 %v2161_v14  ;;  %v415_v14 = vrot.slane %v196_v62, 2  ;;  %v629_v62 = vld [vmem:[%s4131_s1 + $0x260] sm:$0xff] }
  0x3d   : > { %2210 = vmatpush1.bf16.msra.mxu0 %v2209_v15  ;;  %2163 = vmatprep.subr.bf16.mxu1 %v4134_v3  ;;  %v304_v15 = vrot.slane %v2875_v4, 1 }
  0x3e   : > { %2211 = vmatprep.subr.bf16.mxu0 %v4134_v3 }
  0x40   : > { %2165 = vmatpush1.bf16.msra.mxu1 %v2164_v20  ;;  %v623_v20 = vld [vmem:[%s4131_s1 + $0x230] sm:$0xff] }
  0x41   : > { %2213 = vmatpush1.bf16.msra.mxu0 %v2212_v21  ;;  %2166 = vmatprep.subr.bf16.mxu1 %v4134_v3  ;;  %v624_v21 = vld [vmem:[%s4131_s1 + $0x238] sm:$0xff] }
  0x42   : > { %2214 = vmatprep.subr.bf16.mxu0 %v4134_v3  ;;  %v2233_v29 = vpack.c.bf16 %v624_v21, %v623_v20  ;;  %v3068_v20 = vld [vmem:[%s2666_s15 + $0x78] sm:$0xff]  ;;  %v428_v21 = vrot.slane %v3007_v60, 2 }
  0x43   : > { %v432_v51 = vrot.slane %v3068_v20, 2 }
  0x44   : > { %2168 = vmatpush1.bf16.msra.mxu1 %v2167_v26  ;;  %v2936_v26 = vsel %vm293_vm0, %v304_v15, %v305_v16  ;;  %v664_v15 = vld [vmem:[%s4131_s1 + $0x378] sm:$0xff] }
  0x45   : > { %2216 = vmatpush1.bf16.msra.mxu0 %v2215_v27  ;;  %2169 = vmatprep.subr.bf16.mxu1 %v4134_v3  ;;  %v2939_v27 = vld [vmem:[%s2666_s15 + $0x48] sm:$0xff] }
  0x46   : > { %2217 = vmatprep.subr.bf16.mxu0 %v4134_v3 }
  0x48   : > { %2171 = vmatpush1.bf16.msra.mxu1 %v2170_v32  ;;  %v625_v32 = vld [vmem:[%s4131_s1 + $0x240] sm:$0xff] }
  0x49   : > { %2219 = vmatpush1.bf16.msra.mxu0 %v2218_v33  ;;  %2172 = vmatprep.subr.bf16.mxu1 %v4134_v3  ;;  %v626_v33 = vld [vmem:[%s4131_s1 + $0x248] sm:$0xff] }
  0x4a   : > { %2220 = vmatprep.subr.bf16.mxu0 %v4134_v3 }
  0x4c   : > { %2174 = vmatpush1.bf16.msra.mxu1 %v2173_v39  ;;  %v309_v39 = vrot.slane %v2939_v27, 1 }
  0x4d   : > { %2222 = vmatpush1.bf16.msra.mxu0 %v2221_v43  ;;  %2351 = vmatprep.subr.bf16.mxu1 %v4134_v3  ;;  %v2236_v43 = vpack.c.bf16 %v626_v33, %v625_v32  ;;  %v666_v32 = vld [vmem:[%s4131_s1 + $0x388] sm:$0xff]  ;;  %v430_v33 = vrot.slane %v205_v9, 2 }
  0x4e   : > { %2223 = vmatprep.subr.bf16.mxu0 %v4134_v3 }
  0x4f   : > { %762 = vmatmul.mubr.f32.vlgmr.msra.gmra.mrb[0].mxu1 %v2683_v41  ;;  %v411_v41 = vsel %vm406_vm1, %v408_v47, %v410_v56  ;;  %v2976_v47 = vpack.c.bf16 %v658_v35, %v657_v34  ;;  %v3001_v56 = vsel %vm293_vm0, %v309_v39, %v310_v40  ;;  %v319_v34 = vrot.slane %v3068_v20, 1 }
  0x50   : > { %987 = vmatmul.mubr.f32.vlgmr.msra.gmra.mrb[0].mxu0 %v409_v55  ;;  %2367 = vmatpush1.bf16.msra.mxu1 %v2843_v54  ;;  %v2998_v55 = vsel %vm406_vm1, %v418_v25, %v420_v37  ;;  %v320_v37 = vrot.slane %v3072_v24, 1 }
  0x51   : > { %2225 = vmatpush1.bf16.msra.mxu0 %v2224_v53  ;;  %766 = vmatprep.mubr.f32.mxu1 %v298_v59  ;;  %v423_v53 = vrot.slane %v2943_v30, 2  ;;  %v2239_v59 = vpack.c.bf16 %v628_v49, %v627_v48  ;;  %v636_v48 = vld [vmem:[%s4131_s1 + $0x298] sm:$0xff]  ;;  %v667_v49 = vld [vmem:[%s4131_s1 + $0x390] sm:$0xff] }
  0x52   : > { %991 = vmatprep.mubr.f32.mxu0 %v2841_v52  ;;  %2226 = vmatprep.subr.bf16.mxu0 %v4134_v3  ;;  %v3141_v44 = vpack.c.bf16 %v668_v50, %v667_v49  ;;  %v673_v49 = vld [vmem:[%s4131_s1 + $0x3c0] sm:$0xff]  ;;  %v674_v50 = vld [vmem:[%s4131_s1 + $0x3c8] sm:$0xff] }
  0x53   : > { %767 = vmatmul.mubr.f32.gmra.mrb[2].mxu1 %v2686_v42  ;;  %2352 = vmatprep.subr.bf16.mxu1 %v4134_v3  ;;  %v2904_v42 = vsel %vm293_vm0, %v300_v58, %v302_v6  ;;  %v312_v58 = vrot.slane %v202_v46, 1  ;;  %v315_v6 = vrot.slane %v3007_v60, 1 }
  0x54   : > { %992 = vmatmul.mubr.f32.gmra.mrb[2].mxu0 %v411_v41  ;;  %771 = vmatprep.mubr.f32.mxu1 %v2872_v2  ;;  %v425_v41 = vrot.slane %v202_v46, 2  ;;  %v635_v46 = vld [vmem:[%s4131_s1 + $0x290] sm:$0xff]  ;;  %4207 = vst [vmem:[#allocation3_spill] sm:$0xff] %v3141_v44 }
  0x55   : > { %996 = vmatprep.mubr.f32.mxu0 %v2875_v4  ;;  %2228 = vmatpush1.bf16.msra.mxu0 %v2227_v5  ;;  %v314_v5 = vrot.slane %v3004_v57, 1  ;;  %v3100_v35 = vsel %vm293_vm0, %v315_v6, %v317_v22  ;;  %v640_v22 = vld [vmem:[%s4131_s1 + $0x2b8] sm:$0xff] }
  0x56   : > { %2368 = vmatpush1.bf16.msra.mxu1 %v2879_v7  ;;  %2229 = vmatprep.subr.bf16.mxu0 %v4134_v3  ;;  %v3060_v16 = vsel %vm406_vm1, %v423_v53, %v425_v41  ;;  %v638_v41 = vld [vmem:[%s4131_s1 + $0x2a8] sm:$0xff] }
  0x57   : > { %772 = vmatmul.mubr.f32.gmra.mrb[4].mxu1 %v2691_v45  ;;  %2353 = vmatprep.subr.bf16.mxu1 %v4134_v3  ;;  %v2933_v45 = vsel %vm406_vm1, %v413_v1, %v415_v14  ;;  %v663_v14 = vld [vmem:[%s4131_s1 + $0x370] sm:$0xff]  ;;  %v3065_v19 = vsel %vm293_vm0, %v314_v5, %v315_v6  ;;  %v669_v5 = vld [vmem:[%s4131_s1 + $0x3a0] sm:$0xff]  ;;  %v670_v6 = vld [vmem:[%s4131_s1 + $0x3a8] sm:$0xff] }
  0x58   : > { %997 = vmatmul.mubr.f32.gmra.mrb[4].mxu0 %v2900_v13  ;;  %776 = vmatprep.mubr.f32.mxu1 %v2904_v42  ;;  %v3076_v25 = vpack.c.bf16 %v664_v15, %v663_v14  ;;  %v2254_v14 = vpack.c.bf16 %v638_v41, %v637_v0  ;;  %v211_v15 = vld [vmem:[%s2666_s15 + $0xa0] sm:$0x3]  ;;  %v214_v41 = vld [vmem:[%s2666_s15 + $0xb8] sm:$0x3] }
  0x59   : > { %1001 = vmatprep.mubr.f32.mxu0 %v2882_v8  ;;  %2231 = vmatpush1.bf16.msra.mxu0 %v2230_v17  ;;  %v427_v17 = vrot.slane %v3004_v57, 2 }
  0x5a   : > { %2369 = vmatpush1.bf16.msra.mxu1 %v2910_v18  ;;  %2232 = vmatprep.subr.bf16.mxu0 %v4134_v3 }
  0x5b   : > { %777 = vmatmul.mubr.f32.gmra.mrb[6].mxu1 %v2841_v52  ;;  %2354 = vmatprep.subr.bf16.mxu1 %v4134_v3  ;;  %v422_v52 = vrot.slane %v2939_v27, 2 }
  0x5c   : > { %1002 = vmatmul.mubr.f32.gmra.mrb[6].mxu0 %v2933_v45  ;;  %781 = vmatprep.mubr.f32.mxu1 %v2936_v26 }
  0x5d   : > { %1006 = vmatprep.mubr.f32.mxu0 %v2939_v27  ;;  %2234 = vmatpush1.bf16.msra.mxu0 %v2233_v29  ;;  %v3030_v1 = vsel %vm406_vm1, %v422_v52, %v423_v53  ;;  %v665_v29 = vld [vmem:[%s4131_s1 + $0x380] sm:$0xff]  ;;  %v433_v52 = vrot.slane %v3072_v24, 2  ;;  %v3128_v53 = vsel %vm406_vm1, %v428_v21, %v430_v33  ;;  %v3199_v33 = vld [vmem:[%s2666_s15 + $0xa8] sm:$0xff] }
  0x5e   : > { %2370 = vmatpush1.bf16.msra.mxu1 %v2946_v31  ;;  %2235 = vmatprep.subr.bf16.mxu0 %v4134_v3 }
  0x5f   : > { %782 = vmatmul.mubr.f32.gmra.mrb[8].mxu1 %v2875_v4  ;;  %2355 = vmatprep.subr.bf16.mxu1 %v4134_v3  ;;  %v3034_v4 = vsel %vm293_vm0, %v310_v40, %v312_v58  ;;  %v208_v40 = vld [vmem:[%s2666_s15 + $0x88] sm:$0x3]  ;;  %v3134_v58 = vld [vmem:[%s2666_s15 + $0x90] sm:$0xff] }
  0x60   : > { %1007 = vmatmul.mubr.f32.gmra.mrb[8].mxu0 %v2965_v36  ;;  %786 = vmatprep.mubr.f32.mxu1 %v2969_v38  ;;  %v435_v9 = vrot.slane %v208_v40, 2  ;;  %v324_v11 = vrot.slane %v3134_v58, 1 }
  0x61   : > { %1011 = vmatprep.mubr.f32.mxu0 %v2943_v30  ;;  %2237 = vmatpush1.bf16.msra.mxu0 %v2236_v43  ;;  %v3106_v43 = vpack.c.bf16 %v666_v32, %v665_v29 }
  0x62   : > { %2371 = vmatpush1.bf16.msra.mxu1 %v2976_v47  ;;  %2238 = vmatprep.subr.bf16.mxu0 %v4134_v3 }
  0x63   : > { %787 = vmatmul.mubr.f32.gmra.mrb[10].mxu1 %v2882_v8  ;;  %2356 = vmatprep.subr.bf16.mxu1 %v4134_v3  ;;  %v2242_v8 = vpack.c.bf16 %v630_v63, %v629_v62  ;;  %4206 = vst [vmem:[#allocation2_spill] sm:$0xff] %v3106_v43  ;;  %v2251_v62 = vpack.c.bf16 %v636_v48, %v635_v46  ;;  %v3137_v63 = vld [vmem:[%s2666_s15 + $0x98] sm:$0xff]  ;;  %v641_v46 = vld [vmem:[%s4131_s1 + $0x2c0] sm:$0xff]  ;;  %v642_v48 = vld [vmem:[%s4131_s1 + $0x2c8] sm:$0xff] }
  0x64   : > { %1012 = vmatmul.mubr.f32.gmra.mrb[10].mxu0 %v2998_v55  ;;  %791 = vmatprep.mubr.f32.mxu1 %v3001_v56  ;;  %v325_v12 = vrot.slane %v3137_v63, 1  ;;  %v438_v29 = vrot.slane %v3137_v63, 2  ;;  %v2260_v0 = vpack.c.bf16 %v642_v48, %v641_v46  ;;  %v646_v46 = vld [vmem:[%s4131_s1 + $0x2e8] sm:$0xff]  ;;  %v677_v48 = vld [vmem:[%s4131_s1 + $0x3e0] sm:$0xff] }
  0x65   : > { %1016 = vmatprep.mubr.f32.mxu0 %v3004_v57  ;;  %2240 = vmatpush1.bf16.msra.mxu0 %v2239_v59  ;;  %v322_v59 = vrot.slane %v208_v40, 1 }
  0x66   : > { %2372 = vmatpush1.bf16.msra.mxu1 %v3011_v61  ;;  %2241 = vmatprep.subr.bf16.mxu0 %v4134_v3  ;;  %v3196_v32 = vsel %vm293_vm0, %v324_v11, %v325_v12  ;;  %v675_v11 = vld [vmem:[%s4131_s1 + $0x3d0] sm:$0xff] }
  0x67   : > { %792 = vmatmul.mubr.f32.gmra.mrb[12].mxu1 %v2939_v27  ;;  %2357 = vmatprep.subr.bf16.mxu1 %v4134_v3  ;;  %v633_v27 = vld [vmem:[%s4131_s1 + $0x280] sm:$0xff] }
  0x68   : > { %1017 = vmatmul.mubr.f32.gmra.mrb[12].mxu0 %v3030_v1  ;;  %796 = vmatprep.mubr.f32.mxu1 %v3034_v4  ;;  %v2248_v39 = vpack.c.bf16 %v634_v28, %v633_v27  ;;  %v672_v27 = vld [vmem:[%s4131_s1 + $0x3b8] sm:$0xff]  ;;  %v437_v28 = vrot.slane %v3134_v58, 2 }
  0x69   : > { %1021 = vmatprep.mubr.f32.mxu0 %v3007_v60  ;;  %2243 = vmatpush1.bf16.msra.mxu0 %v2242_v8  ;;  %v3160_v8 = vsel %vm406_vm1, %v432_v51, %v433_v52 }
  0x6a   : > { %2373 = vmatpush1.bf16.msra.mxu1 %v3041_v10  ;;  %2244 = vmatprep.subr.bf16.mxu0 %v4134_v3  ;;  %v3225_v51 = vsel %vm406_vm1, %v437_v28, %v438_v29 }
  0x6b   : > { %797 = vmatmul.mubr.f32.gmra.mrb[14].mxu1 %v2943_v30  ;;  %2358 = vmatprep.subr.bf16.mxu1 %v4134_v3  ;;  %v3097_v30 = vsel %vm406_vm1, %v427_v17, %v428_v21  ;;  %v3171_v17 = vpack.c.bf16 %v670_v6, %v669_v5  ;;  %v639_v21 = vld [vmem:[%s4131_s1 + $0x2b0] sm:$0xff]  ;;  %4212 = vst [vmem:[#allocation8_spill] sm:$0xff] %v3225_v51 }
  0x6c   : > { %1022 = vmatmul.mubr.f32.gmra.mrb[14].mxu0 %v3060_v16  ;;  %801 = vmatprep.mubr.f32.mxu1 %v3065_v19  ;;  %v3236_v5 = vpack.c.bf16 %v674_v50, %v673_v49  ;;  %v643_v6 = vld [vmem:[%s4131_s1 + $0x2d0] sm:$0xff]  ;;  %v678_v49 = vld [vmem:[%s4131_s1 + $0x3e8] sm:$0xff] }
  0x6d   : > { %1026 = vmatprep.mubr.f32.mxu0 %v3068_v20  ;;  %2246 = vmatpush1.bf16.msra.mxu0 %v2245_v23  ;;  %4209 = vst [vmem:[#allocation5_spill] sm:$0xff] %v3171_v17  ;;  %v671_v23 = vld [vmem:[%s4131_s1 + $0x3b0] sm:$0xff] }
  0x6e   : > { %2374 = vmatpush1.bf16.msra.mxu1 %v3076_v25  ;;  %2247 = vmatprep.subr.bf16.mxu0 %v4134_v3  ;;  %v3206_v40 = vpack.c.bf16 %v672_v27, %v671_v23  ;;  %4213 = vst [vmem:[#allocation9_spill] sm:$0xff] %v3236_v5  ;;  %v3264_v23 = vld [vmem:[%s2666_s15 + $0xc0] sm:$0xff]  ;;  %v332_v27 = vrot.slane %v214_v41, 1 }
  0x6f   : > { %802 = vmatmul.mubr.f32.gmra.mrb[16].mxu1 %v3004_v57  ;;  %2359 = vmatprep.subr.bf16.mxu1 %v4134_v3  ;;  %v3131_v57 = vsel %vm293_vm0, %v319_v34, %v320_v37  ;;  %v327_v34 = vrot.slane %v211_v15, 1 }
  0x70   : > { %1027 = vmatmul.mubr.f32.gmra.mrb[16].mxu0 %v3097_v30  ;;  %806 = vmatprep.mubr.f32.mxu1 %v3100_v35  ;;  %4211 = vst [vmem:[#allocation7_spill] sm:$0xff] %v3206_v40 }
  0x71   : > { %1031 = vmatprep.mubr.f32.mxu0 %v3072_v24  ;;  %2249 = vmatpush1.bf16.msra.mxu0 %v2248_v39  ;;  %v3202_v39 = vld [vmem:[%s2666_s15 + $0xb0] sm:$0xff] }
  0x72   : > { %2375 = vmatpush1.bf16.msra.mxu1 %v3106_v43  ;;  %2250 = vmatprep.subr.bf16.mxu0 %v4134_v3  ;;  %v3441_v43 = vld [vmem:[%s2666_s15 + $0x128] sm:$0xff] }
  0x73   : > { %807 = vmatmul.mubr.f32.gmra.mrb[18].mxu1 %v3007_v60  ;;  %2360 = vmatprep.subr.bf16.mxu1 %v4134_v3  ;;  %v3164_v60 = vsel %vm293_vm0, %v320_v37, %v322_v59  ;;  %v2257_v37 = vpack.c.bf16 %v640_v22, %v639_v21  ;;  %v329_v59 = vrot.slane %v3199_v33, 1  ;;  %4233 = vst [vmem:[#allocation28_spill] sm:$0xff] %v3441_v43 }
  0x74   : > { %1032 = vmatmul.mubr.f32.gmra.mrb[18].mxu0 %v3128_v53  ;;  %811 = vmatprep.mubr.f32.mxu1 %v3131_v57  ;;  %4208 = vst [vmem:[#allocation4_spill] sm:$0xff] %v3164_v60 }
  0x75   : > { %1036 = vmatprep.mubr.f32.mxu0 %v3134_v58  ;;  %2252 = vmatpush1.bf16.msra.mxu0 %v2251_v62  ;;  %v330_v62 = vrot.slane %v3202_v39, 1 }
  0x76   : > { %2376 = vmatpush1.bf16.msra.mxu1 %v3141_v44  ;;  %2253 = vmatprep.subr.bf16.mxu0 %v4134_v3 }
  0x77   : > { %812 = vmatmul.mubr.f32.gmra.mrb[20].mxu1 %v3068_v20  ;;  %2361 = vmatprep.subr.bf16.mxu1 %v4134_v3  ;;  %v3193_v20 = vsel %vm406_vm1, %v433_v52, %v435_v9  ;;  %v440_v52 = vrot.slane %v211_v15, 2  ;;  %v644_v9 = vld [vmem:[%s4131_s1 + $0x2d8] sm:$0xff]  ;;  %v443_v15 = vrot.slane %v3202_v39, 2  ;;  %v3261_v22 = vsel %vm293_vm0, %v329_v59, %v330_v62 }
  0x78   : > { %1037 = vmatmul.mubr.f32.gmra.mrb[20].mxu0 %v3160_v8  ;;  %816 = vmatprep.mubr.f32.mxu1 %v3164_v60  ;;  %4210 = vst [vmem:[#allocation6_spill] sm:$0xff] %v3193_v20  ;;  %v2263_v28 = vpack.c.bf16 %v644_v9, %v643_v6  ;;  %v3294_v59 = vsel %vm293_vm0, %v330_v62, %v332_v27  ;;  %v648_v62 = vld [vmem:[%s4131_s1 + $0x2f8] sm:$0xff]  ;;  %v3438_v60 = vld [vmem:[%s2666_s15 + $0x120] sm:$0xff] }
  0x79   : > { %1041 = vmatprep.mubr.f32.mxu0 %v3137_v63  ;;  %2255 = vmatpush1.bf16.msra.mxu0 %v2254_v14  ;;  %v442_v14 = vrot.slane %v3199_v33, 2  ;;  %v3258_v21 = vsel %vm406_vm1, %v438_v29, %v440_v52  ;;  %v645_v29 = vld [vmem:[%s4131_s1 + $0x2e0] sm:$0xff]  ;;  %v445_v52 = vrot.slane %v214_v41, 2  ;;  %v647_v41 = vld [vmem:[%s4131_s1 + $0x2f0] sm:$0xff]  ;;  %v680_v27 = vld [vmem:[%s4131_s1 + $0x3f8] sm:$0xff]  ;;  %4232 = vst [vmem:[#allocation27_spill] sm:$0xff] %v3438_v60 }
  0x7a   : > { %2377 = vmatpush1.bf16.msra.mxu1 %v3171_v17  ;;  %2256 = vmatprep.subr.bf16.mxu0 %v4134_v3  ;;  %4214 = vst [vmem:[#allocation10_spill] sm:$0xff] %v3258_v21  ;;  %v2266_v9 = vpack.c.bf16 %v646_v46, %v645_v29  ;;  %v447_v29 = vrot.slane %v3264_v23, 2  ;;  %v681_v46 = vld [vmem:[%s4131_s1 + $0x400] sm:$0xff]  ;;  %v3407_v17 = vld [vmem:[%s2666_s15 + $0x108] sm:$0xff] }
  0x7b   : > { %817 = vmatmul.mubr.f32.gmra.mrb[22].mxu1 %v3072_v24  ;;  %2362 = vmatprep.subr.bf16.mxu1 %v4134_v3  ;;  %v3229_v24 = vsel %vm293_vm0, %v325_v12, %v327_v34  ;;  %v676_v12 = vld [vmem:[%s4131_s1 + $0x3d8] sm:$0xff]  ;;  %v3267_v34 = vld [vmem:[%s2666_s15 + $0xc8] sm:$0xff]  ;;  %v3290_v50 = vsel %vm406_vm1, %v442_v14, %v443_v15  ;;  %v679_v14 = vld [vmem:[%s4131_s1 + $0x3f0] sm:$0xff]  ;;  %4226 = vst [vmem:[#allocation21_spill] sm:$0xff] %v3407_v17 }
  0x7c   : > { %1042 = vmatmul.mubr.f32.gmra.mrb[22].mxu0 %v3193_v20  ;;  %821 = vmatprep.mubr.f32.mxu1 %v3196_v32  ;;  %4216 = vst [vmem:[#allocation12_spill] sm:$0xff] %v3290_v50  ;;  %v335_v6 = vrot.slane %v3267_v34, 1  ;;  %v355_v20 = vrot.slane %v3441_v43, 1 }
  0x7d   : > { %1046 = vmatprep.mubr.f32.mxu0 %v3199_v33  ;;  %2258 = vmatpush1.bf16.msra.mxu0 %v2257_v37  ;;  %v3271_v37 = vpack.c.bf16 %v676_v12, %v675_v11  ;;  %v217_v11 = vld [vmem:[%s2666_s15 + $0xd0] sm:$0x3]  ;;  %v3301_v12 = vpack.c.bf16 %v678_v49, %v677_v48  ;;  %v682_v48 = vld [vmem:[%s4131_s1 + $0x408] sm:$0xff] }
  0x7e   : > { %2378 = vmatpush1.bf16.msra.mxu1 %v3206_v40  ;;  %2259 = vmatprep.subr.bf16.mxu0 %v4134_v3  ;;  %v4219_v40 = vmov 0.0|0.0  }
  0x7f   : > { %822 = vmatmul.mubr.f32.gmra.mrb[24].mxu1 %v3134_v58  ;;  %2363 = vmatprep.subr.bf16.mxu1 %v4134_v3  ;;  %4215 = vst [vmem:[#allocation11_spill] sm:$0xff] %v3271_v37  ;;  %4217 = vst [vmem:[#allocation13_spill] sm:$0xff] %v3301_v12 }
  0x80   : > { %1047 = vmatmul.mubr.f32.gmra.mrb[24].mxu0 %v3225_v51  ;;  %826 = vmatprep.mubr.f32.mxu1 %v3229_v24  ;;  %v226_v51 = vld [vmem:[%s2666_s15 + $0x118] sm:$0x3] }
  0x81   : > { %1051 = vmatprep.mubr.f32.mxu0 %v3202_v39  ;;  %2261 = vmatpush1.bf16.msra.mxu0 %v2260_v0  ;;  %v334_v0 = vrot.slane %v3264_v23, 1 }
  0x82   : > { %2379 = vmatpush1.bf16.msra.mxu1 %v3236_v5  ;;  %2262 = vmatprep.subr.bf16.mxu0 %v4134_v3  ;;  %v3338_v5 = vld [vmem:[%s2666_s15 + $0xe0] sm:$0xff] }
  0x83   : > { %827 = vmatmul.mubr.f32.gmra.mrb[26].mxu1 %v3137_v63  ;;  %2364 = vmatprep.subr.bf16.mxu1 %v4134_v3  ;;  %v3331_v49 = vsel %vm293_vm0, %v334_v0, %v335_v6  ;;  %v3346_v0 = vpack.c.bf16 %v682_v48, %v681_v46  ;;  %v220_v46 = vld [vmem:[%s2666_s15 + $0xe8] sm:$0x3] }
  0x84   : > { %1052 = vmatmul.mubr.f32.gmra.mrb[26].mxu0 %v3258_v21  ;;  %831 = vmatprep.mubr.f32.mxu1 %v3261_v22  ;;  %v342_v48 = vrot.slane %v220_v46, 1  ;;  %v3410_v21 = vld [vmem:[%s2666_s15 + $0x110] sm:$0xff] }
  0x85   : > { %1056 = vmatprep.mubr.f32.mxu0 %v3264_v23  ;;  %2264 = vmatpush1.bf16.msra.mxu0 %v2263_v28  ;;  %v3320_v28 = vsel %vm406_vm1, %v443_v15, %v445_v52  ;;  %v2269_v15 = vpack.c.bf16 %v648_v62, %v647_v41  ;;  %v3335_v52 = vld [vmem:[%s2666_s15 + $0xd8] sm:$0xff]  ;;  %4227 = vst [vmem:[#allocation22_spill] sm:$0xff] %v3410_v21  ;;  %v350_v44 = vrot.slane %v3410_v21, 1 }
  0x86   : > { %2380 = vmatpush1.bf16.msra.mxu1 %v3271_v37  ;;  %2265 = vmatprep.subr.bf16.mxu0 %v4134_v3  ;;  %4218 = vst [vmem:[#allocation14_spill] sm:$0xff] %v3320_v28  ;;  %v337_v37 = vrot.slane %v217_v11, 1 }
  0x87   : > { %832 = vmatmul.mubr.f32.gmra.mrb[28].mxu1 %v3199_v33  ;;  %2365 = vmatprep.subr.bf16.mxu1 %v4134_v3  ;;  %v448_v3 = vrot.slane %v3267_v34, 2 }
  0x88   : > { %1057 = vmatmul.mubr.f32.gmra.mrb[28].mxu0 %v3290_v50  ;;  %836 = vmatprep.mubr.f32.mxu1 %v3294_v59  ;;  %v3342_v50 = vpack.c.bf16 %v680_v27, %v679_v14  ;;  %v3355_v62 = vsel %vm293_vm0, %v335_v6, %v337_v37  ;;  %v339_v14 = vrot.slane %v3335_v52, 1  ;;  %v340_v27 = vrot.slane %v3338_v5, 1 }
  0x89   : > { %1061 = vmatprep.mubr.f32.mxu0 %v3267_v34  ;;  %2267 = vmatpush1.bf16.msra.mxu0 %v2266_v9  ;;  %v450_v9 = vrot.slane %v217_v11, 2  ;;  %v3352_v41 = vsel %vm406_vm1, %v447_v29, %v448_v3  ;;  %v452_v37 = vrot.slane %v3335_v52, 2  ;;  %v453_v6 = vrot.slane %v3338_v5, 2 }
  0x8a   : > { %2381 = vmatpush1.bf16.msra.mxu1 %v3301_v12  ;;  %2268 = vmatprep.subr.bf16.mxu0 %v4219_v40  ;;  %4220 = vst [vmem:[#allocation15_spill] sm:$0xff] %v3342_v50  ;;  %4221 = vst [vmem:[#allocation16_spill] sm:$0xff] %v3352_v41  ;;  %v3373_v29 = vsel %vm293_vm0, %v339_v14, %v340_v27 }
  0x8b   : > { %837 = vmatmul.mubr.f32.gmra.mrb[30].mxu1 %v3202_v39  ;;  %2366 = vmatprep.subr.bf16.mxu1 %v4219_v40  ;;  %v3370_v11 = vsel %vm406_vm1, %v448_v3, %v450_v9  ;;  %v3385_v12 = vsel %vm406_vm1, %v452_v37, %v453_v6  ;;  %v3389_v3 = vsel %vm293_vm0, %v340_v27, %v342_v48  ;;  %v455_v9 = vrot.slane %v220_v46, 2 }
  0x8c   : > { %1062 = vmatmul.mubr.f32.gmra.mrb[30].mxu0 %v3320_v28  ;;  %841 = vmatprep.mubr.f32.mxu1 %v3331_v49  ;;  %4222 = vst [vmem:[#allocation17_spill] sm:$0xff] %v3370_v11  ;;  %4224 = vst [vmem:[#allocation19_spill] sm:$0xff] %v3385_v12  ;;  %v223_v28 = vld [vmem:[%s2666_s15 + $0x100] sm:$0x3] }
  0x8d   : > { %1066 = vmatprep.mubr.f32.mxu0 %v3335_v52  ;;  %2270 = vmatpush1.bf16.msra.mxu0 %v2269_v15  ;;  %v3376_v15 = vld [vmem:[%s2666_s15 + $0xf0] sm:$0xff]  ;;  %v3401_v27 = vsel %vm406_vm1, %v453_v6, %v455_v9  ;;  %v347_v48 = vrot.slane %v223_v28, 1  ;;  %v460_v9 = vrot.slane %v223_v28, 2 }
  0x8e   : > { %2382 = vmatpush1.bf16.msra.mxu1 %v3342_v50  ;;  %2271 = vmatprep.subr.bf16.mxu0 %v4219_v40  ;;  %v3379_v50 = vld [vmem:[%s2666_s15 + $0xf8] sm:$0xff]  ;;  %v344_v14 = vrot.slane %v3376_v15, 1  ;;  %v457_v37 = vrot.slane %v3376_v15, 2  ;;  %4225 = vst [vmem:[#allocation20_spill] sm:$0xff] %v3401_v27 }
  0x8f   : > { %842 = vmatmul.mubr.f32.gmra.mrb[32].mxu1 %v3264_v23  ;;  %2320 = vmatprep.subr.bf16.mxu1 %v3346_v0  ;;  %4223 = vst [vmem:[#allocation18_spill] sm:$0xff] %v3379_v50 }
  0x90   : > { %1067 = vmatmul.mubr.f32.gmra.mrb[32].mxu0 %v3352_v41  ;;  %846 = vmatprep.mubr.f32.mxu1 %v3355_v62  ;;  %v345_v41 = vrot.slane %v3379_v50, 1 }
  0x91   : > { %1071 = vmatprep.mubr.f32.mxu0 %v3338_v5 }
  0x92   : > { %v3404_v46 = vsel %vm293_vm0, %v344_v14, %v345_v41  ;;  %v3420_v6 = vsel %vm293_vm0, %v345_v41, %v347_v48  ;;  %v349_v14 = vrot.slane %v3407_v17, 1  ;;  %v352_v48 = vrot.slane %v226_v51, 1 }
  0x93   : > { %847 = vmatmul.mubr.f32.gmra.mrb[34].mxu1 %v3267_v34  ;;  %4229 = vst [vmem:[#allocation24_spill] sm:$0xff] %v3420_v6 }
  0x94   : > { %1072 = vmatmul.mubr.f32.gmra.mrb[34].mxu0 %v3370_v11  ;;  %851 = vmatprep.mubr.f32.mxu1 %v3373_v29  ;;  %v458_v11 = vrot.slane %v3379_v50, 2  ;;  %v3435_v41 = vsel %vm293_vm0, %v349_v14, %v350_v44  ;;  %v354_v14 = vrot.slane %v3438_v60, 1 }
  0x95   : > { %1076 = vmatprep.mubr.f32.mxu0 %v3376_v15  ;;  %4231 = vst [vmem:[#allocation26_spill] sm:$0xff] %v3435_v41 }
  0x96   : > { %v3432_v28 = vsel %vm406_vm1, %v458_v11, %v460_v9  ;;  %v465_v9 = vrot.slane %v226_v51, 2  ;;  %v3465_v51 = vsel %vm293_vm0, %v354_v14, %v355_v20 }
  0x97   : > { %852 = vmatmul.mubr.f32.gmra.mrb[36].mxu1 %v3335_v52  ;;  %4230 = vst [vmem:[#allocation25_spill] sm:$0xff] %v3432_v28  ;;  %4237 = vst [vmem:[#allocation32_spill] sm:$0xff] %v3465_v51 }
  0x98   : > { %1077 = vmatmul.mubr.f32.gmra.mrb[36].mxu0 %v3385_v12  ;;  %856 = vmatprep.mubr.f32.mxu1 %v3389_v3  ;;  %v3416_v12 = vsel %vm406_vm1, %v457_v37, %v458_v11  ;;  %v462_v37 = vrot.slane %v3407_v17, 2  ;;  %v3451_v11 = vsel %vm293_vm0, %v350_v44, %v352_v48  ;;  %v468_v48 = vrot.slane %v3441_v43, 2 }
  0x99   : > { %1081 = vmatprep.mubr.f32.mxu0 %v3379_v50  ;;  %4228 = vst [vmem:[#allocation23_spill] sm:$0xff] %v3416_v12  ;;  %4235 = vst [vmem:[#allocation30_spill] sm:$0xff] %v3451_v11 }
  0x9b   : > { %857 = vmatmul.mubr.f32.gmra.mrb[38].mxu1 %v3338_v5 }
  0x9c   : > { %1082 = vmatmul.mubr.f32.gmra.mrb[38].mxu0 %v3401_v27  ;;  %861 = vmatprep.mubr.f32.mxu1 %v3404_v46  ;;  %v463_v27 = vrot.slane %v3410_v21, 2 }
  0x9d   : > { %1086 = vmatprep.mubr.f32.mxu0 %v3407_v17 }
  0x9e   : > { %v3462_v44 = vsel %vm406_vm1, %v463_v27, %v465_v9 }
  0x9f   : > { %862 = vmatmul.mubr.f32.gmra.mrb[40].mxu1 %v3376_v15  ;;  %4236 = vst [vmem:[#allocation31_spill] sm:$0xff] %v3462_v44 }
  0xa0   : > { %1087 = vmatmul.mubr.f32.gmra.mrb[40].mxu0 %v3416_v12  ;;  %866 = vmatprep.mubr.f32.mxu1 %v3420_v6  ;;  %v3447_v12 = vsel %vm406_vm1, %v462_v37, %v463_v27  ;;  %v467_v37 = vrot.slane %v3438_v60, 2  ;;  %v238_v6 = vld [vmem:[%s2666_s15 + $0x178] sm:$0x3] }
  0xa1   : > { %1091 = vmatprep.mubr.f32.mxu0 %v3410_v21  ;;  %4234 = vst [vmem:[#allocation29_spill] sm:$0xff] %v3447_v12 }
  0xa2   : > { %v3479_v27 = vsel %vm406_vm1, %v467_v37, %v468_v48 }
  0xa3   : > { %867 = vmatmul.mubr.f32.gmra.mrb[42].mxu1 %v3379_v50  ;;  %v229_v50 = vld [vmem:[%s2666_s15 + $0x130] sm:$0x3]  ;;  %4239 = vst [vmem:[#allocation34_spill] sm:$0xff] %v3479_v27 }
  0xa4   : > { %1092 = vmatmul.mubr.f32.gmra.mrb[42].mxu0 %v3432_v28  ;;  %871 = vmatprep.mubr.f32.mxu1 %v3435_v41  ;;  %v357_v28 = vrot.slane %v229_v50, 1  ;;  %v3469_v41 = vld [vmem:[%s2666_s15 + $0x138] sm:$0xff] }
  0xa5   : > { %1096 = vmatprep.mubr.f32.mxu0 %v3438_v60  ;;  %4238 = vst [vmem:[#allocation33_spill] sm:$0xff] %v3469_v41  ;;  %v359_v14 = vrot.slane %v3469_v41, 1 }
  0xa6   : > { %v3482_v9 = vsel %vm293_vm0, %v355_v20, %v357_v28 }
  0xa7   : > { %872 = vmatmul.mubr.f32.gmra.mrb[44].mxu1 %v3407_v17  ;;  %v3472_v17 = vld [vmem:[%s2666_s15 + $0x140] sm:$0xff]  ;;  %4240 = vst [vmem:[#allocation35_spill] sm:$0xff] %v3482_v9 }
  0xa8   : > { %1097 = vmatmul.mubr.f32.gmra.mrb[44].mxu0 %v3447_v12  ;;  %876 = vmatprep.mubr.f32.mxu1 %v3451_v11  ;;  %v470_v12 = vrot.slane %v229_v50, 2  ;;  %v360_v11 = vrot.slane %v3472_v17, 1  ;;  %v472_v50 = vrot.slane %v3469_v41, 2 }
  0xa9   : > { %1101 = vmatprep.mubr.f32.mxu0 %v3441_v43 }
  0xaa   : > { %v3494_v20 = vsel %vm406_vm1, %v468_v48, %v470_v12  ;;  %v3497_v28 = vsel %vm293_vm0, %v359_v14, %v360_v11 }
  0xab   : > { %877 = vmatmul.mubr.f32.gmra.mrb[46].mxu1 %v3410_v21  ;;  %v232_v21 = vld [vmem:[%s2666_s15 + $0x148] sm:$0x3]  ;;  %4241 = vst [vmem:[#allocation36_spill] sm:$0xff] %v3494_v20  ;;  %4242 = vst [vmem:[#allocation37_spill] sm:$0xff] %v3497_v28 }
  0xac   : > { %1102 = vmatmul.mubr.f32.gmra.mrb[46].mxu0 %v3462_v44  ;;  %881 = vmatprep.mubr.f32.mxu1 %v3465_v51  ;;  %v473_v44 = vrot.slane %v3472_v17, 2  ;;  %v362_v37 = vrot.slane %v232_v21, 1  ;;  %v3500_v51 = vld [vmem:[%s2666_s15 + $0x150] sm:$0xff]  ;;  %v475_v48 = vrot.slane %v232_v21, 2 }
  0xad   : > { %1106 = vmatprep.mubr.f32.mxu0 %v3469_v41  ;;  %v364_v14 = vrot.slane %v3500_v51, 1 }
  0xae   : > { %v3513_v12 = vsel %vm293_vm0, %v360_v11, %v362_v37  ;;  %v3525_v21 = vsel %vm406_vm1, %v473_v44, %v475_v48 }
  0xaf   : > { %882 = vmatmul.mubr.f32.gmra.mrb[48].mxu1 %v3438_v60  ;;  %v3503_v60 = vld [vmem:[%s2666_s15 + $0x158] sm:$0xff]  ;;  %4244 = vst [vmem:[#allocation39_spill] sm:$0xff] %v3513_v12  ;;  %4245 = vst [vmem:[#allocation40_spill] sm:$0xff] %v3525_v21 }
  0xb0   : > { %1107 = vmatmul.mubr.f32.gmra.mrb[48].mxu0 %v3479_v27  ;;  %886 = vmatprep.mubr.f32.mxu1 %v3482_v9  ;;  %v3509_v27 = vsel %vm406_vm1, %v472_v50, %v473_v44  ;;  %v365_v9 = vrot.slane %v3503_v60, 1  ;;  %v477_v50 = vrot.slane %v3500_v51, 2 }
  0xb1   : > { %1111 = vmatprep.mubr.f32.mxu0 %v3472_v17  ;;  %4243 = vst [vmem:[#allocation38_spill] sm:$0xff] %v3509_v27 }
  0xb2   : > { %v3528_v11 = vsel %vm293_vm0, %v364_v14, %v365_v9 }
  0xb3   : > { %887 = vmatmul.mubr.f32.gmra.mrb[50].mxu1 %v3441_v43  ;;  %v235_v43 = vld [vmem:[%s2666_s15 + $0x160] sm:$0x3]  ;;  %4246 = vst [vmem:[#allocation41_spill] sm:$0xff] %v3528_v11 }
  0xb4   : > { %1112 = vmatmul.mubr.f32.gmra.mrb[50].mxu0 %v3494_v20  ;;  %891 = vmatprep.mubr.f32.mxu1 %v3497_v28  ;;  %v478_v20 = vrot.slane %v3503_v60, 2  ;;  %v367_v37 = vrot.slane %v235_v43, 1  ;;  %v3531_v28 = vld [vmem:[%s2666_s15 + $0x168] sm:$0xff]  ;;  %v480_v48 = vrot.slane %v235_v43, 2 }
  0xb5   : > { %1116 = vmatprep.mubr.f32.mxu0 %v3500_v51  ;;  %v369_v14 = vrot.slane %v3531_v28, 1 }
  0xb6   : > { %v3544_v44 = vsel %vm293_vm0, %v365_v9, %v367_v37  ;;  %v3555_v9 = vsel %vm406_vm1, %v478_v20, %v480_v48  ;;  %v485_v48 = vrot.slane %v238_v6, 2 }
  0xb7   : > { %892 = vmatmul.mubr.f32.gmra.mrb[52].mxu1 %v3469_v41  ;;  %v3534_v41 = vld [vmem:[%s2666_s15 + $0x170] sm:$0xff]  ;;  %4248 = vst [vmem:[#allocation43_spill] sm:$0xff] %v3555_v9 }
  0xb8   : > { %1117 = vmatmul.mubr.f32.gmra.mrb[52].mxu0 %v3509_v27  ;;  %896 = vmatprep.mubr.f32.mxu1 %v3513_v12  ;;  %v3540_v27 = vsel %vm406_vm1, %v477_v50, %v478_v20  ;;  %v370_v12 = vrot.slane %v3534_v41, 1  ;;  %v482_v50 = vrot.slane %v3531_v28, 2  ;;  %v483_v37 = vrot.slane %v3534_v41, 2 }
  0xb9   : > { %1121 = vmatprep.mubr.f32.mxu0 %v3503_v60  ;;  %4247 = vst [vmem:[#allocation42_spill] sm:$0xff] %v3540_v27 }
  0xba   : > { %v3558_v43 = vsel %vm293_vm0, %v369_v14, %v370_v12  ;;  %v3575_v14 = vld [vmem:[%s2666_s15 + $0x188] sm:$0xff] }
  0xbb   : > { %897 = vmatmul.mubr.f32.gmra.mrb[54].mxu1 %v3472_v17 }
  0xbc   : > { %1122 = vmatmul.mubr.f32.gmra.mrb[54].mxu0 %v3525_v21  ;;  %901 = vmatprep.mubr.f32.mxu1 %v3528_v11  ;;  %v372_v21 = vrot.slane %v238_v6, 1  ;;  %v3562_v11 = vld [vmem:[%s2666_s15 + $0x180] sm:$0xff]  ;;  %v683_v6 = vld [vmem:[%s4131_s1 + $0x410] sm:$0xff] }
  0xbd   : > { %1126 = vmatprep.mubr.f32.mxu0 %v3531_v28 }
  0xbe   : > { %v3572_v20 = vsel %vm293_vm0, %v370_v12, %v372_v21  ;;  %v684_v12 = vld [vmem:[%s4131_s1 + $0x418] sm:$0xff] }
  0xbf   : > { %902 = vmatmul.mubr.f32.gmra.mrb[56].mxu1 %v3500_v51  ;;  %v2323_v21 = vpack.c.bf16 %v684_v12, %v683_v6  ;;  %v4255_v6 = vld [vmem:[#allocation8_spill] sm:$0xff]  ;;  %v4256_v12 = vld [vmem:[#allocation3_spill] sm:$0xff] }
  0xc0   : > { %1127 = vmatmul.mubr.f32.gmra.mrb[56].mxu0 %v3540_v27  ;;  %906 = vmatprep.mubr.f32.mxu1 %v3544_v44  ;;  %v3569_v27 = vsel %vm406_vm1, %v482_v50, %v483_v37  ;;  %v685_v50 = vld [vmem:[%s4131_s1 + $0x420] sm:$0xff] }
  0xc1   : > { %1131 = vmatprep.mubr.f32.mxu0 %v3534_v41 }
  0xc3   : > { %907 = vmatmul.mubr.f32.gmra.mrb[58].mxu1 %v3503_v60 }
  0xc4   : > { %1132 = vmatmul.mubr.f32.gmra.mrb[58].mxu0 %v3555_v9  ;;  %911 = vmatprep.mubr.f32.mxu1 %v3558_v43  ;;  %v3582_v9 = vsel %vm406_vm1, %v483_v37, %v485_v48  ;;  %v686_v37 = vld [vmem:[%s4131_s1 + $0x428] sm:$0xff]  ;;  %v696_v48 = vld [vmem:[%s4131_s1 + $0x478] sm:$0xff] }
  0xc5   : > { %1136 = vmatprep.mubr.f32.mxu0 %v3562_v11 }
  0xc7   : > { %912 = vmatmul.mubr.f32.gmra.mrb[60].mxu1 %v3531_v28 }
  0xc8   : > { %1137 = vmatmul.mubr.f32.gmra.mrb[60].mxu0 %v3569_v27  ;;  %916 = vmatprep.mubr.f32.mxu1 %v3572_v20 }
  0xc9   : > { %1141 = vmatprep.mubr.f32.mxu0 %v3575_v14 }
  0xcb   : > { %917 = vmatmul.mubr.f32.gmra.mrb[62].mxu1 %v3534_v41 }
  0xcc   : > { %1142 = vmatmul.mubr.f32.gmra.mrb[62].mxu0 %v3582_v9  ;;  %1476 = vmatprep.mubr.f32.mxu1 %v3196_v32 }
  0xcd   : > { %1211 = vmatprep.mubr.f32.mxu0 %v2900_v13  ;;  %v687_v13 = vld [vmem:[%s4131_s1 + $0x430] sm:$0xff] }
  0xcf   : > { %1477 = vmatmul.mubr.f32.vlgmr.msra.gmra.mrb[64].mxu1 %v3134_v58  ;;  %v690_v58 = vld [vmem:[%s4131_s1 + $0x448] sm:$0xff] }
  0xd0   : > { %1212 = vmatmul.mubr.f32.vlgmr.msra.gmra.mrb[0].mxu0 %v2872_v2  ;;  %2322 = vmatpush3.bf16.msra.mxu1 %v3346_v0  ;;  %v2327_v2 = vpack.c.bf16 %v686_v37, %v685_v50  ;;  %v694_v0 = vld [vmem:[%s4131_s1 + $0x468] sm:$0xff]  ;;  %v4259_v50 = vld [vmem:[#allocation10_spill] sm:$0xff]  ;;  %v4260_v37 = vld [vmem:[#allocation5_spill] sm:$0xff] }
  0xd1   : > { %2273 = vmatpush1.bf16.msra.mxu0 %v2843_v54  ;;  %1216 = vmatprep.mubr.f32.mxu0 %v2933_v45  ;;  %v688_v54 = vld [vmem:[%s4131_s1 + $0x438] sm:$0xff]  ;;  %v689_v45 = vld [vmem:[%s4131_s1 + $0x440] sm:$0xff] }
  0xd2   : > { %1481 = vmatprep.mubr.f32.mxu1 %v3229_v24  ;;  %2274 = vmatprep.subr.bf16.mxu0 %v4219_v40 }
  0xd3   : > { %1482 = vmatmul.mubr.f32.gmra.mrb[66].mxu1 %v3137_v63  ;;  %2324 = vmatprep.subr.bf16.mxu1 %v2323_v21  ;;  %v691_v63 = vld [vmem:[%s4131_s1 + $0x450] sm:$0xff] }
  0xd4   : > { %1217 = vmatmul.mubr.f32.gmra.mrb[2].mxu0 %v2904_v42  ;;  %1486 = vmatprep.mubr.f32.mxu1 %v3261_v22  ;;  %v2331_v42 = vpack.c.bf16 %v688_v54, %v687_v13  ;;  %v4262_v13 = vld [vmem:[#allocation32_spill] sm:$0xff] }
  0xd5   : > { %1221 = vmatprep.mubr.f32.mxu0 %v2965_v36  ;;  %2276 = vmatpush1.bf16.msra.mxu0 %v2879_v7  ;;  %v2335_v7 = vpack.c.bf16 %v690_v58, %v689_v45  ;;  %v4263_v54 = vld [vmem:[#allocation12_spill] sm:$0xff]  ;;  %v4266_v45 = vld [vmem:[#allocation35_spill] sm:$0xff]  ;;  %v4267_v58 = vld [vmem:[#allocation14_spill] sm:$0xff] }
  0xd6   : > { %2326 = vmatpush3.bf16.msra.mxu1 %v2323_v21  ;;  %2277 = vmatprep.subr.bf16.mxu0 %v4219_v40  ;;  %v4258_v21 = vld [vmem:[#allocation30_spill] sm:$0xff] }
  0xd7   : > { %1487 = vmatmul.mubr.f32.gmra.mrb[68].mxu1 %v3199_v33  ;;  %2328 = vmatprep.subr.bf16.mxu1 %v2327_v2  ;;  %v692_v33 = vld [vmem:[%s4131_s1 + $0x458] sm:$0xff] }
  0xd8   : > { %1222 = vmatmul.mubr.f32.gmra.mrb[4].mxu0 %v2936_v26  ;;  %1491 = vmatprep.mubr.f32.mxu1 %v3294_v59 }
  0xd9   : > { %1226 = vmatprep.mubr.f32.mxu0 %v2998_v55  ;;  %2279 = vmatpush1.bf16.msra.mxu0 %v2910_v18  ;;  %v2339_v18 = vpack.c.bf16 %v692_v33, %v691_v63  ;;  %v4270_v63 = vld [vmem:[#allocation37_spill] sm:$0xff]  ;;  %v4271_v33 = vld [vmem:[#allocation16_spill] sm:$0xff] }
  0xda   : > { %2280 = vmatprep.subr.bf16.mxu0 %v4219_v40  ;;  %2330 = vmatpush3.bf16.msra.mxu1 %v2327_v2  ;;  %v4261_v2 = vld [vmem:[#allocation22_spill] sm:$0xff] }
  0xdb   : > { %1492 = vmatmul.mubr.f32.gmra.mrb[70].mxu1 %v3202_v39  ;;  %2332 = vmatprep.subr.bf16.mxu1 %v2331_v42  ;;  %v693_v39 = vld [vmem:[%s4131_s1 + $0x460] sm:$0xff] }
  0xdc   : > { %1227 = vmatmul.mubr.f32.gmra.mrb[6].mxu0 %v2969_v38  ;;  %1496 = vmatprep.mubr.f32.mxu1 %v3331_v49 }
  0xdd   : > { %1231 = vmatprep.mubr.f32.mxu0 %v3030_v1  ;;  %2282 = vmatpush1.bf16.msra.mxu0 %v2946_v31  ;;  %v2343_v31 = vpack.c.bf16 %v694_v0, %v693_v39  ;;  %v4274_v39 = vld [vmem:[#allocation39_spill] sm:$0xff]  ;;  %v4275_v0 = vld [vmem:[#allocation17_spill] sm:$0xff] }
  0xde   : > { %2283 = vmatprep.subr.bf16.mxu0 %v4219_v40  ;;  %2334 = vmatpush3.bf16.msra.mxu1 %v2331_v42  ;;  %v4264_v42 = vld [vmem:[#allocation7_spill] sm:$0xff] }
  0xdf   : > { %1497 = vmatmul.mubr.f32.gmra.mrb[72].mxu1 %v3264_v23  ;;  %2336 = vmatprep.subr.bf16.mxu1 %v2335_v7  ;;  %v695_v23 = vld [vmem:[%s4131_s1 + $0x470] sm:$0xff] }
  0xe0   : > { %1232 = vmatmul.mubr.f32.gmra.mrb[8].mxu0 %v3001_v56  ;;  %1501 = vmatprep.mubr.f32.mxu1 %v3355_v62 }
  0xe1   : > { %1236 = vmatprep.mubr.f32.mxu0 %v3060_v16  ;;  %2285 = vmatpush1.bf16.msra.mxu0 %v2976_v47  ;;  %v2347_v47 = vpack.c.bf16 %v696_v48, %v695_v23  ;;  %v4278_v23 = vld [vmem:[#allocation19_spill] sm:$0xff] }
  0xe2   : > { %2286 = vmatprep.subr.bf16.mxu0 %v4219_v40  ;;  %2338 = vmatpush3.bf16.msra.mxu1 %v2335_v7  ;;  %v4268_v7 = vld [vmem:[#allocation9_spill] sm:$0xff]  ;;  %v4279_v48 = vld [vmem:[#allocation15_spill] sm:$0xff] }
  0xe3   : > { %1502 = vmatmul.mubr.f32.gmra.mrb[74].mxu1 %v3267_v34  ;;  %2340 = vmatprep.subr.bf16.mxu1 %v2339_v18  ;;  %v4252_v34 = vld [vmem:[#allocation18_spill] sm:$0xff] }
  0xe4   : > { %1237 = vmatmul.mubr.f32.gmra.mrb[10].mxu0 %v3034_v4  ;;  %1506 = vmatprep.mubr.f32.mxu1 %v3373_v29 }
  0xe5   : > { %1241 = vmatprep.mubr.f32.mxu0 %v3097_v30  ;;  %2288 = vmatpush1.bf16.msra.mxu0 %v3011_v61  ;;  %v4249_v61 = vld [vmem:[#allocation24_spill] sm:$0xff] }
  0xe6   : > { %2289 = vmatprep.subr.bf16.mxu0 %v4219_v40  ;;  %2342 = vmatpush3.bf16.msra.mxu1 %v2339_v18  ;;  %v4272_v18 = vld [vmem:[#allocation11_spill] sm:$0xff] }
  0xe7   : > { %1507 = vmatmul.mubr.f32.gmra.mrb[76].mxu1 %v3335_v52  ;;  %2344 = vmatprep.subr.bf16.mxu1 %v2343_v31  ;;  %v4253_v52 = vld [vmem:[#allocation4_spill] sm:$0xff] }
  0xe8   : > { %1242 = vmatmul.mubr.f32.gmra.mrb[12].mxu0 %v3065_v19  ;;  %1511 = vmatprep.mubr.f32.mxu1 %v3389_v3 }
  0xe9   : > { %1246 = vmatprep.mubr.f32.mxu0 %v3128_v53  ;;  %2291 = vmatpush1.bf16.msra.mxu0 %v3041_v10  ;;  %v4250_v10 = vld [vmem:[#allocation6_spill] sm:$0xff] }
  0xea   : > { %2292 = vmatprep.subr.bf16.mxu0 %v4219_v40  ;;  %2346 = vmatpush3.bf16.msra.mxu1 %v2343_v31  ;;  %v4276_v31 = vld [vmem:[#allocation13_spill] sm:$0xff] }
  0xeb   : > { %1512 = vmatmul.mubr.f32.gmra.mrb[78].mxu1 %v3338_v5  ;;  %2348 = vmatprep.subr.bf16.mxu1 %v2347_v47  ;;  %v4251_v5 = vld [vmem:[#allocation2_spill] sm:$0xff] }
  0xec   : > { %1247 = vmatmul.mubr.f32.gmra.mrb[14].mxu0 %v3100_v35  ;;  %1516 = vmatprep.mubr.f32.mxu1 %v3404_v46 }
  0xed   : > { %1251 = vmatprep.mubr.f32.mxu0 %v3160_v8  ;;  %2294 = vmatpush1.bf16.msra.mxu0 %v3076_v25  ;;  %v4254_v25 = vld [vmem:[#allocation26_spill] sm:$0xff] }
  0xee   : > { %2295 = vmatprep.subr.bf16.mxu0 %v4219_v40  ;;  %2350 = vmatpush3.bf16.msra.mxu1 %v2347_v47  ;;  %v3748_v47 = vld [vmem:[%s2666_s15 + $0x198] sm:$0xff] }
  0xef   : > { %1517 = vmatmul.mubr.f32.gmra.mrb[80].mxu1 %v3376_v15  ;;  %v4257_v15 = vld [vmem:[#allocation21_spill] sm:$0xff] }
  0xf0   : > { %1252 = vmatmul.mubr.f32.gmra.mrb[16].mxu0 %v3131_v57  ;;  %1521 = vmatprep.mubr.f32.mxu1 %v4249_v61 }
  0xf1   : > { %1256 = vmatprep.mubr.f32.mxu0 %v4250_v10  ;;  %2297 = vmatpush1.bf16.msra.mxu0 %v4251_v5  ;;  %v3751_v5 = vld [vmem:[%s2666_s15 + $0x1a0] sm:$0xff] }
  0xf2   : > { %2298 = vmatprep.subr.bf16.mxu0 %v4219_v40 }
  0xf3   : > { %1522 = vmatmul.mubr.f32.gmra.mrb[82].mxu1 %v4252_v34  ;;  %v539_v34 = vrot.slane %v3748_v47, 1 }
  0xf4   : > { %1257 = vmatmul.mubr.f32.gmra.mrb[18].mxu0 %v4253_v52  ;;  %1526 = vmatprep.mubr.f32.mxu1 %v4254_v25 }
  0xf5   : > { %1261 = vmatprep.mubr.f32.mxu0 %v4255_v6  ;;  %2300 = vmatpush1.bf16.msra.mxu0 %v4256_v12  ;;  %v540_v12 = vrot.slane %v3751_v5, 1 }
  0xf6   : > { %2301 = vmatprep.subr.bf16.mxu0 %v4219_v40 }
  0xf7   : > { %1527 = vmatmul.mubr.f32.gmra.mrb[84].mxu1 %v4257_v15  ;;  %v3763_v15 = vld [vmem:[%s2666_s15 + $0x1a8] sm:$0x3] }
  0xf8   : > { %1262 = vmatmul.mubr.f32.gmra.mrb[20].mxu0 %v3196_v32  ;;  %1531 = vmatprep.mubr.f32.mxu1 %v4258_v21  ;;  %v4265_v32 = vld [vmem:[#allocation27_spill] sm:$0xff] }
  0xf9   : > { %1266 = vmatprep.mubr.f32.mxu0 %v4259_v50  ;;  %2303 = vmatpush1.bf16.msra.mxu0 %v4260_v37  ;;  %v542_v37 = vrot.slane %v3763_v15, 1 }
  0xfa   : > { %2304 = vmatprep.subr.bf16.mxu0 %v4219_v40 }
  0xfb   : > { %1532 = vmatmul.mubr.f32.gmra.mrb[86].mxu1 %v4261_v2 }
  0xfc   : > { %1267 = vmatmul.mubr.f32.gmra.mrb[22].mxu0 %v3229_v24  ;;  %1536 = vmatprep.mubr.f32.mxu1 %v4262_v13  ;;  %v4269_v24 = vld [vmem:[#allocation28_spill] sm:$0xff] }
  0xfd   : > { %1271 = vmatprep.mubr.f32.mxu0 %v4263_v54  ;;  %2306 = vmatpush1.bf16.msra.mxu0 %v4264_v42 }
  0xfe   : > { %2307 = vmatprep.subr.bf16.mxu0 %v4219_v40 }
  0xff   : > { %1537 = vmatmul.mubr.f32.gmra.mrb[88].mxu1 %v4265_v32  ;;  %v4285_v32 = vld [vmem:[#allocation34_spill] sm:$0xff] }
 0x100   : > { %1272 = vmatmul.mubr.f32.gmra.mrb[24].mxu0 %v3261_v22  ;;  %1541 = vmatprep.mubr.f32.mxu1 %v4266_v45  ;;  %v4273_v22 = vld [vmem:[#allocation33_spill] sm:$0xff] }
 0x101   : > { %1276 = vmatprep.mubr.f32.mxu0 %v4267_v58  ;;  %2309 = vmatpush1.bf16.msra.mxu0 %v4268_v7 }
 0x102   : > { %2310 = vmatprep.subr.bf16.mxu0 %v4219_v40 }
 0x103   : > { %1542 = vmatmul.mubr.f32.gmra.mrb[90].mxu1 %v4269_v24 }
 0x104   : > { %1277 = vmatmul.mubr.f32.gmra.mrb[26].mxu0 %v3294_v59  ;;  %1546 = vmatprep.mubr.f32.mxu1 %v4270_v63  ;;  %v4277_v59 = vld [vmem:[#allocation41_spill] sm:$0xff] }
 0x105   : > { %1281 = vmatprep.mubr.f32.mxu0 %v4271_v33  ;;  %2312 = vmatpush1.bf16.msra.mxu0 %v4272_v18  ;;  %v4286_v18 = vld [vmem:[#allocation36_spill] sm:$0xff] }
 0x106   : > { %2313 = vmatprep.subr.bf16.mxu0 %v4219_v40 }
 0x107   : > { %1547 = vmatmul.mubr.f32.gmra.mrb[92].mxu1 %v4273_v22 }
 0x108   : > { %1282 = vmatmul.mubr.f32.gmra.mrb[28].mxu0 %v3331_v49  ;;  %1551 = vmatprep.mubr.f32.mxu1 %v4274_v39  ;;  %v4280_v49 = vld [vmem:[#allocation20_spill] sm:$0xff] }
 0x109   : > { %1286 = vmatprep.mubr.f32.mxu0 %v4275_v0  ;;  %2315 = vmatpush1.bf16.msra.mxu0 %v4276_v31  ;;  %v4287_v31 = vld [vmem:[#allocation38_spill] sm:$0xff] }
 0x10a   : > { %2316 = vmatprep.subr.bf16.mxu0 %v4219_v40  ;;  %v522_v40 = vrot.slane %v3562_v11, 1 }
 0x10b   : > { %1552 = vmatmul.mubr.f32.gmra.mrb[94].mxu1 %v3472_v17  ;;  %v4281_v17 = vld [vmem:[#allocation23_spill] sm:$0xff] }
 0x10c   : > { %1287 = vmatmul.mubr.f32.gmra.mrb[30].mxu0 %v3355_v62  ;;  %1556 = vmatprep.mubr.f32.mxu1 %v4277_v59  ;;  %v523_v62 = vrot.slane %v3575_v14, 1 }
 0x10d   : > { %1291 = vmatprep.mubr.f32.mxu0 %v4278_v23  ;;  %2318 = vmatpush1.bf16.msra.mxu0 %v4279_v48 }
 0x10f   : > { %1557 = vmatmul.mubr.f32.gmra.mrb[96].mxu1 %v3500_v51  ;;  %v3737_v51 = vld [vmem:[%s2666_s15 + $0x190] sm:$0x3] }
 0x110   : > { %1292 = vmatmul.mubr.f32.gmra.mrb[32].mxu0 %v3373_v29  ;;  %1561 = vmatprep.mubr.f32.mxu1 %v3544_v44  ;;  %v3744_v29 = vsel %vm293_vm0, %v522_v40, %v523_v62 }
 0x111   : > { %1296 = vmatprep.mubr.f32.mxu0 %v4280_v49 }
 0x113   : > { %1562 = vmatmul.mubr.f32.gmra.mrb[98].mxu1 %v3503_v60  ;;  %v4282_v60 = vld [vmem:[#allocation25_spill] sm:$0xff] }
 0x114   : > { %1297 = vmatmul.mubr.f32.gmra.mrb[34].mxu0 %v3389_v3  ;;  %1566 = vmatprep.mubr.f32.mxu1 %v3558_v43  ;;  %v525_v3 = vrot.slane %v3737_v51, 1 }
 0x115   : > { %1301 = vmatprep.mubr.f32.mxu0 %v4281_v17 }
 0x117   : > { %1567 = vmatmul.mubr.f32.gmra.mrb[100].mxu1 %v3531_v28  ;;  %v3758_v28 = vsel %vm293_vm0, %v523_v62, %v525_v3 }
 0x118   : > { %1302 = vmatmul.mubr.f32.gmra.mrb[36].mxu0 %v3404_v46  ;;  %1571 = vmatprep.mubr.f32.mxu1 %v3572_v20  ;;  %v4283_v46 = vld [vmem:[#allocation29_spill] sm:$0xff] }
 0x119   : > { %1306 = vmatprep.mubr.f32.mxu0 %v4282_v60 }
 0x11b   : > { %1572 = vmatmul.mubr.f32.gmra.mrb[102].mxu1 %v3534_v41  ;;  %v4284_v41 = vld [vmem:[#allocation31_spill] sm:$0xff] }
 0x11c   : > { %1307 = vmatmul.mubr.f32.gmra.mrb[38].mxu0 %v4249_v61  ;;  %1576 = vmatprep.mubr.f32.mxu1 %v3744_v29  ;;  %v541_v61 = vsel %vm293_vm0, %v539_v34, %v540_v12  ;;  %v547_v34 = vrot.slane %v3751_v5, 2 }
 0x11d   : > { %1311 = vmatprep.mubr.f32.mxu0 %v4283_v46 }
 0x11f   : > { %1577 = vmatmul.mubr.f32.gmra.mrb[104].mxu1 %v3562_v11 }
 0x120   : > { %1312 = vmatmul.mubr.f32.gmra.mrb[40].mxu0 %v4254_v25  ;;  %1581 = vmatprep.mubr.f32.mxu1 %v3758_v28  ;;  %v543_v25 = vsel %vm293_vm0, %v540_v12, %v542_v37 }
 0x121   : > { %1316 = vmatprep.mubr.f32.mxu0 %v4284_v41 }
 0x122   : > { %v3771_v2 = vpop.f32.mrb[0].mxu1 }
 0x123   : > { %1582 = vmatmul.mubr.f32.gmra.mrb[106].mxu1 %v3575_v14  ;;  %v765_v42 = vpop.f32.mrb[1].mxu1 }
 0x124   : > { %1317 = vmatmul.mubr.f32.gmra.mrb[42].mxu0 %v4258_v21  ;;  %1586 = vmatprep.mubr.f32.mxu1 %v541_v61  ;;  %v549_v61 = vrot.slane %v3763_v15, 2  ;;  %v2536_v15 = vld [vmem:[%s2666_s15 + $0x80] sm:$0xff] }
 0x125   : > { %1321 = vmatprep.mubr.f32.mxu0 %v4285_v32 }
 0x126   : > { %v3777_v7 = vpop.f32.mrb[2].mxu1 }
 0x127   : > { %1587 = vmatmul.mubr.f32.gmra.mrb[108].mxu1 %v3748_v47  ;;  %v770_v24 = vpop.f32.mrb[3].mxu1 }
 0x128   : > { %1322 = vmatmul.mubr.f32.gmra.mrb[44].mxu0 %v4262_v13  ;;  %1591 = vmatprep.mubr.f32.mxu1 %v543_v25  ;;  %v4288_v13 = vld [vmem:[#allocation40_spill] sm:$0xff] }
 0x129   : > { %1326 = vmatprep.mubr.f32.mxu0 %v4286_v18 }
 0x12a   : > { %v3782_v22 = vpop.f32.mrb[4].mxu1 }
 0x12b   : > { %1592 = vmatmul.mubr.f32.gmra.mrb[110].mxu1 %v3751_v5  ;;  %v775_v21 = vpop.f32.mrb[5].mxu1  ;;  %v2535_v5 = vld [vmem:[%s2666_s15 + $0x78] sm:$0xff] }
 0x12c   : > { %1327 = vmatmul.mubr.f32.gmra.mrb[46].mxu0 %v4266_v45  ;;  %2079 = vmatprep.mubr.f32.mxu1 %v2965_v36  ;;  %v4289_v36 = vld [vmem:[#allocation42_spill] sm:$0xff] }
 0x12d   : > { %1331 = vmatprep.mubr.f32.mxu0 %v4287_v31 }
 0x12e   : > { %v3788_v48 = vpop.f32.mrb[6].mxu1 }
 0x12f   : > { %2080 = vmatmul.mubr.f32.vlgmr.msra.gmra.mrb[112].mxu1 %v2998_v55  ;;  %v780_v40 = vpop.f32.mrb[7].mxu1 }
 0x130   : > { %1332 = vmatmul.mubr.f32.gmra.mrb[48].mxu0 %v4270_v63  ;;  %2082 = vmatprep.mubr.f32.mxu1 %v3030_v1  ;;  %v4290_v1 = vld [vmem:[#allocation43_spill] sm:$0xff] }
 0x131   : > { %1336 = vmatprep.mubr.f32.mxu0 %v4288_v13 }
 0x132   : > { %v3794_v62 = vpop.f32.mrb[8].mxu1 }
 0x133   : > { %2083 = vmatmul.mubr.f32.gmra.mrb[114].mxu1 %v3060_v16  ;;  %v785_v45 = vpop.f32.mrb[9].mxu1 }
 0x134   : > { %1337 = vmatmul.mubr.f32.gmra.mrb[50].mxu0 %v4274_v39  ;;  %2085 = vmatprep.mubr.f32.mxu1 %v3097_v30  ;;  %v530_v39 = vrot.slane %v3575_v14, 2 }
 0x135   : > { %1341 = vmatprep.mubr.f32.mxu0 %v4289_v36 }
 0x136   : > { %v3800_v3 = vpop.f32.mrb[10].mxu1 }
 0x137   : > { %2086 = vmatmul.mubr.f32.gmra.mrb[116].mxu1 %v3128_v53  ;;  %v790_v55 = vpop.f32.mrb[11].mxu1  ;;  %v529_v53 = vrot.slane %v3562_v11, 2 }
 0x138   : > { %1342 = vmatmul.mubr.f32.gmra.mrb[52].mxu0 %v4277_v59  ;;  %2088 = vmatprep.mubr.f32.mxu1 %v3160_v8 }
 0x139   : > { %1346 = vmatprep.mubr.f32.mxu0 %v4290_v1 }
 0x13a   : > { %v3806_v63 = vpop.f32.mrb[12].mxu1 }
 0x13b   : > { %2089 = vmatmul.mubr.f32.gmra.mrb[118].mxu1 %v4250_v10  ;;  %v795_v16 = vpop.f32.mrb[13].mxu1  ;;  %v531_v10 = vsel %vm406_vm1, %v529_v53, %v530_v39 }
 0x13c   : > { %1347 = vmatmul.mubr.f32.gmra.mrb[54].mxu0 %v3544_v44  ;;  %2091 = vmatprep.mubr.f32.mxu1 %v4255_v6  ;;  %v532_v6 = vrot.slane %v3737_v51, 2  ;;  %v2531_v51 = vld [vmem:[%s2666_s15 + $0x48] sm:$0xff] }
 0x13d   : > { %1351 = vmatprep.mubr.f32.mxu0 %v3569_v27 }
 0x13e   : > { %v3812_v30 = vpop.f32.mrb[14].mxu1 }
 0x13f   : > { %2092 = vmatmul.mubr.f32.gmra.mrb[120].mxu1 %v4259_v50  ;;  %v800_v8 = vpop.f32.mrb[15].mxu1 }
 0x140   : > { %1352 = vmatmul.mubr.f32.gmra.mrb[56].mxu0 %v3558_v43  ;;  %2094 = vmatprep.mubr.f32.mxu1 %v4263_v54  ;;  %v533_v43 = vsel %vm406_vm1, %v530_v39, %v532_v6 }
 0x141   : > { %1356 = vmatprep.mubr.f32.mxu0 %v3582_v9 }
 0x142   : > { %v3820_v44 = vpop.f32.mrb[16].mxu1 }
 0x143   : > { %2095 = vmatmul.mubr.f32.gmra.mrb[122].mxu1 %v4267_v58  ;;  %v805_v11 = vpop.f32.mrb[17].mxu1 }
 0x144   : > { %1357 = vmatmul.mubr.f32.gmra.mrb[58].mxu0 %v3572_v20  ;;  %2097 = vmatprep.mubr.f32.mxu1 %v4271_v33 }
 0x145   : > { %1361 = vmatprep.mubr.f32.mxu0 %v531_v10 }
 0x146   : > { %v3827_v14 = vpop.f32.mrb[18].mxu1 }
 0x147   : > { %2098 = vmatmul.mubr.f32.gmra.mrb[124].mxu1 %v4275_v0  ;;  %v810_v50 = vpop.f32.mrb[19].mxu1  ;;  %v2529_v0 = vld [vmem:[%s2666_s15 + $0x30] sm:$0xff] }
 0x148   : > { %1362 = vmatmul.mubr.f32.gmra.mrb[60].mxu0 %v3744_v29  ;;  %2100 = vmatprep.mubr.f32.mxu1 %v4278_v23  ;;  %v2532_v29 = vld [vmem:[%s2666_s15 + $0x50] sm:$0xff] }
 0x149   : > { %1366 = vmatprep.mubr.f32.mxu0 %v533_v43 }
 0x14a   : > { %v3833_v54 = vpop.f32.mrb[20].mxu1 }
 0x14b   : > { %2101 = vmatmul.mubr.f32.gmra.mrb[126].mxu1 %v4280_v49  ;;  %v815_v20 = vpop.f32.mrb[21].mxu1  ;;  %v2530_v49 = vld [vmem:[%s2666_s15 + $0x38] sm:$0xff] }
 0x14c   : > { %1367 = vmatmul.mubr.f32.gmra.mrb[62].mxu0 %v3758_v28  ;;  %2103 = vmatprep.mubr.f32.mxu1 %v4281_v17  ;;  %v2533_v28 = vld [vmem:[%s2666_s15 + $0x60] sm:$0xff] }
 0x14d   : > { %1436 = vmatprep.mubr.f32.mxu0 %v2936_v26 }
 0x14e   : > { %v3839_v58 = vpop.f32.mrb[22].mxu1 }
 0x14f   : > { %2104 = vmatmul.mubr.f32.gmra.mrb[128].mxu1 %v4282_v60  ;;  %v820_v33 = vpop.f32.mrb[23].mxu1 }
 0x150   : > { %1437 = vmatmul.mubr.f32.vlgmr.msra.gmra.mrb[0].mxu0 %v2529_v0  ;;  %2106 = vmatprep.mubr.f32.mxu1 %v4283_v46 }
 0x151   : > { %1441 = vmatprep.mubr.f32.mxu0 %v2969_v38 }
 0x152   : > { %v3845_v59 = vpop.f32.mrb[24].mxu1 }
 0x153   : > { %2107 = vmatmul.mubr.f32.gmra.mrb[130].mxu1 %v4284_v41  ;;  %v825_v23 = vpop.f32.mrb[25].mxu1  ;;  %v2534_v41 = vld [vmem:[%s2666_s15 + $0x68] sm:$0xff]  ;;  %s1997_s15 = sshll.u32 %s4292_s13, 8 }
 0x154   : > { %1442 = vmatmul.mubr.f32.gmra.mrb[2].mxu0 %v2530_v49  ;;  %2109 = vmatprep.mubr.f32.mxu1 %v4285_v32  ;;  %s3997_s18 = scalar_lea.vmem %s4132_s2, %s1997_s15  ;;  %s4009_s20 = scalar_lea.vmem %s4133_s3, %s1997_s15 }
 0x155   : > { %1446 = vmatprep.mubr.f32.mxu0 %v3001_v56 }
 0x156   : > { %v3851_v26 = vpop.f32.mrb[26].mxu1 }
 0x157   : > { %2110 = vmatmul.mubr.f32.gmra.mrb[132].mxu1 %v4286_v18  ;;  %v830_v17 = vpop.f32.mrb[27].mxu1 }
 0x158   : > { %1447 = vmatmul.mubr.f32.gmra.mrb[4].mxu0 %v2531_v51  ;;  %2112 = vmatprep.mubr.f32.mxu1 %v4287_v31 }
 0x159   : > { %1451 = vmatprep.mubr.f32.mxu0 %v3034_v4  ;;  %v546_v4 = vrot.slane %v3748_v47, 2 }
 0x15a   : > { %v3857_v38 = vpop.f32.mrb[28].mxu1 }
 0x15b   : > { %2113 = vmatmul.mubr.f32.gmra.mrb[134].mxu1 %v4288_v13  ;;  %v835_v60 = vpop.f32.mrb[29].mxu1 }
 0x15c   : > { %1452 = vmatmul.mubr.f32.gmra.mrb[6].mxu0 %v2532_v29  ;;  %2115 = vmatprep.mubr.f32.mxu1 %v4289_v36 }
 0x15d   : > { %1456 = vmatprep.mubr.f32.mxu0 %v3065_v19 }
 0x15e   : > { %v3863_v56 = vpop.f32.mrb[30].mxu1 }
 0x15f   : > { %2116 = vmatmul.mubr.f32.gmra.mrb[136].mxu1 %v4290_v1  ;;  %v840_v46 = vpop.f32.mrb[31].mxu1 }
 0x160   : > { %1457 = vmatmul.mubr.f32.gmra.mrb[8].mxu0 %v2533_v28  ;;  %2118 = vmatprep.mubr.f32.mxu1 %v3569_v27  ;;  %v548_v27 = vsel %vm406_vm1, %v546_v4, %v547_v34 }
 0x161   : > { %1461 = vmatprep.mubr.f32.mxu0 %v3100_v35 }
 0x162   : > { %v3871_v12 = vpop.f32.mrb[32].mxu1 }
 0x163   : > { %2119 = vmatmul.mubr.f32.gmra.mrb[138].mxu1 %v3582_v9  ;;  %v845_v19 = vpop.f32.mrb[33].mxu1  ;;  %v550_v9 = vsel %vm406_vm1, %v547_v34, %v549_v61 }
 0x164   : > { %1462 = vmatmul.mubr.f32.gmra.mrb[10].mxu0 %v2534_v41  ;;  %2121 = vmatprep.mubr.f32.mxu1 %v531_v10 }
 0x165   : > { %1466 = vmatprep.mubr.f32.mxu0 %v3131_v57 }
 0x166   : > { %v3878_v35 = vpop.f32.mrb[34].mxu1 }
 0x167   : > { %2122 = vmatmul.mubr.f32.gmra.mrb[140].mxu1 %v533_v43  ;;  %v850_v47 = vpop.f32.mrb[35].mxu1 }
 0x168   : > { %1467 = vmatmul.mubr.f32.gmra.mrb[12].mxu0 %v2535_v5  ;;  %2124 = vmatprep.mubr.f32.mxu1 %v548_v27 }
 0x169   : > { %1471 = vmatprep.mubr.f32.mxu0 %v4253_v52 }
 0x16a   : > { %v3883_v37 = vpop.f32.mrb[36].mxu1 }
 0x16b   : > { %2125 = vmatmul.mubr.f32.gmra.mrb[142].mxu1 %v550_v9  ;;  %v855_v42 = vpop.f32.mrb[37].mxu1 }
 0x16c   : > { %1472 = vmatmul.mubr.f32.gmra.mrb[14].mxu0 %v2536_v15 }
 0x16e   : > { %v3886_v57 = vpop.f32.mrb[38].mxu1 }
 0x16f   : > { %v860_v32 = vpop.f32.mrb[39].mxu1 }
 0x172   : > { %v3888_v25 = vpop.f32.mrb[40].mxu1 }
 0x173   : > { %v865_v24 = vpop.f32.mrb[41].mxu1 }
 0x176   : > { %v3890_v18 = vpop.f32.mrb[42].mxu1 }
 0x177   : > { %v870_v21 = vpop.f32.mrb[43].mxu1 }
 0x17a   : > { %v3892_v31 = vpop.f32.mrb[44].mxu1 }
 0x17b   : > { %v875_v40 = vpop.f32.mrb[45].mxu1 }
 0x17e   : > { %v3894_v13 = vpop.f32.mrb[46].mxu1 }
 0x17f   : > { %v880_v52 = vpop.f32.mrb[47].mxu1 }
 0x182   : > { %v3896_v45 = vpop.f32.mrb[48].mxu1 }
 0x183   : > { %v885_v36 = vpop.f32.mrb[49].mxu1 }
 0x186   : > { %v3898_v55 = vpop.f32.mrb[50].mxu1 }
 0x187   : > { %v890_v1 = vpop.f32.mrb[51].mxu1 }
 0x18a   : > { %v3900_v16 = vpop.f32.mrb[52].mxu1 }
 0x18b   : > { %v895_v53 = vpop.f32.mrb[53].mxu1 }
 0x18e   : > { %v3902_v39 = vpop.f32.mrb[54].mxu1 }
 0x18f   : > { %v900_v8 = vpop.f32.mrb[55].mxu1 }
 0x192   : > { %v3904_v10 = vpop.f32.mrb[56].mxu1 }
 0x193   : > { %v905_v6 = vpop.f32.mrb[57].mxu1 }
 0x196   : > { %v3906_v11 = vpop.f32.mrb[58].mxu1 }
 0x197   : > { %v910_v43 = vpop.f32.mrb[59].mxu1 }
 0x19a   : > { %v3908_v50 = vpop.f32.mrb[60].mxu1 }
 0x19b   : > { %v915_v20 = vpop.f32.mrb[61].mxu1 }
 0x19e   : > { %v3910_v33 = vpop.f32.mrb[62].mxu1 }
 0x19f   : > { %v920_v0 = vpop.f32.mrb[63].mxu1 }
 0x1a2   : > { %v1478_v23 = vpop.f32.mrb[64].mxu1 }
 0x1a3   : > { %v1480_v49 = vpop.f32.mrb[65].mxu1 }
 0x1a6   : > { %v1483_v17 = vpop.f32.mrb[66].mxu1 }
 0x1a7   : > { %v1485_v51 = vpop.f32.mrb[67].mxu1 }
 0x1aa   : > { %v1488_v60 = vpop.f32.mrb[68].mxu1 }
 0x1ab   : > { %v1490_v29 = vpop.f32.mrb[69].mxu1 }
 0x1ae   : > { %v1493_v46 = vpop.f32.mrb[70].mxu1 }
 0x1af   : > { %v1495_v28 = vpop.f32.mrb[71].mxu1 }
 0x1b2   : > { %v1498_v4 = vpop.f32.mrb[72].mxu1 }
 0x1b3   : > { %v1500_v34 = vpop.f32.mrb[73].mxu1 }
 0x1b6   : > { %v1503_v19 = vpop.f32.mrb[74].mxu1 }
 0x1b7   : > { %v1505_v41 = vpop.f32.mrb[75].mxu1 }
 0x1ba   : > { %v1508_v61 = vpop.f32.mrb[76].mxu1 }
 0x1bb   : > { %v1510_v27 = vpop.f32.mrb[77].mxu1 }
 0x1be   : > { %v1513_v47 = vpop.f32.mrb[78].mxu1 }
 0x1bf   : > { %v1515_v5 = vpop.f32.mrb[79].mxu1 }
 0x1c2   : > { %v1518_v9 = vpop.f32.mrb[80].mxu1 }
 0x1c3   : > { %v1253_v42 = vpop.f32.mrb[16].mxu0  ;;  %v1520_v15 = vpop.f32.mrb[81].mxu1 }
 0x1c4   : > { %v2391_v32 = vadd.f32 %v1253_v42, %v3820_v44  ;;  %v1255_v24 = vpop.f32.mrb[17].mxu0 }
 0x1c6   : > { %v1523_v21 = vpop.f32.mrb[82].mxu1  ;;  %v3913_v40 = vadd.f32 %v2391_v32, %v1478_v23 }
 0x1c7   : > { %v1258_v52 = vpop.f32.mrb[18].mxu0  ;;  %v1525_v36 = vpop.f32.mrb[83].mxu1 }
 0x1c8   : > { %v2393_v1 = vadd.f32 %v1258_v52, %v3827_v14  ;;  %v1260_v53 = vpop.f32.mrb[19].mxu0 }
 0x1ca   : > { %v1528_v8 = vpop.f32.mrb[84].mxu1  ;;  %v3916_v6 = vadd.f32 %v2393_v1, %v1483_v17 }
 0x1cb   : > { %v1263_v43 = vpop.f32.mrb[20].mxu0  ;;  %v1530_v20 = vpop.f32.mrb[85].mxu1 }
 0x1cc   : > { %v2395_v0 = vadd.f32 %v1263_v43, %v3833_v54  ;;  %v1265_v49 = vpop.f32.mrb[21].mxu0 }
 0x1ce   : > { %v1533_v51 = vpop.f32.mrb[86].mxu1  ;;  %v3919_v29 = vadd.f32 %v2395_v0, %v1488_v60 }
 0x1cf   : > { %v1268_v44 = vpop.f32.mrb[22].mxu0  ;;  %v1535_v28 = vpop.f32.mrb[87].mxu1 }
 0x1d0   : > { %v2397_v23 = vadd.f32 %v1268_v44, %v3839_v58  ;;  %v1270_v34 = vpop.f32.mrb[23].mxu0 }
 0x1d2   : > { %v1538_v41 = vpop.f32.mrb[88].mxu1  ;;  %v3922_v27 = vadd.f32 %v2397_v23, %v1493_v46 }
 0x1d3   : > { %v1273_v14 = vpop.f32.mrb[24].mxu0  ;;  %v1540_v5 = vpop.f32.mrb[89].mxu1 }
 0x1d4   : > { %v2399_v17 = vadd.f32 %v1273_v14, %v3845_v59  ;;  %v1275_v42 = vpop.f32.mrb[25].mxu0 }
 0x1d6   : > { %v1543_v15 = vpop.f32.mrb[90].mxu1  ;;  %v3925_v32 = vadd.f32 %v2399_v17, %v1498_v4 }
 0x1d7   : > { %v1278_v54 = vpop.f32.mrb[26].mxu0  ;;  %v1545_v24 = vpop.f32.mrb[91].mxu1 }
 0x1d8   : > { %v2401_v60 = vadd.f32 %v1278_v54, %v3851_v26  ;;  %v1280_v52 = vpop.f32.mrb[27].mxu0 }
 0x1da   : > { %v1548_v36 = vpop.f32.mrb[92].mxu1  ;;  %v3928_v1 = vadd.f32 %v2401_v60, %v1503_v19 }
 0x1db   : > { %v1283_v58 = vpop.f32.mrb[28].mxu0  ;;  %v1550_v53 = vpop.f32.mrb[93].mxu1 }
 0x1dc   : > { %v2403_v46 = vadd.f32 %v1283_v58, %v3857_v38  ;;  %v1285_v43 = vpop.f32.mrb[29].mxu0 }
 0x1de   : > { %v1553_v20 = vpop.f32.mrb[94].mxu1  ;;  %v3931_v0 = vadd.f32 %v2403_v46, %v1508_v61 }
 0x1df   : > { %v1288_v59 = vpop.f32.mrb[30].mxu0  ;;  %v1555_v49 = vpop.f32.mrb[95].mxu1 }
 0x1e0   : > { %v2405_v4 = vadd.f32 %v1288_v59, %v3863_v56  ;;  %v1290_v44 = vpop.f32.mrb[31].mxu0 }
 0x1e2   : > { %v1558_v28 = vpop.f32.mrb[96].mxu1  ;;  %v3934_v23 = vadd.f32 %v2405_v4, %v1513_v47 }
 0x1e3   : > { %v1293_v26 = vpop.f32.mrb[32].mxu0  ;;  %v1560_v34 = vpop.f32.mrb[97].mxu1 }
 0x1e4   : > { %v2407_v19 = vadd.f32 %v1293_v26, %v3871_v12  ;;  %v1295_v14 = vpop.f32.mrb[33].mxu0 }
 0x1e6   : > { %v1563_v5 = vpop.f32.mrb[98].mxu1  ;;  %v3937_v17 = vadd.f32 %v2407_v19, %v1518_v9 }
 0x1e7   : > { %v1298_v38 = vpop.f32.mrb[34].mxu0  ;;  %v1565_v42 = vpop.f32.mrb[99].mxu1 }
 0x1e8   : > { %v2409_v61 = vadd.f32 %v1298_v38, %v3878_v35  ;;  %v1300_v54 = vpop.f32.mrb[35].mxu0 }
 0x1ea   : > { %v1568_v24 = vpop.f32.mrb[100].mxu1  ;;  %v3940_v60 = vadd.f32 %v2409_v61, %v1523_v21 }
 0x1eb   : > { %v1303_v56 = vpop.f32.mrb[36].mxu0  ;;  %v1570_v52 = vpop.f32.mrb[101].mxu1 }
 0x1ec   : > { %v2411_v47 = vadd.f32 %v1303_v56, %v3883_v37  ;;  %v1305_v58 = vpop.f32.mrb[37].mxu0 }
 0x1ee   : > { %v1573_v53 = vpop.f32.mrb[102].mxu1  ;;  %v3943_v46 = vadd.f32 %v2411_v47, %v1528_v8 }
 0x1ef   : > { %v1308_v12 = vpop.f32.mrb[38].mxu0  ;;  %v1575_v43 = vpop.f32.mrb[103].mxu1 }
 0x1f0   : > { %v2413_v9 = vadd.f32 %v1308_v12, %v3886_v57  ;;  %v1310_v59 = vpop.f32.mrb[39].mxu0 }
 0x1f2   : > { %v3946_v49 = vpop.f32.mrb[104].mxu1  ;;  %v3948_v35 = vadd.f32 %v2413_v9, %v1533_v51 }
 0x1f3   : > { %v1313_v4 = vpop.f32.mrb[40].mxu0  ;;  %v1580_v21 = vpop.f32.mrb[105].mxu1 }
 0x1f4   : > { %v2415_v44 = vadd.f32 %v1313_v4, %v3888_v25  ;;  %v1315_v26 = vpop.f32.mrb[41].mxu0 }
 0x1f6   : > { %v3951_v34 = vpop.f32.mrb[106].mxu1  ;;  %v3953_v37 = vadd.f32 %v2415_v44, %v1538_v41 }
 0x1f7   : > { %v1318_v8 = vpop.f32.mrb[42].mxu0  ;;  %v1585_v19 = vpop.f32.mrb[107].mxu1 }
 0x1f8   : > { %v2417_v14 = vadd.f32 %v1318_v8, %v3890_v18  ;;  %v1320_v38 = vpop.f32.mrb[43].mxu0 }
 0x1fa   : > { %v3956_v57 = vpop.f32.mrb[108].mxu1  ;;  %v3958_v42 = vadd.f32 %v2417_v14, %v1543_v15 }
 0x1fb   : > { %v1323_v51 = vpop.f32.mrb[44].mxu0  ;;  %v1590_v61 = vpop.f32.mrb[109].mxu1 }
 0x1fc   : > { %v2419_v54 = vadd.f32 %v1323_v51, %v3892_v31  ;;  %v1325_v56 = vpop.f32.mrb[45].mxu0 }
 0x1fd   : > { %v1831_v56 = vld [vmem:[%s3997_s18 + $0x48] sm:$0xff] }
 0x1fe   : > { %v3961_v25 = vpop.f32.mrb[110].mxu1  ;;  %v3963_v52 = vadd.f32 %v2419_v54, %v1548_v36 }
 0x1ff   : > { %v1328_v41 = vpop.f32.mrb[46].mxu0  ;;  %v1595_v47 = vpop.f32.mrb[111].mxu1 }
 0x200   : > { %v2421_v58 = vadd.f32 %v1328_v41, %v3894_v13  ;;  %v1330_v12 = vpop.f32.mrb[47].mxu0 }
 0x201   : > { %v1830_v12 = vld [vmem:[%s3997_s18 + $0x40] sm:$0xff] }
 0x202   : > { %v3966_v18 = vpop.f32.mrb[112].mxu1  ;;  %v3968_v43 = vadd.f32 %v2421_v58, %v1553_v20 }
 0x203   : > { %v1333_v15 = vpop.f32.mrb[48].mxu0  ;;  %v3970_v9 = vpop.f32.mrb[113].mxu1 }
 0x204   : > { %v2423_v31 = vadd.f32 %v1333_v15, %v3896_v45  ;;  %v1335_v59 = vpop.f32.mrb[49].mxu0 }
 0x206   : > { %v3973_v4 = vpop.f32.mrb[114].mxu1  ;;  %v3975_v36 = vadd.f32 %v2423_v31, %v1558_v28 }
 0x207   : > { %v1338_v21 = vpop.f32.mrb[50].mxu0  ;;  %v3977_v44 = vpop.f32.mrb[115].mxu1 }
 0x208   : > { %v2425_v13 = vadd.f32 %v1338_v21, %v3898_v55  ;;  %v1340_v26 = vpop.f32.mrb[51].mxu0 }
 0x20a   : > { %v3980_v8 = vpop.f32.mrb[116].mxu1  ;;  %v3982_v20 = vadd.f32 %v2425_v13, %v1563_v5 }
 0x20b   : > { %v1343_v19 = vpop.f32.mrb[52].mxu0  ;;  %v3984_v14 = vpop.f32.mrb[117].mxu1 }
 0x20c   : > { %v2427_v45 = vadd.f32 %v1343_v19, %v3900_v16  ;;  %v1345_v38 = vpop.f32.mrb[53].mxu0 }
 0x20e   : > { %v3988_v51 = vpop.f32.mrb[118].mxu1  ;;  %v3990_v28 = vadd.f32 %v2427_v45, %v1568_v24  ;;  %v1832_v45 = vld [vmem:[%s3997_s18 + $0x50] sm:$0xff] }
 0x20f   : > { %v1348_v61 = vpop.f32.mrb[54].mxu0  ;;  %v3992_v54 = vpop.f32.mrb[119].mxu1 }
 0x210   : > { %v2429_v55 = vadd.f32 %v1348_v61, %v3902_v39  ;;  %v1350_v16 = vpop.f32.mrb[55].mxu0 }
 0x212   : > { %v2093_v5 = vpop.f32.mrb[120].mxu1  ;;  %v4001_v41 = vadd.f32 %v2429_v55, %v1573_v53 }
 0x213   : > { %v1353_v24 = vpop.f32.mrb[56].mxu0  ;;  %v1709_v47 = vadd.f32 %v3916_v6, %v2093_v5  ;;  %v1703_v58 = vpop.f32.mrb[121].mxu1  ;;  %v1833_v6 = vld [vmem:[%s3997_s18 + $0x58] sm:$0xff] }
 0x214   : > { %v2431_v15 = vadd.f32 %v1353_v24, %v3904_v10  ;;  %v1355_v39 = vpop.f32.mrb[57].mxu0  ;;  %v1704_v31 = vadd.f32 %v3913_v40, %v1703_v58 }
 0x215   : > { %v1863_v53 = vadd.f32 %v1831_v56, %v1709_v47 }
 0x216   : > { %v1862_v59 = vadd.f32 %v1830_v12, %v1704_v31  ;;  %v2096_v21 = vpop.f32.mrb[122].mxu1  ;;  %v4014_v13 = vadd.f32 %v2431_v15, %v3946_v49  ;;  %v1835_v49 = vld [vmem:[%s3997_s18 + $0x68] sm:$0xff] }
 0x217   : > { %1895 = vst [vmem:[%s4009_s20 + $0x48] sm:$0xff] %v1863_v53  ;;  %v1358_v10 = vpop.f32.mrb[58].mxu0  ;;  %v1719_v26 = vadd.f32 %v3922_v27, %v2096_v21  ;;  %v1713_v19 = vpop.f32.mrb[123].mxu1 }
 0x218   : > { %1894 = vst [vmem:[%s4009_s20 + $0x40] sm:$0xff] %v1862_v59  ;;  %v2433_v40 = vadd.f32 %v1358_v10, %v3906_v11  ;;  %v1360_v38 = vpop.f32.mrb[59].mxu0  ;;  %v1714_v61 = vadd.f32 %v3919_v29, %v1713_v19  ;;  %v1834_v11 = vld [vmem:[%s3997_s18 + $0x60] sm:$0xff] }
 0x219   : > { %v1865_v55 = vadd.f32 %v1833_v6, %v1719_v26 }
 0x21a   : > { %v1864_v16 = vadd.f32 %v1832_v45, %v1714_v61  ;;  %v2099_v5 = vpop.f32.mrb[124].mxu1  ;;  %v4024_v56 = vadd.f32 %v2433_v40, %v3951_v34  ;;  %v1837_v34 = vld [vmem:[%s3997_s18 + $0x78] sm:$0xff] }
 0x21b   : > { %1897 = vst [vmem:[%s4009_s20 + $0x58] sm:$0xff] %v1865_v55  ;;  %v1363_v27 = vpop.f32.mrb[60].mxu0  ;;  %v1729_v24 = vadd.f32 %v3928_v1, %v2099_v5  ;;  %v1723_v47 = vpop.f32.mrb[125].mxu1  ;;  %v1822_v5 = vld [vmem:[%s3997_s18] sm:$0xff] }
 0x21c   : > { %1896 = vst [vmem:[%s4009_s20 + $0x50] sm:$0xff] %v1864_v16  ;;  %v2435_v29 = vadd.f32 %v1363_v27, %v3908_v50  ;;  %v1365_v58 = vpop.f32.mrb[61].mxu0  ;;  %v1724_v12 = vadd.f32 %v3925_v32, %v1723_v47  ;;  %v1836_v50 = vld [vmem:[%s3997_s18 + $0x70] sm:$0xff]  ;;  %v1841_v47 = vld [vmem:[%s3997_s18 + $0x98] sm:$0xff] }
 0x21d   : > { %v1867_v15 = vadd.f32 %v1835_v49, %v1729_v24 }
 0x21e   : > { %v1866_v39 = vadd.f32 %v1834_v11, %v1724_v12  ;;  %v2102_v31 = vpop.f32.mrb[126].mxu1  ;;  %v4034_v53 = vadd.f32 %v2435_v29, %v3956_v57  ;;  %v1839_v57 = vld [vmem:[%s3997_s18 + $0x88] sm:$0xff] }
 0x21f   : > { %1899 = vst [vmem:[%s4009_s20 + $0x68] sm:$0xff] %v1867_v15  ;;  %v1368_v1 = vpop.f32.mrb[62].mxu0  ;;  %v1739_v59 = vadd.f32 %v3934_v23, %v2102_v31  ;;  %v1733_v21 = vpop.f32.mrb[127].mxu1  ;;  %v1823_v15 = vld [vmem:[%s3997_s18 + $0x8] sm:$0xff] }
 0x220   : > { %1898 = vst [vmem:[%s4009_s20 + $0x60] sm:$0xff] %v1866_v39  ;;  %v2437_v32 = vadd.f32 %v1368_v1, %v3910_v33  ;;  %v1370_v6 = vpop.f32.mrb[63].mxu0  ;;  %v1734_v10 = vadd.f32 %v3931_v0, %v1733_v21  ;;  %v1838_v33 = vld [vmem:[%s3997_s18 + $0x80] sm:$0xff]  ;;  %v1843_v1 = vld [vmem:[%s3997_s18 + $0xa8] sm:$0xff] }
 0x221   : > { %v1869_v26 = vadd.f32 %v1837_v34, %v1739_v59 }
 0x222   : > { %v1868_v19 = vadd.f32 %v1836_v50, %v1734_v10  ;;  %v2105_v45 = vpop.f32.mrb[128].mxu1  ;;  %v4044_v40 = vadd.f32 %v2437_v32, %v3961_v25  ;;  %v1842_v50 = vld [vmem:[%s3997_s18 + $0xa0] sm:$0xff]  ;;  %v1824_v10 = vld [vmem:[%s3997_s18 + $0x10] sm:$0xff] }
 0x223   : > { %1901 = vst [vmem:[%s4009_s20 + $0x78] sm:$0xff] %v1869_v26  ;;  %v1438_v23 = vpop.f32.mrb[0].mxu0  ;;  %v1749_v38 = vadd.f32 %v3940_v60, %v2105_v45  ;;  %v1743_v61 = vpop.f32.mrb[129].mxu1 }
 0x224   : > { %1900 = vst [vmem:[%s4009_s20 + $0x70] sm:$0xff] %v1868_v19  ;;  %v2383_v0 = vadd.f32 %v1438_v23, %v3771_v2  ;;  %v1440_v55 = vpop.f32.mrb[1].mxu0  ;;  %v1744_v16 = vadd.f32 %v3937_v17, %v1743_v61  ;;  %v1840_v2 = vld [vmem:[%s3997_s18 + $0x90] sm:$0xff] }
 0x225   : > { %v1871_v49 = vadd.f32 %v1839_v57, %v1749_v38  ;;  %v1845_v57 = vld [vmem:[%s3997_s18 + $0xb8] sm:$0xff]  ;;  %v1844_v61 = vld [vmem:[%s3997_s18 + $0xb0] sm:$0xff] }
 0x226   : > { %v1664_v25 = vadd.f32 %v2383_v0, %v3970_v9  ;;  %v1870_v27 = vadd.f32 %v1838_v33, %v1744_v16  ;;  %v2108_v24 = vpop.f32.mrb[130].mxu1  ;;  %v1825_v55 = vld [vmem:[%s3997_s18 + $0x18] sm:$0xff] }
 0x227   : > { %1903 = vst [vmem:[%s4009_s20 + $0x88] sm:$0xff] %v1871_v49  ;;  %v1443_v60 = vpop.f32.mrb[2].mxu0  ;;  %v1759_v11 = vadd.f32 %v3948_v35, %v2108_v24  ;;  %v1753_v29 = vpop.f32.mrb[131].mxu1 }
 0x228   : > { %v1854_v58 = vadd.f32 %v1822_v5, %v1664_v25  ;;  %1902 = vst [vmem:[%s4009_s20 + $0x80] sm:$0xff] %v1870_v27  ;;  %v2384_v17 = vadd.f32 %v1443_v60, %v3777_v7  ;;  %v1445_v12 = vpop.f32.mrb[3].mxu0  ;;  %v1754_v9 = vadd.f32 %v3943_v46, %v1753_v29  ;;  %v1847_v25 = vld [vmem:[%s3997_s18 + $0xc8] sm:$0xff]  ;;  %v1826_v29 = vld [vmem:[%s3997_s18 + $0x20] sm:$0xff] }
 0x229   : > { %v1873_v39 = vadd.f32 %v1841_v47, %v1759_v11  ;;  %v1846_v47 = vld [vmem:[%s3997_s18 + $0xc0] sm:$0xff]  ;;  %v1849_v12 = vld [vmem:[%s3997_s18 + $0xd8] sm:$0xff] }
 0x22a   : > { %1886 = vst [vmem:[%s4009_s20] sm:$0xff] %v1854_v58  ;;  %v1669_v31 = vadd.f32 %v2384_v17, %v3966_v18  ;;  %v1872_v34 = vadd.f32 %v1840_v2, %v1754_v9  ;;  %v2111_v35 = vpop.f32.mrb[132].mxu1 }
 0x22b   : > { %1905 = vst [vmem:[%s4009_s20 + $0x98] sm:$0xff] %v1873_v39  ;;  %v1448_v59 = vpop.f32.mrb[4].mxu0  ;;  %v1769_v7 = vadd.f32 %v3958_v42, %v2111_v35  ;;  %v1763_v21 = vpop.f32.mrb[133].mxu1  ;;  %v1848_v39 = vld [vmem:[%s3997_s18 + $0xd0] sm:$0xff]  ;;  %v1827_v35 = vld [vmem:[%s3997_s18 + $0x28] sm:$0xff] }
 0x22c   : > { %v1855_v32 = vadd.f32 %v1823_v15, %v1669_v31  ;;  %1904 = vst [vmem:[%s4009_s20 + $0x90] sm:$0xff] %v1872_v34  ;;  %v2385_v46 = vadd.f32 %v1448_v59, %v3782_v22  ;;  %v1450_v6 = vpop.f32.mrb[5].mxu0  ;;  %v1764_v18 = vadd.f32 %v3953_v37, %v1763_v21  ;;  %v1851_v21 = vld [vmem:[%s3997_s18 + $0xe8] sm:$0xff] }
 0x22d   : > { %v1875_v26 = vadd.f32 %v1843_v1, %v1769_v7 }
 0x22e   : > { %1887 = vst [vmem:[%s4009_s20 + $0x8] sm:$0xff] %v1855_v32  ;;  %v1674_v19 = vadd.f32 %v2385_v46, %v3977_v44  ;;  %v1874_v45 = vadd.f32 %v1842_v50, %v1764_v18  ;;  %v2114_v42 = vpop.f32.mrb[134].mxu1  ;;  %v1850_v46 = vld [vmem:[%s3997_s18 + $0xe0] sm:$0xff] }
 0x22f   : > { %1907 = vst [vmem:[%s4009_s20 + $0xa8] sm:$0xff] %v1875_v26  ;;  %v1453_v23 = vpop.f32.mrb[6].mxu0  ;;  %v1779_v22 = vadd.f32 %v3968_v43, %v2114_v42  ;;  %v1773_v38 = vpop.f32.mrb[135].mxu1  ;;  %v1853_v42 = vld [vmem:[%s3997_s18 + $0xf8] sm:$0xff] }
 0x230   : > { %v1856_v33 = vadd.f32 %v1824_v10, %v1674_v19  ;;  %1906 = vst [vmem:[%s4009_s20 + $0xa0] sm:$0xff] %v1874_v45  ;;  %v2386_v37 = vadd.f32 %v1453_v23, %v3788_v48  ;;  %v1455_v0 = vpop.f32.mrb[7].mxu0  ;;  %v1774_v44 = vadd.f32 %v3963_v52, %v1773_v38  ;;  %v1828_v10 = vld [vmem:[%s3997_s18 + $0x30] sm:$0xff] }
 0x231   : > { %v1877_v16 = vadd.f32 %v1845_v57, %v1779_v22  ;;  %v1852_v22 = vld [vmem:[%s3997_s18 + $0xf0] sm:$0xff] }
 0x232   : > { %1888 = vst [vmem:[%s4009_s20 + $0x10] sm:$0xff] %v1856_v33  ;;  %v1679_v5 = vadd.f32 %v2386_v37, %v3973_v4  ;;  %v1876_v49 = vadd.f32 %v1844_v61, %v1774_v44  ;;  %v2117_v43 = vpop.f32.mrb[136].mxu1  ;;  %v1829_v33 = vld [vmem:[%s3997_s18 + $0x38] sm:$0xff] }
 0x233   : > { %1909 = vst [vmem:[%s4009_s20 + $0xb8] sm:$0xff] %v1877_v16  ;;  %v1458_v27 = vpop.f32.mrb[8].mxu0  ;;  %v1789_v48 = vadd.f32 %v3982_v20, %v2117_v43  ;;  %v1783_v24 = vpop.f32.mrb[137].mxu1 }
 0x234   : > { %v1857_v60 = vadd.f32 %v1825_v55, %v1679_v5  ;;  %1908 = vst [vmem:[%s4009_s20 + $0xb0] sm:$0xff] %v1876_v49  ;;  %v2387_v52 = vadd.f32 %v1458_v27, %v3794_v62  ;;  %v1460_v11 = vpop.f32.mrb[9].mxu0  ;;  %v1784_v4 = vadd.f32 %v3975_v36, %v1783_v24 }
 0x235   : > { %v1879_v2 = vadd.f32 %v1847_v25, %v1789_v48 }
 0x236   : > { %1889 = vst [vmem:[%s4009_s20 + $0x18] sm:$0xff] %v1857_v60  ;;  %v1684_v58 = vadd.f32 %v2387_v52, %v3984_v14  ;;  %v1878_v17 = vadd.f32 %v1846_v47, %v1784_v4  ;;  %v2120_v20 = vpop.f32.mrb[138].mxu1 }
 0x237   : > { %1911 = vst [vmem:[%s4009_s20 + $0xc8] sm:$0xff] %v1879_v2  ;;  %v1463_v9 = vpop.f32.mrb[10].mxu0  ;;  %v1799_v62 = vadd.f32 %v4001_v41, %v2120_v20  ;;  %v1793_v15 = vpop.f32.mrb[139].mxu1 }
 0x238   : > { %v1858_v31 = vadd.f32 %v1826_v29, %v1684_v58  ;;  %1910 = vst [vmem:[%s4009_s20 + $0xc0] sm:$0xff] %v1878_v17  ;;  %v2388_v36 = vadd.f32 %v1463_v9, %v3800_v3  ;;  %v1465_v34 = vpop.f32.mrb[11].mxu0  ;;  %v1794_v14 = vadd.f32 %v3990_v28, %v1793_v15 }
 0x239   : > { %v1881_v1 = vadd.f32 %v1849_v12, %v1799_v62 }
 0x23a   : > { %1890 = vst [vmem:[%s4009_s20 + $0x20] sm:$0xff] %v1858_v31  ;;  %v1689_v59 = vadd.f32 %v2388_v36, %v3980_v8  ;;  %v1880_v7 = vadd.f32 %v1848_v39, %v1794_v14  ;;  %v2123_v41 = vpop.f32.mrb[140].mxu1 }
 0x23b   : > { %1913 = vst [vmem:[%s4009_s20 + $0xd8] sm:$0xff] %v1881_v1  ;;  %v1468_v50 = vpop.f32.mrb[12].mxu0  ;;  %v1809_v3 = vadd.f32 %v4024_v56, %v2123_v41  ;;  %v1803_v32 = vpop.f32.mrb[141].mxu1 }
 0x23c   : > { %v1859_v6 = vadd.f32 %v1827_v35, %v1689_v59  ;;  %1912 = vst [vmem:[%s4009_s20 + $0xd0] sm:$0xff] %v1880_v7  ;;  %v2389_v28 = vadd.f32 %v1468_v50, %v3806_v63  ;;  %v1470_v18 = vpop.f32.mrb[13].mxu0  ;;  %v1804_v8 = vadd.f32 %v4014_v13, %v1803_v32 }
 0x23d   : > { %v1883_v26 = vadd.f32 %v1851_v21, %v1809_v3 }
 0x23e   : > { %1891 = vst [vmem:[%s4009_s20 + $0x28] sm:$0xff] %v1859_v6  ;;  %v1694_v19 = vadd.f32 %v2389_v28, %v3992_v54  ;;  %v1882_v45 = vadd.f32 %v1850_v46, %v1804_v8  ;;  %v2126_v56 = vpop.f32.mrb[142].mxu1 }
 0x23f   : > { %1915 = vst [vmem:[%s4009_s20 + $0xe8] sm:$0xff] %v1883_v26  ;;  %v1473_v57 = vpop.f32.mrb[14].mxu0  ;;  %v1819_v63 = vadd.f32 %v4044_v40, %v2126_v56  ;;  %v1813_v23 = vpop.f32.mrb[143].mxu1 }
 0x240   : > { %v1860_v13 = vadd.f32 %v1828_v10, %v1694_v19  ;;  %1914 = vst [vmem:[%s4009_s20 + $0xe0] sm:$0xff] %v1882_v45  ;;  %v2390_v38 = vadd.f32 %v1473_v57, %v3812_v30  ;;  %v1475_v61 = vpop.f32.mrb[15].mxu0  ;;  %v1814_v54 = vadd.f32 %v4034_v53, %v1813_v23 }
 0x241   : > { %v1885_v37 = vadd.f32 %v1853_v42, %v1819_v63 }
 0x242   : > { %1892 = vst [vmem:[%s4009_s20 + $0x30] sm:$0xff] %v1860_v13  ;;  %v1699_v0 = vadd.f32 %v2390_v38, %v3988_v51  ;;  %v1884_v44 = vadd.f32 %v1852_v22, %v1814_v54 }
 0x243   : > { %1917 = vst [vmem:[%s4009_s20 + $0xf8] sm:$0xff] %v1885_v37 }
 0x244   : > { %v1861_v55 = vadd.f32 %v1829_v33, %v1699_v0  ;;  %1916 = vst [vmem:[%s4009_s20 + $0xf0] sm:$0xff] %v1884_v44 }
 0x246   : > { %1893 = vst [vmem:[%s4009_s20 + $0x38] sm:$0xff] %v1861_v55 }
 0x247 PF: > { %s13_s12 = sadd.s32 1, %s2543_s12  }
 0x248   : > { %p10_p4 = scmp.ge.s32.totalorder %s13_s12, 4  }
 0x24a   :  { %12 = sbr.rel (!%p10_p4) target bundleno = 1 (0x1), region = 65 }

// kernel: orsnet_forward.35
= control target key start
LH: loop header
LB: loop body
LE: loop exit
PB: predicated region body
PF: predicated region fallthrough
CT: control target
= control target key end

     0   :  { %s1680_s18 = smov 0   ;;  %s1981_s0 = inlined_call_operand.vmem [shape: f32[512,128], index: 0, kind: input, shape index: {}]   ;;  %s1982_s1 = inlined_call_operand.vmem [shape: f32[512,96], index: 1, kind: input, shape index: {}]   ;;  %s1983_s2 = inlined_call_operand.vmem [shape: f32[512,96], index: 2, kind: input, shape index: {}]   ;;  %s1984_s3 = inlined_call_operand.vmem [shape: f32[96,128], index: 3, kind: input, shape index: {}]   ;;  %s1985_s4 = inlined_call_operand.vmem [shape: f32[96,128], index: 4, kind: input, shape index: {}]   ;;  %s1986_s5 = inlined_call_operand.vmem [shape: f32[512,128], index: 5, kind: output, shape index: {}]  }
   0x1 LB: > { %s1211_s19 = sadd.s32 4294967295, %s1648_s18   ;;  %p1215_p0 = scmp.ge.s32.totalorder %s1648_s18, 1  ;;  %s1648_s18 = sphi %s1680_s18, %s15_s18  }
   0x2   : > { %p210_p1 = scmp.lt.s32.totalorder %s1648_s18, 3 }
   0x4   : > { %p211_p2 = pnand %p1215_p0, %p210_p1 }
   0x5   : > { %v336_v0 = vld [vmem:[%s1984_s3] sm:$0xff] (!%p211_p2)  ;;  %v337_v1 = vld [vmem:[%s1984_s3 + $0x8] sm:$0xff] (!%p211_p2)  ;;  %s1216_s26 = sshll.u32 (!%p211_p2), %s1211_s19, 5  ;;  %v338_v5 = vld [vmem:[%s1984_s3 + $0x10] sm:$0xff] (!%p211_p2)  ;;  %vm348_vm0 = vcmask (!%p211_p2), 785408  }
   0x6   : > { %214 = sbr.rel (%p211_p2) target bundleno = 310 (0x136), region = 40  ;;  %v734_v2 = vld [vmem:[%s1985_s4] sm:$0xff] (!%p211_p2)  ;;  %v1522_v3 = vpack.c.bf16 (!%p211_p2), %v337_v1, %v336_v0  ;;  %v735_v4 = vld [vmem:[%s1985_s4 + $0x8] sm:$0xff] (!%p211_p2)  ;;  %v339_v6 = vld [vmem:[%s1984_s3 + $0x18] sm:$0xff] (!%p211_p2)  ;;  %p249_p3 = scmp.lt.s32.totalorder (!%p211_p2), %s1216_s26, 63 }
   0x7   : > { %v1546_v7 = vpack.c.bf16 (!%p211_p2), %v735_v4, %v734_v2  ;;  %v1526_v8 = vpack.c.bf16 (!%p211_p2), %v339_v6, %v338_v5  ;;  %v736_v9 = vld [vmem:[%s1985_s4 + $0x10] sm:$0xff] (!%p211_p2)  ;;  %v737_v10 = vld [vmem:[%s1985_s4 + $0x18] sm:$0xff] (!%p211_p2)  ;;  %v340_v11 = vld [vmem:[%s1984_s3 + $0x20] sm:$0xff] (!%p211_p2) }
   0x8   : > { %1523 = vmatprep.subr.bf16.mxu1 (!%p211_p2), %v1522_v3  ;;  %v1550_v12 = vpack.c.bf16 (!%p211_p2), %v737_v10, %v736_v9  ;;  %v341_v13 = vld [vmem:[%s1984_s3 + $0x28] sm:$0xff] (!%p211_p2)  ;;  %v738_v14 = vld [vmem:[%s1985_s4 + $0x20] sm:$0xff] (!%p211_p2)  ;;  %v342_v18 = vld [vmem:[%s1984_s3 + $0x30] sm:$0xff] (!%p211_p2) }
   0x9   : > { %v739_v15 = vld [vmem:[%s1985_s4 + $0x28] sm:$0xff] (!%p211_p2)  ;;  %1525 = vmatpush3.bf16.msra.mxu1 (!%p211_p2), %v1522_v3  ;;  %1547 = vmatprep.subr.bf16.mxu0 (!%p211_p2), %v1546_v7  ;;  %v1530_v16 = vpack.c.bf16 (!%p211_p2), %v341_v13, %v340_v11  ;;  %v343_v19 = vld [vmem:[%s1984_s3 + $0x38] sm:$0xff] (!%p211_p2)  ;;  %v740_v20 = vld [vmem:[%s1985_s4 + $0x30] sm:$0xff] (!%p211_p2) }
   0xa   : > { %1549 = vmatpush3.bf16.msra.mxu0 (!%p211_p2), %v1546_v7  ;;  %1527 = vmatprep.subr.bf16.mxu1 (!%p211_p2), %v1526_v8  ;;  %v1554_v17 = vpack.c.bf16 (!%p211_p2), %v739_v15, %v738_v14  ;;  %v741_v21 = vld [vmem:[%s1985_s4 + $0x38] sm:$0xff] (!%p211_p2)  ;;  %v1534_v24 = vpack.c.bf16 (!%p211_p2), %v343_v19, %v342_v18  ;;  %v344_v26 = vld [vmem:[%s1984_s3 + $0x40] sm:$0xff] (!%p211_p2)  ;;  %v345_v27 = vld [vmem:[%s1984_s3 + $0x48] sm:$0xff] (!%p211_p2) }
   0xb   : > { %1551 = vmatprep.subr.bf16.mxu0 (!%p211_p2), %v1550_v12  ;;  %v1558_v25 = vpack.c.bf16 (!%p211_p2), %v741_v21, %v740_v20  ;;  %v742_v28 = vld [vmem:[%s1985_s4 + $0x40] sm:$0xff] (!%p211_p2)  ;;  %v743_v29 = vld [vmem:[%s1985_s4 + $0x48] sm:$0xff] (!%p211_p2)  ;;  %v1538_v30 = vpack.c.bf16 (!%p211_p2), %v345_v27, %v344_v26  ;;  %v346_v32 = vld [vmem:[%s1984_s3 + $0x50] sm:$0xff] (!%p211_p2) }
   0xc   : > { %v1562_v31 = vpack.c.bf16 (!%p211_p2), %v743_v29, %v742_v28  ;;  %v347_v33 = vld [vmem:[%s1984_s3 + $0x58] sm:$0xff] (!%p211_p2)  ;;  %v744_v34 = vld [vmem:[%s1985_s4 + $0x50] sm:$0xff] (!%p211_p2) }
   0xd   : > { %s1988_s26 = smov (!%p249_p3, %s1216_s26), 63  ;;  %1529 = vmatpush3.bf16.msra.mxu1 %v1526_v8  ;;  %v745_v35 = vld [vmem:[%s1985_s4 + $0x58] sm:$0xff]  ;;  %v1542_v36 = vpack.c.bf16 %v347_v33, %v346_v32 }
   0xe   : > { %s1724_s21 = sshll.u32 %s1988_s26, 3  ;;  %1553 = vmatpush3.bf16.msra.mxu0 %v1550_v12  ;;  %1531 = vmatprep.subr.bf16.mxu1 %v1530_v16  ;;  %v1566_v37 = vpack.c.bf16 %v745_v35, %v744_v34 }
   0xf   : > { %s1736_s29 = scalar_lea.vmem %s1982_s1, %s1724_s21  ;;  %s1742_s6 = scalar_lea.vmem %s1983_s2, %s1724_s21  ;;  %1555 = vmatprep.subr.bf16.mxu0 %v1554_v17 }
  0x10   : > { %v304_v22 = vld [vmem:[%s1736_s29] sm:$0xff]  ;;  %v305_v38 = vld [vmem:[%s1736_s29 + $0x8] sm:$0xff]  ;;  %v306_v40 = vld [vmem:[%s1736_s29 + $0x10] sm:$0xff]  ;;  %s1906_s8 = scalar_lea.vmem %s1981_s0, %s1724_s21  ;;  %s1914_s9 = scalar_lea.vmem %s1986_s5, %s1724_s21 }
  0x11   : > { %v702_v23 = vld [vmem:[%s1742_s6] sm:$0xff]  ;;  %1402 = vmatprep.mubr.msk.f32.mxu1 %vm348_vm0, %v304_v22  ;;  %1533 = vmatpush3.bf16.msra.mxu1 %v1530_v16  ;;  %v703_v39 = vld [vmem:[%s1742_s6 + $0x8] sm:$0xff]  ;;  %v704_v41 = vld [vmem:[%s1742_s6 + $0x10] sm:$0xff] }
  0x12   : > { %1474 = vmatprep.mubr.msk.f32.mxu0 %vm348_vm0, %v702_v23  ;;  %1557 = vmatpush3.bf16.msra.mxu0 %v1554_v17  ;;  %v307_v42 = vld [vmem:[%s1736_s29 + $0x18] sm:$0xff]  ;;  %v308_v44 = vld [vmem:[%s1736_s29 + $0x20] sm:$0xff]  ;;  %v309_v46 = vld [vmem:[%s1736_s29 + $0x28] sm:$0xff] }
  0x13   : > { %1535 = vmatprep.subr.bf16.mxu1 %v1534_v24  ;;  %1559 = vmatprep.subr.bf16.mxu0 %v1558_v25  ;;  %v705_v43 = vld [vmem:[%s1742_s6 + $0x18] sm:$0xff]  ;;  %v706_v45 = vld [vmem:[%s1742_s6 + $0x20] sm:$0xff]  ;;  %v707_v47 = vld [vmem:[%s1742_s6 + $0x28] sm:$0xff] }
  0x14   : > { %v310_v48 = vld [vmem:[%s1736_s29 + $0x30] sm:$0xff]  ;;  %v311_v50 = vld [vmem:[%s1736_s29 + $0x38] sm:$0xff]  ;;  %v312_v52 = vld [vmem:[%s1736_s29 + $0x40] sm:$0xff] }
  0x15   : > { %1537 = vmatpush3.bf16.msra.mxu1 %v1534_v24  ;;  %v708_v49 = vld [vmem:[%s1742_s6 + $0x30] sm:$0xff]  ;;  %v709_v51 = vld [vmem:[%s1742_s6 + $0x38] sm:$0xff]  ;;  %v710_v53 = vld [vmem:[%s1742_s6 + $0x40] sm:$0xff] }
  0x16   : > { %1561 = vmatpush3.bf16.msra.mxu0 %v1558_v25  ;;  %1539 = vmatprep.subr.bf16.mxu1 %v1538_v30  ;;  %v313_v54 = vld [vmem:[%s1736_s29 + $0x48] sm:$0xff]  ;;  %v314_v56 = vld [vmem:[%s1736_s29 + $0x50] sm:$0xff]  ;;  %v315_v58 = vld [vmem:[%s1736_s29 + $0x58] sm:$0xff] }
  0x17   : > { %1563 = vmatprep.subr.bf16.mxu0 %v1562_v31  ;;  %v711_v55 = vld [vmem:[%s1742_s6 + $0x48] sm:$0xff]  ;;  %v712_v57 = vld [vmem:[%s1742_s6 + $0x50] sm:$0xff]  ;;  %v713_v59 = vld [vmem:[%s1742_s6 + $0x58] sm:$0xff] }
  0x18   : > { %v316_v60 = vld [vmem:[%s1736_s29 + $0x60] sm:$0xff]  ;;  %v317_v62 = vld [vmem:[%s1736_s29 + $0x68] sm:$0xff]  ;;  %v318_v0 = vld [vmem:[%s1736_s29 + $0x70] sm:$0xff] }
  0x19   : > { %1541 = vmatpush3.bf16.msra.mxu1 %v1538_v30  ;;  %v714_v61 = vld [vmem:[%s1742_s6 + $0x60] sm:$0xff]  ;;  %v715_v63 = vld [vmem:[%s1742_s6 + $0x68] sm:$0xff]  ;;  %v716_v1 = vld [vmem:[%s1742_s6 + $0x70] sm:$0xff] }
  0x1a   : > { %1565 = vmatpush3.bf16.msra.mxu0 %v1562_v31  ;;  %1543 = vmatprep.subr.bf16.mxu1 %v1542_v36  ;;  %v319_v2 = vld [vmem:[%s1736_s29 + $0x78] sm:$0xff]  ;;  %v320_v4 = vld [vmem:[%s1736_s29 + $0x80] sm:$0xff]  ;;  %v321_v6 = vld [vmem:[%s1736_s29 + $0x88] sm:$0xff] }
  0x1b   : > { %1567 = vmatprep.subr.bf16.mxu0 %v1566_v37  ;;  %v717_v3 = vld [vmem:[%s1742_s6 + $0x78] sm:$0xff]  ;;  %v718_v5 = vld [vmem:[%s1742_s6 + $0x80] sm:$0xff]  ;;  %v719_v7 = vld [vmem:[%s1742_s6 + $0x88] sm:$0xff] }
  0x1c   : > { %v322_v8 = vld [vmem:[%s1736_s29 + $0x90] sm:$0xff]  ;;  %v323_v10 = vld [vmem:[%s1736_s29 + $0x98] sm:$0xff]  ;;  %v324_v12 = vld [vmem:[%s1736_s29 + $0xa0] sm:$0xff] }
  0x1d   : > { %1545 = vmatpush3.bf16.msra.mxu1 %v1542_v36  ;;  %v720_v9 = vld [vmem:[%s1742_s6 + $0x90] sm:$0xff]  ;;  %v721_v11 = vld [vmem:[%s1742_s6 + $0x98] sm:$0xff]  ;;  %v722_v13 = vld [vmem:[%s1742_s6 + $0xa0] sm:$0xff] }
  0x1e   : > { %1569 = vmatpush3.bf16.msra.mxu0 %v1566_v37  ;;  %v325_v14 = vld [vmem:[%s1736_s29 + $0xa8] sm:$0xff]  ;;  %v326_v16 = vld [vmem:[%s1736_s29 + $0xb0] sm:$0xff]  ;;  %v327_v18 = vld [vmem:[%s1736_s29 + $0xb8] sm:$0xff] }
  0x1f   : > { %v723_v15 = vld [vmem:[%s1742_s6 + $0xa8] sm:$0xff]  ;;  %v724_v17 = vld [vmem:[%s1742_s6 + $0xb0] sm:$0xff]  ;;  %v725_v19 = vld [vmem:[%s1742_s6 + $0xb8] sm:$0xff] }
  0x20   : > { %1403 = vmatmul.mubr.msk.f32.vlgmr.msra.gmra.mrb[0].mxu1 %vm348_vm0, %v305_v38  ;;  %v328_v20 = vld [vmem:[%s1736_s29 + $0xc0] sm:$0xff]  ;;  %v329_v22 = vld [vmem:[%s1736_s29 + $0xc8] sm:$0xff]  ;;  %v330_v24 = vld [vmem:[%s1736_s29 + $0xd0] sm:$0xff] }
  0x21   : > { %1475 = vmatmul.mubr.msk.f32.vlgmr.msra.gmra.mrb[0].mxu0 %vm348_vm0, %v703_v39  ;;  %1405 = vmatprep.mubr.msk.f32.mxu1 %vm348_vm0, %v306_v40  ;;  %v726_v21 = vld [vmem:[%s1742_s6 + $0xc0] sm:$0xff]  ;;  %v727_v23 = vld [vmem:[%s1742_s6 + $0xc8] sm:$0xff]  ;;  %v728_v25 = vld [vmem:[%s1742_s6 + $0xd0] sm:$0xff] }
  0x22   : > { %1477 = vmatprep.mubr.msk.f32.mxu0 %vm348_vm0, %v704_v41  ;;  %v331_v26 = vld [vmem:[%s1736_s29 + $0xd8] sm:$0xff]  ;;  %v332_v28 = vld [vmem:[%s1736_s29 + $0xe0] sm:$0xff]  ;;  %v333_v30 = vld [vmem:[%s1736_s29 + $0xe8] sm:$0xff] }
  0x23   : > { %v729_v27 = vld [vmem:[%s1742_s6 + $0xd8] sm:$0xff]  ;;  %v730_v29 = vld [vmem:[%s1742_s6 + $0xe0] sm:$0xff]  ;;  %v731_v31 = vld [vmem:[%s1742_s6 + $0xe8] sm:$0xff] }
  0x24   : > { %1406 = vmatmul.mubr.msk.f32.gmra.mrb[2].mxu1 %vm348_vm0, %v307_v42  ;;  %v334_v32 = vld [vmem:[%s1736_s29 + $0xf0] sm:$0xff]  ;;  %v335_v34 = vld [vmem:[%s1736_s29 + $0xf8] sm:$0xff]  ;;  %v273_v36 = vld [vmem:[%s1906_s8 + $0x8] sm:$0xff] }
  0x25   : > { %1478 = vmatmul.mubr.msk.f32.gmra.mrb[2].mxu0 %vm348_vm0, %v705_v43  ;;  %1408 = vmatprep.mubr.msk.f32.mxu1 %vm348_vm0, %v308_v44  ;;  %v732_v33 = vld [vmem:[%s1742_s6 + $0xf0] sm:$0xff]  ;;  %v733_v35 = vld [vmem:[%s1742_s6 + $0xf8] sm:$0xff]  ;;  %v272_v37 = vld [vmem:[%s1906_s8] sm:$0xff] }
  0x26   : > { %1480 = vmatprep.mubr.msk.f32.mxu0 %vm348_vm0, %v706_v45  ;;  %v275_v44 = vld [vmem:[%s1906_s8 + $0x18] sm:$0xff] }
  0x28   : > { %1409 = vmatmul.mubr.msk.f32.gmra.mrb[4].mxu1 %vm348_vm0, %v309_v46  ;;  %v274_v46 = vld [vmem:[%s1906_s8 + $0x10] sm:$0xff] }
  0x29   : > { %1481 = vmatmul.mubr.msk.f32.gmra.mrb[4].mxu0 %vm348_vm0, %v707_v47  ;;  %1411 = vmatprep.mubr.msk.f32.mxu1 %vm348_vm0, %v310_v48 }
  0x2a   : > { %1483 = vmatprep.mubr.msk.f32.mxu0 %vm348_vm0, %v708_v49 }
  0x2c   : > { %1412 = vmatmul.mubr.msk.f32.gmra.mrb[6].mxu1 %vm348_vm0, %v311_v50 }
  0x2d   : > { %1484 = vmatmul.mubr.msk.f32.gmra.mrb[6].mxu0 %vm348_vm0, %v709_v51  ;;  %1414 = vmatprep.mubr.msk.f32.mxu1 %vm348_vm0, %v312_v52 }
  0x2e   : > { %1486 = vmatprep.mubr.msk.f32.mxu0 %vm348_vm0, %v710_v53 }
  0x30   : > { %1415 = vmatmul.mubr.msk.f32.gmra.mrb[8].mxu1 %vm348_vm0, %v313_v54  ;;  %v277_v54 = vld [vmem:[%s1906_s8 + $0x28] sm:$0xff] }
  0x31   : > { %1487 = vmatmul.mubr.msk.f32.gmra.mrb[8].mxu0 %vm348_vm0, %v711_v55  ;;  %1417 = vmatprep.mubr.msk.f32.mxu1 %vm348_vm0, %v314_v56  ;;  %v276_v56 = vld [vmem:[%s1906_s8 + $0x20] sm:$0xff] }
  0x32   : > { %1489 = vmatprep.mubr.msk.f32.mxu0 %vm348_vm0, %v712_v57 }
  0x34   : > { %1418 = vmatmul.mubr.msk.f32.gmra.mrb[10].mxu1 %vm348_vm0, %v315_v58 }
  0x35   : > { %1490 = vmatmul.mubr.msk.f32.gmra.mrb[10].mxu0 %vm348_vm0, %v713_v59  ;;  %1420 = vmatprep.mubr.msk.f32.mxu1 %vm348_vm0, %v316_v60 }
  0x36   : > { %1492 = vmatprep.mubr.msk.f32.mxu0 %vm348_vm0, %v714_v61 }
  0x38   : > { %1421 = vmatmul.mubr.msk.f32.gmra.mrb[12].mxu1 %vm348_vm0, %v317_v62 }
  0x39   : > { %1493 = vmatmul.mubr.msk.f32.gmra.mrb[12].mxu0 %vm348_vm0, %v715_v63  ;;  %1423 = vmatprep.mubr.msk.f32.mxu1 %vm348_vm0, %v318_v0  ;;  %v279_v0 = vld [vmem:[%s1906_s8 + $0x38] sm:$0xff] }
  0x3a   : > { %1495 = vmatprep.mubr.msk.f32.mxu0 %vm348_vm0, %v716_v1 }
  0x3c   : > { %1424 = vmatmul.mubr.msk.f32.gmra.mrb[14].mxu1 %vm348_vm0, %v319_v2  ;;  %v278_v2 = vld [vmem:[%s1906_s8 + $0x30] sm:$0xff] }
  0x3d   : > { %1496 = vmatmul.mubr.msk.f32.gmra.mrb[14].mxu0 %vm348_vm0, %v717_v3  ;;  %1426 = vmatprep.mubr.msk.f32.mxu1 %vm348_vm0, %v320_v4 }
  0x3e   : > { %1498 = vmatprep.mubr.msk.f32.mxu0 %vm348_vm0, %v718_v5 }
  0x40   : > { %1427 = vmatmul.mubr.msk.f32.gmra.mrb[16].mxu1 %vm348_vm0, %v321_v6 }
  0x41   : > { %1499 = vmatmul.mubr.msk.f32.gmra.mrb[16].mxu0 %vm348_vm0, %v719_v7  ;;  %1429 = vmatprep.mubr.msk.f32.mxu1 %vm348_vm0, %v322_v8 }
  0x42   : > { %1501 = vmatprep.mubr.msk.f32.mxu0 %vm348_vm0, %v720_v9 }
  0x44   : > { %1430 = vmatmul.mubr.msk.f32.gmra.mrb[18].mxu1 %vm348_vm0, %v323_v10  ;;  %v281_v10 = vld [vmem:[%s1906_s8 + $0x48] sm:$0xff] }
  0x45   : > { %1502 = vmatmul.mubr.msk.f32.gmra.mrb[18].mxu0 %vm348_vm0, %v721_v11  ;;  %1432 = vmatprep.mubr.msk.f32.mxu1 %vm348_vm0, %v324_v12  ;;  %v280_v12 = vld [vmem:[%s1906_s8 + $0x40] sm:$0xff] }
  0x46   : > { %1504 = vmatprep.mubr.msk.f32.mxu0 %vm348_vm0, %v722_v13 }
  0x48   : > { %1433 = vmatmul.mubr.msk.f32.gmra.mrb[20].mxu1 %vm348_vm0, %v325_v14 }
  0x49   : > { %1505 = vmatmul.mubr.msk.f32.gmra.mrb[20].mxu0 %vm348_vm0, %v723_v15  ;;  %1435 = vmatprep.mubr.msk.f32.mxu1 %vm348_vm0, %v326_v16 }
  0x4a   : > { %1507 = vmatprep.mubr.msk.f32.mxu0 %vm348_vm0, %v724_v17 }
  0x4c   : > { %1436 = vmatmul.mubr.msk.f32.gmra.mrb[22].mxu1 %vm348_vm0, %v327_v18 }
  0x4d   : > { %1508 = vmatmul.mubr.msk.f32.gmra.mrb[22].mxu0 %vm348_vm0, %v725_v19  ;;  %1438 = vmatprep.mubr.msk.f32.mxu1 %vm348_vm0, %v328_v20  ;;  %v283_v20 = vld [vmem:[%s1906_s8 + $0x58] sm:$0xff] }
  0x4e   : > { %1510 = vmatprep.mubr.msk.f32.mxu0 %vm348_vm0, %v726_v21 }
  0x50   : > { %1439 = vmatmul.mubr.msk.f32.gmra.mrb[24].mxu1 %vm348_vm0, %v329_v22  ;;  %v282_v22 = vld [vmem:[%s1906_s8 + $0x50] sm:$0xff] }
  0x51   : > { %1511 = vmatmul.mubr.msk.f32.gmra.mrb[24].mxu0 %vm348_vm0, %v727_v23  ;;  %1441 = vmatprep.mubr.msk.f32.mxu1 %vm348_vm0, %v330_v24 }
  0x52   : > { %1513 = vmatprep.mubr.msk.f32.mxu0 %vm348_vm0, %v728_v25 }
  0x54   : > { %1442 = vmatmul.mubr.msk.f32.gmra.mrb[26].mxu1 %vm348_vm0, %v331_v26 }
  0x55   : > { %1514 = vmatmul.mubr.msk.f32.gmra.mrb[26].mxu0 %vm348_vm0, %v729_v27  ;;  %1444 = vmatprep.mubr.msk.f32.mxu1 %vm348_vm0, %v332_v28 }
  0x56   : > { %1516 = vmatprep.mubr.msk.f32.mxu0 %vm348_vm0, %v730_v29 }
  0x58   : > { %1445 = vmatmul.mubr.msk.f32.gmra.mrb[28].mxu1 %vm348_vm0, %v333_v30  ;;  %v285_v30 = vld [vmem:[%s1906_s8 + $0x68] sm:$0xff] }
  0x59   : > { %1517 = vmatmul.mubr.msk.f32.gmra.mrb[28].mxu0 %vm348_vm0, %v731_v31  ;;  %1447 = vmatprep.mubr.msk.f32.mxu1 %vm348_vm0, %v334_v32  ;;  %v284_v32 = vld [vmem:[%s1906_s8 + $0x60] sm:$0xff] }
  0x5a   : > { %1519 = vmatprep.mubr.msk.f32.mxu0 %vm348_vm0, %v732_v33 }
  0x5c   : > { %1448 = vmatmul.mubr.msk.f32.gmra.mrb[30].mxu1 %vm348_vm0, %v335_v34 }
  0x5d   : > { %1520 = vmatmul.mubr.msk.f32.gmra.mrb[30].mxu0 %vm348_vm0, %v733_v35 }
  0xf3   : > { %v1404_v38 = vpop.f32.mrb[0].mxu1 }
  0xf4   : > { %v671_v39 = vadd.f32 %v1404_v38, %v273_v36  ;;  %v511_v40 = vpop.f32.mrb[1].mxu1  ;;  %v1476_v41 = vpop.f32.mrb[0].mxu0 }
  0xf5   : > { %v670_v42 = vadd.f32 %v511_v40, %v272_v37  ;;  %v908_v43 = vpop.f32.mrb[1].mxu0  ;;  %v287_v40 = vld [vmem:[%s1906_s8 + $0x78] sm:$0xff] }
  0xf6   : > { %v1068_v45 = vadd.f32 %v1476_v41, %v671_v39 }
  0xf7   : > { %v1067_v47 = vadd.f32 %v908_v43, %v670_v42  ;;  %v1407_v48 = vpop.f32.mrb[2].mxu1  ;;  %v286_v42 = vld [vmem:[%s1906_s8 + $0x70] sm:$0xff] }
  0xf8   : > { %1100 = vst [vmem:[%s1914_s9 + $0x8] sm:$0xff] %v1068_v45  ;;  %v673_v49 = vadd.f32 %v1407_v48, %v275_v44  ;;  %v521_v50 = vpop.f32.mrb[3].mxu1  ;;  %v1479_v51 = vpop.f32.mrb[2].mxu0 }
  0xf9   : > { %1099 = vst [vmem:[%s1914_s9] sm:$0xff] %v1067_v47  ;;  %v672_v52 = vadd.f32 %v521_v50, %v274_v46  ;;  %v918_v53 = vpop.f32.mrb[3].mxu0  ;;  %v289_v50 = vld [vmem:[%s1906_s8 + $0x88] sm:$0xff] }
  0xfa   : > { %v1070_v55 = vadd.f32 %v1479_v51, %v673_v49 }
  0xfb   : > { %v1069_v57 = vadd.f32 %v918_v53, %v672_v52  ;;  %v1410_v58 = vpop.f32.mrb[4].mxu1  ;;  %v288_v52 = vld [vmem:[%s1906_s8 + $0x80] sm:$0xff] }
  0xfc   : > { %1102 = vst [vmem:[%s1914_s9 + $0x18] sm:$0xff] %v1070_v55  ;;  %v675_v59 = vadd.f32 %v1410_v58, %v277_v54  ;;  %v531_v60 = vpop.f32.mrb[5].mxu1  ;;  %v1482_v61 = vpop.f32.mrb[4].mxu0 }
  0xfd   : > { %1101 = vst [vmem:[%s1914_s9 + $0x10] sm:$0xff] %v1069_v57  ;;  %v674_v62 = vadd.f32 %v531_v60, %v276_v56  ;;  %v928_v63 = vpop.f32.mrb[5].mxu0  ;;  %v291_v60 = vld [vmem:[%s1906_s8 + $0x98] sm:$0xff] }
  0xfe   : > { %v1072_v1 = vadd.f32 %v1482_v61, %v675_v59 }
  0xff   : > { %v1071_v3 = vadd.f32 %v928_v63, %v674_v62  ;;  %v1413_v4 = vpop.f32.mrb[6].mxu1  ;;  %v290_v62 = vld [vmem:[%s1906_s8 + $0x90] sm:$0xff] }
 0x100   : > { %1104 = vst [vmem:[%s1914_s9 + $0x28] sm:$0xff] %v1072_v1  ;;  %v677_v5 = vadd.f32 %v1413_v4, %v279_v0  ;;  %v541_v6 = vpop.f32.mrb[7].mxu1  ;;  %v1485_v7 = vpop.f32.mrb[6].mxu0 }
 0x101   : > { %1103 = vst [vmem:[%s1914_s9 + $0x20] sm:$0xff] %v1071_v3  ;;  %v676_v8 = vadd.f32 %v541_v6, %v278_v2  ;;  %v938_v9 = vpop.f32.mrb[7].mxu0  ;;  %v293_v6 = vld [vmem:[%s1906_s8 + $0xa8] sm:$0xff] }
 0x102   : > { %v1074_v11 = vadd.f32 %v1485_v7, %v677_v5 }
 0x103   : > { %v1073_v13 = vadd.f32 %v938_v9, %v676_v8  ;;  %v1416_v14 = vpop.f32.mrb[8].mxu1  ;;  %v292_v8 = vld [vmem:[%s1906_s8 + $0xa0] sm:$0xff] }
 0x104   : > { %1106 = vst [vmem:[%s1914_s9 + $0x38] sm:$0xff] %v1074_v11  ;;  %v679_v15 = vadd.f32 %v1416_v14, %v281_v10  ;;  %v551_v16 = vpop.f32.mrb[9].mxu1  ;;  %v1488_v17 = vpop.f32.mrb[8].mxu0 }
 0x105   : > { %1105 = vst [vmem:[%s1914_s9 + $0x30] sm:$0xff] %v1073_v13  ;;  %v678_v18 = vadd.f32 %v551_v16, %v280_v12  ;;  %v948_v19 = vpop.f32.mrb[9].mxu0  ;;  %v295_v16 = vld [vmem:[%s1906_s8 + $0xb8] sm:$0xff] }
 0x106   : > { %v1076_v21 = vadd.f32 %v1488_v17, %v679_v15 }
 0x107   : > { %v1075_v23 = vadd.f32 %v948_v19, %v678_v18  ;;  %v1419_v24 = vpop.f32.mrb[10].mxu1  ;;  %v294_v18 = vld [vmem:[%s1906_s8 + $0xb0] sm:$0xff] }
 0x108   : > { %1108 = vst [vmem:[%s1914_s9 + $0x48] sm:$0xff] %v1076_v21  ;;  %v681_v25 = vadd.f32 %v1419_v24, %v283_v20  ;;  %v561_v26 = vpop.f32.mrb[11].mxu1  ;;  %v1491_v27 = vpop.f32.mrb[10].mxu0 }
 0x109   : > { %1107 = vst [vmem:[%s1914_s9 + $0x40] sm:$0xff] %v1075_v23  ;;  %v680_v28 = vadd.f32 %v561_v26, %v282_v22  ;;  %v958_v29 = vpop.f32.mrb[11].mxu0  ;;  %v297_v26 = vld [vmem:[%s1906_s8 + $0xc8] sm:$0xff] }
 0x10a   : > { %v1078_v31 = vadd.f32 %v1491_v27, %v681_v25 }
 0x10b   : > { %v1077_v33 = vadd.f32 %v958_v29, %v680_v28  ;;  %v1422_v34 = vpop.f32.mrb[12].mxu1  ;;  %v296_v28 = vld [vmem:[%s1906_s8 + $0xc0] sm:$0xff] }
 0x10c   : > { %1110 = vst [vmem:[%s1914_s9 + $0x58] sm:$0xff] %v1078_v31  ;;  %v683_v35 = vadd.f32 %v1422_v34, %v285_v30  ;;  %v571_v36 = vpop.f32.mrb[13].mxu1  ;;  %v1494_v37 = vpop.f32.mrb[12].mxu0 }
 0x10d   : > { %1109 = vst [vmem:[%s1914_s9 + $0x50] sm:$0xff] %v1077_v33  ;;  %v682_v38 = vadd.f32 %v571_v36, %v284_v32  ;;  %v968_v39 = vpop.f32.mrb[13].mxu0  ;;  %v299_v36 = vld [vmem:[%s1906_s8 + $0xd8] sm:$0xff] }
 0x10e   : > { %v1080_v41 = vadd.f32 %v1494_v37, %v683_v35 }
 0x10f   : > { %v1079_v43 = vadd.f32 %v968_v39, %v682_v38  ;;  %v1425_v44 = vpop.f32.mrb[14].mxu1  ;;  %v298_v38 = vld [vmem:[%s1906_s8 + $0xd0] sm:$0xff] }
 0x110   : > { %1112 = vst [vmem:[%s1914_s9 + $0x68] sm:$0xff] %v1080_v41  ;;  %v685_v45 = vadd.f32 %v1425_v44, %v287_v40  ;;  %v581_v46 = vpop.f32.mrb[15].mxu1  ;;  %v1497_v47 = vpop.f32.mrb[14].mxu0 }
 0x111   : > { %1111 = vst [vmem:[%s1914_s9 + $0x60] sm:$0xff] %v1079_v43  ;;  %v684_v48 = vadd.f32 %v581_v46, %v286_v42  ;;  %v978_v49 = vpop.f32.mrb[15].mxu0  ;;  %v301_v46 = vld [vmem:[%s1906_s8 + $0xe8] sm:$0xff] }
 0x112   : > { %v1082_v51 = vadd.f32 %v1497_v47, %v685_v45 }
 0x113   : > { %v1081_v53 = vadd.f32 %v978_v49, %v684_v48  ;;  %v1428_v54 = vpop.f32.mrb[16].mxu1  ;;  %v300_v48 = vld [vmem:[%s1906_s8 + $0xe0] sm:$0xff] }
 0x114   : > { %1114 = vst [vmem:[%s1914_s9 + $0x78] sm:$0xff] %v1082_v51  ;;  %v687_v55 = vadd.f32 %v1428_v54, %v289_v50  ;;  %v591_v56 = vpop.f32.mrb[17].mxu1  ;;  %v1500_v57 = vpop.f32.mrb[16].mxu0 }
 0x115   : > { %1113 = vst [vmem:[%s1914_s9 + $0x70] sm:$0xff] %v1081_v53  ;;  %v686_v58 = vadd.f32 %v591_v56, %v288_v52  ;;  %v988_v59 = vpop.f32.mrb[17].mxu0  ;;  %v303_v56 = vld [vmem:[%s1906_s8 + $0xf8] sm:$0xff] }
 0x116   : > { %v1084_v61 = vadd.f32 %v1500_v57, %v687_v55 }
 0x117   : > { %v1083_v63 = vadd.f32 %v988_v59, %v686_v58  ;;  %v1431_v0 = vpop.f32.mrb[18].mxu1  ;;  %v302_v58 = vld [vmem:[%s1906_s8 + $0xf0] sm:$0xff] }
 0x118   : > { %1116 = vst [vmem:[%s1914_s9 + $0x88] sm:$0xff] %v1084_v61  ;;  %v689_v1 = vadd.f32 %v1431_v0, %v291_v60  ;;  %v601_v2 = vpop.f32.mrb[19].mxu1  ;;  %v1503_v3 = vpop.f32.mrb[18].mxu0 }
 0x119   : > { %1115 = vst [vmem:[%s1914_s9 + $0x80] sm:$0xff] %v1083_v63  ;;  %v688_v4 = vadd.f32 %v601_v2, %v290_v62  ;;  %v998_v5 = vpop.f32.mrb[19].mxu0 }
 0x11a   : > { %v1086_v7 = vadd.f32 %v1503_v3, %v689_v1 }
 0x11b   : > { %v1085_v9 = vadd.f32 %v998_v5, %v688_v4  ;;  %v1434_v10 = vpop.f32.mrb[20].mxu1 }
 0x11c   : > { %1118 = vst [vmem:[%s1914_s9 + $0x98] sm:$0xff] %v1086_v7  ;;  %v691_v11 = vadd.f32 %v1434_v10, %v293_v6  ;;  %v611_v12 = vpop.f32.mrb[21].mxu1  ;;  %v1506_v13 = vpop.f32.mrb[20].mxu0 }
 0x11d   : > { %1117 = vst [vmem:[%s1914_s9 + $0x90] sm:$0xff] %v1085_v9  ;;  %v690_v14 = vadd.f32 %v611_v12, %v292_v8  ;;  %v1008_v15 = vpop.f32.mrb[21].mxu0 }
 0x11e   : > { %v1088_v17 = vadd.f32 %v1506_v13, %v691_v11 }
 0x11f   : > { %v1087_v19 = vadd.f32 %v1008_v15, %v690_v14  ;;  %v1437_v20 = vpop.f32.mrb[22].mxu1 }
 0x120   : > { %1120 = vst [vmem:[%s1914_s9 + $0xa8] sm:$0xff] %v1088_v17  ;;  %v693_v21 = vadd.f32 %v1437_v20, %v295_v16  ;;  %v621_v22 = vpop.f32.mrb[23].mxu1  ;;  %v1509_v23 = vpop.f32.mrb[22].mxu0 }
 0x121   : > { %1119 = vst [vmem:[%s1914_s9 + $0xa0] sm:$0xff] %v1087_v19  ;;  %v692_v24 = vadd.f32 %v621_v22, %v294_v18  ;;  %v1018_v25 = vpop.f32.mrb[23].mxu0 }
 0x122   : > { %v1090_v27 = vadd.f32 %v1509_v23, %v693_v21 }
 0x123   : > { %v1089_v29 = vadd.f32 %v1018_v25, %v692_v24  ;;  %v1440_v30 = vpop.f32.mrb[24].mxu1 }
 0x124   : > { %1122 = vst [vmem:[%s1914_s9 + $0xb8] sm:$0xff] %v1090_v27  ;;  %v695_v31 = vadd.f32 %v1440_v30, %v297_v26  ;;  %v631_v32 = vpop.f32.mrb[25].mxu1  ;;  %v1512_v33 = vpop.f32.mrb[24].mxu0 }
 0x125   : > { %1121 = vst [vmem:[%s1914_s9 + $0xb0] sm:$0xff] %v1089_v29  ;;  %v694_v34 = vadd.f32 %v631_v32, %v296_v28  ;;  %v1028_v35 = vpop.f32.mrb[25].mxu0 }
 0x126   : > { %v1092_v37 = vadd.f32 %v1512_v33, %v695_v31 }
 0x127   : > { %v1091_v39 = vadd.f32 %v1028_v35, %v694_v34  ;;  %v1443_v40 = vpop.f32.mrb[26].mxu1 }
 0x128   : > { %1124 = vst [vmem:[%s1914_s9 + $0xc8] sm:$0xff] %v1092_v37  ;;  %v697_v41 = vadd.f32 %v1443_v40, %v299_v36  ;;  %v641_v42 = vpop.f32.mrb[27].mxu1  ;;  %v1515_v43 = vpop.f32.mrb[26].mxu0 }
 0x129   : > { %1123 = vst [vmem:[%s1914_s9 + $0xc0] sm:$0xff] %v1091_v39  ;;  %v696_v44 = vadd.f32 %v641_v42, %v298_v38  ;;  %v1038_v45 = vpop.f32.mrb[27].mxu0 }
 0x12a   : > { %v1094_v47 = vadd.f32 %v1515_v43, %v697_v41 }
 0x12b   : > { %v1093_v49 = vadd.f32 %v1038_v45, %v696_v44  ;;  %v1446_v50 = vpop.f32.mrb[28].mxu1 }
 0x12c   : > { %1126 = vst [vmem:[%s1914_s9 + $0xd8] sm:$0xff] %v1094_v47  ;;  %v699_v51 = vadd.f32 %v1446_v50, %v301_v46  ;;  %v651_v52 = vpop.f32.mrb[29].mxu1  ;;  %v1518_v53 = vpop.f32.mrb[28].mxu0 }
 0x12d   : > { %1125 = vst [vmem:[%s1914_s9 + $0xd0] sm:$0xff] %v1093_v49  ;;  %v698_v54 = vadd.f32 %v651_v52, %v300_v48  ;;  %v1048_v55 = vpop.f32.mrb[29].mxu0 }
 0x12e   : > { %v1096_v57 = vadd.f32 %v1518_v53, %v699_v51 }
 0x12f   : > { %v1095_v59 = vadd.f32 %v1048_v55, %v698_v54  ;;  %v1449_v60 = vpop.f32.mrb[30].mxu1 }
 0x130   : > { %1128 = vst [vmem:[%s1914_s9 + $0xe8] sm:$0xff] %v1096_v57  ;;  %v701_v61 = vadd.f32 %v1449_v60, %v303_v56  ;;  %v661_v62 = vpop.f32.mrb[31].mxu1  ;;  %v1521_v63 = vpop.f32.mrb[30].mxu0 }
 0x131   : > { %1127 = vst [vmem:[%s1914_s9 + $0xe0] sm:$0xff] %v1095_v59  ;;  %v700_v0 = vadd.f32 %v661_v62, %v302_v58  ;;  %v1058_v1 = vpop.f32.mrb[31].mxu0 }
 0x132   : > { %v1098_v2 = vadd.f32 %v1521_v63, %v701_v61 }
 0x133   : > { %v1097_v3 = vadd.f32 %v1058_v1, %v700_v0 }
 0x134   : > { %1130 = vst [vmem:[%s1914_s9 + $0xf8] sm:$0xff] %v1098_v2 }
 0x135   : > { %1129 = vst [vmem:[%s1914_s9 + $0xf0] sm:$0xff] %v1097_v3 }
 0x136 PF: > { %s15_s18 = sadd.s32 1, %s1648_s18  }
 0x137   : > { %p12_p4 = scmp.ge.s32.totalorder %s15_s18, 4  }
 0x139   :  { %14 = sbr.rel (!%p12_p4) target bundleno = 1 (0x1), region = 76 }

// kernel: orsnet_forward.43
= control target key start
LH: loop header
LB: loop body
LE: loop exit
PB: predicated region body
PF: predicated region fallthrough
CT: control target
= control target key end

     0   :  { %s477_s9 = smov 0   ;;  %s596_s0 = inlined_call_operand.vmem [shape: f32[128,144], index: 0, kind: input, shape index: {}]   ;;  %s597_s1 = inlined_call_operand.vmem [shape: f32[144,128], index: 1, kind: input, shape index: {}]   ;;  %s598_s2 = inlined_call_operand.vmem [shape: f32[128,128], index: 2, kind: output, shape index: {}]  }
   0x1 LB: > { %s378_s10 = sadd.s32 4294967295, %s459_s9   ;;  %p382_p0 = scmp.ge.s32.totalorder %s459_s9, 1  ;;  %s459_s9 = sphi %s477_s9, %s12_s9  }
   0x2   : > { %p114_p1 = scmp.lt.s32.totalorder %s459_s9, 3 }
   0x4   : > { %p115_p2 = pnand %p382_p0, %p114_p1 }
   0x5   : > { %v166_v0 = vld [vmem:[%s597_s1] sm:$0xff] (!%p115_p2)  ;;  %v167_v1 = vld [vmem:[%s597_s1 + $0x8] sm:$0xff] (!%p115_p2)  ;;  %v168_v2 = vld [vmem:[%s597_s1 + $0x10] sm:$0xff] (!%p115_p2)  ;;  %s383_s17 = sshll.u32 (!%p115_p2), %s378_s10, 3  ;;  %v461_v3 = vmov (!%p115_p2), 0.0|0.0   ;;  %vm184_vm0 = vcmask (!%p115_p2), 130048  }
   0x6   : > { %118 = sbr.rel (%p115_p2) target bundleno = 268 (0x10c), region = 28  ;;  %399 = vmatprep.subr.bf16.mxu0 (!%p115_p2), %v461_v3  ;;  %426 = vmatprep.subr.bf16.mxu1 (!%p115_p2), %v461_v3  ;;  %v400_v4 = vpack.c.bf16 (!%p115_p2), %v167_v1, %v166_v0  ;;  %v169_v5 = vld [vmem:[%s597_s1 + $0x18] sm:$0xff] (!%p115_p2)  ;;  %p138_p3 = scmp.lt.s32.totalorder (!%p115_p2), %s383_s17, 15  ;;  %v170_v7 = vld [vmem:[%s597_s1 + $0x20] sm:$0xff] (!%p115_p2)  ;;  %v171_v8 = vld [vmem:[%s597_s1 + $0x28] sm:$0xff] (!%p115_p2) }
   0x7   : > { %v403_v6 = vpack.c.bf16 (!%p115_p2), %v169_v5, %v168_v2  ;;  %v406_v9 = vpack.c.bf16 (!%p115_p2), %v171_v8, %v170_v7  ;;  %v172_v12 = vld [vmem:[%s597_s1 + $0x30] sm:$0xff] (!%p115_p2)  ;;  %v173_v13 = vld [vmem:[%s597_s1 + $0x38] sm:$0xff] (!%p115_p2)  ;;  %v174_v15 = vld [vmem:[%s597_s1 + $0x40] sm:$0xff] (!%p115_p2) }
   0x8   : > { %401 = vmatpush1.bf16.msra.mxu0 (!%p115_p2), %v400_v4  ;;  %435 = vmatpush1.bf16.msra.mxu1 (!%p115_p2), %v400_v4  ;;  %v409_v14 = vpack.c.bf16 (!%p115_p2), %v173_v13, %v172_v12  ;;  %v175_v16 = vld [vmem:[%s597_s1 + $0x48] sm:$0xff] (!%p115_p2)  ;;  %v176_v18 = vld [vmem:[%s597_s1 + $0x50] sm:$0xff] (!%p115_p2)  ;;  %v177_v19 = vld [vmem:[%s597_s1 + $0x58] sm:$0xff] (!%p115_p2) }
   0x9   : > { %402 = vmatprep.subr.bf16.mxu0 (!%p115_p2), %v461_v3  ;;  %427 = vmatprep.subr.bf16.mxu1 (!%p115_p2), %v461_v3  ;;  %v412_v17 = vpack.c.bf16 (!%p115_p2), %v175_v16, %v174_v15  ;;  %v415_v20 = vpack.c.bf16 (!%p115_p2), %v177_v19, %v176_v18  ;;  %v178_v21 = vld [vmem:[%s597_s1 + $0x60] sm:$0xff] (!%p115_p2)  ;;  %v179_v22 = vld [vmem:[%s597_s1 + $0x68] sm:$0xff] (!%p115_p2)  ;;  %v180_v24 = vld [vmem:[%s597_s1 + $0x70] sm:$0xff] (!%p115_p2) }
   0xa   : > { %v418_v23 = vpack.c.bf16 (!%p115_p2), %v179_v22, %v178_v21  ;;  %v181_v25 = vld [vmem:[%s597_s1 + $0x78] sm:$0xff] (!%p115_p2)  ;;  %v182_v27 = vld [vmem:[%s597_s1 + $0x80] sm:$0xff] (!%p115_p2)  ;;  %v183_v28 = vld [vmem:[%s597_s1 + $0x88] sm:$0xff] (!%p115_p2) }
   0xb   : > { %v421_v26 = vpack.c.bf16 (!%p115_p2), %v181_v25, %v180_v24  ;;  %v424_v29 = vpack.c.bf16 (!%p115_p2), %v183_v28, %v182_v27 }
   0xc   : > { %404 = vmatpush1.bf16.msra.mxu0 (!%p115_p2), %v403_v6  ;;  %436 = vmatpush1.bf16.msra.mxu1 (!%p115_p2), %v403_v6 }
   0xd   : > { %s600_s17 = smov (!%p138_p3, %s383_s17), 15  ;;  %405 = vmatprep.subr.bf16.mxu0 %v461_v3  ;;  %428 = vmatprep.subr.bf16.mxu1 %v461_v3 }
   0xe   : > { %s398_s24 = sshll.u32 %s600_s17, 4  ;;  %s387_s26 = sshll.u32 %s600_s17, 3 }
   0xf   : > { %s513_s27 = scalar_lea.vmem %s596_s0, %s398_s24  ;;  %s148_s30 = scalar_lea.vmem %s598_s2, %s387_s26 }
  0x10   : > { %v151_v10 = vld [vmem:[%s513_s27 + $0x8] sm:$0xff]  ;;  %407 = vmatpush1.bf16.msra.mxu0 %v406_v9  ;;  %437 = vmatpush1.bf16.msra.mxu1 %v406_v9  ;;  %v150_v30 = vld [vmem:[%s513_s27] sm:$0xff]  ;;  %v153_v32 = vld [vmem:[%s513_s27 + $0x18] sm:$0xff] }
  0x11   : > { %v159_v11 = vld [vmem:[%s513_s27 + $0x48] sm:$0xff]  ;;  %388 = vmatprep.mubr.msk.f32.mxu0 %vm184_vm0, %v151_v10  ;;  %408 = vmatprep.subr.bf16.mxu0 %v461_v3  ;;  %v158_v31 = vld [vmem:[%s513_s27 + $0x40] sm:$0xff]  ;;  %v161_v33 = vld [vmem:[%s513_s27 + $0x58] sm:$0xff] }
  0x12   : > { %392 = vmatprep.mubr.msk.f32.mxu1 %vm184_vm0, %v159_v11  ;;  %429 = vmatprep.subr.bf16.mxu1 %v461_v3  ;;  %v152_v34 = vld [vmem:[%s513_s27 + $0x10] sm:$0xff]  ;;  %v155_v36 = vld [vmem:[%s513_s27 + $0x28] sm:$0xff]  ;;  %v154_v38 = vld [vmem:[%s513_s27 + $0x20] sm:$0xff] }
  0x13   : > { %v160_v35 = vld [vmem:[%s513_s27 + $0x50] sm:$0xff]  ;;  %v163_v37 = vld [vmem:[%s513_s27 + $0x68] sm:$0xff]  ;;  %v162_v39 = vld [vmem:[%s513_s27 + $0x60] sm:$0xff] }
  0x14   : > { %410 = vmatpush1.bf16.msra.mxu0 %v409_v14  ;;  %438 = vmatpush1.bf16.msra.mxu1 %v409_v14  ;;  %v157_v40 = vld [vmem:[%s513_s27 + $0x38] sm:$0xff]  ;;  %v156_v42 = vld [vmem:[%s513_s27 + $0x30] sm:$0xff] }
  0x15   : > { %411 = vmatprep.subr.bf16.mxu0 %v461_v3  ;;  %430 = vmatprep.subr.bf16.mxu1 %v461_v3  ;;  %v165_v41 = vld [vmem:[%s513_s27 + $0x78] sm:$0xff]  ;;  %v164_v43 = vld [vmem:[%s513_s27 + $0x70] sm:$0xff] }
  0x18   : > { %413 = vmatpush1.bf16.msra.mxu0 %v412_v17  ;;  %439 = vmatpush1.bf16.msra.mxu1 %v412_v17 }
  0x19   : > { %414 = vmatprep.subr.bf16.mxu0 %v461_v3  ;;  %431 = vmatprep.subr.bf16.mxu1 %v461_v3 }
  0x1c   : > { %416 = vmatpush1.bf16.msra.mxu0 %v415_v20  ;;  %440 = vmatpush1.bf16.msra.mxu1 %v415_v20 }
  0x1d   : > { %417 = vmatprep.subr.bf16.mxu0 %v461_v3  ;;  %432 = vmatprep.subr.bf16.mxu1 %v461_v3 }
  0x20   : > { %419 = vmatpush1.bf16.msra.mxu0 %v418_v23  ;;  %441 = vmatpush1.bf16.msra.mxu1 %v418_v23 }
  0x21   : > { %420 = vmatprep.subr.bf16.mxu0 %v461_v3  ;;  %433 = vmatprep.subr.bf16.mxu1 %v461_v3 }
  0x24   : > { %422 = vmatpush1.bf16.msra.mxu0 %v421_v26  ;;  %442 = vmatpush1.bf16.msra.mxu1 %v421_v26 }
  0x25   : > { %423 = vmatprep.subr.bf16.mxu0 %v461_v3  ;;  %434 = vmatprep.subr.bf16.mxu1 %v461_v3 }
  0x28   : > { %425 = vmatpush1.bf16.msra.mxu0 %v424_v29  ;;  %443 = vmatpush1.bf16.msra.mxu1 %v424_v29 }
  0x2b   : > { %274 = vmatmul.mubr.f32.vlgmr.msra.gmra.mrb[0].mxu0 %v150_v30  ;;  %294 = vmatmul.mubr.f32.vlgmr.msra.gmra.mrb[0].mxu1 %v158_v31 }
  0x2c   : > { %389 = vmatprep.mubr.msk.f32.mxu0 %vm184_vm0, %v153_v32  ;;  %393 = vmatprep.mubr.msk.f32.mxu1 %vm184_vm0, %v161_v33 }
  0x2f   : > { %279 = vmatmul.mubr.f32.gmra.mrb[2].mxu0 %v152_v34  ;;  %299 = vmatmul.mubr.f32.gmra.mrb[2].mxu1 %v160_v35 }
  0x30   : > { %390 = vmatprep.mubr.msk.f32.mxu0 %vm184_vm0, %v155_v36  ;;  %394 = vmatprep.mubr.msk.f32.mxu1 %vm184_vm0, %v163_v37 }
  0x33   : > { %284 = vmatmul.mubr.f32.gmra.mrb[4].mxu0 %v154_v38  ;;  %304 = vmatmul.mubr.f32.gmra.mrb[4].mxu1 %v162_v39 }
  0x34   : > { %391 = vmatprep.mubr.msk.f32.mxu0 %vm184_vm0, %v157_v40  ;;  %395 = vmatprep.mubr.msk.f32.mxu1 %vm184_vm0, %v165_v41 }
  0x37   : > { %289 = vmatmul.mubr.f32.gmra.mrb[6].mxu0 %v156_v42  ;;  %309 = vmatmul.mubr.f32.gmra.mrb[6].mxu1 %v164_v43 }
  0xfe   : > { %v275_v44 = vpop.f32.mrb[0].mxu0  ;;  %v295_v45 = vpop.f32.mrb[0].mxu1 }
  0xff   : > { %314 = vst [vmem:[%s148_s30] sm:$0xff] %v275_v44  ;;  %318 = vst [vmem:[%s148_s30 + $0x20] sm:$0xff] %v295_v45  ;;  %v277_v46 = vpop.f32.mrb[1].mxu0  ;;  %v297_v47 = vpop.f32.mrb[1].mxu1 }
 0x102   : > { %v280_v48 = vpop.f32.mrb[2].mxu0  ;;  %v300_v49 = vpop.f32.mrb[2].mxu1 }
 0x103   : > { %315 = vst [vmem:[%s148_s30 + $0x8] sm:$0xff] %v280_v48  ;;  %319 = vst [vmem:[%s148_s30 + $0x28] sm:$0xff] %v300_v49  ;;  %v282_v50 = vpop.f32.mrb[3].mxu0  ;;  %v302_v51 = vpop.f32.mrb[3].mxu1 }
 0x106   : > { %v285_v52 = vpop.f32.mrb[4].mxu0  ;;  %v305_v53 = vpop.f32.mrb[4].mxu1 }
 0x107   : > { %316 = vst [vmem:[%s148_s30 + $0x10] sm:$0xff] %v285_v52  ;;  %320 = vst [vmem:[%s148_s30 + $0x30] sm:$0xff] %v305_v53  ;;  %v287_v54 = vpop.f32.mrb[5].mxu0  ;;  %v307_v55 = vpop.f32.mrb[5].mxu1 }
 0x10a   : > { %v290_v56 = vpop.f32.mrb[6].mxu0  ;;  %v310_v57 = vpop.f32.mrb[6].mxu1 }
 0x10b   : > { %317 = vst [vmem:[%s148_s30 + $0x18] sm:$0xff] %v290_v56  ;;  %321 = vst [vmem:[%s148_s30 + $0x38] sm:$0xff] %v310_v57  ;;  %v292_v58 = vpop.f32.mrb[7].mxu0  ;;  %v312_v59 = vpop.f32.mrb[7].mxu1 }
 0x10c PF: > { %s12_s9 = sadd.s32 1, %s459_s9  }
 0x10d   : > { %p9_p4 = scmp.ge.s32.totalorder %s12_s9, 4  }
 0x10f   :  { %11 = sbr.rel (!%p9_p4) target bundleno = 1 (0x1), region = 58 }

// kernel: orsnet_forward.45
= control target key start
LH: loop header
LB: loop body
LE: loop exit
PB: predicated region body
PF: predicated region fallthrough
CT: control target
= control target key end

     0   :  { %s541_s12 = smov 0   ;;  %s700_s0 = inlined_call_operand.vmem [shape: f32[512,128], index: 0, kind: input, shape index: {}]   ;;  %s701_s1 = inlined_call_operand.vmem [shape: f32[512,128], index: 1, kind: input, shape index: {}]   ;;  %s702_s2 = inlined_call_operand.vmem [shape: f32[512,128], index: 2, kind: input, shape index: {}]   ;;  %s703_s3 = inlined_call_operand.vmem [shape: f32[512,128], index: 3, kind: output, shape index: {}]  }
   0x1 LB: > { %s490_s13 = sadd.s32 4294967295, %s519_s12   ;;  %p494_p0 = scmp.ge.s32.totalorder %s519_s12, 1  ;;  %s519_s12 = sphi %s541_s12, %s13_s12  }
   0x2   : > { %p160_p1 = scmp.lt.s32.totalorder %s519_s12, 3 }
   0x4   : > { %p161_p2 = pnand %p494_p0, %p160_p1 }
   0x5   : > { %s495_s14 = sshll.u32 (!%p161_p2), %s490_s13, 5 }
   0x6   : > { %164 = sbr.rel (%p161_p2) target bundleno = 56 (0x38), region = 32  ;;  %p195_p3 = scmp.lt.s32.totalorder (!%p161_p2), %s495_s14, 63 }
   0xd   : > { %s705_s14 = smov (!%p195_p3, %s495_s14), 63 }
   0xe   : > { %s496_s15 = sshll.u32 %s705_s14, 3 }
   0xf   : > { %s552_s18 = scalar_lea.vmem %s700_s0, %s496_s15  ;;  %s557_s21 = scalar_lea.vmem %s701_s1, %s496_s15 }
  0x10   : > { %s562_s24 = scalar_lea.vmem %s702_s2, %s496_s15  ;;  %v218_v0 = vld [vmem:[%s552_s18] sm:$0xff]  ;;  %v219_v2 = vld [vmem:[%s552_s18 + $0x8] sm:$0xff]  ;;  %s573_s27 = scalar_lea.vmem %s703_s3, %s496_s15  ;;  %v220_v8 = vld [vmem:[%s552_s18 + $0x10] sm:$0xff] }
  0x11   : > { %v250_v1 = vld [vmem:[%s557_s21] sm:$0xff]  ;;  %v251_v5 = vld [vmem:[%s557_s21 + $0x8] sm:$0xff]  ;;  %v252_v9 = vld [vmem:[%s557_s21 + $0x10] sm:$0xff] }
  0x12   : > { %v282_v3 = vadd.f32 %v250_v1, %v218_v0  ;;  %v314_v4 = vld [vmem:[%s562_s24] sm:$0xff]  ;;  %v315_v6 = vld [vmem:[%s562_s24 + $0x8] sm:$0xff]  ;;  %v283_v7 = vadd.f32 %v251_v5, %v219_v2  ;;  %v316_v10 = vld [vmem:[%s562_s24 + $0x10] sm:$0xff]  ;;  %v284_v12 = vadd.f32 %v252_v9, %v220_v8 }
  0x13   : > { %v221_v13 = vld [vmem:[%s552_s18 + $0x18] sm:$0xff]  ;;  %v222_v18 = vld [vmem:[%s552_s18 + $0x20] sm:$0xff]  ;;  %v223_v23 = vld [vmem:[%s552_s18 + $0x28] sm:$0xff] }
  0x14   : > { %v346_v11 = vadd.f32 %v314_v4, %v282_v3  ;;  %v253_v14 = vld [vmem:[%s557_s21 + $0x18] sm:$0xff]  ;;  %v347_v16 = vadd.f32 %v315_v6, %v283_v7  ;;  %v254_v19 = vld [vmem:[%s557_s21 + $0x20] sm:$0xff]  ;;  %v348_v21 = vadd.f32 %v316_v10, %v284_v12  ;;  %v255_v24 = vld [vmem:[%s557_s21 + $0x28] sm:$0xff] }
  0x15   : > { %v317_v15 = vld [vmem:[%s562_s24 + $0x18] sm:$0xff]  ;;  %v285_v17 = vadd.f32 %v253_v14, %v221_v13  ;;  %v318_v20 = vld [vmem:[%s562_s24 + $0x20] sm:$0xff]  ;;  %v286_v22 = vadd.f32 %v254_v19, %v222_v18  ;;  %v319_v25 = vld [vmem:[%s562_s24 + $0x28] sm:$0xff]  ;;  %v287_v27 = vadd.f32 %v255_v24, %v223_v23 }
  0x16   : > { %378 = vst [vmem:[%s573_s27] sm:$0xff] %v346_v11  ;;  %379 = vst [vmem:[%s573_s27 + $0x8] sm:$0xff] %v347_v16  ;;  %v224_v28 = vld [vmem:[%s552_s18 + $0x30] sm:$0xff]  ;;  %v225_v33 = vld [vmem:[%s552_s18 + $0x38] sm:$0xff] }
  0x17   : > { %v349_v26 = vadd.f32 %v317_v15, %v285_v17  ;;  %v256_v29 = vld [vmem:[%s557_s21 + $0x30] sm:$0xff]  ;;  %380 = vst [vmem:[%s573_s27 + $0x10] sm:$0xff] %v348_v21  ;;  %v350_v31 = vadd.f32 %v318_v20, %v286_v22  ;;  %v257_v34 = vld [vmem:[%s557_s21 + $0x38] sm:$0xff]  ;;  %v351_v36 = vadd.f32 %v319_v25, %v287_v27  ;;  %v226_v38 = vld [vmem:[%s552_s18 + $0x40] sm:$0xff] }
  0x18   : > { %v320_v30 = vld [vmem:[%s562_s24 + $0x30] sm:$0xff]  ;;  %v288_v32 = vadd.f32 %v256_v29, %v224_v28  ;;  %v321_v35 = vld [vmem:[%s562_s24 + $0x38] sm:$0xff]  ;;  %v289_v37 = vadd.f32 %v257_v34, %v225_v33  ;;  %v258_v39 = vld [vmem:[%s557_s21 + $0x40] sm:$0xff] }
  0x19   : > { %381 = vst [vmem:[%s573_s27 + $0x18] sm:$0xff] %v349_v26  ;;  %v322_v40 = vld [vmem:[%s562_s24 + $0x40] sm:$0xff]  ;;  %382 = vst [vmem:[%s573_s27 + $0x20] sm:$0xff] %v350_v31  ;;  %v290_v42 = vadd.f32 %v258_v39, %v226_v38  ;;  %v227_v43 = vld [vmem:[%s552_s18 + $0x48] sm:$0xff] }
  0x1a   : > { %v352_v41 = vadd.f32 %v320_v30, %v288_v32  ;;  %v259_v44 = vld [vmem:[%s557_s21 + $0x48] sm:$0xff]  ;;  %383 = vst [vmem:[%s573_s27 + $0x28] sm:$0xff] %v351_v36  ;;  %v353_v46 = vadd.f32 %v321_v35, %v289_v37  ;;  %v228_v48 = vld [vmem:[%s552_s18 + $0x50] sm:$0xff]  ;;  %v229_v53 = vld [vmem:[%s552_s18 + $0x58] sm:$0xff] }
  0x1b   : > { %v323_v45 = vld [vmem:[%s562_s24 + $0x48] sm:$0xff]  ;;  %v291_v47 = vadd.f32 %v259_v44, %v227_v43  ;;  %v260_v49 = vld [vmem:[%s557_s21 + $0x50] sm:$0xff]  ;;  %v354_v51 = vadd.f32 %v322_v40, %v290_v42  ;;  %v261_v54 = vld [vmem:[%s557_s21 + $0x58] sm:$0xff] }
  0x1c   : > { %v324_v50 = vld [vmem:[%s562_s24 + $0x50] sm:$0xff]  ;;  %384 = vst [vmem:[%s573_s27 + $0x30] sm:$0xff] %v352_v41  ;;  %v292_v52 = vadd.f32 %v260_v49, %v228_v48  ;;  %v325_v55 = vld [vmem:[%s562_s24 + $0x58] sm:$0xff]  ;;  %385 = vst [vmem:[%s573_s27 + $0x38] sm:$0xff] %v353_v46  ;;  %v293_v57 = vadd.f32 %v261_v54, %v229_v53 }
  0x1d   : > { %v355_v56 = vadd.f32 %v323_v45, %v291_v47  ;;  %v230_v58 = vld [vmem:[%s552_s18 + $0x60] sm:$0xff]  ;;  %386 = vst [vmem:[%s573_s27 + $0x40] sm:$0xff] %v354_v51  ;;  %v231_v63 = vld [vmem:[%s552_s18 + $0x68] sm:$0xff]  ;;  %v232_v4 = vld [vmem:[%s552_s18 + $0x70] sm:$0xff] }
  0x1e   : > { %v262_v59 = vld [vmem:[%s557_s21 + $0x60] sm:$0xff]  ;;  %v356_v61 = vadd.f32 %v324_v50, %v292_v52  ;;  %v263_v0 = vld [vmem:[%s557_s21 + $0x68] sm:$0xff]  ;;  %v357_v2 = vadd.f32 %v325_v55, %v293_v57  ;;  %v264_v5 = vld [vmem:[%s557_s21 + $0x70] sm:$0xff] }
  0x1f   : > { %v326_v60 = vld [vmem:[%s562_s24 + $0x60] sm:$0xff]  ;;  %v294_v62 = vadd.f32 %v262_v59, %v230_v58  ;;  %v327_v1 = vld [vmem:[%s562_s24 + $0x68] sm:$0xff]  ;;  %387 = vst [vmem:[%s573_s27 + $0x48] sm:$0xff] %v355_v56  ;;  %v295_v3 = vadd.f32 %v263_v0, %v231_v63  ;;  %v328_v6 = vld [vmem:[%s562_s24 + $0x70] sm:$0xff]  ;;  %v296_v8 = vadd.f32 %v264_v5, %v232_v4 }
  0x20   : > { %388 = vst [vmem:[%s573_s27 + $0x50] sm:$0xff] %v356_v61  ;;  %v233_v9 = vld [vmem:[%s552_s18 + $0x78] sm:$0xff]  ;;  %389 = vst [vmem:[%s573_s27 + $0x58] sm:$0xff] %v357_v2  ;;  %v234_v14 = vld [vmem:[%s552_s18 + $0x80] sm:$0xff] }
  0x21   : > { %v358_v7 = vadd.f32 %v326_v60, %v294_v62  ;;  %v265_v10 = vld [vmem:[%s557_s21 + $0x78] sm:$0xff]  ;;  %v359_v12 = vadd.f32 %v327_v1, %v295_v3  ;;  %v266_v15 = vld [vmem:[%s557_s21 + $0x80] sm:$0xff]  ;;  %v360_v17 = vadd.f32 %v328_v6, %v296_v8  ;;  %v235_v19 = vld [vmem:[%s552_s18 + $0x88] sm:$0xff] }
  0x22   : > { %v329_v11 = vld [vmem:[%s562_s24 + $0x78] sm:$0xff]  ;;  %v297_v13 = vadd.f32 %v265_v10, %v233_v9  ;;  %v330_v16 = vld [vmem:[%s562_s24 + $0x80] sm:$0xff]  ;;  %v298_v18 = vadd.f32 %v266_v15, %v234_v14  ;;  %v267_v20 = vld [vmem:[%s557_s21 + $0x88] sm:$0xff] }
  0x23   : > { %390 = vst [vmem:[%s573_s27 + $0x60] sm:$0xff] %v358_v7  ;;  %v331_v21 = vld [vmem:[%s562_s24 + $0x88] sm:$0xff]  ;;  %391 = vst [vmem:[%s573_s27 + $0x68] sm:$0xff] %v359_v12  ;;  %v299_v23 = vadd.f32 %v267_v20, %v235_v19  ;;  %v236_v24 = vld [vmem:[%s552_s18 + $0x90] sm:$0xff] }
  0x24   : > { %v361_v22 = vadd.f32 %v329_v11, %v297_v13  ;;  %v268_v25 = vld [vmem:[%s557_s21 + $0x90] sm:$0xff]  ;;  %392 = vst [vmem:[%s573_s27 + $0x70] sm:$0xff] %v360_v17  ;;  %v362_v27 = vadd.f32 %v330_v16, %v298_v18  ;;  %v237_v29 = vld [vmem:[%s552_s18 + $0x98] sm:$0xff]  ;;  %v238_v34 = vld [vmem:[%s552_s18 + $0xa0] sm:$0xff] }
  0x25   : > { %v332_v26 = vld [vmem:[%s562_s24 + $0x90] sm:$0xff]  ;;  %v300_v28 = vadd.f32 %v268_v25, %v236_v24  ;;  %v269_v30 = vld [vmem:[%s557_s21 + $0x98] sm:$0xff]  ;;  %v363_v32 = vadd.f32 %v331_v21, %v299_v23  ;;  %v270_v35 = vld [vmem:[%s557_s21 + $0xa0] sm:$0xff] }
  0x26   : > { %v333_v31 = vld [vmem:[%s562_s24 + $0x98] sm:$0xff]  ;;  %393 = vst [vmem:[%s573_s27 + $0x78] sm:$0xff] %v361_v22  ;;  %v301_v33 = vadd.f32 %v269_v30, %v237_v29  ;;  %v334_v36 = vld [vmem:[%s562_s24 + $0xa0] sm:$0xff]  ;;  %394 = vst [vmem:[%s573_s27 + $0x80] sm:$0xff] %v362_v27  ;;  %v302_v38 = vadd.f32 %v270_v35, %v238_v34 }
  0x27   : > { %v364_v37 = vadd.f32 %v332_v26, %v300_v28  ;;  %v239_v39 = vld [vmem:[%s552_s18 + $0xa8] sm:$0xff]  ;;  %395 = vst [vmem:[%s573_s27 + $0x88] sm:$0xff] %v363_v32  ;;  %v240_v44 = vld [vmem:[%s552_s18 + $0xb0] sm:$0xff]  ;;  %v241_v49 = vld [vmem:[%s552_s18 + $0xb8] sm:$0xff] }
  0x28   : > { %v271_v40 = vld [vmem:[%s557_s21 + $0xa8] sm:$0xff]  ;;  %v365_v42 = vadd.f32 %v333_v31, %v301_v33  ;;  %v272_v45 = vld [vmem:[%s557_s21 + $0xb0] sm:$0xff]  ;;  %v366_v47 = vadd.f32 %v334_v36, %v302_v38  ;;  %v273_v50 = vld [vmem:[%s557_s21 + $0xb8] sm:$0xff] }
  0x29   : > { %v335_v41 = vld [vmem:[%s562_s24 + $0xa8] sm:$0xff]  ;;  %v303_v43 = vadd.f32 %v271_v40, %v239_v39  ;;  %v336_v46 = vld [vmem:[%s562_s24 + $0xb0] sm:$0xff]  ;;  %396 = vst [vmem:[%s573_s27 + $0x90] sm:$0xff] %v364_v37  ;;  %v304_v48 = vadd.f32 %v272_v45, %v240_v44  ;;  %v337_v51 = vld [vmem:[%s562_s24 + $0xb8] sm:$0xff]  ;;  %v305_v53 = vadd.f32 %v273_v50, %v241_v49 }
  0x2a   : > { %397 = vst [vmem:[%s573_s27 + $0x98] sm:$0xff] %v365_v42  ;;  %v242_v54 = vld [vmem:[%s552_s18 + $0xc0] sm:$0xff]  ;;  %398 = vst [vmem:[%s573_s27 + $0xa0] sm:$0xff] %v366_v47  ;;  %v243_v59 = vld [vmem:[%s552_s18 + $0xc8] sm:$0xff] }
  0x2b   : > { %v367_v52 = vadd.f32 %v335_v41, %v303_v43  ;;  %v274_v55 = vld [vmem:[%s557_s21 + $0xc0] sm:$0xff]  ;;  %v368_v57 = vadd.f32 %v336_v46, %v304_v48  ;;  %v275_v60 = vld [vmem:[%s557_s21 + $0xc8] sm:$0xff]  ;;  %v369_v62 = vadd.f32 %v337_v51, %v305_v53  ;;  %v244_v0 = vld [vmem:[%s552_s18 + $0xd0] sm:$0xff] }
  0x2c   : > { %v338_v56 = vld [vmem:[%s562_s24 + $0xc0] sm:$0xff]  ;;  %v306_v58 = vadd.f32 %v274_v55, %v242_v54  ;;  %v339_v61 = vld [vmem:[%s562_s24 + $0xc8] sm:$0xff]  ;;  %v307_v63 = vadd.f32 %v275_v60, %v243_v59  ;;  %v276_v1 = vld [vmem:[%s557_s21 + $0xd0] sm:$0xff] }
  0x2d   : > { %399 = vst [vmem:[%s573_s27 + $0xa8] sm:$0xff] %v367_v52  ;;  %v340_v2 = vld [vmem:[%s562_s24 + $0xd0] sm:$0xff]  ;;  %400 = vst [vmem:[%s573_s27 + $0xb0] sm:$0xff] %v368_v57  ;;  %v308_v4 = vadd.f32 %v276_v1, %v244_v0  ;;  %v245_v5 = vld [vmem:[%s552_s18 + $0xd8] sm:$0xff] }
  0x2e   : > { %v370_v3 = vadd.f32 %v338_v56, %v306_v58  ;;  %v277_v6 = vld [vmem:[%s557_s21 + $0xd8] sm:$0xff]  ;;  %401 = vst [vmem:[%s573_s27 + $0xb8] sm:$0xff] %v369_v62  ;;  %v371_v8 = vadd.f32 %v339_v61, %v307_v63  ;;  %v246_v10 = vld [vmem:[%s552_s18 + $0xe0] sm:$0xff]  ;;  %v247_v15 = vld [vmem:[%s552_s18 + $0xe8] sm:$0xff] }
  0x2f   : > { %v341_v7 = vld [vmem:[%s562_s24 + $0xd8] sm:$0xff]  ;;  %v309_v9 = vadd.f32 %v277_v6, %v245_v5  ;;  %v278_v11 = vld [vmem:[%s557_s21 + $0xe0] sm:$0xff]  ;;  %v372_v13 = vadd.f32 %v340_v2, %v308_v4  ;;  %v279_v16 = vld [vmem:[%s557_s21 + $0xe8] sm:$0xff] }
  0x30   : > { %v342_v12 = vld [vmem:[%s562_s24 + $0xe0] sm:$0xff]  ;;  %402 = vst [vmem:[%s573_s27 + $0xc0] sm:$0xff] %v370_v3  ;;  %v310_v14 = vadd.f32 %v278_v11, %v246_v10  ;;  %v343_v17 = vld [vmem:[%s562_s24 + $0xe8] sm:$0xff]  ;;  %403 = vst [vmem:[%s573_s27 + $0xc8] sm:$0xff] %v371_v8  ;;  %v311_v19 = vadd.f32 %v279_v16, %v247_v15 }
  0x31   : > { %v373_v18 = vadd.f32 %v341_v7, %v309_v9  ;;  %v248_v20 = vld [vmem:[%s552_s18 + $0xf0] sm:$0xff]  ;;  %404 = vst [vmem:[%s573_s27 + $0xd0] sm:$0xff] %v372_v13  ;;  %v249_v25 = vld [vmem:[%s552_s18 + $0xf8] sm:$0xff] }
  0x32   : > { %v280_v21 = vld [vmem:[%s557_s21 + $0xf0] sm:$0xff]  ;;  %v374_v23 = vadd.f32 %v342_v12, %v310_v14  ;;  %v281_v26 = vld [vmem:[%s557_s21 + $0xf8] sm:$0xff]  ;;  %v375_v28 = vadd.f32 %v343_v17, %v311_v19 }
  0x33   : > { %v344_v22 = vld [vmem:[%s562_s24 + $0xf0] sm:$0xff]  ;;  %v312_v24 = vadd.f32 %v280_v21, %v248_v20  ;;  %v345_v27 = vld [vmem:[%s562_s24 + $0xf8] sm:$0xff]  ;;  %405 = vst [vmem:[%s573_s27 + $0xd8] sm:$0xff] %v373_v18  ;;  %v313_v29 = vadd.f32 %v281_v26, %v249_v25 }
  0x34   : > { %406 = vst [vmem:[%s573_s27 + $0xe0] sm:$0xff] %v374_v23  ;;  %407 = vst [vmem:[%s573_s27 + $0xe8] sm:$0xff] %v375_v28 }
  0x35   : > { %v376_v30 = vadd.f32 %v344_v22, %v312_v24  ;;  %v377_v31 = vadd.f32 %v345_v27, %v313_v29 }
  0x37   : > { %408 = vst [vmem:[%s573_s27 + $0xf0] sm:$0xff] %v376_v30  ;;  %409 = vst [vmem:[%s573_s27 + $0xf8] sm:$0xff] %v377_v31 }
  0x38 PF: > { %s13_s12 = sadd.s32 1, %s519_s12  }
  0x39   : > { %p10_p4 = scmp.ge.s32.totalorder %s13_s12, 4  }
  0x3b   :  { %12 = sbr.rel (!%p10_p4) target bundleno = 1 (0x1), region = 68 }

// kernel: orsnet_forward.53
= control target key start
LH: loop header
LB: loop body
LE: loop exit
PB: predicated region body
PF: predicated region fallthrough
CT: control target
= control target key end

     0   :  { %s426_s9 = smov 0   ;;  %s549_s0 = inlined_call_operand.vmem [shape: f32[32,192], index: 0, kind: input, shape index: {}]   ;;  %s550_s1 = inlined_call_operand.vmem [shape: f32[192,128], index: 1, kind: input, shape index: {}]   ;;  %s551_s2 = inlined_call_operand.vmem [shape: f32[32,128], index: 2, kind: output, shape index: {}]  }
   0x1 LB: > { %s318_s10 = sadd.s32 4294967295, %s408_s9   ;;  %p322_p0 = scmp.ge.s32.totalorder %s408_s9, 1  ;;  %s408_s9 = sphi %s426_s9, %s12_s9  }
   0x2   : > { %p114_p1 = scmp.lt.s32.totalorder %s408_s9, 3 }
   0x4   : > { %p115_p2 = pnand %p322_p0, %p114_p1 }
   0x5   : > { %v154_v0 = vld [vmem:[%s550_s1] sm:$0xff] (!%p115_p2)  ;;  %v155_v1 = vld [vmem:[%s550_s1 + $0x8] sm:$0xff] (!%p115_p2)  ;;  %v156_v2 = vld [vmem:[%s550_s1 + $0x10] sm:$0xff] (!%p115_p2)  ;;  %s323_s17 = sshll.u32 (!%p115_p2), %s318_s10, 1  ;;  %v410_v3 = vmov (!%p115_p2), 0.0|0.0   ;;  %vm178_vm0 = vcmask (!%p115_p2), 523264  }
   0x6   : > { %118 = sbr.rel (%p115_p2) target bundleno = 268 (0x10c), region = 28  ;;  %333 = vmatprep.subr.bf16.mxu0 (!%p115_p2), %v410_v3  ;;  %369 = vmatprep.subr.bf16.mxu1 (!%p115_p2), %v410_v3  ;;  %v334_v4 = vpack.c.bf16 (!%p115_p2), %v155_v1, %v154_v0  ;;  %v157_v5 = vld [vmem:[%s550_s1 + $0x18] sm:$0xff] (!%p115_p2)  ;;  %p138_p3 = scmp.lt.s32.totalorder (!%p115_p2), %s323_s17, 3  ;;  %v158_v7 = vld [vmem:[%s550_s1 + $0x20] sm:$0xff] (!%p115_p2)  ;;  %v159_v8 = vld [vmem:[%s550_s1 + $0x28] sm:$0xff] (!%p115_p2) }
   0x7   : > { %v337_v6 = vpack.c.bf16 (!%p115_p2), %v157_v5, %v156_v2  ;;  %v340_v9 = vpack.c.bf16 (!%p115_p2), %v159_v8, %v158_v7  ;;  %v160_v10 = vld [vmem:[%s550_s1 + $0x30] sm:$0xff] (!%p115_p2)  ;;  %v161_v11 = vld [vmem:[%s550_s1 + $0x38] sm:$0xff] (!%p115_p2)  ;;  %v162_v15 = vld [vmem:[%s550_s1 + $0x40] sm:$0xff] (!%p115_p2) }
   0x8   : > { %335 = vmatpush1.bf16.msra.mxu0 (!%p115_p2), %v334_v4  ;;  %381 = vmatpush1.bf16.msra.mxu1 (!%p115_p2), %v334_v4  ;;  %v343_v14 = vpack.c.bf16 (!%p115_p2), %v161_v11, %v160_v10  ;;  %v163_v16 = vld [vmem:[%s550_s1 + $0x48] sm:$0xff] (!%p115_p2)  ;;  %v164_v18 = vld [vmem:[%s550_s1 + $0x50] sm:$0xff] (!%p115_p2)  ;;  %v165_v19 = vld [vmem:[%s550_s1 + $0x58] sm:$0xff] (!%p115_p2) }
   0x9   : > { %336 = vmatprep.subr.bf16.mxu0 (!%p115_p2), %v410_v3  ;;  %370 = vmatprep.subr.bf16.mxu1 (!%p115_p2), %v410_v3  ;;  %v346_v17 = vpack.c.bf16 (!%p115_p2), %v163_v16, %v162_v15  ;;  %v349_v20 = vpack.c.bf16 (!%p115_p2), %v165_v19, %v164_v18  ;;  %v166_v21 = vld [vmem:[%s550_s1 + $0x60] sm:$0xff] (!%p115_p2)  ;;  %v167_v22 = vld [vmem:[%s550_s1 + $0x68] sm:$0xff] (!%p115_p2)  ;;  %v168_v24 = vld [vmem:[%s550_s1 + $0x70] sm:$0xff] (!%p115_p2) }
   0xa   : > { %v352_v23 = vpack.c.bf16 (!%p115_p2), %v167_v22, %v166_v21  ;;  %v169_v25 = vld [vmem:[%s550_s1 + $0x78] sm:$0xff] (!%p115_p2)  ;;  %v170_v27 = vld [vmem:[%s550_s1 + $0x80] sm:$0xff] (!%p115_p2)  ;;  %v171_v28 = vld [vmem:[%s550_s1 + $0x88] sm:$0xff] (!%p115_p2) }
   0xb   : > { %v355_v26 = vpack.c.bf16 (!%p115_p2), %v169_v25, %v168_v24  ;;  %v358_v29 = vpack.c.bf16 (!%p115_p2), %v171_v28, %v170_v27  ;;  %v172_v30 = vld [vmem:[%s550_s1 + $0x90] sm:$0xff] (!%p115_p2)  ;;  %v173_v31 = vld [vmem:[%s550_s1 + $0x98] sm:$0xff] (!%p115_p2)  ;;  %v174_v33 = vld [vmem:[%s550_s1 + $0xa0] sm:$0xff] (!%p115_p2) }
   0xc   : > { %338 = vmatpush1.bf16.msra.mxu0 (!%p115_p2), %v337_v6  ;;  %382 = vmatpush1.bf16.msra.mxu1 (!%p115_p2), %v337_v6  ;;  %v361_v32 = vpack.c.bf16 (!%p115_p2), %v173_v31, %v172_v30  ;;  %v175_v34 = vld [vmem:[%s550_s1 + $0xa8] sm:$0xff] (!%p115_p2)  ;;  %v176_v36 = vld [vmem:[%s550_s1 + $0xb0] sm:$0xff] (!%p115_p2)  ;;  %v177_v37 = vld [vmem:[%s550_s1 + $0xb8] sm:$0xff] (!%p115_p2) }
   0xd   : > { %s553_s17 = smov (!%p138_p3, %s323_s17), 3  ;;  %339 = vmatprep.subr.bf16.mxu0 %v410_v3  ;;  %371 = vmatprep.subr.bf16.mxu1 %v410_v3  ;;  %v364_v35 = vpack.c.bf16 %v175_v34, %v174_v33  ;;  %v367_v38 = vpack.c.bf16 %v177_v37, %v176_v36 }
   0xe   : > { %s332_s24 = sshll.u32 %s553_s17, 4  ;;  %s327_s12 = sshll.u32 %s553_s17, 3 }
   0xf   : > { %s462_s27 = scalar_lea.vmem %s549_s0, %s332_s24  ;;  %s148_s15 = scalar_lea.vmem %s551_s2, %s327_s12 }
  0x10   : > { %v151_v12 = vld [vmem:[%s462_s27 + $0x8] sm:$0xff]  ;;  %v153_v13 = vld [vmem:[%s462_s27 + $0x18] sm:$0xff]  ;;  %341 = vmatpush1.bf16.msra.mxu0 %v340_v9  ;;  %383 = vmatpush1.bf16.msra.mxu1 %v340_v9  ;;  %v150_v39 = vld [vmem:[%s462_s27] sm:$0xff] }
  0x11   : > { %328 = vmatprep.mubr.msk.f32.mxu0 %vm178_vm0, %v151_v12  ;;  %329 = vmatprep.mubr.msk.f32.mxu1 %vm178_vm0, %v153_v13  ;;  %v152_v40 = vld [vmem:[%s462_s27 + $0x10] sm:$0xff] }
  0x12   : > { %342 = vmatprep.subr.bf16.mxu0 %v410_v3  ;;  %372 = vmatprep.subr.bf16.mxu1 %v410_v3 }
  0x14   : > { %344 = vmatpush1.bf16.msra.mxu0 %v343_v14  ;;  %384 = vmatpush1.bf16.msra.mxu1 %v343_v14 }
  0x15   : > { %345 = vmatprep.subr.bf16.mxu0 %v410_v3  ;;  %373 = vmatprep.subr.bf16.mxu1 %v410_v3 }
  0x18   : > { %347 = vmatpush1.bf16.msra.mxu0 %v346_v17  ;;  %385 = vmatpush1.bf16.msra.mxu1 %v346_v17 }
  0x19   : > { %348 = vmatprep.subr.bf16.mxu0 %v410_v3  ;;  %374 = vmatprep.subr.bf16.mxu1 %v410_v3 }
  0x1c   : > { %350 = vmatpush1.bf16.msra.mxu0 %v349_v20  ;;  %386 = vmatpush1.bf16.msra.mxu1 %v349_v20 }
  0x1d   : > { %351 = vmatprep.subr.bf16.mxu0 %v410_v3  ;;  %375 = vmatprep.subr.bf16.mxu1 %v410_v3 }
  0x20   : > { %353 = vmatpush1.bf16.msra.mxu0 %v352_v23  ;;  %387 = vmatpush1.bf16.msra.mxu1 %v352_v23 }
  0x21   : > { %354 = vmatprep.subr.bf16.mxu0 %v410_v3  ;;  %376 = vmatprep.subr.bf16.mxu1 %v410_v3 }
  0x24   : > { %356 = vmatpush1.bf16.msra.mxu0 %v355_v26  ;;  %388 = vmatpush1.bf16.msra.mxu1 %v355_v26 }
  0x25   : > { %357 = vmatprep.subr.bf16.mxu0 %v410_v3  ;;  %377 = vmatprep.subr.bf16.mxu1 %v410_v3 }
  0x28   : > { %359 = vmatpush1.bf16.msra.mxu0 %v358_v29  ;;  %389 = vmatpush1.bf16.msra.mxu1 %v358_v29 }
  0x29   : > { %360 = vmatprep.subr.bf16.mxu0 %v410_v3  ;;  %378 = vmatprep.subr.bf16.mxu1 %v410_v3 }
  0x2c   : > { %362 = vmatpush1.bf16.msra.mxu0 %v361_v32  ;;  %390 = vmatpush1.bf16.msra.mxu1 %v361_v32 }
  0x2d   : > { %363 = vmatprep.subr.bf16.mxu0 %v410_v3  ;;  %379 = vmatprep.subr.bf16.mxu1 %v410_v3 }
  0x30   : > { %365 = vmatpush1.bf16.msra.mxu0 %v364_v35  ;;  %391 = vmatpush1.bf16.msra.mxu1 %v364_v35 }
  0x31   : > { %366 = vmatprep.subr.bf16.mxu0 %v410_v3  ;;  %380 = vmatprep.subr.bf16.mxu1 %v410_v3 }
  0x34   : > { %368 = vmatpush1.bf16.msra.mxu0 %v367_v38  ;;  %392 = vmatpush1.bf16.msra.mxu1 %v367_v38 }
  0x37   : > { %250 = vmatmul.mubr.f32.vlgmr.msra.gmra.mrb[0].mxu0 %v150_v39  ;;  %255 = vmatmul.mubr.f32.vlgmr.msra.gmra.mrb[0].mxu1 %v152_v40 }
 0x10a   : > { %v251_v41 = vpop.f32.mrb[0].mxu0  ;;  %v256_v42 = vpop.f32.mrb[0].mxu1 }
 0x10b   : > { %260 = vst [vmem:[%s148_s15] sm:$0xff] %v251_v41  ;;  %v253_v43 = vpop.f32.mrb[1].mxu0  ;;  %v258_v44 = vpop.f32.mrb[1].mxu1  ;;  %261 = vst [vmem:[%s148_s15 + $0x8] sm:$0xff] %v256_v42 }
 0x10c PF: > { %s12_s9 = sadd.s32 1, %s408_s9  }
 0x10d   : > { %p9_p4 = scmp.ge.s32.totalorder %s12_s9, 4  }
 0x10f   :  { %11 = sbr.rel (!%p9_p4) target bundleno = 1 (0x1), region = 58 }

// kernel: orsnet_forward.55
= control target key start
LH: loop header
LB: loop body
LE: loop exit
PB: predicated region body
PF: predicated region fallthrough
CT: control target
= control target key end

     0   :  { %8 = vsyncpa [#allocation3], 0  ;;  %s902_s0 = inlined_call_operand.vmem [shape: f32[512,128], index: 0, kind: input, shape index: {}]   ;;  %s903_s1 = inlined_call_operand.vmem [shape: f32[512,128], index: 1, kind: input, shape index: {}]   ;;  %s904_s2 = inlined_call_operand.vmem [shape: f32[512,128], index: 2, kind: input, shape index: {}]   ;;  %s905_s3 = inlined_call_operand.hbm [shape: f32[512,128], index: 3, kind: output, shape index: {}]  }
   0x1   :  { %10 = vsyncpa [#allocation3 + $0x1], 0  ;;  %s653_s12 = smov 0   ;;  %s655_s13 = smov 0  }
   0x2   :  { %s657_s14 = smov 0   ;;  %s659_s15 = smov 0  }
   0x3 LB: > { %s674_s16 = sadd.s32 4294967295, %s628_s15   ;;  %s508_s17 = sadd.s32 4294967294, %s628_s15   ;;  %s628_s15 = sphi %s659_s15, %s911_s15   ;;  %s624_s14 = sphi %s657_s14, %s910_s14   ;;  %s620_s13 = sphi %s655_s13, %s909_s13   ;;  %s616_s12 = sphi %s653_s12, %s908_s12  }
   0x4   : > { %s678_s18 = sadd.s32 1, %s628_s15   ;;  %s101_s19 = sadd.s32 1, %s624_s14 }
   0x5   : > { %s98_s20 = ssub.s32 %s628_s15, %s678_s18  ;;  %p111_p0 = scmp.ne.s32.totalorder %s624_s14, %s620_s13 }
   0x6   : > { %p99_p1 = scmp.eq.s32.totalorder %s98_s20, 0  ;;  %p112_p2 = scmp.eq.s32.totalorder %s674_s16, 1 }
   0x7   : > { %p117_p3 = scmp.ne.s32.totalorder %s620_s13, %s616_s12  ;;  %p118_p4 = scmp.eq.s32.totalorder %s508_s17, 1 }
   0x8   : > { %s689_s21 = scalar_select %p99_p1, %s624_s14, %s101_s19  }
   0x9   : > { %p691_p5 = por %p112_p2, %p111_p0  ;;  %p695_p6 = por %p118_p4, %p117_p3 }
   0xa   : > { %p511_p7 = scmp.ge.s32.totalorder %s628_s15, 1  ;;  %p163_p8 = scmp.lt.s32.totalorder %s628_s15, 3 }
   0xc   : > { %p164_p9 = pnand %p511_p7, %p163_p8 }
   0xd   : > { %s513_s24 = sshll.u32 (!%p164_p9), %s674_s16, 5  ;;  %s194_s25 = sand.u32 (!%p164_p9), 1, %s620_s13  }
   0xe   : > { %167 = sbr.rel (%p164_p9) target bundleno = 78 (0x4e), region = 32  ;;  %p198_p10 = scmp.lt.s32.totalorder (!%p164_p9), %s513_s24, 63 }
   0xf   : > { %s512_s26 = sshll.u32 (!%p164_p9), %s194_s25, 8  ;;  %s524_s11 = sshll.u32 (!%p164_p9), %s674_s16, 12 }
  0x10   : > { %s735_s10 = scalar_lea.vmem (!%p164_p9), [#allocation2], %s512_s26  ;;  %s852_s16 = scalar_lea.hbm (!%p164_p9), %s905_s3, %s524_s11 }
  0x11   : > { %s422_s17 = sshll.u32 (!%p164_p9), %s735_s10, 4  ;;  %s854_s17 = int_to_ptr.vmem [resolvable:$true] %s422_s17 }
  0x12   : > { %s566_s26 = scalar_lea.vmem (!%p164_p9), %s854_s17, 4096 }
  0x13   : > { %p567_p11 = scmp.ne.s32.totalorder (!%p164_p9), %s854_s17, %s566_s26 }
  0x15   : > { %s913_s24 = smov (!%p198_p10, %s513_s24), 63  ;;  %p568_p12 = pnand %p567_p11, %p691_p5 }
  0x16   : > { %s514_s27 = sshll.u32 %s913_s24, 3  ;;  %s861_s24 = scalar_lea.sflag [#allocation3], %s194_s25 }
  0x17   : > { %s708_s30 = scalar_lea.vmem %s902_s0, %s514_s27  ;;  %s713_s6 = scalar_lea.vmem %s903_s1, %s514_s27 }
  0x18   : > { %s718_s9 = scalar_lea.vmem %s904_s2, %s514_s27  ;;  %v216_v0 = vld [vmem:[%s708_s30] sm:$0xff]  ;;  %v217_v2 = vld [vmem:[%s708_s30 + $0x8] sm:$0xff]  ;;  %v218_v8 = vld [vmem:[%s708_s30 + $0x10] sm:$0xff]  ;;  %p569_p13 = pneg %p568_p12 }
  0x19   : > { %v248_v1 = vld [vmem:[%s713_s6] sm:$0xff]  ;;  %v249_v5 = vld [vmem:[%s713_s6 + $0x8] sm:$0xff]  ;;  %v250_v9 = vld [vmem:[%s713_s6 + $0x10] sm:$0xff]  ;;  %s630_s27 = smov [#allocation2]  }
  0x1a   : > { %v280_v3 = vadd.f32 %v248_v1, %v216_v0  ;;  %v312_v4 = vld [vmem:[%s718_s9] sm:$0xff]  ;;  %v313_v6 = vld [vmem:[%s718_s9 + $0x8] sm:$0xff]  ;;  %v281_v7 = vadd.f32 %v249_v5, %v217_v2  ;;  %v314_v10 = vld [vmem:[%s718_s9 + $0x10] sm:$0xff]  ;;  %v282_v12 = vadd.f32 %v250_v9, %v218_v8  ;;  %s570_s28 = sshll.u32 %s630_s27, 4  ;;  %s571_s28 = int_to_ptr.vmem [resolvable:$false] %s570_s28 }
  0x1b   : > { %v219_v13 = vld [vmem:[%s708_s30 + $0x18] sm:$0xff]  ;;  %v220_v18 = vld [vmem:[%s708_s30 + $0x20] sm:$0xff]  ;;  %v221_v23 = vld [vmem:[%s708_s30 + $0x28] sm:$0xff]  ;;  %s572_s29 = scalar_lea.vmem %s571_s28, 8192  ;;  %p573_p0 = scmp.lt.s32.totalorder %s854_s17, %s571_s28 }
  0x1c   : > { %v344_v11 = vadd.f32 %v312_v4, %v280_v3  ;;  %v251_v14 = vld [vmem:[%s713_s6 + $0x18] sm:$0xff]  ;;  %v345_v16 = vadd.f32 %v313_v6, %v281_v7  ;;  %v252_v19 = vld [vmem:[%s713_s6 + $0x20] sm:$0xff]  ;;  %v346_v21 = vadd.f32 %v314_v10, %v282_v12  ;;  %v253_v24 = vld [vmem:[%s713_s6 + $0x28] sm:$0xff]  ;;  %p574_p1 = scmp.lt.s32.totalorder %s572_s29, %s566_s26 }
  0x1d   : > { %v315_v15 = vld [vmem:[%s718_s9 + $0x18] sm:$0xff]  ;;  %v283_v17 = vadd.f32 %v251_v14, %v219_v13  ;;  %v316_v20 = vld [vmem:[%s718_s9 + $0x20] sm:$0xff]  ;;  %v284_v22 = vadd.f32 %v252_v19, %v220_v18  ;;  %v317_v25 = vld [vmem:[%s718_s9 + $0x28] sm:$0xff]  ;;  %v285_v27 = vadd.f32 %v253_v24, %v221_v23 }
  0x1e   : > { %376 = vst [vmem:[%s735_s10] sm:$0xff] %v344_v11  ;;  %377 = vst [vmem:[%s735_s10 + $0x8] sm:$0xff] %v345_v16  ;;  %v222_v28 = vld [vmem:[%s708_s30 + $0x30] sm:$0xff]  ;;  %v223_v33 = vld [vmem:[%s708_s30 + $0x38] sm:$0xff]  ;;  %p575_p2 = por %p574_p1, %p573_p0 }
  0x1f   : > { %v347_v26 = vadd.f32 %v315_v15, %v283_v17  ;;  %v254_v29 = vld [vmem:[%s713_s6 + $0x30] sm:$0xff]  ;;  %378 = vst [vmem:[%s735_s10 + $0x10] sm:$0xff] %v346_v21  ;;  %v348_v31 = vadd.f32 %v316_v20, %v284_v22  ;;  %v255_v34 = vld [vmem:[%s713_s6 + $0x38] sm:$0xff]  ;;  %v349_v36 = vadd.f32 %v317_v25, %v285_v27  ;;  %v224_v38 = vld [vmem:[%s708_s30 + $0x40] sm:$0xff] }
  0x20   : > { %v318_v30 = vld [vmem:[%s718_s9 + $0x30] sm:$0xff]  ;;  %v286_v32 = vadd.f32 %v254_v29, %v222_v28  ;;  %v319_v35 = vld [vmem:[%s718_s9 + $0x38] sm:$0xff]  ;;  %v287_v37 = vadd.f32 %v255_v34, %v223_v33  ;;  %v256_v39 = vld [vmem:[%s713_s6 + $0x40] sm:$0xff]  ;;  %p576_p3 = pnand %p575_p2, %p569_p13 }
  0x21   : > { %379 = vst [vmem:[%s735_s10 + $0x18] sm:$0xff] %v347_v26  ;;  %v320_v40 = vld [vmem:[%s718_s9 + $0x40] sm:$0xff]  ;;  %380 = vst [vmem:[%s735_s10 + $0x20] sm:$0xff] %v348_v31  ;;  %v288_v42 = vadd.f32 %v256_v39, %v224_v38  ;;  %v225_v43 = vld [vmem:[%s708_s30 + $0x48] sm:$0xff] }
  0x22   : > { %v350_v41 = vadd.f32 %v318_v30, %v286_v32  ;;  %v257_v44 = vld [vmem:[%s713_s6 + $0x48] sm:$0xff]  ;;  %381 = vst [vmem:[%s735_s10 + $0x28] sm:$0xff] %v349_v36  ;;  %v351_v46 = vadd.f32 %v319_v35, %v287_v37  ;;  %v226_v48 = vld [vmem:[%s708_s30 + $0x50] sm:$0xff]  ;;  %v227_v53 = vld [vmem:[%s708_s30 + $0x58] sm:$0xff] }
  0x23   : > { %v321_v45 = vld [vmem:[%s718_s9 + $0x48] sm:$0xff]  ;;  %v289_v47 = vadd.f32 %v257_v44, %v225_v43  ;;  %v258_v49 = vld [vmem:[%s713_s6 + $0x50] sm:$0xff]  ;;  %v352_v51 = vadd.f32 %v320_v40, %v288_v42  ;;  %v259_v54 = vld [vmem:[%s713_s6 + $0x58] sm:$0xff] }
  0x24   : > { %v322_v50 = vld [vmem:[%s718_s9 + $0x50] sm:$0xff]  ;;  %382 = vst [vmem:[%s735_s10 + $0x30] sm:$0xff] %v350_v41  ;;  %v290_v52 = vadd.f32 %v258_v49, %v226_v48  ;;  %v323_v55 = vld [vmem:[%s718_s9 + $0x58] sm:$0xff]  ;;  %383 = vst [vmem:[%s735_s10 + $0x38] sm:$0xff] %v351_v46  ;;  %v291_v57 = vadd.f32 %v259_v54, %v227_v53 }
  0x25   : > { %v353_v56 = vadd.f32 %v321_v45, %v289_v47  ;;  %v228_v58 = vld [vmem:[%s708_s30 + $0x60] sm:$0xff]  ;;  %384 = vst [vmem:[%s735_s10 + $0x40] sm:$0xff] %v352_v51  ;;  %v229_v63 = vld [vmem:[%s708_s30 + $0x68] sm:$0xff]  ;;  %v230_v4 = vld [vmem:[%s708_s30 + $0x70] sm:$0xff] }
  0x26   : > { %v260_v59 = vld [vmem:[%s713_s6 + $0x60] sm:$0xff]  ;;  %v354_v61 = vadd.f32 %v322_v50, %v290_v52  ;;  %v261_v0 = vld [vmem:[%s713_s6 + $0x68] sm:$0xff]  ;;  %v355_v2 = vadd.f32 %v323_v55, %v291_v57  ;;  %v262_v5 = vld [vmem:[%s713_s6 + $0x70] sm:$0xff] }
  0x27   : > { %v324_v60 = vld [vmem:[%s718_s9 + $0x60] sm:$0xff]  ;;  %v292_v62 = vadd.f32 %v260_v59, %v228_v58  ;;  %v325_v1 = vld [vmem:[%s718_s9 + $0x68] sm:$0xff]  ;;  %385 = vst [vmem:[%s735_s10 + $0x48] sm:$0xff] %v353_v56  ;;  %v293_v3 = vadd.f32 %v261_v0, %v229_v63  ;;  %v326_v6 = vld [vmem:[%s718_s9 + $0x70] sm:$0xff]  ;;  %v294_v8 = vadd.f32 %v262_v5, %v230_v4 }
  0x28   : > { %386 = vst [vmem:[%s735_s10 + $0x50] sm:$0xff] %v354_v61  ;;  %v231_v9 = vld [vmem:[%s708_s30 + $0x78] sm:$0xff]  ;;  %387 = vst [vmem:[%s735_s10 + $0x58] sm:$0xff] %v355_v2  ;;  %v232_v14 = vld [vmem:[%s708_s30 + $0x80] sm:$0xff] }
  0x29   : > { %v356_v7 = vadd.f32 %v324_v60, %v292_v62  ;;  %v263_v10 = vld [vmem:[%s713_s6 + $0x78] sm:$0xff]  ;;  %v357_v12 = vadd.f32 %v325_v1, %v293_v3  ;;  %v264_v15 = vld [vmem:[%s713_s6 + $0x80] sm:$0xff]  ;;  %v358_v17 = vadd.f32 %v326_v6, %v294_v8  ;;  %v233_v19 = vld [vmem:[%s708_s30 + $0x88] sm:$0xff] }
  0x2a   : > { %v327_v11 = vld [vmem:[%s718_s9 + $0x78] sm:$0xff]  ;;  %v295_v13 = vadd.f32 %v263_v10, %v231_v9  ;;  %v328_v16 = vld [vmem:[%s718_s9 + $0x80] sm:$0xff]  ;;  %v296_v18 = vadd.f32 %v264_v15, %v232_v14  ;;  %v265_v20 = vld [vmem:[%s713_s6 + $0x88] sm:$0xff] }
  0x2b   : > { %388 = vst [vmem:[%s735_s10 + $0x60] sm:$0xff] %v356_v7  ;;  %v329_v21 = vld [vmem:[%s718_s9 + $0x88] sm:$0xff]  ;;  %389 = vst [vmem:[%s735_s10 + $0x68] sm:$0xff] %v357_v12  ;;  %v297_v23 = vadd.f32 %v265_v20, %v233_v19  ;;  %v234_v24 = vld [vmem:[%s708_s30 + $0x90] sm:$0xff] }
  0x2c   : > { %v359_v22 = vadd.f32 %v327_v11, %v295_v13  ;;  %v266_v25 = vld [vmem:[%s713_s6 + $0x90] sm:$0xff]  ;;  %390 = vst [vmem:[%s735_s10 + $0x70] sm:$0xff] %v358_v17  ;;  %v360_v27 = vadd.f32 %v328_v16, %v296_v18  ;;  %v235_v29 = vld [vmem:[%s708_s30 + $0x98] sm:$0xff]  ;;  %v236_v34 = vld [vmem:[%s708_s30 + $0xa0] sm:$0xff] }
  0x2d   : > { %v330_v26 = vld [vmem:[%s718_s9 + $0x90] sm:$0xff]  ;;  %v298_v28 = vadd.f32 %v266_v25, %v234_v24  ;;  %v267_v30 = vld [vmem:[%s713_s6 + $0x98] sm:$0xff]  ;;  %v361_v32 = vadd.f32 %v329_v21, %v297_v23  ;;  %v268_v35 = vld [vmem:[%s713_s6 + $0xa0] sm:$0xff] }
  0x2e   : > { %v331_v31 = vld [vmem:[%s718_s9 + $0x98] sm:$0xff]  ;;  %391 = vst [vmem:[%s735_s10 + $0x78] sm:$0xff] %v359_v22  ;;  %v299_v33 = vadd.f32 %v267_v30, %v235_v29  ;;  %v332_v36 = vld [vmem:[%s718_s9 + $0xa0] sm:$0xff]  ;;  %392 = vst [vmem:[%s735_s10 + $0x80] sm:$0xff] %v360_v27  ;;  %v300_v38 = vadd.f32 %v268_v35, %v236_v34 }
  0x2f   : > { %v362_v37 = vadd.f32 %v330_v26, %v298_v28  ;;  %v237_v39 = vld [vmem:[%s708_s30 + $0xa8] sm:$0xff]  ;;  %393 = vst [vmem:[%s735_s10 + $0x88] sm:$0xff] %v361_v32  ;;  %v238_v44 = vld [vmem:[%s708_s30 + $0xb0] sm:$0xff]  ;;  %v239_v49 = vld [vmem:[%s708_s30 + $0xb8] sm:$0xff] }
  0x30   : > { %v269_v40 = vld [vmem:[%s713_s6 + $0xa8] sm:$0xff]  ;;  %v363_v42 = vadd.f32 %v331_v31, %v299_v33  ;;  %v270_v45 = vld [vmem:[%s713_s6 + $0xb0] sm:$0xff]  ;;  %v364_v47 = vadd.f32 %v332_v36, %v300_v38  ;;  %v271_v50 = vld [vmem:[%s713_s6 + $0xb8] sm:$0xff] }
  0x31   : > { %v333_v41 = vld [vmem:[%s718_s9 + $0xa8] sm:$0xff]  ;;  %v301_v43 = vadd.f32 %v269_v40, %v237_v39  ;;  %v334_v46 = vld [vmem:[%s718_s9 + $0xb0] sm:$0xff]  ;;  %394 = vst [vmem:[%s735_s10 + $0x90] sm:$0xff] %v362_v37  ;;  %v302_v48 = vadd.f32 %v270_v45, %v238_v44  ;;  %v335_v51 = vld [vmem:[%s718_s9 + $0xb8] sm:$0xff]  ;;  %v303_v53 = vadd.f32 %v271_v50, %v239_v49 }
  0x32   : > { %395 = vst [vmem:[%s735_s10 + $0x98] sm:$0xff] %v363_v42  ;;  %v240_v54 = vld [vmem:[%s708_s30 + $0xc0] sm:$0xff]  ;;  %396 = vst [vmem:[%s735_s10 + $0xa0] sm:$0xff] %v364_v47  ;;  %v241_v59 = vld [vmem:[%s708_s30 + $0xc8] sm:$0xff] }
  0x33   : > { %v365_v52 = vadd.f32 %v333_v41, %v301_v43  ;;  %v272_v55 = vld [vmem:[%s713_s6 + $0xc0] sm:$0xff]  ;;  %v366_v57 = vadd.f32 %v334_v46, %v302_v48  ;;  %v273_v60 = vld [vmem:[%s713_s6 + $0xc8] sm:$0xff]  ;;  %v367_v62 = vadd.f32 %v335_v51, %v303_v53  ;;  %v242_v0 = vld [vmem:[%s708_s30 + $0xd0] sm:$0xff] }
  0x34   : > { %v336_v56 = vld [vmem:[%s718_s9 + $0xc0] sm:$0xff]  ;;  %v304_v58 = vadd.f32 %v272_v55, %v240_v54  ;;  %v337_v61 = vld [vmem:[%s718_s9 + $0xc8] sm:$0xff]  ;;  %v305_v63 = vadd.f32 %v273_v60, %v241_v59  ;;  %v274_v1 = vld [vmem:[%s713_s6 + $0xd0] sm:$0xff] }
  0x35   : > { %397 = vst [vmem:[%s735_s10 + $0xa8] sm:$0xff] %v365_v52  ;;  %v338_v2 = vld [vmem:[%s718_s9 + $0xd0] sm:$0xff]  ;;  %398 = vst [vmem:[%s735_s10 + $0xb0] sm:$0xff] %v366_v57  ;;  %v306_v4 = vadd.f32 %v274_v1, %v242_v0  ;;  %v243_v5 = vld [vmem:[%s708_s30 + $0xd8] sm:$0xff] }
  0x36   : > { %v368_v3 = vadd.f32 %v336_v56, %v304_v58  ;;  %v275_v6 = vld [vmem:[%s713_s6 + $0xd8] sm:$0xff]  ;;  %399 = vst [vmem:[%s735_s10 + $0xb8] sm:$0xff] %v367_v62  ;;  %v369_v8 = vadd.f32 %v337_v61, %v305_v63  ;;  %v244_v10 = vld [vmem:[%s708_s30 + $0xe0] sm:$0xff]  ;;  %v245_v15 = vld [vmem:[%s708_s30 + $0xe8] sm:$0xff] }
  0x37   : > { %v339_v7 = vld [vmem:[%s718_s9 + $0xd8] sm:$0xff]  ;;  %v307_v9 = vadd.f32 %v275_v6, %v243_v5  ;;  %v276_v11 = vld [vmem:[%s713_s6 + $0xe0] sm:$0xff]  ;;  %v370_v13 = vadd.f32 %v338_v2, %v306_v4  ;;  %v277_v16 = vld [vmem:[%s713_s6 + $0xe8] sm:$0xff] }
  0x38   : > { %v340_v12 = vld [vmem:[%s718_s9 + $0xe0] sm:$0xff]  ;;  %400 = vst [vmem:[%s735_s10 + $0xc0] sm:$0xff] %v368_v3  ;;  %v308_v14 = vadd.f32 %v276_v11, %v244_v10  ;;  %v341_v17 = vld [vmem:[%s718_s9 + $0xe8] sm:$0xff]  ;;  %401 = vst [vmem:[%s735_s10 + $0xc8] sm:$0xff] %v369_v8  ;;  %v309_v19 = vadd.f32 %v277_v16, %v245_v15 }
  0x39   : > { %v371_v18 = vadd.f32 %v339_v7, %v307_v9  ;;  %v246_v20 = vld [vmem:[%s708_s30 + $0xf0] sm:$0xff]  ;;  %402 = vst [vmem:[%s735_s10 + $0xd0] sm:$0xff] %v370_v13  ;;  %v247_v25 = vld [vmem:[%s708_s30 + $0xf8] sm:$0xff] }
  0x3a   : > { %v278_v21 = vld [vmem:[%s713_s6 + $0xf0] sm:$0xff]  ;;  %v372_v23 = vadd.f32 %v340_v12, %v308_v14  ;;  %v279_v26 = vld [vmem:[%s713_s6 + $0xf8] sm:$0xff]  ;;  %v373_v28 = vadd.f32 %v341_v17, %v309_v19 }
  0x3b   : > { %v342_v22 = vld [vmem:[%s718_s9 + $0xf0] sm:$0xff]  ;;  %v310_v24 = vadd.f32 %v278_v21, %v246_v20  ;;  %v343_v27 = vld [vmem:[%s718_s9 + $0xf8] sm:$0xff]  ;;  %403 = vst [vmem:[%s735_s10 + $0xd8] sm:$0xff] %v371_v18  ;;  %v311_v29 = vadd.f32 %v279_v26, %v247_v25 }
  0x3c   : > { %404 = vst [vmem:[%s735_s10 + $0xe0] sm:$0xff] %v372_v23  ;;  %405 = vst [vmem:[%s735_s10 + $0xe8] sm:$0xff] %v373_v28 }
  0x3d   : > { %v374_v30 = vadd.f32 %v342_v22, %v310_v24  ;;  %v375_v31 = vadd.f32 %v343_v27, %v311_v29 }
  0x3f   : > { %406 = vst [vmem:[%s735_s10 + $0xf0] sm:$0xff] %v374_v30  ;;  %407 = vst [vmem:[%s735_s10 + $0xf8] sm:$0xff] %v375_v31 }
  0x40   : > { %579 = shalt.err (!%p576_p3)
}
  0x41   : > { %s580_s25 = scalar_lea.hbm %s852_s16, 4096  ;;  %s584_s5 = scalar_lea.hbm %s905_s3, 8192 }
  0x42   : > { %p581_p4 = scmp.ne.s32.totalorder %s852_s16, %s580_s25  ;;  %p585_p9 = scmp.lt.u32.totalorder %s852_s16, %s905_s3 }
  0x43   : > { %p586_p10 = scmp.lt.u32.totalorder %s584_s5, %s580_s25  ;;  %p588_p12 = scmp.lt.u32.totalorder %s580_s25, %s852_s16 }
  0x44   : > { %p582_p7 = pnand %p581_p4, %p691_p5 }
  0x45   : > { %p587_p11 = por %p586_p10, %p585_p9 }
  0x46   : > { %p583_p8 = pneg %p582_p7 }
  0x47   : > { %p589_p13 = por %p588_p12, %p587_p11 }
  0x49   : > { %p590_p0 = pnand %p589_p13, %p583_p8 }
  0x4b   : > { %593 = shalt.err (!%p590_p0)
}
  0x4c   : > { %s631_s8 = smov 128   ;;  %s632_s9 = smov 8  }
  0x4d   : > { %525 = dma.vmem_to_hbm [thread:$0]  (%p691_p5), %s854_s17, 4096, %s852_s16, %s861_s24, %s631_s8, %s631_s8, %s632_s9  }
  0x4e PF: > { %p531_p1 = scmp.ge.s32.totalorder %s628_s15, 2  ;;  %s437_s10 = sand.u32 1, %s616_s12  }
  0x4f   : > { %s438_s11 = scalar_lea.sflag [#allocation3], %s437_s10 }
  0x50   : > { %p528_p2 = pnand %p531_p1, %p695_p6 }
  0x52   : > { %611 = dma.done.wait (!%p528_p2), %s438_s11, 4096  }
  0x53   : > { %613 = vsyncadd (!%p528_p2), %s438_s11, 4294963200  ;;  %p13_p3 = scmp.ge.s32.totalorder %s678_s18, 4   ;;  %s908_s12 = smov %s620_s13 }
  0x54   : > { %s909_s13 = smov %s624_s14  ;;  %s910_s14 = smov %s689_s21 }
  0x55   : > { %s911_s15 = smov %s678_s18  ;;  %15 = sbr.rel (!%p13_p3) target bundleno = 3 (0x3), region = 73 }
  0x5c   :  { %443 = vsyncpa [#allocation3], 1 }
  0x5d   :  { %445 = vsyncpa [#allocation3 + $0x1], 1 }

</bundles_post_ra>
